<compile_context>
chip_gen: v5e
topology: v5e:2x2
jax: 0.10.0
libtpu: 0.0.40
codegen_flags: <defaults>
</compile_context>

<pallas_src>
import jax
import jax.numpy as jnp
from jax.experimental import pallas as pl
from jax.experimental.pallas import tpu as pltpu

# Logical (PyTorch) dims and their 128-lane-padded counterparts.
D_IN, D_H1, D_H2, D_OUT = 2380, 714, 214, 70


def _round_up(x, m):
    return ((x + m - 1) // m) * m


D_IN_P = _round_up(D_IN, 128)    # 2432
D_H1_P = _round_up(D_H1, 128)    # 768
D_H2_P = _round_up(D_H2, 128)    # 256
D_OUT_P = _round_up(D_OUT, 128)  # 128

_NEG_BIG = -1e30  # finite "minus infinity" baked into b3's padded lanes


def mlp_kernel(x_ref, w1_ref, b1_ref, w2_ref, b2_ref, w3_ref, b3_ref, o_ref):
    # x already bf16 in VMEM; weights bf16; MXU accumulates in f32.
    x = x_ref[...]

    # Layer 1: Linear + Sigmoid (EUP exp + approx reciprocal).
    h1 = jnp.dot(x, w1_ref[...], preferred_element_type=jnp.float32) + b1_ref[...]
    h1 = pl.reciprocal(1.0 + jnp.exp(-h1), approx=True)

    # Layer 2: Linear + Sigmoid.
    h2 = jnp.dot(h1.astype(jnp.bfloat16), w2_ref[...],
                 preferred_element_type=jnp.float32) + b2_ref[...]
    h2 = pl.reciprocal(1.0 + jnp.exp(-h2), approx=True)

    # Layer 3: Linear. Padded output lanes already carry -1e30 via b3, so they
    # underflow to exactly 0 in the softmax (no iota/where needed here).
    logits = jnp.dot(h2.astype(jnp.bfloat16), w3_ref[...],
                     preferred_element_type=jnp.float32) + b3_ref[...]

    # Numerically stable softmax along the feature axis; exact divide so rows
    # sum to 1 at f32 precision (the denominator is only tb x 1 values).
    m = jnp.max(logits, axis=-1, keepdims=True)
    e = jnp.exp(logits - m)
    o_ref[...] = e / jnp.sum(e, axis=-1, keepdims=True)


def _vmem_budget_bytes(tb):
    """Tight-but-safe VMEM request (double-buffered tiles + headroom)."""
    w_bytes = 2 * 2 * (D_IN_P * D_H1_P + D_H1_P * D_H2_P + D_H2_P * D_OUT_P)  # bf16 x2 bufs
    b_bytes = 2 * 4 * (D_H1_P + D_H2_P + D_OUT_P)                             # f32  x2 bufs
    x_bytes = 2 * 2 * tb * D_IN_P                                             # bf16 x2 bufs
    o_bytes = 2 * 4 * tb * D_OUT_P
    act_bytes = 4 * tb * (D_H1_P + D_H2_P + 2 * D_OUT_P)                      # temporaries
    return int(w_bytes + b_bytes + x_bytes + o_bytes + act_bytes + (4 << 20))  # + headroom


def prepare_params(params):
    """Pad all feature dims to 128 multiples; weights -> bf16, biases stay f32.

    b3's padded lanes are set to -1e30 so the softmax mask is free in-kernel.
    """
    w1, b1, w2, b2, w3, b3 = params

    def pad_w(w, rows, cols):
        w = jnp.pad(w, ((0, rows - w.shape[0]), (0, cols - w.shape[1])))
        return w.astype(jnp.bfloat16)

    def pad_b(b, cols, pad_value=0.0):
        return jnp.pad(b, ((0, 0), (0, cols - b.shape[1])),
                       constant_values=pad_value).astype(jnp.float32)

    return (pad_w(w1, D_IN_P, D_H1_P), pad_b(b1, D_H1_P),
            pad_w(w2, D_H1_P, D_H2_P), pad_b(b2, D_H2_P),
            pad_w(w3, D_H2_P, D_OUT_P), pad_b(b3, D_OUT_P, pad_value=_NEG_BIG))


def neural_network_forward(x, prepared_params):
    w1, b1, w2, b2, w3, b3 = prepared_params
    batch = x.shape[0]

    # Batch tile: 256 rows for large batches (amortizes per-step overhead and
    # stays VMEM-safe on v5e/v6e/v7x), 128 for mid-size, else round up to 16
    # (bf16 sublane packing is 16 rows per vreg).
    if batch >= 256:
        tb = 256
    elif batch >= 128:
        tb = 128
    else:
        tb = _round_up(batch, 16)
    padded_batch = _round_up(batch, tb)

    # Stream x in bf16: cast fused into the pad (halves x HBM traffic).
    x_p = jnp.pad(x.astype(jnp.bfloat16),
                  ((0, padded_batch - batch), (0, D_IN_P - x.shape[1])))

    grid = (padded_batch // tb,)
    const = lambda shape: pl.BlockSpec(shape, lambda i: (0, 0))  # weights stay resident

    flops = 2 * padded_batch * (D_IN_P * D_H1_P + D_H1_P * D_H2_P + D_H2_P * D_OUT_P)
    transcendentals = padded_batch * (D_H1_P + D_H2_P + D_OUT_P)
    bytes_accessed = (2 * (D_IN_P * D_H1_P + D_H1_P * D_H2_P + D_H2_P * D_OUT_P)  # bf16 W
                      + 4 * (D_H1_P + D_H2_P + D_OUT_P)                           # f32 bias
                      + 2 * padded_batch * D_IN_P                                 # bf16 x
                      + 4 * padded_batch * D_OUT_P)                               # f32 out

    out = pl.pallas_call(
        mlp_kernel,
        out_shape=jax.ShapeDtypeStruct((padded_batch, D_OUT_P), jnp.float32),
        grid=grid,
        in_specs=[
            pl.BlockSpec((tb, D_IN_P), lambda i: (i, 0)),
            const((D_IN_P, D_H1_P)),
            const((1, D_H1_P)),
            const((D_H1_P, D_H2_P)),
            const((1, D_H2_P)),
            const((D_H2_P, D_OUT_P)),
            const((1, D_OUT_P)),
        ],
        out_specs=pl.BlockSpec((tb, D_OUT_P), lambda i: (i, 0)),
        compiler_params=pltpu.CompilerParams(
            dimension_semantics=("parallel",),
            vmem_limit_bytes=_vmem_budget_bytes(tb),
        ),
        cost_estimate=pl.CostEstimate(
            flops=flops, transcendentals=transcendentals, bytes_accessed=bytes_accessed),
    )(x_p, w1, b1, w2, b2, w3, b3)

    return out[:batch, :D_OUT]


def init_params(key):
    """Deterministic init mirroring nn.Linear's U(-1/sqrt(fan_in), 1/sqrt(fan_in))."""
    ks = jax.random.split(key, 6)

    def linear(kw, kb, fan_in, fan_out):
        bound = 1.0 / jnp.sqrt(jnp.float32(fan_in))
        # stored [in, out] so the kernel can use x @ W directly (== PyTorch x @ W.T)
        w = jax.random.uniform(kw, (fan_in, fan_out), jnp.float32, -bound, bound)
        b = jax.random.uniform(kb, (1, fan_out), jnp.float32, -bound, bound)
        return w, b

    w1, b1 = linear(ks[0], ks[1], D_IN, D_H1)
    w2, b2 = linear(ks[2], ks[3], D_H1, D_H2)
    w3, b3 = linear(ks[4], ks[5], D_H2, D_OUT)
    return (w1, b1, w2, b2, w3, b3)


def reference_forward(x, params):
    """Pure-JAX reference mirroring the kernel's bf16-weight / f32-accum numerics."""
    w1, b1, w2, b2, w3, b3 = params

    def lin(h, w, b):
        return jnp.dot(h.astype(jnp.bfloat16), w.astype(jnp.bfloat16),
                       preferred_element_type=jnp.float32) + b

    h1 = jax.nn.sigmoid(lin(x, w1, b1))
    h2 = jax.nn.sigmoid(lin(h1, w2, b2))
    return jax.nn.softmax(lin(h2, w3, b3), axis=1)


if __name__ == "__main__":
    key = jax.random.PRNGKey(0)
    k_params, k_x = jax.random.split(key)

    params = init_params(k_params)
    prepared = prepare_params(params)

    batch = 8
    x = jax.random.normal(k_x, (batch, D_IN), jnp.float32)

    out = neural_network_forward(x, prepared)
    out = jax.block_until_ready(out)

    ref = reference_forward(x, params)
    assert out.shape == (batch, D_OUT)
    assert jnp.allclose(out, ref, atol=1e-3, rtol=1e-2)
    # softmax rows must sum to 1 (exact divide in-kernel -> f32 accuracy)
    assert jnp.allclose(jnp.sum(out, axis=1), jnp.ones((batch,)), atol=1e-3)

    print("KERNEL_OK")
</pallas_src>

<mosaic_0001>
module attributes {stable_mosaic.version = 11 : i64} {
  func.func @mlp_kernel(%arg0: i32, %arg1: memref<16x2432xbf16, #tpu.memory_space<vmem>>, %arg2: memref<2432x768xbf16, #tpu.memory_space<vmem>>, %arg3: memref<1x768xf32, #tpu.memory_space<vmem>>, %arg4: memref<768x256xbf16, #tpu.memory_space<vmem>>, %arg5: memref<1x256xf32, #tpu.memory_space<vmem>>, %arg6: memref<256x128xbf16, #tpu.memory_space<vmem>>, %arg7: memref<1x128xf32, #tpu.memory_space<vmem>>, %arg8: memref<16x128xf32, #tpu.memory_space<vmem>>) attributes {dimension_semantics = [#tpu.dimension_semantics<parallel>], iteration_bounds = array<i64: 1>, scalar_prefetch = 0 : i64, scratch_operands = 0 : i64, tpu.core_type = #tpu.core_type<tc>, window_params = [{transform_indices = @transform_0, window_bounds = array<i64: 16, 2432>}, {pipeline_mode = #tpu.pipeline_mode<synchronous>, transform_indices = @transform_1, window_bounds = array<i64: 2432, 768>}, {pipeline_mode = #tpu.pipeline_mode<synchronous>, transform_indices = @transform_2, window_bounds = array<i64: 1, 768>}, {pipeline_mode = #tpu.pipeline_mode<synchronous>, transform_indices = @transform_3, window_bounds = array<i64: 768, 256>}, {pipeline_mode = #tpu.pipeline_mode<synchronous>, transform_indices = @transform_4, window_bounds = array<i64: 1, 256>}, {pipeline_mode = #tpu.pipeline_mode<synchronous>, transform_indices = @transform_5, window_bounds = array<i64: 256, 128>}, {pipeline_mode = #tpu.pipeline_mode<synchronous>, transform_indices = @transform_6, window_bounds = array<i64: 1, 128>}, {transform_indices = @transform_7, window_bounds = array<i64: 16, 128>}]} {
    %c0 = arith.constant 0 : index
    %c0_0 = arith.constant 0 : index
    %0 = vector.load %arg1[%c0, %c0_0] : memref<16x2432xbf16, #tpu.memory_space<vmem>>, vector<16x2432xbf16>
    %c0_1 = arith.constant 0 : index
    %c0_2 = arith.constant 0 : index
    %1 = vector.load %arg2[%c0_1, %c0_2] : memref<2432x768xbf16, #tpu.memory_space<vmem>>, vector<2432x768xbf16>
    %cst = arith.constant dense<0.000000e+00> : vector<16x768xf32>
    %2 = tpu.matmul %0, %1, %cst {dimension_numbers = #tpu.dot_dimension_numbers<[1], [0], [0], [1], [0, 0, 1, 1], [], []>} : vector<16x2432xbf16>, vector<2432x768xbf16>, vector<16x768xf32> -> vector<16x768xf32>
    %c0_3 = arith.constant 0 : index
    %c0_4 = arith.constant 0 : index
    %3 = vector.load %arg3[%c0_3, %c0_4] : memref<1x768xf32, #tpu.memory_space<vmem>>, vector<1x768xf32>
    %4 = vector.broadcast %3 : vector<1x768xf32> to vector<16x768xf32>
    %5 = arith.addf %2, %4 : vector<16x768xf32>
    %cst_5 = arith.constant 0.000000e+00 : f32
    %6 = vector.broadcast %cst_5 : f32 to vector<16x768xf32>
    %7 = arith.subf %6, %5 : vector<16x768xf32>
    %8 = math.exp %7 : vector<16x768xf32>
    %cst_6 = arith.constant 1.000000e+00 : f32
    %9 = vector.broadcast %cst_6 : f32 to vector<16x768xf32>
    %10 = arith.addf %9, %8 : vector<16x768xf32>
    %11 = tpu.reciprocal %10 {approx = true} : vector<16x768xf32> -> vector<16x768xf32>
    %12 = arith.truncf %11 : vector<16x768xf32> to vector<16x768xbf16>
    %c0_7 = arith.constant 0 : index
    %c0_8 = arith.constant 0 : index
    %13 = vector.load %arg4[%c0_7, %c0_8] : memref<768x256xbf16, #tpu.memory_space<vmem>>, vector<768x256xbf16>
    %cst_9 = arith.constant dense<0.000000e+00> : vector<16x256xf32>
    %14 = tpu.matmul %12, %13, %cst_9 {dimension_numbers = #tpu.dot_dimension_numbers<[1], [0], [0], [1], [0, 0, 1, 1], [], []>} : vector<16x768xbf16>, vector<768x256xbf16>, vector<16x256xf32> -> vector<16x256xf32>
    %c0_10 = arith.constant 0 : index
    %c0_11 = arith.constant 0 : index
    %15 = vector.load %arg5[%c0_10, %c0_11] : memref<1x256xf32, #tpu.memory_space<vmem>>, vector<1x256xf32>
    %16 = vector.broadcast %15 : vector<1x256xf32> to vector<16x256xf32>
    %17 = arith.addf %14, %16 : vector<16x256xf32>
    %cst_12 = arith.constant 0.000000e+00 : f32
    %18 = vector.broadcast %cst_12 : f32 to vector<16x256xf32>
    %19 = arith.subf %18, %17 : vector<16x256xf32>
    %20 = math.exp %19 : vector<16x256xf32>
    %cst_13 = arith.constant 1.000000e+00 : f32
    %21 = vector.broadcast %cst_13 : f32 to vector<16x256xf32>
    %22 = arith.addf %21, %20 : vector<16x256xf32>
    %23 = tpu.reciprocal %22 {approx = true} : vector<16x256xf32> -> vector<16x256xf32>
    %24 = arith.truncf %23 : vector<16x256xf32> to vector<16x256xbf16>
    %c0_14 = arith.constant 0 : index
    %c0_15 = arith.constant 0 : index
    %25 = vector.load %arg6[%c0_14, %c0_15] : memref<256x128xbf16, #tpu.memory_space<vmem>>, vector<256x128xbf16>
    %cst_16 = arith.constant dense<0.000000e+00> : vector<16x128xf32>
    %26 = tpu.matmul %24, %25, %cst_16 {dimension_numbers = #tpu.dot_dimension_numbers<[1], [0], [0], [1], [0, 0, 1, 1], [], []>} : vector<16x256xbf16>, vector<256x128xbf16>, vector<16x128xf32> -> vector<16x128xf32>
    %c0_17 = arith.constant 0 : index
    %c0_18 = arith.constant 0 : index
    %27 = vector.load %arg7[%c0_17, %c0_18] : memref<1x128xf32, #tpu.memory_space<vmem>>, vector<1x128xf32>
    %28 = vector.broadcast %27 : vector<1x128xf32> to vector<16x128xf32>
    %29 = arith.addf %26, %28 : vector<16x128xf32>
    %cst_19 = arith.constant dense<0xFF800000> : vector<16xf32>
    %30 = vector.multi_reduction <maximumf>, %29, %cst_19 [1] : vector<16x128xf32> to vector<16xf32>
    %31 = vector.shape_cast %30 : vector<16xf32> to vector<16x1xf32>
    %32 = vector.broadcast %31 : vector<16x1xf32> to vector<16x128xf32>
    %33 = arith.subf %29, %32 : vector<16x128xf32>
    %34 = math.exp %33 : vector<16x128xf32>
    %cst_20 = arith.constant dense<0.000000e+00> : vector<16xf32>
    %35 = vector.multi_reduction <add>, %34, %cst_20 [1] : vector<16x128xf32> to vector<16xf32>
    %36 = vector.shape_cast %35 : vector<16xf32> to vector<16x1xf32>
    %37 = vector.broadcast %36 : vector<16x1xf32> to vector<16x128xf32>
    %38 = arith.divf %34, %37 : vector<16x128xf32>
    %c0_21 = arith.constant 0 : index
    %c0_22 = arith.constant 0 : index
    %39 = vector.load %arg8[%c0_21, %c0_22] : memref<16x128xf32, #tpu.memory_space<vmem>>, vector<16x128xf32>
    tpu.vector_store %arg8[%c0_21, %c0_22], %38 {strides = array<i32>} : memref<16x128xf32, #tpu.memory_space<vmem>>, vector<16x128xf32>,
    return
  }
  func.func @transform_0(%arg0: i32) -> (i32, i32) {
    %c0_i32 = arith.constant 0 : i32
    %c0_i32_0 = arith.constant 0 : i32
    return %arg0, %c0_i32 : i32, i32
  }
  func.func @transform_1(%arg0: i32) -> (i32, i32) {
    %c0_i32 = arith.constant 0 : i32
    %c0_i32_0 = arith.constant 0 : i32
    %c0_i32_1 = arith.constant 0 : i32
    return %c0_i32, %c0_i32_0 : i32, i32
  }
  func.func @transform_2(%arg0: i32) -> (i32, i32) {
    %c0_i32 = arith.constant 0 : i32
    %c0_i32_0 = arith.constant 0 : i32
    %c0_i32_1 = arith.constant 0 : i32
    return %c0_i32, %c0_i32_0 : i32, i32
  }
  func.func @transform_3(%arg0: i32) -> (i32, i32) {
    %c0_i32 = arith.constant 0 : i32
    %c0_i32_0 = arith.constant 0 : i32
    %c0_i32_1 = arith.constant 0 : i32
    return %c0_i32, %c0_i32_0 : i32, i32
  }
  func.func @transform_4(%arg0: i32) -> (i32, i32) {
    %c0_i32 = arith.constant 0 : i32
    %c0_i32_0 = arith.constant 0 : i32
    %c0_i32_1 = arith.constant 0 : i32
    return %c0_i32, %c0_i32_0 : i32, i32
  }
  func.func @transform_5(%arg0: i32) -> (i32, i32) {
    %c0_i32 = arith.constant 0 : i32
    %c0_i32_0 = arith.constant 0 : i32
    %c0_i32_1 = arith.constant 0 : i32
    return %c0_i32, %c0_i32_0 : i32, i32
  }
  func.func @transform_6(%arg0: i32) -> (i32, i32) {
    %c0_i32 = arith.constant 0 : i32
    %c0_i32_0 = arith.constant 0 : i32
    %c0_i32_1 = arith.constant 0 : i32
    return %c0_i32, %c0_i32_0 : i32, i32
  }
  func.func @transform_7(%arg0: i32) -> (i32, i32) {
    %c0_i32 = arith.constant 0 : i32
    %c0_i32_0 = arith.constant 0 : i32
    return %arg0, %c0_i32 : i32, i32
  }
}

</mosaic_0001>

<bundles_post_ra>
// kernel: tpu_custom_call.1
= control target key start
LH: loop header
LB: loop body
LE: loop exit
PB: predicated region body
PF: predicated region fallthrough
CT: control target
= control target key end

     0   :  { %12 = vsyncpa [#allocation3], 0  ;;  %s14606_s0 = inlined_call_operand.hbm [shape: bf16[16,2432], index: 0, kind: input, shape index: {}]   ;;  %s14607_s1 = inlined_call_operand.hbm [shape: bf16[2432,768], index: 1, kind: input, shape index: {}]   ;;  %s14608_s2 = inlined_call_operand.hbm [shape: f32[1,768], index: 2, kind: input, shape index: {}]   ;;  %s14609_s3 = inlined_call_operand.hbm [shape: bf16[768,256], index: 3, kind: input, shape index: {}]   ;;  %s14610_s4 = inlined_call_operand.hbm [shape: f32[1,256], index: 4, kind: input, shape index: {}]   ;;  %s14611_s5 = inlined_call_operand.hbm [shape: bf16[256,128], index: 5, kind: input, shape index: {}]   ;;  %s14612_s6 = inlined_call_operand.hbm [shape: f32[1,128], index: 6, kind: input, shape index: {}]   ;;  %s14613_s7 = inlined_call_operand.hbm [shape: f32[16,128], index: 7, kind: output, shape index: {}]  }
   0x1   :  { %13 = vsyncpa [#allocation6], 0 }
   0x2   :  { %14 = vsyncpa [#allocation9], 0 }
   0x3   :  { %15 = vsyncpa [#allocation12], 0  ;;  %s34_s26 = sshll.u32 %s14607_s1, 4  ;;  %s35_s26 = int_to_ptr.hbm [resolvable:$true] %s34_s26 }
   0x4   :  { %16 = vsyncpa [#allocation4], 0  ;;  %s13905_s27 = smov [#allocation5]   ;;  %s58_s8 = sshll.u32 %s14609_s3, 4  ;;  %s59_s8 = int_to_ptr.hbm [resolvable:$true] %s58_s8 }
   0x5   :  { %s36_s28 = sshll.u32 %s13905_s27, 4  ;;  %s13906_s9 = smov 384   ;;  %s37_s28 = int_to_ptr.vmem [resolvable:$true] %s36_s28 }
   0x6   :  { %s13907_s10 = smov 24   ;;  %s13908_s11 = smov [#allocation8]  }
   0x7   :  { %42 = dma.hbm_to_vmem [thread:$0]  %s35_s26, 116736, %s37_s28, [#allocation6], %s13906_s9, %s13906_s9, %s13907_s10  }
   0x8   :  { %s60_s12 = sshll.u32 %s13908_s11, 4  ;;  %s13909_s13 = smov 128   ;;  %s61_s12 = int_to_ptr.vmem [resolvable:$true] %s60_s12 }
   0x9   :  { %s13910_s14 = smov 8   ;;  %s82_s16 = sshll.u32 %s14611_s5, 4  ;;  %s83_s16 = int_to_ptr.hbm [resolvable:$true] %s82_s16 }
   0xa   :  { %66 = dma.hbm_to_vmem [thread:$0]  %s59_s8, 12288, %s61_s12, [#allocation9], %s13909_s13, %s13909_s13, %s13910_s14  }
   0xb   :  { %s13911_s17 = smov [#allocation11]   ;;  %s21_s20 = sshll.u32 %s14606_s0, 4  ;;  %s22_s20 = int_to_ptr.hbm [resolvable:$true] %s21_s20 }
   0xc   :  { %s84_s3 = sshll.u32 %s13911_s17, 4  ;;  %s13912_s21 = smov 64   ;;  %s85_s3 = int_to_ptr.vmem [resolvable:$true] %s84_s3 }
   0xd   :  { %s13913_s22 = smov 4   ;;  %s13914_s23 = smov [#allocation2]  }
   0xe   :  { %90 = dma.hbm_to_vmem [thread:$0]  %s83_s16, 2048, %s85_s3, [#allocation12], %s13912_s21, %s13912_s21, %s13913_s22  }
   0xf   :  { %s23_s24 = sshll.u32 %s13914_s23, 4  ;;  %s13915_s25 = smov 1216   ;;  %s24_s24 = int_to_ptr.vmem [resolvable:$true] %s23_s24 }
  0x10   :  { %s13916_s26 = smov 76   ;;  %s48_s28 = sshll.u32 %s14608_s2, 4  ;;  %s49_s28 = int_to_ptr.hbm [resolvable:$true] %s48_s28 }
  0x11   :  { %29 = dma.hbm_to_vmem [thread:$0]  %s22_s20, 2432, %s24_s24, [#allocation3], %s13915_s25, %s13915_s25, %s13916_s26  }
  0x12   :  { %s13917_s29 = smov [#allocation7]   ;;  %s72_s9 = sshll.u32 %s14610_s4, 4  ;;  %s73_s9 = int_to_ptr.hbm [resolvable:$true] %s72_s9 }
  0x13   :  { %s50_s30 = sshll.u32 %s13917_s29, 4  ;;  %s13918_s10 = smov [#allocation10]   ;;  %s51_s30 = int_to_ptr.vmem [resolvable:$true] %s50_s30 }
  0x14   :  { %53 = dma.hbm_to_vmem [thread:$0]  %s49_s28, 96, %s51_s30, [#allocation6]  }
  0x15   :  { %s74_s11 = sshll.u32 %s13918_s10, 4  ;;  %s96_s15 = sshll.u32 %s14612_s6, 4  ;;  %s75_s11 = int_to_ptr.vmem [resolvable:$true] %s74_s11  ;;  %s97_s15 = int_to_ptr.hbm [resolvable:$true] %s96_s15 }
  0x16   :  { %77 = dma.hbm_to_vmem [thread:$0]  %s73_s9, 32, %s75_s11, [#allocation9]  }
  0x17   :  { %s13919_s2 = smov [#allocation13]  }
  0x18   :  { %s98_s16 = sshll.u32 %s13919_s2, 4  ;;  %s99_s16 = int_to_ptr.vmem [resolvable:$true] %s98_s16 }
  0x19   :  { %101 = dma.hbm_to_vmem [thread:$0]  %s97_s15, 16, %s99_s16, [#allocation12]  }
  0x1a   :  { %13895 = dma.done.wait [#allocation3], 2432  }
  0x1b   :  { %13896 = vsyncadd [#allocation3], 4294964864 }
  0x1c   :  { %13897 = dma.done.wait [#allocation6], 116832  }
  0x1d   :  { %13898 = vsyncadd [#allocation6], 4294850464 }
  0x1e   :  { %13899 = dma.done.wait [#allocation9], 12320  }
  0x1f   :  { %13900 = vsyncadd [#allocation9], 4294954976 }
  0x20   :  { %13901 = dma.done.wait [#allocation12], 2064  }
  0x21   :  { %13902 = vsyncadd [#allocation12], 4294965232  ;;  %v8640_v0 = vld [vmem:[#allocation5 + $0x150] sm:$0xf]  ;;  %v12630_v1 = vld [vmem:[#allocation5 + $0x164] sm:$0xf0] }
  0x22   :  { %v8832_v2 = vld [vmem:[#allocation5 + $0x2d0] sm:$0xf]  ;;  %v8641_v3 = vor.u32 %v12630_v1, %v8640_v0  ;;  %v12678_v4 = vld [vmem:[#allocation5 + $0x2e4] sm:$0xf0]  ;;  %v8616_v11 = vld [vmem:[#allocation5 + $0x120] sm:$0xf] }
  0x23   :  { %v9024_v5 = vld [vmem:[#allocation5 + $0x450] sm:$0xf]  ;;  %v12726_v6 = vld [vmem:[#allocation5 + $0x464] sm:$0xf0]  ;;  %v8833_v7 = vor.u32 %v12678_v4, %v8832_v2  ;;  %v12624_v13 = vld [vmem:[#allocation5 + $0x134] sm:$0xf0] }
  0x24   :  { %v9025_v8 = vor.u32 %v12726_v6, %v9024_v5  ;;  %v9216_v9 = vld [vmem:[#allocation5 + $0x5d0] sm:$0xf]  ;;  %v12774_v10 = vld [vmem:[#allocation5 + $0x5e4] sm:$0xf0]  ;;  %5732 = vmatpush.bf16.msra.mxu0 %v8641_v3  ;;  %v8808_v14 = vld [vmem:[#allocation5 + $0x2a0] sm:$0xf]  ;;  %v8617_v16 = vor.u32 %v12624_v13, %v8616_v11 }
  0x25   :  { %v9217_v12 = vor.u32 %v12774_v10, %v9216_v9  ;;  %v12672_v15 = vld [vmem:[#allocation5 + $0x2b4] sm:$0xf0]  ;;  %5746 = vmatpush.bf16.msra.mxu1 %v8833_v7  ;;  %v9000_v18 = vld [vmem:[#allocation5 + $0x420] sm:$0xf]  ;;  %v8592_v23 = vld [vmem:[#allocation5 + $0xf0] sm:$0xf] }
  0x26   :  { %5760 = vmatpush.bf16.msra.mxu2 %v9025_v8  ;;  %v8809_v17 = vor.u32 %v12672_v15, %v8808_v14  ;;  %v12720_v19 = vld [vmem:[#allocation5 + $0x434] sm:$0xf0]  ;;  %v9192_v20 = vld [vmem:[#allocation5 + $0x5a0] sm:$0xf]  ;;  %v12618_v24 = vld [vmem:[#allocation5 + $0x104] sm:$0xf0] }
  0x27   :  { %5774 = vmatpush.bf16.msra.mxu3 %v9217_v12  ;;  %v9001_v21 = vor.u32 %v12720_v19, %v9000_v18  ;;  %v12768_v22 = vld [vmem:[#allocation5 + $0x5b4] sm:$0xf0]  ;;  %v8784_v26 = vld [vmem:[#allocation5 + $0x270] sm:$0xf]  ;;  %v12666_v27 = vld [vmem:[#allocation5 + $0x284] sm:$0xf0]  ;;  %v8593_v29 = vor.u32 %v12618_v24, %v8592_v23 }
  0x28   :  { %v9193_v25 = vor.u32 %v12768_v22, %v9192_v20  ;;  %v8976_v28 = vld [vmem:[#allocation5 + $0x3f0] sm:$0xf]  ;;  %5733 = vmatpush.bf16.msra.mxu0 %v8617_v16  ;;  %v12714_v30 = vld [vmem:[#allocation5 + $0x404] sm:$0xf0]  ;;  %v8785_v33 = vor.u32 %v12666_v27, %v8784_v26  ;;  %v8568_v35 = vld [vmem:[#allocation5 + $0xc0] sm:$0xf] }
  0x29   :  { %v9168_v31 = vld [vmem:[#allocation5 + $0x570] sm:$0xf]  ;;  %v12762_v32 = vld [vmem:[#allocation5 + $0x584] sm:$0xf0]  ;;  %5747 = vmatpush.bf16.msra.mxu1 %v8809_v17  ;;  %v8977_v34 = vor.u32 %v12714_v30, %v8976_v28  ;;  %v12612_v36 = vld [vmem:[#allocation5 + $0xd4] sm:$0xf0] }
  0x2a   :  { %5761 = vmatpush.bf16.msra.mxu2 %v9001_v21  ;;  %v8760_v37 = vld [vmem:[#allocation5 + $0x240] sm:$0xf]  ;;  %v9169_v38 = vor.u32 %v12762_v32, %v9168_v31  ;;  %v12660_v39 = vld [vmem:[#allocation5 + $0x254] sm:$0xf0]  ;;  %v8569_v44 = vor.u32 %v12612_v36, %v8568_v35  ;;  %v8544_v47 = vld [vmem:[#allocation5 + $0x90] sm:$0xf] }
  0x2b   :  { %5775 = vmatpush.bf16.msra.mxu3 %v9193_v25  ;;  %v8952_v40 = vld [vmem:[#allocation5 + $0x3c0] sm:$0xf]  ;;  %v12708_v41 = vld [vmem:[#allocation5 + $0x3d4] sm:$0xf0]  ;;  %v8761_v45 = vor.u32 %v12660_v39, %v8760_v37  ;;  %v12606_v48 = vld [vmem:[#allocation5 + $0xa4] sm:$0xf0] }
  0x2c   :  { %v9144_v42 = vld [vmem:[#allocation5 + $0x540] sm:$0xf]  ;;  %v12756_v43 = vld [vmem:[#allocation5 + $0x554] sm:$0xf0]  ;;  %5734 = vmatpush.bf16.msra.mxu0 %v8593_v29  ;;  %v8953_v46 = vor.u32 %v12708_v41, %v8952_v40  ;;  %v8736_v49 = vld [vmem:[#allocation5 + $0x210] sm:$0xf]  ;;  %v8545_v56 = vor.u32 %v12606_v48, %v8544_v47 }
  0x2d   :  { %5748 = vmatpush.bf16.msra.mxu1 %v8785_v33  ;;  %v9145_v50 = vor.u32 %v12756_v43, %v9144_v42  ;;  %v12654_v51 = vld [vmem:[#allocation5 + $0x224] sm:$0xf0]  ;;  %v8928_v52 = vld [vmem:[#allocation5 + $0x390] sm:$0xf]  ;;  %v8520_v59 = vld [vmem:[#allocation5 + $0x60] sm:$0xf] }
  0x2e   :  { %5762 = vmatpush.bf16.msra.mxu2 %v8977_v34  ;;  %v12702_v53 = vld [vmem:[#allocation5 + $0x3a4] sm:$0xf0]  ;;  %v9120_v54 = vld [vmem:[#allocation5 + $0x510] sm:$0xf]  ;;  %v8737_v57 = vor.u32 %v12654_v51, %v8736_v49  ;;  %v12600_v60 = vld [vmem:[#allocation5 + $0x74] sm:$0xf0] }
  0x2f   :  { %5776 = vmatpush.bf16.msra.mxu3 %v9169_v38  ;;  %v12750_v55 = vld [vmem:[#allocation5 + $0x524] sm:$0xf0]  ;;  %v8929_v58 = vor.u32 %v12702_v53, %v8928_v52  ;;  %v8712_v61 = vld [vmem:[#allocation5 + $0x1e0] sm:$0xf]  ;;  %v12648_v63 = vld [vmem:[#allocation5 + $0x1f4] sm:$0xf0]  ;;  %v8521_v4 = vor.u32 %v12600_v60, %v8520_v59 }
  0x30   :  { %5735 = vmatpush.bf16.msra.mxu0 %v8569_v44  ;;  %v9121_v62 = vor.u32 %v12750_v55, %v9120_v54  ;;  %v8904_v0 = vld [vmem:[#allocation5 + $0x360] sm:$0xf]  ;;  %v12696_v1 = vld [vmem:[#allocation5 + $0x374] sm:$0xf0]  ;;  %v8713_v5 = vor.u32 %v12648_v63, %v8712_v61  ;;  %v8496_v7 = vld [vmem:[#allocation5 + $0x30] sm:$0xf] }
  0x31   :  { %5749 = vmatpush.bf16.msra.mxu1 %v8761_v45  ;;  %v9096_v2 = vld [vmem:[#allocation5 + $0x4e0] sm:$0xf]  ;;  %v12744_v3 = vld [vmem:[#allocation5 + $0x4f4] sm:$0xf0]  ;;  %v8905_v6 = vor.u32 %v12696_v1, %v8904_v0  ;;  %v12594_v8 = vld [vmem:[#allocation5 + $0x44] sm:$0xf0] }
  0x32   :  { %5763 = vmatpush.bf16.msra.mxu2 %v8953_v46  ;;  %v8688_v9 = vld [vmem:[#allocation5 + $0x1b0] sm:$0xf]  ;;  %v9097_v10 = vor.u32 %v12744_v3, %v9096_v2  ;;  %v12642_v11 = vld [vmem:[#allocation5 + $0x1c4] sm:$0xf0]  ;;  %v8497_v16 = vor.u32 %v12594_v8, %v8496_v7  ;;  %v8472_v17 = vld [vmem:[#allocation5] sm:$0xf] }
  0x33   :  { %5777 = vmatpush.bf16.msra.mxu3 %v9145_v50  ;;  %v8880_v12 = vld [vmem:[#allocation5 + $0x330] sm:$0xf]  ;;  %v12690_v13 = vld [vmem:[#allocation5 + $0x344] sm:$0xf0]  ;;  %v12588_v18 = vld [vmem:[#allocation5 + $0x14] sm:$0xf0]  ;;  %v8689_v19 = vor.u32 %v12642_v11, %v8688_v9 }
  0x34   :  { %5736 = vmatpush.bf16.msra.mxu0 %v8545_v56  ;;  %v9072_v14 = vld [vmem:[#allocation5 + $0x4b0] sm:$0xf]  ;;  %v12738_v15 = vld [vmem:[#allocation5 + $0x4c4] sm:$0xf0]  ;;  %v8881_v20 = vor.u32 %v12690_v13, %v8880_v12  ;;  %v8664_v21 = vld [vmem:[#allocation5 + $0x180] sm:$0xf]  ;;  %v8473_v31 = vor.u32 %v12588_v18, %v8472_v17 }
  0x35   :  { %5750 = vmatpush.bf16.msra.mxu1 %v8737_v57  ;;  %v12636_v22 = vld [vmem:[#allocation5 + $0x194] sm:$0xf0]  ;;  %v8856_v23 = vld [vmem:[#allocation5 + $0x300] sm:$0xf]  ;;  %v9073_v24 = vor.u32 %v12738_v15, %v9072_v14  ;;  %v9408_v28 = vld [vmem:[#allocation5 + $0x750] sm:$0xf] }
  0x36   :  { %5764 = vmatpush.bf16.msra.mxu2 %v8929_v58  ;;  %v12684_v25 = vld [vmem:[#allocation5 + $0x314] sm:$0xf0]  ;;  %v9048_v26 = vld [vmem:[#allocation5 + $0x480] sm:$0xf]  ;;  %v12822_v29 = vld [vmem:[#allocation5 + $0x764] sm:$0xf0]  ;;  %v8665_v35 = vor.u32 %v12636_v22, %v8664_v21 }
  0x37   :  { %5778 = vmatpush.bf16.msra.mxu3 %v9121_v62  ;;  %v12732_v27 = vld [vmem:[#allocation5 + $0x494] sm:$0xf0]  ;;  %v9600_v30 = vld [vmem:[#allocation5 + $0x8d0] sm:$0xf]  ;;  %v12870_v32 = vld [vmem:[#allocation5 + $0x8e4] sm:$0xf0]  ;;  %v8857_v36 = vor.u32 %v12684_v25, %v8856_v23  ;;  %v9409_v40 = vor.u32 %v12822_v29, %v9408_v28 }
  0x38   :  { %5737 = vmatpush.bf16.msra.mxu0 %v8521_v4  ;;  %v9792_v33 = vld [vmem:[#allocation5 + $0xa50] sm:$0xf]  ;;  %v12918_v34 = vld [vmem:[#allocation5 + $0xa64] sm:$0xf0]  ;;  %v9049_v39 = vor.u32 %v12732_v27, %v9048_v26  ;;  %v9384_v41 = vld [vmem:[#allocation5 + $0x720] sm:$0xf]  ;;  %v9601_v43 = vor.u32 %v12870_v32, %v9600_v30 }
  0x39   :  { %5751 = vmatpush.bf16.msra.mxu1 %v8713_v5  ;;  %v9984_v37 = vld [vmem:[#allocation5 + $0xbd0] sm:$0xf]  ;;  %v12966_v38 = vld [vmem:[#allocation5 + $0xbe4] sm:$0xf0]  ;;  %v12816_v42 = vld [vmem:[#allocation5 + $0x734] sm:$0xf0]  ;;  %v9793_v44 = vor.u32 %v12918_v34, %v9792_v33 }
  0x3a   :  { %5765 = vmatpush.bf16.msra.mxu2 %v8905_v6  ;;  %v9576_v45 = vld [vmem:[#allocation5 + $0x8a0] sm:$0xf]  ;;  %v12864_v46 = vld [vmem:[#allocation5 + $0x8b4] sm:$0xf0]  ;;  %v9985_v48 = vor.u32 %v12966_v38, %v9984_v37  ;;  %v8396_v52 = vld [vmem:[#allocation2] sm:$0xf]  ;;  %v9385_v55 = vor.u32 %v12816_v42, %v9384_v41 }
  0x3b   :  { %5779 = vmatpush.bf16.msra.mxu3 %v9097_v10  ;;  %v9768_v47 = vld [vmem:[#allocation5 + $0xa20] sm:$0xf]  ;;  %v12912_v49 = vld [vmem:[#allocation5 + $0xa34] sm:$0xf0]  ;;  %v12575_v53 = vld [vmem:[#allocation2 + $0x48] sm:$0xf0]  ;;  %v9577_v60 = vor.u32 %v12864_v46, %v9576_v45 }
  0x3c   :  { %5738 = vmatpush.bf16.msra.mxu0 %v8497_v16  ;;  %v9960_v50 = vld [vmem:[#allocation5 + $0xba0] sm:$0xf]  ;;  %v12960_v51 = vld [vmem:[#allocation5 + $0xbb4] sm:$0xf0]  ;;  %v8404_v54 = vld [vmem:[#allocation2 + $0x8] sm:$0xf]  ;;  %v13985_v58 = vor.u32 %v12575_v53, %v8396_v52  ;;  %v9769_v61 = vor.u32 %v12912_v49, %v9768_v47 }
  0x3d   :  { %5752 = vmatpush.bf16.msra.mxu1 %v8689_v19  ;;  %v9360_v56 = vld [vmem:[#allocation5 + $0x6f0] sm:$0xf]  ;;  %v12810_v57 = vld [vmem:[#allocation5 + $0x704] sm:$0xf0]  ;;  %v12576_v59 = vld [vmem:[#allocation2 + $0x50] sm:$0xf0]  ;;  %v9961_v2 = vor.u32 %v12960_v51, %v9960_v50 }
  0x3e   :  { %5766 = vmatpush.bf16.msra.mxu2 %v8881_v20  ;;  %v9552_v62 = vld [vmem:[#allocation5 + $0x870] sm:$0xf]  ;;  %v12858_v63 = vld [vmem:[#allocation5 + $0x884] sm:$0xf0]  ;;  %v13987_v1 = vor.u32 %v12576_v59, %v8404_v54  ;;  %v12566_v6 = vld [vmem:[#allocation2 + $0x4] sm:$0xf]  ;;  %v9361_v9 = vor.u32 %v12810_v57, %v9360_v56 }
  0x3f   :  { %5780 = vmatpush.bf16.msra.mxu3 %v9073_v24  ;;  %v9744_v0 = vld [vmem:[#allocation5 + $0x9f0] sm:$0xf]  ;;  %v12906_v3 = vld [vmem:[#allocation5 + $0xa04] sm:$0xf0]  ;;  %v8398_v7 = vld [vmem:[#allocation2 + $0x4c] sm:$0xf0]  ;;  %v9553_v12 = vor.u32 %v12858_v63, %v9552_v62 }
  0x40   :  { %5739 = vmatpush.bf16.msra.mxu0 %v8473_v31  ;;  %v9936_v4 = vld [vmem:[#allocation5 + $0xb70] sm:$0xf]  ;;  %v12954_v5 = vld [vmem:[#allocation5 + $0xb84] sm:$0xf0]  ;;  %v12567_v8 = vld [vmem:[#allocation2 + $0xc] sm:$0xf]  ;;  %v13991_v10 = vor.u32 %v12566_v6, %v8398_v7  ;;  %v9745_v13 = vor.u32 %v12906_v3, %v9744_v0 }
  0x41   :  { %5753 = vmatpush.bf16.msra.mxu1 %v8665_v35  ;;  %v8406_v11 = vld [vmem:[#allocation2 + $0x54] sm:$0xf0]  ;;  %v12804_v15 = vld [vmem:[#allocation5 + $0x6d4] sm:$0xf0]  ;;  %v9937_v18 = vor.u32 %v12954_v5, %v9936_v4  ;;  %v9312_v27 = vld [vmem:[#allocation5 + $0x690] sm:$0xf] }
  0x42   :  { %5767 = vmatpush.bf16.msra.mxu2 %v8857_v36  ;;  %v9336_v14 = vld [vmem:[#allocation5 + $0x6c0] sm:$0xf]  ;;  %v13993_v17 = vor.u32 %v12567_v8, %v8406_v11  ;;  %v12852_v19 = vld [vmem:[#allocation5 + $0x854] sm:$0xf0]  ;;  %v12798_v28 = vld [vmem:[#allocation5 + $0x6a4] sm:$0xf0] }
  0x43   :  { %5781 = vmatpush.bf16.msra.mxu3 %v9049_v39  ;;  %5740 = vmatmul.bf16.vlgmr.msra.gmra.mxu0 %v13985_v58  ;;  %v9528_v16 = vld [vmem:[#allocation5 + $0x840] sm:$0xf]  ;;  %v12900_v21 = vld [vmem:[#allocation5 + $0x9d4] sm:$0xf0]  ;;  %v9337_v24 = vor.u32 %v12804_v15, %v9336_v14  ;;  %v9504_v29 = vld [vmem:[#allocation5 + $0x810] sm:$0xf]  ;;  %v9313_v36 = vor.u32 %v12798_v28, %v9312_v27 }
  0x44   :  { %5788 = vmatpush.bf16.msrb.mxu0 %v9409_v40  ;;  %v9720_v20 = vld [vmem:[#allocation5 + $0x9c0] sm:$0xf]  ;;  %5754 = vmatmul.bf16.vlgmr.msra.gmra.mxu1 %v13991_v10  ;;  %v12948_v23 = vld [vmem:[#allocation5 + $0xb54] sm:$0xf0]  ;;  %v9529_v25 = vor.u32 %v12852_v19, %v9528_v16  ;;  %v12846_v31 = vld [vmem:[#allocation5 + $0x824] sm:$0xf0] }
  0x45   :  { %5802 = vmatpush.bf16.msrb.mxu1 %v9601_v43  ;;  %5768 = vmatmul.bf16.vlgmr.msra.gmra.mxu2 %v13987_v1  ;;  %v9912_v22 = vld [vmem:[#allocation5 + $0xb40] sm:$0xf]  ;;  %v9721_v26 = vor.u32 %v12900_v21, %v9720_v20  ;;  %v9696_v32 = vld [vmem:[#allocation5 + $0x990] sm:$0xf]  ;;  %v12894_v33 = vld [vmem:[#allocation5 + $0x9a4] sm:$0xf0]  ;;  %v9505_v37 = vor.u32 %v12846_v31, %v9504_v29 }
  0x46   :  { %5816 = vmatpush.bf16.msrb.mxu2 %v9793_v44  ;;  %5782 = vmatmul.bf16.vlgmr.msra.gmra.mxu3 %v13993_v17  ;;  %v9913_v30 = vor.u32 %v12948_v23, %v9912_v22  ;;  %v9888_v34 = vld [vmem:[#allocation5 + $0xb10] sm:$0xf]  ;;  %v12942_v35 = vld [vmem:[#allocation5 + $0xb24] sm:$0xf0]  ;;  %v9697_v38 = vor.u32 %v12894_v33, %v9696_v32  ;;  %v9288_v39 = vld [vmem:[#allocation5 + $0x660] sm:$0xf] }
  0x47   :  { %5830 = vmatpush.bf16.msrb.mxu3 %v9985_v48  ;;  %v12792_v40 = vld [vmem:[#allocation5 + $0x674] sm:$0xf0]  ;;  %v9480_v41 = vld [vmem:[#allocation5 + $0x7e0] sm:$0xf]  ;;  %v9889_v42 = vor.u32 %v12942_v35, %v9888_v34  ;;  %v9264_v49 = vld [vmem:[#allocation5 + $0x630] sm:$0xf] }
  0x48   :  { %5789 = vmatpush.bf16.msrb.mxu0 %v9385_v55  ;;  %v12840_v43 = vld [vmem:[#allocation5 + $0x7f4] sm:$0xf0]  ;;  %v9672_v44 = vld [vmem:[#allocation5 + $0x960] sm:$0xf]  ;;  %v9289_v48 = vor.u32 %v12792_v40, %v9288_v39  ;;  %v12786_v52 = vld [vmem:[#allocation5 + $0x644] sm:$0xf0] }
  0x49   :  { %5803 = vmatpush.bf16.msrb.mxu1 %v9577_v60  ;;  %v12888_v45 = vld [vmem:[#allocation5 + $0x974] sm:$0xf0]  ;;  %v9864_v46 = vld [vmem:[#allocation5 + $0xae0] sm:$0xf]  ;;  %v9481_v50 = vor.u32 %v12840_v43, %v9480_v41  ;;  %v9456_v53 = vld [vmem:[#allocation5 + $0x7b0] sm:$0xf]  ;;  %v9265_v63 = vor.u32 %v12786_v52, %v9264_v49 }
  0x4a   :  { %5817 = vmatpush.bf16.msrb.mxu2 %v9769_v61  ;;  %v12936_v47 = vld [vmem:[#allocation5 + $0xaf4] sm:$0xf0]  ;;  %v9673_v51 = vor.u32 %v12888_v45, %v9672_v44  ;;  %v12834_v54 = vld [vmem:[#allocation5 + $0x7c4] sm:$0xf0]  ;;  %v9648_v56 = vld [vmem:[#allocation5 + $0x930] sm:$0xf] }
  0x4b   :  { %5831 = vmatpush.bf16.msrb.mxu3 %v9961_v2  ;;  %v9865_v55 = vor.u32 %v12936_v47, %v9864_v46  ;;  %v12882_v57 = vld [vmem:[#allocation5 + $0x944] sm:$0xf0]  ;;  %v9840_v59 = vld [vmem:[#allocation5 + $0xab0] sm:$0xf]  ;;  %v9240_v61 = vld [vmem:[#allocation5 + $0x600] sm:$0xf]  ;;  %v9457_v5 = vor.u32 %v12834_v54, %v9456_v53 }
  0x4c   :  { %5790 = vmatpush.bf16.msrb.mxu0 %v9361_v9  ;;  %v12930_v60 = vld [vmem:[#allocation5 + $0xac4] sm:$0xf0]  ;;  %v12780_v62 = vld [vmem:[#allocation5 + $0x614] sm:$0xf0]  ;;  %v9432_v0 = vld [vmem:[#allocation5 + $0x780] sm:$0xf]  ;;  %v9649_v6 = vor.u32 %v12882_v57, %v9648_v56 }
  0x4d   :  { %5804 = vmatpush.bf16.msrb.mxu1 %v9553_v12  ;;  %v12828_v2 = vld [vmem:[#allocation5 + $0x794] sm:$0xf0]  ;;  %v9624_v3 = vld [vmem:[#allocation5 + $0x900] sm:$0xf]  ;;  %v10176_v9 = vld [vmem:[#allocation5 + $0xd50] sm:$0xf]  ;;  %v9841_v11 = vor.u32 %v12930_v60, %v9840_v59  ;;  %v9241_v19 = vor.u32 %v12780_v62, %v9240_v61 }
  0x4e   :  { %5818 = vmatpush.bf16.msrb.mxu2 %v9745_v13  ;;  %v12876_v4 = vld [vmem:[#allocation5 + $0x914] sm:$0xf0]  ;;  %v9816_v7 = vld [vmem:[#allocation5 + $0xa80] sm:$0xf]  ;;  %v13014_v12 = vld [vmem:[#allocation5 + $0xd64] sm:$0xf0]  ;;  %v9433_v23 = vor.u32 %v12828_v2, %v9432_v0 }
  0x4f   :  { %5832 = vmatpush.bf16.msrb.mxu3 %v9937_v18  ;;  %v12924_v8 = vld [vmem:[#allocation5 + $0xa94] sm:$0xf0]  ;;  %v10368_v13 = vld [vmem:[#allocation5 + $0xed0] sm:$0xf]  ;;  %v13062_v14 = vld [vmem:[#allocation5 + $0xee4] sm:$0xf0]  ;;  %v10177_v29 = vor.u32 %v13014_v12, %v10176_v9 }
  0x50   :  { %5791 = vmatpush.bf16.msrb.mxu0 %v9337_v24  ;;  %v10560_v15 = vld [vmem:[#allocation5 + $0x1050] sm:$0xf]  ;;  %v13110_v16 = vld [vmem:[#allocation5 + $0x1064] sm:$0xf0]  ;;  %v8412_v21 = vld [vmem:[#allocation2 + $0x10] sm:$0xf]  ;;  %v9625_v24 = vor.u32 %v12876_v4, %v9624_v3  ;;  %v9817_v28 = vor.u32 %v12924_v8, %v9816_v7  ;;  %v10369_v33 = vor.u32 %v13062_v14, %v10368_v13 }
  0x51   :  { %5805 = vmatpush.bf16.msrb.mxu1 %v9529_v25  ;;  %v10752_v18 = vld [vmem:[#allocation5 + $0x11d0] sm:$0xf]  ;;  %v13158_v20 = vld [vmem:[#allocation5 + $0x11e4] sm:$0xf0]  ;;  %v12577_v22 = vld [vmem:[#allocation2 + $0x58] sm:$0xf0]  ;;  %v10561_v34 = vor.u32 %v13110_v16, %v10560_v15 }
  0x52   :  { %5819 = vmatpush.bf16.msrb.mxu2 %v9721_v26  ;;  %v8420_v25 = vld [vmem:[#allocation2 + $0x18] sm:$0xf]  ;;  %v12578_v26 = vld [vmem:[#allocation2 + $0x60] sm:$0xf0]  ;;  %v12568_v27 = vld [vmem:[#allocation2 + $0x14] sm:$0xf]  ;;  %v13997_v39 = vor.u32 %v12577_v22, %v8412_v21 }
  0x53   :  { %5833 = vmatpush.bf16.msrb.mxu3 %v9913_v30  ;;  %v8414_v30 = vld [vmem:[#allocation2 + $0x5c] sm:$0xf0]  ;;  %v12569_v31 = vld [vmem:[#allocation2 + $0x1c] sm:$0xf]  ;;  %v8422_v32 = vld [vmem:[#allocation2 + $0x64] sm:$0xf0]  ;;  %v13999_v43 = vor.u32 %v12578_v26, %v8420_v25 }
  0x54   :  { %5792 = vmatpush.bf16.msrb.mxu0 %v9313_v36  ;;  %v10152_v35 = vld [vmem:[#allocation5 + $0xd20] sm:$0xf]  ;;  %v13008_v36 = vld [vmem:[#allocation5 + $0xd34] sm:$0xf0]  ;;  %v14001_v44 = vor.u32 %v12568_v27, %v8414_v30  ;;  %v14003_v47 = vor.u32 %v12569_v31, %v8422_v32  ;;  %v13002_v52 = vld [vmem:[#allocation5 + $0xd04] sm:$0xf0] }
  0x55   :  { %5806 = vmatpush.bf16.msrb.mxu1 %v9505_v37  ;;  %v10344_v37 = vld [vmem:[#allocation5 + $0xea0] sm:$0xf]  ;;  %v13056_v40 = vld [vmem:[#allocation5 + $0xeb4] sm:$0xf0]  ;;  %v10320_v53 = vld [vmem:[#allocation5 + $0xe70] sm:$0xf] }
  0x56   :  { %5820 = vmatpush.bf16.msrb.mxu2 %v9697_v38  ;;  %v10753_v38 = vor.u32 %v13158_v20, %v10752_v18  ;;  %v10536_v41 = vld [vmem:[#allocation5 + $0x1020] sm:$0xf]  ;;  %v13152_v46 = vld [vmem:[#allocation5 + $0x11b4] sm:$0xf0]  ;;  %v10345_v49 = vor.u32 %v13056_v40, %v10344_v37  ;;  %v10512_v56 = vld [vmem:[#allocation5 + $0xff0] sm:$0xf] }
  0x57   :  { %5834 = vmatpush.bf16.msrb.mxu3 %v9889_v42  ;;  %v13104_v42 = vld [vmem:[#allocation5 + $0x1034] sm:$0xf0]  ;;  %v10728_v45 = vld [vmem:[#allocation5 + $0x11a0] sm:$0xf]  ;;  %v13098_v57 = vld [vmem:[#allocation5 + $0x1004] sm:$0xf0] }
  0x58   :  { %5793 = vmatpush.bf16.msrb.mxu0 %v9289_v48  ;;  %v10153_v48 = vor.u32 %v13008_v36, %v10152_v35  ;;  %v10729_v54 = vor.u32 %v13152_v46, %v10728_v45  ;;  %v10704_v59 = vld [vmem:[#allocation5 + $0x1170] sm:$0xf]  ;;  %v13146_v60 = vld [vmem:[#allocation5 + $0x1184] sm:$0xf0]  ;;  %v10104_v0 = vld [vmem:[#allocation5 + $0xcc0] sm:$0xf] }
  0x59   :  { %5807 = vmatpush.bf16.msrb.mxu1 %v9481_v50  ;;  %v10537_v50 = vor.u32 %v13104_v42, %v10536_v41  ;;  %v12996_v2 = vld [vmem:[#allocation5 + $0xcd4] sm:$0xf0]  ;;  %v10296_v3 = vld [vmem:[#allocation5 + $0xe40] sm:$0xf]  ;;  %v10705_v4 = vor.u32 %v13146_v60, %v10704_v59  ;;  %v10080_v14 = vld [vmem:[#allocation5 + $0xc90] sm:$0xf] }
  0x5a   :  { %5821 = vmatpush.bf16.msrb.mxu2 %v9673_v51  ;;  %v10128_v51 = vld [vmem:[#allocation5 + $0xcf0] sm:$0xf]  ;;  %v13092_v7 = vld [vmem:[#allocation5 + $0xfd4] sm:$0xf0]  ;;  %v10680_v8 = vld [vmem:[#allocation5 + $0x1140] sm:$0xf] }
  0x5b   :  { %5835 = vmatpush.bf16.msrb.mxu3 %v9865_v55  ;;  %v13050_v55 = vld [vmem:[#allocation5 + $0xe84] sm:$0xf0]  ;;  %v10129_v61 = vor.u32 %v13002_v52, %v10128_v51  ;;  %v13140_v9 = vld [vmem:[#allocation5 + $0x1154] sm:$0xf0]  ;;  %v10272_v16 = vld [vmem:[#allocation5 + $0xe10] sm:$0xf] }
  0x5c   :  { %5794 = vmatpush.bf16.msrb.mxu0 %v9265_v63  ;;  %v10321_v62 = vor.u32 %v13050_v55, %v10320_v53  ;;  %v10513_v63 = vor.u32 %v13098_v57, %v10512_v56  ;;  %v12990_v15 = vld [vmem:[#allocation5 + $0xca4] sm:$0xf0]  ;;  %v10681_v18 = vor.u32 %v13140_v9, %v10680_v8  ;;  %v10464_v20 = vld [vmem:[#allocation5 + $0xf90] sm:$0xf]  ;;  %v10056_v27 = vld [vmem:[#allocation5 + $0xc60] sm:$0xf] }
  0x5d   :  { %5808 = vmatpush.bf16.msrb.mxu1 %v9457_v5  ;;  %v13044_v5 = vld [vmem:[#allocation5 + $0xe54] sm:$0xf0]  ;;  %v13086_v21 = vld [vmem:[#allocation5 + $0xfa4] sm:$0xf0]  ;;  %v10656_v22 = vld [vmem:[#allocation5 + $0x1110] sm:$0xf] }
  0x5e   :  { %5822 = vmatpush.bf16.msrb.mxu2 %v9649_v6  ;;  %v10488_v6 = vld [vmem:[#allocation5 + $0xfc0] sm:$0xf]  ;;  %v10297_v12 = vor.u32 %v13044_v5, %v10296_v3  ;;  %v10465_v26 = vor.u32 %v13086_v21, %v10464_v20  ;;  %v13032_v31 = vld [vmem:[#allocation5 + $0xdf4] sm:$0xf0]  ;;  %v10032_v37 = vld [vmem:[#allocation5 + $0xc30] sm:$0xf] }
  0x5f   :  { %5836 = vmatpush.bf16.msrb.mxu3 %v9841_v11  ;;  %v10105_v11 = vor.u32 %v12996_v2, %v10104_v0  ;;  %v10489_v13 = vor.u32 %v13092_v7, %v10488_v6  ;;  %v10440_v32 = vld [vmem:[#allocation5 + $0xf60] sm:$0xf]  ;;  %v13128_v35 = vld [vmem:[#allocation5 + $0x10f4] sm:$0xf0]  ;;  %v12978_v41 = vld [vmem:[#allocation5 + $0xc44] sm:$0xf0] }
  0x60   :  { %5795 = vmatpush.bf16.msrb.mxu0 %v9241_v19  ;;  %v13038_v19 = vld [vmem:[#allocation5 + $0xe24] sm:$0xf0]  ;;  %v10224_v42 = vld [vmem:[#allocation5 + $0xdb0] sm:$0xf]  ;;  %v10008_v52 = vld [vmem:[#allocation5 + $0xc00] sm:$0xf] }
  0x61   :  { %5809 = vmatpush.bf16.msrb.mxu1 %v9433_v23  ;;  %v13134_v23 = vld [vmem:[#allocation5 + $0x1124] sm:$0xf0]  ;;  %v10273_v25 = vor.u32 %v13038_v19, %v10272_v16  ;;  %v12972_v53 = vld [vmem:[#allocation5 + $0xc14] sm:$0xf0]  ;;  %v10200_v55 = vld [vmem:[#allocation5 + $0xd80] sm:$0xf] }
  0x62   :  { %5823 = vmatpush.bf16.msrb.mxu2 %v9625_v24  ;;  %v10081_v24 = vor.u32 %v12990_v15, %v10080_v14  ;;  %v10657_v30 = vor.u32 %v13134_v23, %v10656_v22  ;;  %v13026_v45 = vld [vmem:[#allocation5 + $0xdc4] sm:$0xf0]  ;;  %v13020_v56 = vld [vmem:[#allocation5 + $0xd94] sm:$0xf0]  ;;  %v10392_v57 = vld [vmem:[#allocation5 + $0xf00] sm:$0xf]  ;;  %v10009_v9 = vor.u32 %v12972_v53, %v10008_v52 }
  0x63   :  { %5837 = vmatpush.bf16.msrb.mxu3 %v9817_v28  ;;  %5796 = vmatmul.bf16.vlgmr.msrb.gmra.mxu0 %v13997_v39  ;;  %v12984_v28 = vld [vmem:[#allocation5 + $0xc74] sm:$0xf0]  ;;  %v13122_v51 = vld [vmem:[#allocation5 + $0x10c4] sm:$0xf0]  ;;  %v10225_v60 = vor.u32 %v13026_v45, %v10224_v42  ;;  %v10944_v0 = vld [vmem:[#allocation5 + $0x1350] sm:$0xf]  ;;  %v10201_v14 = vor.u32 %v13020_v56, %v10200_v55 }
  0x64   :  { %5844 = vmatpush.bf16.msra.mxu0 %v10177_v29  ;;  %5810 = vmatmul.bf16.vlgmr.msrb.gmra.mxu1 %v14001_v44  ;;  %v10248_v29 = vld [vmem:[#allocation5 + $0xde0] sm:$0xf]  ;;  %v10057_v36 = vor.u32 %v12984_v28, %v10056_v27  ;;  %v13068_v59 = vld [vmem:[#allocation5 + $0xf14] sm:$0xf0]  ;;  %v13206_v3 = vld [vmem:[#allocation5 + $0x1364] sm:$0xf0] }
  0x65   :  { %5858 = vmatpush.bf16.msra.mxu1 %v10369_v33  ;;  %5824 = vmatmul.bf16.vlgmr.msrb.gmra.mxu2 %v13999_v43  ;;  %v13080_v33 = vld [vmem:[#allocation5 + $0xf74] sm:$0xf0]  ;;  %v13254_v5 = vld [vmem:[#allocation5 + $0x14e4] sm:$0xf0]  ;;  %v11328_v6 = vld [vmem:[#allocation5 + $0x1650] sm:$0xf]  ;;  %v10393_v15 = vor.u32 %v13068_v59, %v10392_v57  ;;  %v10945_v21 = vor.u32 %v13206_v3, %v10944_v0 }
  0x66   :  { %5872 = vmatpush.bf16.msra.mxu2 %v10561_v34  ;;  %5838 = vmatmul.bf16.vlgmr.msrb.gmra.mxu3 %v14003_v47  ;;  %v10632_v34 = vld [vmem:[#allocation5 + $0x10e0] sm:$0xf]  ;;  %v10441_v40 = vor.u32 %v13080_v33, %v10440_v32  ;;  %v13302_v7 = vld [vmem:[#allocation5 + $0x1664] sm:$0xf0]  ;;  %v11520_v8 = vld [vmem:[#allocation5 + $0x17d0] sm:$0xf] }
  0x67   :  { %5886 = vmatpush.bf16.msra.mxu3 %v10753_v38  ;;  %v10249_v38 = vor.u32 %v13032_v31, %v10248_v29  ;;  %v10633_v46 = vor.u32 %v13128_v35, %v10632_v34  ;;  %v8436_v16 = vld [vmem:[#allocation2 + $0x28] sm:$0xf]  ;;  %v12570_v19 = vld [vmem:[#allocation2 + $0x24] sm:$0xf]  ;;  %v8430_v22 = vld [vmem:[#allocation2 + $0x6c] sm:$0xf0] }
  0x68   :  { %5845 = vmatpush.bf16.msra.mxu0 %v10153_v48  ;;  %v10416_v48 = vld [vmem:[#allocation5 + $0xf30] sm:$0xf]  ;;  %v12571_v23 = vld [vmem:[#allocation2 + $0x2c] sm:$0xf]  ;;  %v10920_v27 = vld [vmem:[#allocation5 + $0x1320] sm:$0xf] }
  0x69   :  { %5859 = vmatpush.bf16.msra.mxu1 %v10345_v49  ;;  %v13074_v49 = vld [vmem:[#allocation5 + $0xf44] sm:$0xf0]  ;;  %v13200_v28 = vld [vmem:[#allocation5 + $0x1334] sm:$0xf0]  ;;  %v11112_v29 = vld [vmem:[#allocation5 + $0x14a0] sm:$0xf] }
  0x6a   :  { %5873 = vmatpush.bf16.msra.mxu2 %v10537_v50  ;;  %v10608_v50 = vld [vmem:[#allocation5 + $0x10b0] sm:$0xf]  ;;  %v13248_v32 = vld [vmem:[#allocation5 + $0x14b4] sm:$0xf0]  ;;  %v11304_v33 = vld [vmem:[#allocation5 + $0x1620] sm:$0xf] }
  0x6b   :  { %5887 = vmatpush.bf16.msra.mxu3 %v10729_v54  ;;  %v10033_v54 = vor.u32 %v12978_v41, %v10032_v37  ;;  %v10609_v2 = vor.u32 %v13122_v51, %v10608_v50  ;;  %v13296_v34 = vld [vmem:[#allocation5 + $0x1634] sm:$0xf0]  ;;  %v11496_v37 = vld [vmem:[#allocation5 + $0x17a0] sm:$0xf]  ;;  %v10921_v41 = vor.u32 %v13200_v28, %v10920_v27  ;;  %v11113_v42 = vor.u32 %v13248_v32, %v11112_v29  ;;  %v13242_v51 = vld [vmem:[#allocation5 + $0x1484] sm:$0xf0] }
  0x6c   :  { %5846 = vmatpush.bf16.msra.mxu0 %v10129_v61  ;;  %v10417_v61 = vor.u32 %v13074_v49, %v10416_v48  ;;  %v11305_v45 = vor.u32 %v13296_v34, %v11304_v33  ;;  %v13194_v48 = vld [vmem:[#allocation5 + $0x1304] sm:$0xf0]  ;;  %v11088_v49 = vld [vmem:[#allocation5 + $0x1470] sm:$0xf]  ;;  %v13236_v0 = vld [vmem:[#allocation5 + $0x1454] sm:$0xf0] }
  0x6d   :  { %5860 = vmatpush.bf16.msra.mxu1 %v10321_v62  ;;  %v10584_v62 = vld [vmem:[#allocation5 + $0x1080] sm:$0xf]  ;;  %v11280_v52 = vld [vmem:[#allocation5 + $0x15f0] sm:$0xf]  ;;  %v13290_v53 = vld [vmem:[#allocation5 + $0x1604] sm:$0xf0]  ;;  %v11089_v57 = vor.u32 %v13242_v51, %v11088_v49 }
  0x6e   :  { %5874 = vmatpush.bf16.msra.mxu2 %v10513_v63  ;;  %v13116_v63 = vld [vmem:[#allocation5 + $0x1094] sm:$0xf0]  ;;  %v13338_v55 = vld [vmem:[#allocation5 + $0x1784] sm:$0xf0]  ;;  %v11281_v59 = vor.u32 %v13290_v53, %v11280_v52  ;;  %v11208_v28 = vld [vmem:[#allocation5 + $0x1560] sm:$0xf] }
  0x6f   :  { %5888 = vmatpush.bf16.msra.mxu3 %v10705_v4  ;;  %v11136_v4 = vld [vmem:[#allocation5 + $0x14d0] sm:$0xf]  ;;  %v10585_v20 = vor.u32 %v13116_v63, %v10584_v62  ;;  %v11064_v62 = vld [vmem:[#allocation5 + $0x1440] sm:$0xf]  ;;  %v13284_v3 = vld [vmem:[#allocation5 + $0x15d4] sm:$0xf0] }
  0x70   :  { %5847 = vmatpush.bf16.msra.mxu0 %v10105_v11  ;;  %v13350_v11 = vld [vmem:[#allocation5 + $0x17e4] sm:$0xf0]  ;;  %v13224_v27 = vld [vmem:[#allocation5 + $0x13f4] sm:$0xf0]  ;;  %v10800_v34 = vld [vmem:[#allocation5 + $0x1230] sm:$0xf] }
  0x71   :  { %5861 = vmatpush.bf16.msra.mxu1 %v10297_v12  ;;  %v8428_v12 = vld [vmem:[#allocation2 + $0x20] sm:$0xf]  ;;  %v13272_v29 = vld [vmem:[#allocation5 + $0x1574] sm:$0xf0]  ;;  %v10776_v52 = vld [vmem:[#allocation5 + $0x1200] sm:$0xf] }
  0x72   :  { %5875 = vmatpush.bf16.msra.mxu2 %v10489_v13  ;;  %v12579_v13 = vld [vmem:[#allocation2 + $0x68] sm:$0xf0]  ;;  %v13320_v32 = vld [vmem:[#allocation5 + $0x16f4] sm:$0xf0]  ;;  %v13266_v49 = vld [vmem:[#allocation5 + $0x1544] sm:$0xf0] }
  0x73   :  { %5889 = vmatpush.bf16.msra.mxu3 %v10681_v18  ;;  %v12580_v18 = vld [vmem:[#allocation2 + $0x70] sm:$0xf0]  ;;  %v14009_v31 = vor.u32 %v12579_v13, %v8428_v12  ;;  %v11040_v12 = vld [vmem:[#allocation5 + $0x1410] sm:$0xf]  ;;  %v13314_v51 = vld [vmem:[#allocation5 + $0x16c4] sm:$0xf0] }
  0x74   :  { %5848 = vmatpush.bf16.msra.mxu0 %v10081_v24  ;;  %v8438_v24 = vld [vmem:[#allocation2 + $0x74] sm:$0xf0]  ;;  %v14011_v35 = vor.u32 %v12580_v18, %v8436_v16  ;;  %v13278_v16 = vld [vmem:[#allocation5 + $0x15a4] sm:$0xf0]  ;;  %v11424_v18 = vld [vmem:[#allocation5 + $0x1710] sm:$0xf] }
  0x75   :  { %5862 = vmatpush.bf16.msra.mxu1 %v10273_v25  ;;  %v11137_v25 = vor.u32 %v13254_v5, %v11136_v4  ;;  %v11448_v4 = vld [vmem:[#allocation5 + $0x1740] sm:$0xf]  ;;  %v13332_v5 = vld [vmem:[#allocation5 + $0x1754] sm:$0xf0]  ;;  %s13920_s4 = smov [#allocation14]   ;;  %s8378_s18 = sshll.u32 %s14613_s7, 4  ;;  %s8379_s18 = int_to_ptr.hbm [resolvable:$true] %s8378_s18 }
  0x76   :  { %5876 = vmatpush.bf16.msra.mxu2 %v10465_v26  ;;  %v11329_v26 = vor.u32 %v13302_v7, %v11328_v6  ;;  %v11065_v7 = vor.u32 %v13236_v0, %v11064_v62  ;;  %v11449_v13 = vor.u32 %v13332_v5, %v11448_v4  ;;  %v13164_v53 = vld [vmem:[#allocation5 + $0x1214] sm:$0xf0]  ;;  %v11352_v62 = vld [vmem:[#allocation5 + $0x1680] sm:$0xf]  ;;  %v11712_v0 = vld [vmem:[#allocation5 + $0x1950] sm:$0xf] }
  0x77   :  { %5890 = vmatpush.bf16.msra.mxu3 %v10657_v30  ;;  %v11521_v30 = vor.u32 %v13350_v11, %v11520_v8  ;;  %v13182_v11 = vld [vmem:[#allocation5 + $0x12a4] sm:$0xf0]  ;;  %v11904_v4 = vld [vmem:[#allocation5 + $0x1ad0] sm:$0xf]  ;;  %s8376_s6 = sshll.u32 %s13920_s4, 4  ;;  %s8377_s6 = int_to_ptr.vmem [resolvable:$true] %s8376_s6 }
  0x78   :  { %5849 = vmatpush.bf16.msra.mxu0 %v10057_v36  ;;  %v14013_v36 = vor.u32 %v12570_v19, %v8430_v22  ;;  %v13326_v19 = vld [vmem:[#allocation5 + $0x1724] sm:$0xf0] }
  0x79   :  { %5863 = vmatpush.bf16.msra.mxu1 %v10249_v38  ;;  %v13344_v38 = vld [vmem:[#allocation5 + $0x17b4] sm:$0xf0]  ;;  %v13446_v5 = vld [vmem:[#allocation5 + $0x1ae4] sm:$0xf0] }
  0x7a   :  { %5877 = vmatpush.bf16.msra.mxu2 %v10441_v40  ;;  %v14015_v40 = vor.u32 %v12571_v23, %v8438_v24  ;;  %v11497_v50 = vor.u32 %v13344_v38, %v11496_v37  ;;  %v10824_v23 = vld [vmem:[#allocation5 + $0x1260] sm:$0xf]  ;;  %v13176_v24 = vld [vmem:[#allocation5 + $0x1274] sm:$0xf0]  ;;  %v13170_v37 = vld [vmem:[#allocation5 + $0x1244] sm:$0xf0] }
  0x7b   :  { %5891 = vmatpush.bf16.msra.mxu3 %v10633_v46  ;;  %v10896_v46 = vld [vmem:[#allocation5 + $0x12f0] sm:$0xf]  ;;  %v10825_v33 = vor.u32 %v13176_v24, %v10824_v23  ;;  %v12573_v23 = vld [vmem:[#allocation2 + $0x3c] sm:$0xf] }
  0x7c   :  { %5850 = vmatpush.bf16.msra.mxu0 %v10033_v54  ;;  %v11472_v54 = vld [vmem:[#allocation5 + $0x1770] sm:$0xf]  ;;  %v10897_v56 = vor.u32 %v13194_v48, %v10896_v46 }
  0x7d   :  { %5864 = vmatpush.bf16.msra.mxu1 %v10225_v60  ;;  %v10872_v60 = vld [vmem:[#allocation5 + $0x12c0] sm:$0xf]  ;;  %v11473_v63 = vor.u32 %v13338_v55, %v11472_v54  ;;  %v11184_v46 = vld [vmem:[#allocation5 + $0x1530] sm:$0xf]  ;;  %v10801_v54 = vor.u32 %v13170_v37, %v10800_v34  ;;  %v13488_v37 = vld [vmem:[#allocation5 + $0x1c34] sm:$0xf0] }
  0x7e   :  { %5878 = vmatpush.bf16.msra.mxu2 %v10417_v61  ;;  %v13188_v61 = vld [vmem:[#allocation5 + $0x12d4] sm:$0xf0]  ;;  %v10968_v55 = vld [vmem:[#allocation5 + $0x1380] sm:$0xf]  ;;  %v8454_v24 = vld [vmem:[#allocation2 + $0x84] sm:$0xf0] }
  0x7f   :  { %5892 = vmatpush.bf16.msra.mxu3 %v10609_v2  ;;  %v11256_v2 = vld [vmem:[#allocation5 + $0x15c0] sm:$0xf]  ;;  %v10873_v6 = vor.u32 %v13188_v61, %v10872_v60  ;;  %v11185_v61 = vor.u32 %v13266_v49, %v11184_v46  ;;  %v14027_v46 = vor.u32 %v12573_v23, %v8454_v24  ;;  %v8546_v23 = vld [vmem:[#allocation5 + $0xa8] sm:$0xf0] }
  0x80   :  { %5851 = vmatpush.bf16.msra.mxu0 %v10009_v9  ;;  %v11257_v8 = vor.u32 %v13284_v3, %v11256_v2  ;;  %v10848_v9 = vld [vmem:[#allocation5 + $0x1290] sm:$0xf]  ;;  %v13398_v3 = vld [vmem:[#allocation5 + $0x1964] sm:$0xf0]  ;;  %v12072_v34 = vld [vmem:[#allocation5 + $0x1c20] sm:$0xf] }
  0x81   :  { %5865 = vmatpush.bf16.msra.mxu1 %v10201_v14  ;;  %v13230_v14 = vld [vmem:[#allocation5 + $0x1424] sm:$0xf0] }
  0x82   :  { %5879 = vmatpush.bf16.msra.mxu2 %v10393_v15  ;;  %v11232_v15 = vld [vmem:[#allocation5 + $0x1590] sm:$0xf] }
  0x83   :  { %5893 = vmatpush.bf16.msra.mxu3 %v10585_v20  ;;  %5852 = vmatmul.bf16.vlgmr.msra.gmra.mxu0 %v14009_v31  ;;  %v10849_v20 = vor.u32 %v13182_v11, %v10848_v9  ;;  %v11233_v22 = vor.u32 %v13278_v16, %v11232_v15  ;;  %v10777_v9 = vor.u32 %v13164_v53, %v10776_v52  ;;  %v8642_v11 = vld [vmem:[#allocation5 + $0x168] sm:$0xf0]  ;;  %v8452_v16 = vld [vmem:[#allocation2 + $0x38] sm:$0xf]  ;;  %v13386_v52 = vld [vmem:[#allocation5 + $0x1904] sm:$0xf0] }
  0x84   :  { %5900 = vmatpush.bf16.msrb.mxu0 %v10945_v21  ;;  %5866 = vmatmul.bf16.vlgmr.msra.gmra.mxu1 %v14013_v36  ;;  %v11041_v21 = vor.u32 %v13230_v14, %v11040_v12  ;;  %v8444_v12 = vld [vmem:[#allocation2 + $0x30] sm:$0xf]  ;;  %v11856_v53 = vld [vmem:[#allocation5 + $0x1a70] sm:$0xf] }
  0x85   :  { %5914 = vmatpush.bf16.msrb.mxu1 %v11137_v25  ;;  %5880 = vmatmul.bf16.vlgmr.msra.gmra.mxu2 %v14011_v35  ;;  %v11016_v25 = vld [vmem:[#allocation5 + $0x13e0] sm:$0xf] }
  0x86   :  { %5928 = vmatpush.bf16.msrb.mxu2 %v11329_v26  ;;  %5894 = vmatmul.bf16.vlgmr.msra.gmra.mxu3 %v14015_v40  ;;  %v11425_v26 = vor.u32 %v13326_v19, %v11424_v18  ;;  %v11017_v38 = vor.u32 %v13224_v27, %v11016_v25  ;;  %v12582_v18 = vld [vmem:[#allocation2 + $0x80] sm:$0xf0]  ;;  %v12572_v19 = vld [vmem:[#allocation2 + $0x34] sm:$0xf]  ;;  %v11905_v25 = vor.u32 %v13446_v5, %v11904_v4  ;;  %v11688_v27 = vld [vmem:[#allocation5 + $0x1920] sm:$0xf] }
  0x87   :  { %5942 = vmatpush.bf16.msrb.mxu3 %v11521_v30  ;;  %v11400_v30 = vld [vmem:[#allocation5 + $0x16e0] sm:$0xf]  ;;  %v13428_v5 = vld [vmem:[#allocation5 + $0x1a54] sm:$0xf0] }
  0x88   :  { %5901 = vmatpush.bf16.msrb.mxu0 %v10921_v41  ;;  %v11209_v41 = vor.u32 %v13272_v29, %v11208_v28  ;;  %v11401_v48 = vor.u32 %v13320_v32, %v11400_v30  ;;  %v13392_v28 = vld [vmem:[#allocation5 + $0x1934] sm:$0xf0]  ;;  %v11880_v29 = vld [vmem:[#allocation5 + $0x1aa0] sm:$0xf] }
  0x89   :  { %5915 = vmatpush.bf16.msrb.mxu1 %v11113_v42  ;;  %v10992_v42 = vld [vmem:[#allocation5 + $0x13b0] sm:$0xf] }
  0x8a   :  { %5929 = vmatpush.bf16.msrb.mxu2 %v11305_v45  ;;  %v13218_v45 = vld [vmem:[#allocation5 + $0x13c4] sm:$0xf0] }
  0x8b   :  { %5943 = vmatpush.bf16.msrb.mxu3 %v11497_v50  ;;  %v11376_v50 = vld [vmem:[#allocation5 + $0x16b0] sm:$0xf]  ;;  %v10993_v60 = vor.u32 %v13218_v45, %v10992_v42  ;;  %v12621_v42 = vld [vmem:[#allocation5 + $0x124] sm:$0xf]  ;;  %v8618_v45 = vld [vmem:[#allocation5 + $0x138] sm:$0xf0] }
  0x8c   :  { %5902 = vmatpush.bf16.msrb.mxu0 %v10897_v56  ;;  %v13212_v56 = vld [vmem:[#allocation5 + $0x1394] sm:$0xf0]  ;;  %v11377_v2 = vor.u32 %v13314_v51, %v11376_v50  ;;  %v12073_v50 = vor.u32 %v13488_v37, %v12072_v34  ;;  %v11664_v51 = vld [vmem:[#allocation5 + $0x18f0] sm:$0xf]  ;;  %v11976_v34 = vld [vmem:[#allocation5 + $0x1b60] sm:$0xf] }
  0x8d   :  { %5916 = vmatpush.bf16.msrb.mxu1 %v11089_v57  ;;  %v11160_v57 = vld [vmem:[#allocation5 + $0x1500] sm:$0xf]  ;;  %v10969_v14 = vor.u32 %v13212_v56, %v10968_v55  ;;  %v13434_v55 = vld [vmem:[#allocation5 + $0x1a84] sm:$0xf0]  ;;  %v12048_v56 = vld [vmem:[#allocation5 + $0x1bf0] sm:$0xf] }
  0x8e   :  { %5930 = vmatpush.bf16.msrb.mxu2 %v11281_v59  ;;  %v13260_v59 = vld [vmem:[#allocation5 + $0x1514] sm:$0xf0] }
  0x8f   :  { %5944 = vmatpush.bf16.msrb.mxu3 %v11473_v63  ;;  %v13308_v63 = vld [vmem:[#allocation5 + $0x1694] sm:$0xf0]  ;;  %v11161_v15 = vor.u32 %v13260_v59, %v11160_v57  ;;  %v13482_v57 = vld [vmem:[#allocation5 + $0x1c04] sm:$0xf0]  ;;  %v12615_v59 = vld [vmem:[#allocation5 + $0xf4] sm:$0xf] }
  0x90   :  { %5903 = vmatpush.bf16.msrb.mxu0 %v10873_v6  ;;  %v12096_v6 = vld [vmem:[#allocation5 + $0x1c50] sm:$0xf]  ;;  %v13464_v37 = vld [vmem:[#allocation5 + $0x1b74] sm:$0xf0] }
  0x91   :  { %5917 = vmatpush.bf16.msrb.mxu1 %v11065_v7  ;;  %v13494_v7 = vld [vmem:[#allocation5 + $0x1c64] sm:$0xf0] }
  0x92   :  { %5931 = vmatpush.bf16.msrb.mxu2 %v11257_v8  ;;  %v12627_v8 = vld [vmem:[#allocation5 + $0x154] sm:$0xf] }
  0x93   :  { %5945 = vmatpush.bf16.msrb.mxu3 %v11449_v13  ;;  %v12581_v13 = vld [vmem:[#allocation2 + $0x78] sm:$0xf0]  ;;  %v8645_v30 = vor.u32 %v12627_v8, %v8642_v11 }
  0x94   :  { %5904 = vmatpush.bf16.msrb.mxu0 %v10849_v20  ;;  %v11353_v20 = vor.u32 %v13308_v63, %v11352_v62  ;;  %v14021_v32 = vor.u32 %v12581_v13, %v8444_v12  ;;  %v11857_v62 = vor.u32 %v13434_v55, %v11856_v53  ;;  %v12049_v63 = vor.u32 %v13482_v57, %v12048_v56  ;;  %v12609_v8 = vld [vmem:[#allocation5 + $0xc4] sm:$0xf]  ;;  %v11760_v53 = vld [vmem:[#allocation5 + $0x19b0] sm:$0xf]  ;;  %v13410_v55 = vld [vmem:[#allocation5 + $0x19c4] sm:$0xf0] }
  0x95   :  { %5918 = vmatpush.bf16.msrb.mxu1 %v11041_v21  ;;  %v11713_v21 = vor.u32 %v13398_v3, %v11712_v0  ;;  %v11640_v0 = vld [vmem:[#allocation5 + $0x18c0] sm:$0xf]  ;;  %v11952_v56 = vld [vmem:[#allocation5 + $0x1b30] sm:$0xf]  ;;  %v13458_v57 = vld [vmem:[#allocation5 + $0x1b44] sm:$0xf0] }
  0x96   :  { %5932 = vmatpush.bf16.msrb.mxu2 %v11233_v22  ;;  %v8446_v22 = vld [vmem:[#allocation2 + $0x7c] sm:$0xf0]  ;;  %v11832_v3 = vld [vmem:[#allocation5 + $0x1a40] sm:$0xf] }
  0x97   :  { %5946 = vmatpush.bf16.msrb.mxu3 %v11425_v26  ;;  %v12097_v26 = vor.u32 %v13494_v7, %v12096_v6  ;;  %v12024_v6 = vld [vmem:[#allocation5 + $0x1bc0] sm:$0xf]  ;;  %v13476_v7 = vld [vmem:[#allocation5 + $0x1bd4] sm:$0xf0]  ;;  %v11833_v12 = vor.u32 %v13428_v5, %v11832_v3  ;;  %v11761_v3 = vor.u32 %v13410_v55, %v11760_v53  ;;  %v12813_v55 = vld [vmem:[#allocation5 + $0x724] sm:$0xf] }
  0x98   :  { %5905 = vmatpush.bf16.msrb.mxu0 %v10825_v33  ;;  %v13440_v33 = vld [vmem:[#allocation5 + $0x1ab4] sm:$0xf0]  ;;  %v12025_v13 = vor.u32 %v13476_v7, %v12024_v6  ;;  %v11928_v5 = vld [vmem:[#allocation5 + $0x1b00] sm:$0xf]  ;;  %v12585_v7 = vld [vmem:[#allocation5 + $0x4] sm:$0xf] }
  0x99   :  { %5919 = vmatpush.bf16.msrb.mxu1 %v11017_v38  ;;  %v14023_v38 = vor.u32 %v12582_v18, %v8452_v16  ;;  %v11881_v49 = vor.u32 %v13440_v33, %v11880_v29  ;;  %v11808_v16 = vld [vmem:[#allocation5 + $0x1a10] sm:$0xf]  ;;  %v11784_v29 = vld [vmem:[#allocation5 + $0x19e0] sm:$0xf]  ;;  %v13416_v33 = vld [vmem:[#allocation5 + $0x19f4] sm:$0xf0] }
  0x9a   :  { %5933 = vmatpush.bf16.msrb.mxu2 %v11209_v41  ;;  %v14025_v41 = vor.u32 %v12572_v19, %v8446_v22  ;;  %v13422_v19 = vld [vmem:[#allocation5 + $0x1a24] sm:$0xf0]  ;;  %v12603_v22 = vld [vmem:[#allocation5 + $0x94] sm:$0xf]  ;;  %v13452_v6 = vld [vmem:[#allocation5 + $0x1b14] sm:$0xf0] }
  0x9b   :  { %5947 = vmatpush.bf16.msrb.mxu3 %v11401_v48  ;;  %v11689_v48 = vor.u32 %v13392_v28, %v11688_v27  ;;  %v11592_v27 = vld [vmem:[#allocation5 + $0x1860] sm:$0xf]  ;;  %v13368_v28 = vld [vmem:[#allocation5 + $0x1874] sm:$0xf0] }
  0x9c   :  { %5906 = vmatpush.bf16.msrb.mxu0 %v10801_v54  ;;  %v8621_v54 = vor.u32 %v12621_v42, %v8618_v45  ;;  %v12597_v42 = vld [vmem:[#allocation5 + $0x64] sm:$0xf]  ;;  %v8522_v45 = vld [vmem:[#allocation5 + $0x78] sm:$0xf0] }
  0x9d   :  { %5920 = vmatpush.bf16.msrb.mxu1 %v10993_v60  ;;  %v8594_v60 = vld [vmem:[#allocation5 + $0x108] sm:$0xf0] }
  0x9e   :  { %5934 = vmatpush.bf16.msrb.mxu2 %v11185_v61  ;;  %v11665_v61 = vor.u32 %v13386_v52, %v11664_v51  ;;  %v8597_v4 = vor.u32 %v12615_v59, %v8594_v60  ;;  %v11568_v51 = vld [vmem:[#allocation5 + $0x1830] sm:$0xf]  ;;  %v13362_v52 = vld [vmem:[#allocation5 + $0x1844] sm:$0xf0]  ;;  %v12591_v59 = vld [vmem:[#allocation5 + $0x34] sm:$0xf] }
  0x9f   :  { %5948 = vmatpush.bf16.msrb.mxu3 %v11377_v2  ;;  %v13380_v2 = vld [vmem:[#allocation5 + $0x18d4] sm:$0xf0]  ;;  %v8498_v60 = vld [vmem:[#allocation5 + $0x48] sm:$0xf0] }
  0xa0   :  { %5907 = vmatpush.bf16.msrb.mxu0 %v10777_v9  ;;  %v8570_v9 = vld [vmem:[#allocation5 + $0xd8] sm:$0xf0]  ;;  %v11641_v11 = vor.u32 %v13380_v2, %v11640_v0  ;;  %v11736_v0 = vld [vmem:[#allocation5 + $0x1980] sm:$0xf]  ;;  %v13404_v2 = vld [vmem:[#allocation5 + $0x1994] sm:$0xf0] }
  0xa1   :  { %5921 = vmatpush.bf16.msrb.mxu1 %v10969_v14  ;;  %v11616_v14 = vld [vmem:[#allocation5 + $0x1890] sm:$0xf]  ;;  %v8573_v18 = vor.u32 %v12609_v8, %v8570_v9  ;;  %v8501_v8 = vor.u32 %v12591_v59, %v8498_v60  ;;  %v8474_v9 = vld [vmem:[#allocation5 + $0x18] sm:$0xf0]  ;;  %v12663_v59 = vld [vmem:[#allocation5 + $0x274] sm:$0xf] }
  0xa2   :  { %5935 = vmatpush.bf16.msrb.mxu2 %v11161_v15  ;;  %v13374_v15 = vld [vmem:[#allocation5 + $0x18a4] sm:$0xf0] }
  0xa3   :  { %5949 = vmatpush.bf16.msrb.mxu3 %v11353_v20  ;;  %5908 = vmatmul.bf16.vlgmr.msrb.gmra.mxu0 %v14021_v32  ;;  %v12000_v20 = vld [vmem:[#allocation5 + $0x1b90] sm:$0xf]  ;;  %v11617_v24 = vor.u32 %v13374_v15, %v11616_v14  ;;  %v9026_v14 = vld [vmem:[#allocation5 + $0x468] sm:$0xf0]  ;;  %v12771_v15 = vld [vmem:[#allocation5 + $0x5d4] sm:$0xf] }
  0xa4   :  { %5956 = vmatpush.bf16.msra.mxu0 %v11713_v21  ;;  %5922 = vmatmul.bf16.vlgmr.msrb.gmra.mxu1 %v14025_v41  ;;  %v13470_v21 = vld [vmem:[#allocation5 + $0x1ba4] sm:$0xf0] }
  0xa5   :  { %5970 = vmatpush.bf16.msra.mxu1 %v11905_v25  ;;  %5936 = vmatmul.bf16.vlgmr.msrb.gmra.mxu2 %v14023_v38  ;;  %v11809_v25 = vor.u32 %v13422_v19, %v11808_v16  ;;  %v12819_v19 = vld [vmem:[#allocation5 + $0x754] sm:$0xf] }
  0xa6   :  { %5984 = vmatpush.bf16.msra.mxu2 %v12097_v26  ;;  %5950 = vmatmul.bf16.vlgmr.msrb.gmra.mxu3 %v14027_v46  ;;  %v12001_v26 = vor.u32 %v13470_v21, %v12000_v20  ;;  %v9410_v20 = vld [vmem:[#allocation5 + $0x768] sm:$0xf0]  ;;  %v11737_v21 = vor.u32 %v13404_v2, %v11736_v0  ;;  %v14039_v0 = vld [vmem:[#allocation7] sm:$0x3f] }
  0xa7   :  { %5998 = vmatpush.bf16.msra.mxu3 %v8645_v30  ;;  %v8549_v30 = vor.u32 %v12603_v22, %v8546_v23  ;;  %v11929_v22 = vor.u32 %v13452_v6, %v11928_v5  ;;  %v8460_v23 = vld [vmem:[#allocation2 + $0x40] sm:$0xf]  ;;  %v9170_v5 = vld [vmem:[#allocation5 + $0x588] sm:$0xf0]  ;;  %v12807_v6 = vld [vmem:[#allocation5 + $0x6f4] sm:$0xf] }
  0xa8   :  { %5957 = vmatpush.bf16.msra.mxu0 %v11689_v48  ;;  %v11593_v48 = vor.u32 %v13368_v28, %v11592_v27  ;;  %v12584_v28 = vld [vmem:[#allocation2 + $0x90] sm:$0xf0] }
  0xa9   :  { %5971 = vmatpush.bf16.msra.mxu1 %v11881_v49  ;;  %v11785_v49 = vor.u32 %v13416_v33, %v11784_v29  ;;  %v12574_v29 = vld [vmem:[#allocation2 + $0x44] sm:$0xf] }
  0xaa   :  { %5985 = vmatpush.bf16.msra.mxu2 %v12073_v50  ;;  %v11977_v50 = vor.u32 %v13464_v37, %v11976_v34  ;;  %v12669_v37 = vld [vmem:[#allocation5 + $0x2a4] sm:$0xf] }
  0xab   :  { %5999 = vmatpush.bf16.msra.mxu3 %v8621_v54  ;;  %v8525_v54 = vor.u32 %v12597_v42, %v8522_v45  ;;  %v8810_v42 = vld [vmem:[#allocation5 + $0x2b8] sm:$0xf0]  ;;  %v12717_v45 = vld [vmem:[#allocation5 + $0x424] sm:$0xf] }
  0xac   :  { %5958 = vmatpush.bf16.msra.mxu0 %v11665_v61  ;;  %v11544_v61 = vld [vmem:[#allocation5 + $0x1800] sm:$0xf] }
  0xad   :  { %5972 = vmatpush.bf16.msra.mxu1 %v11857_v62  ;;  %v11569_v62 = vor.u32 %v13362_v52, %v11568_v51  ;;  %v12765_v51 = vld [vmem:[#allocation5 + $0x5a4] sm:$0xf]  ;;  %v9194_v52 = vld [vmem:[#allocation5 + $0x5b8] sm:$0xf0] }
  0xae   :  { %5986 = vmatpush.bf16.msra.mxu2 %v12049_v63  ;;  %v13356_v63 = vld [vmem:[#allocation5 + $0x1814] sm:$0xf0] }
  0xaf   :  { %6000 = vmatpush.bf16.msra.mxu3 %v8597_v4  ;;  %v11953_v4 = vor.u32 %v13458_v57, %v11952_v56  ;;  %v11545_v16 = vor.u32 %v13356_v63, %v11544_v61  ;;  %v9386_v56 = vld [vmem:[#allocation5 + $0x738] sm:$0xf0]  ;;  %v8813_v57 = vor.u32 %v12669_v37, %v8810_v42  ;;  %v9197_v61 = vor.u32 %v12765_v51, %v9194_v52  ;;  %v12711_v63 = vld [vmem:[#allocation5 + $0x3f4] sm:$0xf]  ;;  %v9122_v42 = vld [vmem:[#allocation5 + $0x528] sm:$0xf0] }
  0xb0   :  { %5959 = vmatpush.bf16.msra.mxu0 %v11641_v11  ;;  %v12675_v11 = vld [vmem:[#allocation5 + $0x2d4] sm:$0xf]  ;;  %v9389_v2 = vor.u32 %v12813_v55, %v9386_v56 }
  0xb1   :  { %5973 = vmatpush.bf16.msra.mxu1 %v11833_v12  ;;  %v8834_v12 = vld [vmem:[#allocation5 + $0x2e8] sm:$0xf0]  ;;  %v12747_v37 = vld [vmem:[#allocation5 + $0x514] sm:$0xf] }
  0xb2   :  { %5987 = vmatpush.bf16.msra.mxu2 %v12025_v13  ;;  %v12723_v13 = vld [vmem:[#allocation5 + $0x454] sm:$0xf]  ;;  %v8837_v27 = vor.u32 %v12675_v11, %v8834_v12  ;;  %v9125_v56 = vor.u32 %v12747_v37, %v9122_v42  ;;  %v9050_v37 = vld [vmem:[#allocation5 + $0x498] sm:$0xf0]  ;;  %v12777_v42 = vld [vmem:[#allocation5 + $0x604] sm:$0xf] }
  0xb3   :  { %6001 = vmatpush.bf16.msra.mxu3 %v8573_v18  ;;  %v9218_v18 = vld [vmem:[#allocation5 + $0x5e8] sm:$0xf0]  ;;  %v9029_v33 = vor.u32 %v12723_v13, %v9026_v14  ;;  %v12657_v13 = vld [vmem:[#allocation5 + $0x244] sm:$0xf]  ;;  %v8762_v14 = vld [vmem:[#allocation5 + $0x258] sm:$0xf0] }
  0xb4   :  { %5960 = vmatpush.bf16.msra.mxu0 %v11617_v24  ;;  %v12583_v24 = vld [vmem:[#allocation2 + $0x88] sm:$0xf0]  ;;  %v9221_v34 = vor.u32 %v12771_v15, %v9218_v18  ;;  %v12705_v15 = vld [vmem:[#allocation5 + $0x3c4] sm:$0xf]  ;;  %v8954_v18 = vld [vmem:[#allocation5 + $0x3d8] sm:$0xf0] }
  0xb5   :  { %5974 = vmatpush.bf16.msra.mxu1 %v11809_v25  ;;  %v8468_v25 = vld [vmem:[#allocation2 + $0x48] sm:$0xf] }
  0xb6   :  { %5988 = vmatpush.bf16.msra.mxu2 %v12001_v26  ;;  %v8477_v26 = vor.u32 %v12585_v7, %v8474_v9  ;;  %v14035_v53 = vor.u32 %v12584_v28, %v8468_v25  ;;  %v9362_v7 = vld [vmem:[#allocation5 + $0x708] sm:$0xf0]  ;;  %v14614_v9 = vperm.slane %v14039_v0, 0  ;;  %v12651_v28 = vld [vmem:[#allocation5 + $0x214] sm:$0xf] }
  0xb7   :  { %6002 = vmatpush.bf16.msra.mxu3 %v8549_v30  ;;  %v8462_v30 = vld [vmem:[#allocation2 + $0x8c] sm:$0xf0] }
  0xb8   :  { %5961 = vmatpush.bf16.msra.mxu0 %v11593_v48  ;;  %v9413_v48 = vor.u32 %v12819_v19, %v9410_v20  ;;  %14621 = vst [vmem:[#allocation20_spill] sm:$0xff] %v14035_v53  ;;  %v12753_v19 = vld [vmem:[#allocation5 + $0x544] sm:$0xf]  ;;  %v9146_v20 = vld [vmem:[#allocation5 + $0x558] sm:$0xf0] }
  0xb9   :  { %5975 = vmatpush.bf16.msra.mxu1 %v11785_v49  ;;  %v14033_v49 = vor.u32 %v12583_v24, %v8460_v23  ;;  %v8765_v24 = vor.u32 %v12657_v13, %v8762_v14  ;;  %v8690_v13 = vld [vmem:[#allocation5 + $0x1c8] sm:$0xf0]  ;;  %v12687_v14 = vld [vmem:[#allocation5 + $0x334] sm:$0xf] }
  0xba   :  { %5989 = vmatpush.bf16.msra.mxu2 %v11977_v50  ;;  %v9002_v50 = vld [vmem:[#allocation5 + $0x438] sm:$0xf0] }
  0xbb   :  { %6003 = vmatpush.bf16.msra.mxu3 %v8525_v54  ;;  %v14037_v54 = vor.u32 %v12574_v29, %v8462_v30  ;;  %v9005_v60 = vor.u32 %v12717_v45, %v9002_v50  ;;  %v8738_v29 = vld [vmem:[#allocation5 + $0x228] sm:$0xf0]  ;;  %v12699_v30 = vld [vmem:[#allocation5 + $0x394] sm:$0xf] }
  0xbc   :  { %5962 = vmatpush.bf16.msra.mxu0 %v11569_v62  ;;  %v8786_v62 = vld [vmem:[#allocation5 + $0x288] sm:$0xf0]  ;;  %v12795_v45 = vld [vmem:[#allocation5 + $0x694] sm:$0xf]  ;;  %v8741_v51 = vor.u32 %v12651_v28, %v8738_v29  ;;  %v12681_v29 = vld [vmem:[#allocation5 + $0x304] sm:$0xf] }
  0xbd   :  { %5976 = vmatpush.bf16.msra.mxu1 %v11761_v3  ;;  %v8978_v3 = vld [vmem:[#allocation5 + $0x408] sm:$0xf0] }
  0xbe   :  { %5990 = vmatpush.bf16.msra.mxu2 %v11953_v4  ;;  %v12759_v4 = vld [vmem:[#allocation5 + $0x574] sm:$0xf]  ;;  %v8981_v11 = vor.u32 %v12711_v63, %v8978_v3  ;;  %v12741_v63 = vld [vmem:[#allocation5 + $0x4e4] sm:$0xf] }
  0xbf   :  { %6004 = vmatpush.bf16.msra.mxu3 %v8501_v8  ;;  %v8789_v8 = vor.u32 %v12663_v59, %v8786_v62  ;;  %v9173_v12 = vor.u32 %v12759_v4, %v9170_v5  ;;  %v8714_v59 = vld [vmem:[#allocation5 + $0x1f8] sm:$0xf0]  ;;  %v12789_v4 = vld [vmem:[#allocation5 + $0x664] sm:$0xf] }
  0xc0   :  { %5963 = vmatpush.bf16.msra.mxu0 %v11545_v16  ;;  %v9365_v16 = vor.u32 %v12807_v6, %v9362_v7  ;;  %v5741_v23 = vpop.f32.mrf.mxu0  ;;  %v8906_v62 = vld [vmem:[#allocation5 + $0x378] sm:$0xf0] }
  0xc1   :  { %5977 = vmatpush.bf16.msra.mxu1 %v11737_v21  ;;  %v12801_v21 = vld [vmem:[#allocation5 + $0x6c4] sm:$0xf]  ;;  %v5742_v25 = vadd.f32 %v5741_v23, %v14614_v9  ;;  %v5755_v50 = vpop.f32.mrf.mxu1  ;;  %v9290_v5 = vld [vmem:[#allocation5 + $0x678] sm:$0xf0]  ;;  %v12625_v9 = vld [vmem:[#allocation5 + $0x13c] sm:$0xf0] }
  0xc2   :  { %5991 = vmatpush.bf16.msra.mxu2 %v11929_v22  ;;  %v9338_v22 = vld [vmem:[#allocation5 + $0x6d8] sm:$0xf0] }
  0xc3   :  { %6005 = vmatpush.bf16.msra.mxu3 %v8477_v26  ;;  %5964 = vmatmul.bf16.vlgmr.msra.gmra.mxu0 %v14033_v49  ;;  %v8957_v26 = vor.u32 %v12705_v15, %v8954_v18  ;;  %v5756_v52 = vadd.f32 %v5755_v50, %v5742_v25  ;;  %v9293_v15 = vor.u32 %v12789_v4, %v9290_v5  ;;  %v12735_v18 = vld [vmem:[#allocation5 + $0x4b4] sm:$0xf]  ;;  %v12633_v25 = vld [vmem:[#allocation5 + $0x184] sm:$0xf]  ;;  %v9602_v50 = vld [vmem:[#allocation5 + $0x8e8] sm:$0xf0] }
  0xc4   :  { %6012 = vmatpush.bf16.msrb.mxu0 %v8837_v27  ;;  %5978 = vmatmul.bf16.vlgmr.msra.gmra.mxu1 %v14037_v54  ;;  %v9149_v27 = vor.u32 %v12753_v19, %v9146_v20  ;;  %v9074_v19 = vld [vmem:[#allocation5 + $0x4c8] sm:$0xf0] }
  0xc5   :  { %6026 = vmatpush.bf16.msrb.mxu1 %v9029_v33  ;;  %5992 = vmatmul.bf16.vlgmr.msra.gmra.mxu2 %v14035_v53  ;;  %v9341_v33 = vor.u32 %v12801_v21, %v9338_v22  ;;  %v12783_v21 = vld [vmem:[#allocation5 + $0x634] sm:$0xf]  ;;  %v9266_v22 = vld [vmem:[#allocation5 + $0x648] sm:$0xf0]  ;;  %v9077_v28 = vor.u32 %v12735_v18, %v9074_v19 }
  0xc6   :  { %6040 = vmatpush.bf16.msrb.mxu2 %v9221_v34  ;;  %6006 = vmatmul.bf16.vlgmr.msra.gmra.mxu3 %v13985_v58  ;;  %v8930_v34 = vld [vmem:[#allocation5 + $0x3a8] sm:$0xf0] }
  0xc7   :  { %6054 = vmatpush.bf16.msrb.mxu3 %v9413_v48  ;;  %v9314_v48 = vld [vmem:[#allocation5 + $0x6a8] sm:$0xf0]  ;;  %v8933_v55 = vor.u32 %v12699_v30, %v8930_v34  ;;  %v8858_v30 = vld [vmem:[#allocation5 + $0x318] sm:$0xf0]  ;;  %v9269_v34 = vor.u32 %v12783_v21, %v9266_v22  ;;  %v12855_v22 = vld [vmem:[#allocation5 + $0x874] sm:$0xf] }
  0xc8   :  { %6013 = vmatpush.bf16.msrb.mxu0 %v8813_v57  ;;  %v12645_v57 = vld [vmem:[#allocation5 + $0x1e4] sm:$0xf]  ;;  %v5769_v3 = vpop.f32.mrf.mxu2  ;;  %v14050_v5 = vpop.f32.mrf.mxu0 }
  0xc9   :  { %6027 = vmatpush.bf16.msrb.mxu1 %v9005_v60  ;;  %v12693_v60 = vld [vmem:[#allocation5 + $0x364] sm:$0xf]  ;;  %v5770_v6 = vadd.f32 %v5769_v3, %v5756_v52  ;;  %v8717_v7 = vor.u32 %v12645_v57, %v8714_v59  ;;  %v5783_v20 = vpop.f32.mrf.mxu3  ;;  %v9986_v57 = vld [vmem:[#allocation5 + $0xbe8] sm:$0xf0]  ;;  %v8861_v59 = vor.u32 %v12681_v29, %v8858_v30  ;;  %v14052_v18 = vpop.f32.mrf.mxu1  ;;  %v12999_v30 = vld [vmem:[#allocation5 + $0xcf4] sm:$0xf] }
  0xca   :  { %6041 = vmatpush.bf16.msrb.mxu2 %v9197_v61  ;;  %v9317_v61 = vor.u32 %v12795_v45, %v9314_v48  ;;  %v9242_v45 = vld [vmem:[#allocation5 + $0x618] sm:$0xf0]  ;;  %v12867_v48 = vld [vmem:[#allocation5 + $0x8d4] sm:$0xf]  ;;  %v9938_v29 = vld [vmem:[#allocation5 + $0xb88] sm:$0xf0] }
  0xcb   :  { %6055 = vmatpush.bf16.msrb.mxu3 %v9389_v2  ;;  %v9098_v2 = vld [vmem:[#allocation5 + $0x4f8] sm:$0xf0]  ;;  %v14048_v23 = vadd.f32 %v5783_v20, %v5770_v6  ;;  %v12861_v6 = vld [vmem:[#allocation5 + $0x8a4] sm:$0xf] }
  0xcc   :  { %6014 = vmatpush.bf16.msrb.mxu0 %v8789_v8  ;;  %v8909_v8 = vor.u32 %v12693_v60, %v8906_v62  ;;  %v10178_v62 = vld [vmem:[#allocation5 + $0xd68] sm:$0xf0] }
  0xcd   :  { %6028 = vmatpush.bf16.msrb.mxu1 %v8981_v11  ;;  %v9101_v11 = vor.u32 %v12741_v63, %v9098_v2  ;;  %v9245_v63 = vor.u32 %v12777_v42, %v9242_v45  ;;  %v9605_v2 = vor.u32 %v12867_v48, %v9602_v50  ;;  %v12849_v48 = vld [vmem:[#allocation5 + $0x844] sm:$0xf]  ;;  %v9530_v50 = vld [vmem:[#allocation5 + $0x858] sm:$0xf0] }
  0xce   :  { %6042 = vmatpush.bf16.msrb.mxu2 %v9173_v12  ;;  %v12639_v12 = vld [vmem:[#allocation5 + $0x1b4] sm:$0xf] }
  0xcf   :  { %6056 = vmatpush.bf16.msrb.mxu3 %v9365_v16  ;;  %v8882_v16 = vld [vmem:[#allocation5 + $0x348] sm:$0xf0] }
  0xd0   :  { %6015 = vmatpush.bf16.msrb.mxu0 %v8765_v24  ;;  %v8693_v24 = vor.u32 %v12639_v12, %v8690_v13  ;;  %v9770_v12 = vld [vmem:[#allocation5 + $0xa38] sm:$0xf0]  ;;  %v12957_v13 = vld [vmem:[#allocation5 + $0xba4] sm:$0xf] }
  0xd1   :  { %6029 = vmatpush.bf16.msrb.mxu1 %v8957_v26  ;;  %v8666_v26 = vld [vmem:[#allocation5 + $0x198] sm:$0xf0] }
  0xd2   :  { %6043 = vmatpush.bf16.msrb.mxu2 %v9149_v27  ;;  %v8885_v27 = vor.u32 %v12687_v14, %v8882_v16  ;;  %v8669_v52 = vor.u32 %v12633_v25, %v8666_v26  ;;  %v9962_v14 = vld [vmem:[#allocation5 + $0xbb8] sm:$0xf0]  ;;  %v12903_v25 = vld [vmem:[#allocation5 + $0x9f4] sm:$0xf] }
  0xd3   :  { %6057 = vmatpush.bf16.msrb.mxu3 %v9341_v33  ;;  %v12729_v33 = vld [vmem:[#allocation5 + $0x484] sm:$0xf]  ;;  %v10154_v16 = vld [vmem:[#allocation5 + $0xd38] sm:$0xf0]  ;;  %v9965_v21 = vor.u32 %v12957_v13, %v9962_v14  ;;  %v9698_v14 = vld [vmem:[#allocation5 + $0x9a8] sm:$0xf0] }
  0xd4   :  { %6016 = vmatpush.bf16.msrb.mxu0 %v8741_v51  ;;  %v12915_v51 = vld [vmem:[#allocation5 + $0xa54] sm:$0xf]  ;;  %v9053_v60 = vor.u32 %v12729_v33, %v9050_v37  ;;  %v10130_v33 = vld [vmem:[#allocation5 + $0xd08] sm:$0xf0]  ;;  %v14057_v37 = vpop.f32.mrf.mxu2 }
  0xd5   :  { %6030 = vmatpush.bf16.msrb.mxu1 %v8933_v55  ;;  %v9794_v55 = vld [vmem:[#allocation5 + $0xa68] sm:$0xf0] }
  0xd6   :  { %6044 = vmatpush.bf16.msrb.mxu2 %v9125_v56  ;;  %v12963_v56 = vld [vmem:[#allocation5 + $0xbd4] sm:$0xf]  ;;  %v9797_v3 = vor.u32 %v12915_v51, %v9794_v55  ;;  %v12897_v51 = vld [vmem:[#allocation5 + $0x9c4] sm:$0xf]  ;;  %v14060_v55 = vpop.f32.mrf.mxu3 }
  0xd7   :  { %6058 = vmatpush.bf16.msrb.mxu3 %v9317_v61  ;;  %v13011_v61 = vld [vmem:[#allocation5 + $0xd54] sm:$0xf]  ;;  %v9989_v4 = vor.u32 %v12963_v56, %v9986_v57  ;;  %v9722_v56 = vld [vmem:[#allocation5 + $0x9d8] sm:$0xf0]  ;;  %v12945_v57 = vld [vmem:[#allocation5 + $0xb44] sm:$0xf] }
  0xd8   :  { %6017 = vmatpush.bf16.msrb.mxu0 %v8717_v7  ;;  %v9578_v7 = vld [vmem:[#allocation5 + $0x8b8] sm:$0xf0] }
  0xd9   :  { %6031 = vmatpush.bf16.msrb.mxu1 %v8909_v8  ;;  %v12909_v8 = vld [vmem:[#allocation5 + $0xa24] sm:$0xf]  ;;  %v9581_v19 = vor.u32 %v12861_v6, %v9578_v7  ;;  %v12843_v7 = vld [vmem:[#allocation5 + $0x814] sm:$0xf] }
  0xda   :  { %6045 = vmatpush.bf16.msrb.mxu2 %v9101_v11  ;;  %v10181_v11 = vor.u32 %v13011_v61, %v10178_v62  ;;  %v9773_v20 = vor.u32 %v12909_v8, %v9770_v12  ;;  %v12993_v61 = vld [vmem:[#allocation5 + $0xcc4] sm:$0xf]  ;;  %v10106_v62 = vld [vmem:[#allocation5 + $0xcd8] sm:$0xf0]  ;;  %v9506_v8 = vld [vmem:[#allocation5 + $0x828] sm:$0xf0] }
  0xdb   :  { %6059 = vmatpush.bf16.msrb.mxu3 %v9293_v15  ;;  %v13005_v15 = vld [vmem:[#allocation5 + $0xd24] sm:$0xf]  ;;  %v10109_v12 = vor.u32 %v12993_v61, %v10106_v62  ;;  %v9650_v62 = vld [vmem:[#allocation5 + $0x948] sm:$0xf0] }
  0xdc   :  { %6018 = vmatpush.bf16.msrb.mxu0 %v8693_v24  ;;  %v9554_v24 = vld [vmem:[#allocation5 + $0x888] sm:$0xf0]  ;;  %v10157_v26 = vor.u32 %v13005_v15, %v10154_v16  ;;  %v12939_v15 = vld [vmem:[#allocation5 + $0xb14] sm:$0xf] }
  0xdd   :  { %6032 = vmatpush.bf16.msrb.mxu1 %v8885_v27  ;;  %v9746_v27 = vld [vmem:[#allocation5 + $0xa08] sm:$0xf0] }
  0xde   :  { %6046 = vmatpush.bf16.msrb.mxu2 %v9077_v28  ;;  %v12951_v28 = vld [vmem:[#allocation5 + $0xb74] sm:$0xf]  ;;  %v9749_v42 = vor.u32 %v12903_v25, %v9746_v27  ;;  %v9890_v16 = vld [vmem:[#allocation5 + $0xb28] sm:$0xf0]  ;;  %v9482_v25 = vld [vmem:[#allocation5 + $0x7f8] sm:$0xf0] }
  0xdf   :  { %6060 = vmatpush.bf16.msrb.mxu3 %v9269_v34  ;;  %v9557_v34 = vor.u32 %v12855_v22, %v9554_v24  ;;  %v9941_v45 = vor.u32 %v12951_v28, %v9938_v29  ;;  %v9893_v22 = vor.u32 %v12939_v15, %v9890_v16  ;;  %v12837_v24 = vld [vmem:[#allocation5 + $0x7e4] sm:$0xf]  ;;  %v9674_v29 = vld [vmem:[#allocation5 + $0x978] sm:$0xf0] }
  0xe0   :  { %6019 = vmatpush.bf16.msrb.mxu0 %v8669_v52  ;;  %v10133_v52 = vor.u32 %v12999_v30, %v10130_v33  ;;  %v12933_v30 = vld [vmem:[#allocation5 + $0xae4] sm:$0xf]  ;;  %v9866_v33 = vld [vmem:[#allocation5 + $0xaf8] sm:$0xf0] }
  0xe1   :  { %6033 = vmatpush.bf16.msrb.mxu1 %v8861_v59  ;;  %v9914_v59 = vld [vmem:[#allocation5 + $0xb58] sm:$0xf0]  ;;  %v5811_v6 = vpop.f32.mrf.mxu1  ;;  %v12921_v15 = vld [vmem:[#allocation5 + $0xa84] sm:$0xf] }
  0xe2   :  { %6047 = vmatpush.bf16.msrb.mxu2 %v9053_v60  ;;  %v5797_v60 = vpop.f32.mrf.mxu0 }
  0xe3   :  { %6061 = vmatpush.bf16.msrb.mxu3 %v9245_v63  ;;  %6020 = vmatmul.bf16.vlgmr.msrb.gmra.mxu0 %v13991_v10  ;;  %v5798_v63 = vadd.f32 %v5797_v60, %v14048_v23  ;;  %v12879_v60 = vld [vmem:[#allocation5 + $0x934] sm:$0xf] }
  0xe4   :  { %6068 = vmatpush.bf16.msra.mxu0 %v9605_v2  ;;  %6034 = vmatmul.bf16.vlgmr.msrb.gmra.mxu1 %v13987_v1  ;;  %v9533_v2 = vor.u32 %v12849_v48, %v9530_v50  ;;  %v9485_v50 = vor.u32 %v12837_v24, %v9482_v25  ;;  %v13107_v24 = vld [vmem:[#allocation5 + $0x1054] sm:$0xf] }
  0xe5   :  { %6082 = vmatpush.bf16.msra.mxu1 %v9797_v3  ;;  %6048 = vmatmul.bf16.vlgmr.msrb.gmra.mxu2 %v13993_v17  ;;  %v9725_v3 = vor.u32 %v12897_v51, %v9722_v56  ;;  %v5812_v13 = vadd.f32 %v5811_v6, %v5798_v63  ;;  %v9869_v56 = vor.u32 %v12933_v30, %v9866_v33  ;;  %v12927_v63 = vld [vmem:[#allocation5 + $0xab4] sm:$0xf] }
  0xe6   :  { %6096 = vmatpush.bf16.msra.mxu2 %v9989_v4  ;;  %6062 = vmatmul.bf16.vlgmr.msrb.gmra.mxu3 %v13997_v39  ;;  %v9917_v4 = vor.u32 %v12945_v57, %v9914_v59  ;;  %v12831_v57 = vld [vmem:[#allocation5 + $0x7b4] sm:$0xf]  ;;  %v9458_v59 = vld [vmem:[#allocation5 + $0x7c8] sm:$0xf0] }
  0xe7   :  { %6110 = vmatpush.bf16.msra.mxu3 %v10181_v11  ;;  %v12891_v11 = vld [vmem:[#allocation5 + $0x994] sm:$0xf]  ;;  %v9461_v6 = vor.u32 %v12831_v57, %v9458_v59  ;;  %v13101_v57 = vld [vmem:[#allocation5 + $0x1024] sm:$0xf] }
  0xe8   :  { %6069 = vmatpush.bf16.msra.mxu0 %v9581_v19  ;;  %v12987_v19 = vld [vmem:[#allocation5 + $0xc94] sm:$0xf]  ;;  %v9701_v23 = vor.u32 %v12891_v11, %v9698_v14  ;;  %v5825_v28 = vpop.f32.mrf.mxu2  ;;  %v9653_v11 = vor.u32 %v12879_v60, %v9650_v62  ;;  %v9626_v14 = vld [vmem:[#allocation5 + $0x918] sm:$0xf0] }
  0xe9   :  { %6083 = vmatpush.bf16.msra.mxu1 %v9773_v20  ;;  %v10082_v20 = vld [vmem:[#allocation5 + $0xca8] sm:$0xf0]  ;;  %v5839_v48 = vpop.f32.mrf.mxu3  ;;  %v13203_v33 = vld [vmem:[#allocation5 + $0x1354] sm:$0xf]  ;;  %v10538_v60 = vld [vmem:[#allocation5 + $0x1038] sm:$0xf0] }
  0xea   :  { %6097 = vmatpush.bf16.msra.mxu2 %v9965_v21  ;;  %v9509_v21 = vor.u32 %v12843_v7, %v9506_v8  ;;  %v10085_v27 = vor.u32 %v12987_v19, %v10082_v20  ;;  %v12825_v7 = vld [vmem:[#allocation5 + $0x784] sm:$0xf]  ;;  %v9434_v8 = vld [vmem:[#allocation5 + $0x798] sm:$0xf0] }
  0xeb   :  { %6111 = vmatpush.bf16.msra.mxu3 %v10157_v26  ;;  %v12885_v26 = vld [vmem:[#allocation5 + $0x964] sm:$0xf]  ;;  %v9818_v19 = vld [vmem:[#allocation5 + $0xa98] sm:$0xf0]  ;;  %v9437_v25 = vor.u32 %v12825_v7, %v9434_v8  ;;  %v10541_v7 = vor.u32 %v13101_v57, %v10538_v60 }
  0xec   :  { %6070 = vmatpush.bf16.msra.mxu0 %v9557_v34  ;;  %v5826_v34 = vadd.f32 %v5825_v28, %v5812_v13  ;;  %v12873_v13 = vld [vmem:[#allocation5 + $0x904] sm:$0xf]  ;;  %v10754_v28 = vld [vmem:[#allocation5 + $0x11e8] sm:$0xf0]  ;;  %v9821_v30 = vor.u32 %v12921_v15, %v9818_v19  ;;  %v10730_v62 = vld [vmem:[#allocation5 + $0x11b8] sm:$0xf0] }
  0xed   :  { %6084 = vmatpush.bf16.msra.mxu1 %v9749_v42  ;;  %v12981_v42 = vld [vmem:[#allocation5 + $0xc64] sm:$0xf]  ;;  %v10514_v15 = vld [vmem:[#allocation5 + $0x1008] sm:$0xf0] }
  0xee   :  { %6098 = vmatpush.bf16.msra.mxu2 %v9941_v45  ;;  %v10058_v45 = vld [vmem:[#allocation5 + $0xc78] sm:$0xf0]  ;;  %v14063_v51 = vadd.f32 %v5839_v48, %v5826_v34  ;;  %v12969_v20 = vld [vmem:[#allocation5 + $0xc04] sm:$0xf]  ;;  %v10946_v34 = vld [vmem:[#allocation5 + $0x1368] sm:$0xf0] }
  0xef   :  { %6112 = vmatpush.bf16.msra.mxu3 %v10133_v52  ;;  %v9677_v52 = vor.u32 %v12885_v26, %v9674_v29  ;;  %v10061_v61 = vor.u32 %v12981_v42, %v10058_v45  ;;  %v10562_v26 = vld [vmem:[#allocation5 + $0x1068] sm:$0xf0]  ;;  %v9629_v29 = vor.u32 %v12873_v13, %v9626_v14  ;;  %v10949_v59 = vor.u32 %v13203_v33, %v10946_v34  ;;  %v13095_v13 = vld [vmem:[#allocation5 + $0xff4] sm:$0xf]  ;;  %v13137_v33 = vld [vmem:[#allocation5 + $0x1144] sm:$0xf] }
  0xf0   :  { %6071 = vmatpush.bf16.msra.mxu0 %v9533_v2  ;;  %v9842_v2 = vld [vmem:[#allocation5 + $0xac8] sm:$0xf0]  ;;  %v10565_v48 = vor.u32 %v13107_v24, %v10562_v26  ;;  %v10298_v26 = vld [vmem:[#allocation5 + $0xe58] sm:$0xf0] }
  0xf1   :  { %6085 = vmatpush.bf16.msra.mxu1 %v9725_v3  ;;  %v12975_v3 = vld [vmem:[#allocation5 + $0xc34] sm:$0xf]  ;;  %v10706_v19 = vld [vmem:[#allocation5 + $0x1188] sm:$0xf0]  ;;  %v10682_v34 = vld [vmem:[#allocation5 + $0x1158] sm:$0xf0] }
  0xf2   :  { %6099 = vmatpush.bf16.msra.mxu2 %v9917_v4  ;;  %v10034_v4 = vld [vmem:[#allocation5 + $0xc48] sm:$0xf0]  ;;  %v10685_v60 = vor.u32 %v13137_v33, %v10682_v34 }
  0xf3   :  { %6113 = vmatpush.bf16.msra.mxu3 %v10109_v12  ;;  %v9845_v12 = vor.u32 %v12927_v63, %v9842_v2  ;;  %v10037_v16 = vor.u32 %v12975_v3, %v10034_v4  ;;  %v14065_v63 = vpop.f32.mrf.mxu0  ;;  %v13197_v2 = vld [vmem:[#allocation5 + $0x1324] sm:$0xf]  ;;  %v10922_v3 = vld [vmem:[#allocation5 + $0x1338] sm:$0xf0]  ;;  %v14067_v4 = vpop.f32.mrf.mxu1 }
  0xf4   :  { %6072 = vmatpush.bf16.msra.mxu0 %v9509_v21  ;;  %v10010_v21 = vld [vmem:[#allocation5 + $0xc18] sm:$0xf0]  ;;  %v10925_v14 = vor.u32 %v13197_v2, %v10922_v3  ;;  %v13083_v2 = vld [vmem:[#allocation5 + $0xf94] sm:$0xf] }
  0xf5   :  { %6086 = vmatpush.bf16.msra.mxu1 %v9701_v23  ;;  %v13059_v23 = vld [vmem:[#allocation5 + $0xed4] sm:$0xf]  ;;  %v10013_v42 = vor.u32 %v12969_v20, %v10010_v21  ;;  %v10898_v21 = vld [vmem:[#allocation5 + $0x1308] sm:$0xf0] }
  0xf6   :  { %6100 = vmatpush.bf16.msra.mxu2 %v9893_v22  ;;  %v10370_v22 = vld [vmem:[#allocation5 + $0xee8] sm:$0xf0]  ;;  %v13191_v20 = vld [vmem:[#allocation5 + $0x12f4] sm:$0xf] }
  0xf7   :  { %6114 = vmatpush.bf16.msra.mxu3 %v10085_v27  ;;  %v13155_v27 = vld [vmem:[#allocation5 + $0x11d4] sm:$0xf]  ;;  %v10373_v45 = vor.u32 %v13059_v23, %v10370_v22  ;;  %v10517_v22 = vor.u32 %v13095_v13, %v10514_v15  ;;  %v10850_v13 = vld [vmem:[#allocation5 + $0x12a8] sm:$0xf0] }
  0xf8   :  { %6073 = vmatpush.bf16.msra.mxu0 %v9485_v50  ;;  %v10757_v50 = vor.u32 %v13155_v27, %v10754_v28  ;;  %v13089_v27 = vld [vmem:[#allocation5 + $0xfc4] sm:$0xf]  ;;  %v14073_v28 = vpop.f32.mrf.mxu2 }
  0xf9   :  { %6087 = vmatpush.bf16.msra.mxu1 %v9677_v52  ;;  %v13053_v52 = vld [vmem:[#allocation5 + $0xea4] sm:$0xf]  ;;  %14622 = vst [vmem:[#allocation21_spill] sm:$0xff] %v14073_v28 }
  0xfa   :  { %6101 = vmatpush.bf16.msra.mxu2 %v9869_v56  ;;  %v10346_v56 = vld [vmem:[#allocation5 + $0xeb8] sm:$0xf0] }
  0xfb   :  { %6115 = vmatpush.bf16.msra.mxu3 %v10061_v61  ;;  %v13149_v61 = vld [vmem:[#allocation5 + $0x11a4] sm:$0xf] }
  0xfc   :  { %6074 = vmatpush.bf16.msra.mxu0 %v9461_v6  ;;  %v10349_v6 = vor.u32 %v13053_v52, %v10346_v56  ;;  %v10733_v8 = vor.u32 %v13149_v61, %v10730_v62  ;;  %v13035_v61 = vld [vmem:[#allocation5 + $0xe14] sm:$0xf]  ;;  %v10274_v62 = vld [vmem:[#allocation5 + $0xe28] sm:$0xf0] }
  0xfd   :  { %6088 = vmatpush.bf16.msra.mxu1 %v9653_v11  ;;  %v13047_v11 = vld [vmem:[#allocation5 + $0xe74] sm:$0xf] }
  0xfe   :  { %6102 = vmatpush.bf16.msra.mxu2 %v9845_v12  ;;  %v10322_v12 = vld [vmem:[#allocation5 + $0xe88] sm:$0xf0] }
  0xff   :  { %6116 = vmatpush.bf16.msra.mxu3 %v10037_v16  ;;  %v13143_v16 = vld [vmem:[#allocation5 + $0x1174] sm:$0xf]  ;;  %v10325_v23 = vor.u32 %v13047_v11, %v10322_v12  ;;  %v10658_v11 = vld [vmem:[#allocation5 + $0x1128] sm:$0xf0] }
 0x100   :  { %6075 = vmatpush.bf16.msra.mxu0 %v9437_v25  ;;  %v10709_v24 = vor.u32 %v13143_v16, %v10706_v19  ;;  %v13041_v25 = vld [vmem:[#allocation5 + $0xe44] sm:$0xf]  ;;  %v13179_v12 = vld [vmem:[#allocation5 + $0x1294] sm:$0xf]  ;;  %v10250_v19 = vld [vmem:[#allocation5 + $0xdf8] sm:$0xf0] }
 0x101   :  { %6089 = vmatpush.bf16.msra.mxu1 %v9629_v29  ;;  %v10901_v29 = vor.u32 %v13191_v20, %v10898_v21  ;;  %v10301_v56 = vor.u32 %v13041_v25, %v10298_v26  ;;  %v5867_v57 = vpop.f32.mrf.mxu1  ;;  %v13029_v16 = vld [vmem:[#allocation5 + $0xde4] sm:$0xf]  ;;  %v10853_v21 = vor.u32 %v13179_v12, %v10850_v13  ;;  %v10634_v25 = vld [vmem:[#allocation5 + $0x10f8] sm:$0xf0] }
 0x102   :  { %6103 = vmatpush.bf16.msra.mxu2 %v9821_v30  ;;  %v10490_v30 = vld [vmem:[#allocation5 + $0xfd8] sm:$0xf0]  ;;  %v13077_v20 = vld [vmem:[#allocation5 + $0xf64] sm:$0xf]  ;;  %v10253_v33 = vor.u32 %v13029_v16, %v10250_v19 }
 0x103   :  { %6117 = vmatpush.bf16.msra.mxu3 %v10013_v42  ;;  %6076 = vmatmul.bf16.vlgmr.msra.gmra.mxu0 %v14001_v44  ;;  %v14075_v42 = vpop.f32.mrf.mxu3  ;;  %v13065_v12 = vld [vmem:[#allocation5 + $0xf04] sm:$0xf]  ;;  %v10394_v13 = vld [vmem:[#allocation5 + $0xf18] sm:$0xf0] }
 0x104   :  { %6124 = vmatpush.bf16.msrb.mxu0 %v10373_v45  ;;  %6090 = vmatmul.bf16.vlgmr.msra.gmra.mxu1 %v13999_v43  ;;  %14623 = vst [vmem:[#allocation22_spill] sm:$0xff] %v14075_v42  ;;  %v5853_v45 = vpop.f32.mrf.mxu0  ;;  %v13161_v16 = vld [vmem:[#allocation5 + $0x1204] sm:$0xf]  ;;  %v10778_v19 = vld [vmem:[#allocation5 + $0x1218] sm:$0xf0] }
 0x105   :  { %6138 = vmatpush.bf16.msrb.mxu1 %v10565_v48  ;;  %6104 = vmatmul.bf16.vlgmr.msra.gmra.mxu2 %v14003_v47  ;;  %v13185_v48 = vld [vmem:[#allocation5 + $0x12c4] sm:$0xf]  ;;  %v5854_v52 = vadd.f32 %v5853_v45, %v14063_v51  ;;  %v10736_v42 = vld [vmem:[#allocation5 + $0x11a8] sm:$0xf] }
 0x106   :  { %6152 = vmatpush.bf16.msrb.mxu2 %v10757_v50  ;;  %6118 = vmatmul.bf16.vlgmr.msra.gmra.mxu3 %v14009_v31  ;;  %v10874_v50 = vld [vmem:[#allocation5 + $0x12d8] sm:$0xf0] }
 0x107   :  { %6166 = vmatpush.bf16.msrb.mxu3 %v10949_v59  ;;  %v10493_v59 = vor.u32 %v13089_v27, %v10490_v30  ;;  %v10877_v3 = vor.u32 %v13185_v48, %v10874_v50  ;;  %v10826_v30 = vld [vmem:[#allocation5 + $0x1278] sm:$0xf0]  ;;  %v13023_v50 = vld [vmem:[#allocation5 + $0xdb4] sm:$0xf] }
 0x108   :  { %6125 = vmatpush.bf16.msrb.mxu0 %v10349_v6  ;;  %v5868_v6 = vadd.f32 %v5867_v57, %v5854_v52  ;;  %v10226_v52 = vld [vmem:[#allocation5 + $0xdc8] sm:$0xf0] }
 0x109   :  { %6139 = vmatpush.bf16.msrb.mxu1 %v10541_v7  ;;  %v10466_v7 = vld [vmem:[#allocation5 + $0xfa8] sm:$0xf0] }
 0x10a   :  { %6153 = vmatpush.bf16.msrb.mxu2 %v10733_v8  ;;  %v13131_v8 = vld [vmem:[#allocation5 + $0x1114] sm:$0xf]  ;;  %v10469_v51 = vor.u32 %v13083_v2, %v10466_v7  ;;  %v10802_v2 = vld [vmem:[#allocation5 + $0x1248] sm:$0xf0]  ;;  %v10202_v7 = vld [vmem:[#allocation5 + $0xd98] sm:$0xf0] }
 0x10b   :  { %6167 = vmatpush.bf16.msrb.mxu3 %v10925_v14  ;;  %v10277_v14 = vor.u32 %v13035_v61, %v10274_v62  ;;  %v10661_v15 = vor.u32 %v13131_v8, %v10658_v11  ;;  %v5895_v27 = vpop.f32.mrf.mxu3  ;;  %v10610_v61 = vld [vmem:[#allocation5 + $0x10c8] sm:$0xf0]  ;;  %v13167_v62 = vld [vmem:[#allocation5 + $0x1234] sm:$0xf] }
 0x10c   :  { %6126 = vmatpush.bf16.msrb.mxu0 %v10325_v23  ;;  %v5881_v23 = vpop.f32.mrf.mxu2 }
 0x10d   :  { %6140 = vmatpush.bf16.msrb.mxu1 %v10517_v22  ;;  %v10442_v22 = vld [vmem:[#allocation5 + $0xf78] sm:$0xf0]  ;;  %v5882_v26 = vadd.f32 %v5881_v23, %v5868_v6  ;;  %v13017_v6 = vld [vmem:[#allocation5 + $0xd84] sm:$0xf]  ;;  %v13299_v23 = vld [vmem:[#allocation5 + $0x1654] sm:$0xf] }
 0x10e   :  { %6154 = vmatpush.bf16.msrb.mxu2 %v10709_v24  ;;  %v13125_v24 = vld [vmem:[#allocation5 + $0x10e4] sm:$0xf]  ;;  %v10445_v45 = vor.u32 %v13077_v20, %v10442_v22  ;;  %v13251_v20 = vld [vmem:[#allocation5 + $0x14d4] sm:$0xf]  ;;  %v10205_v22 = vor.u32 %v13017_v6, %v10202_v7  ;;  %v11690_v7 = vld [vmem:[#allocation5 + $0x1938] sm:$0xf0] }
 0x10f   :  { %6168 = vmatpush.bf16.msrb.mxu3 %v10901_v29  ;;  %v13173_v29 = vld [vmem:[#allocation5 + $0x1264] sm:$0xf]  ;;  %v14078_v34 = vadd.f32 %v5895_v27, %v5882_v26  ;;  %v10637_v48 = vor.u32 %v13125_v24, %v10634_v25  ;;  %v11330_v24 = vld [vmem:[#allocation5 + $0x1668] sm:$0xf0]  ;;  %v13347_v25 = vld [vmem:[#allocation5 + $0x17d4] sm:$0xf]  ;;  %v10397_v27 = vor.u32 %v13065_v12, %v10394_v13 }
 0x110   :  { %6127 = vmatpush.bf16.msrb.mxu0 %v10301_v56  ;;  %v13071_v56 = vld [vmem:[#allocation5 + $0xf34] sm:$0xf]  ;;  %v10829_v57 = vor.u32 %v13173_v29, %v10826_v30  ;;  %v11522_v26 = vld [vmem:[#allocation5 + $0x17e8] sm:$0xf0]  ;;  %v13389_v6 = vld [vmem:[#allocation5 + $0x1924] sm:$0xf] }
 0x111   :  { %6141 = vmatpush.bf16.msrb.mxu1 %v10493_v59  ;;  %v10418_v59 = vld [vmem:[#allocation5 + $0xf48] sm:$0xf0]  ;;  %v13395_v30 = vld [vmem:[#allocation5 + $0x1954] sm:$0xf] }
 0x112   :  { %6155 = vmatpush.bf16.msrb.mxu2 %v10685_v60  ;;  %v13119_v60 = vld [vmem:[#allocation5 + $0x10b4] sm:$0xf]  ;;  %v10421_v8 = vor.u32 %v13071_v56, %v10418_v59  ;;  %v13245_v56 = vld [vmem:[#allocation5 + $0x14a4] sm:$0xf] }
 0x113   :  { %6169 = vmatpush.bf16.msrb.mxu3 %v10877_v3  ;;  %v10229_v3 = vor.u32 %v13023_v50, %v10226_v52  ;;  %v10613_v11 = vor.u32 %v13119_v60, %v10610_v61  ;;  %v11333_v50 = vor.u32 %v13299_v23, %v11330_v24  ;;  %v11525_v52 = vor.u32 %v13347_v25, %v11522_v26  ;;  %v13293_v59 = vld [vmem:[#allocation5 + $0x1624] sm:$0xf]  ;;  %v11306_v61 = vld [vmem:[#allocation5 + $0x1638] sm:$0xf0]  ;;  %v13383_v23 = vld [vmem:[#allocation5 + $0x18f4] sm:$0xf] }
 0x114   :  { %6128 = vmatpush.bf16.msrb.mxu0 %v10277_v14  ;;  %v13113_v14 = vld [vmem:[#allocation5 + $0x1084] sm:$0xf]  ;;  %v11309_v12 = vor.u32 %v13293_v59, %v11306_v61 }
 0x115   :  { %6142 = vmatpush.bf16.msrb.mxu1 %v10469_v51  ;;  %v10805_v51 = vor.u32 %v13167_v62, %v10802_v2  ;;  %v13341_v62 = vld [vmem:[#allocation5 + $0x17a4] sm:$0xf]  ;;  %v11498_v2 = vld [vmem:[#allocation5 + $0x17b8] sm:$0xf0] }
 0x116   :  { %6156 = vmatpush.bf16.msrb.mxu2 %v10661_v15  ;;  %v10586_v15 = vld [vmem:[#allocation5 + $0x1098] sm:$0xf0]  ;;  %v11501_v13 = vor.u32 %v13341_v62, %v11498_v2  ;;  %v13377_v59 = vld [vmem:[#allocation5 + $0x18c4] sm:$0xf] }
 0x117   :  { %6170 = vmatpush.bf16.msrb.mxu3 %v10853_v21  ;;  %v11138_v21 = vld [vmem:[#allocation5 + $0x14e8] sm:$0xf0]  ;;  %v10589_v29 = vor.u32 %v13113_v14, %v10586_v15  ;;  %v13239_v14 = vld [vmem:[#allocation5 + $0x1474] sm:$0xf] }
 0x118   :  { %6129 = vmatpush.bf16.msrb.mxu0 %v10253_v33  ;;  %v11714_v33 = vld [vmem:[#allocation5 + $0x1968] sm:$0xf0]  ;;  %v13287_v15 = vld [vmem:[#allocation5 + $0x15f4] sm:$0xf] }
 0x119   :  { %6143 = vmatpush.bf16.msrb.mxu1 %v10445_v45  ;;  %v10781_v45 = vor.u32 %v13161_v16, %v10778_v19  ;;  %v11717_v60 = vor.u32 %v13395_v30, %v11714_v33  ;;  %v11693_v16 = vor.u32 %v13389_v6, %v11690_v7  ;;  %v11282_v19 = vld [vmem:[#allocation5 + $0x1608] sm:$0xf0]  ;;  %v13281_v30 = vld [vmem:[#allocation5 + $0x15c4] sm:$0xf]  ;;  %v14088_v33 = vpop.f32.mrf.mxu2 }
 0x11a   :  { %6157 = vmatpush.bf16.msrb.mxu2 %v10637_v48  ;;  %v11141_v48 = vor.u32 %v13251_v20, %v11138_v21  ;;  %v13335_v20 = vld [vmem:[#allocation5 + $0x1774] sm:$0xf]  ;;  %v11474_v21 = vld [vmem:[#allocation5 + $0x1788] sm:$0xf0]  ;;  %v11285_v25 = vor.u32 %v13287_v15, %v11282_v19  ;;  %14626 = vst [vmem:[#allocation25_spill] sm:$0xff] %v14088_v33 }
 0x11b   :  { %6171 = vmatpush.bf16.msrb.mxu3 %v10829_v57  ;;  %v11114_v57 = vld [vmem:[#allocation5 + $0x14b8] sm:$0xf0]  ;;  %v11477_v26 = vor.u32 %v13335_v20, %v11474_v21  ;;  %v11234_v15 = vld [vmem:[#allocation5 + $0x15a8] sm:$0xf0]  ;;  %v13371_v20 = vld [vmem:[#allocation5 + $0x1894] sm:$0xf] }
 0x11c   :  { %6130 = vmatpush.bf16.msrb.mxu0 %v10229_v3  ;;  %v14080_v3 = vpop.f32.mrf.mxu0  ;;  %v11426_v19 = vld [vmem:[#allocation5 + $0x1728] sm:$0xf0]  ;;  %v10160_v33 = vld [vmem:[#allocation5 + $0xd28] sm:$0xf] }
 0x11d   :  { %6144 = vmatpush.bf16.msrb.mxu1 %v10421_v8  ;;  %14624 = vst [vmem:[#allocation23_spill] sm:$0xff] %v14080_v3  ;;  %v14082_v8 = vpop.f32.mrf.mxu1  ;;  %v11618_v21 = vld [vmem:[#allocation5 + $0x18a8] sm:$0xf0]  ;;  %v13105_v3 = vld [vmem:[#allocation5 + $0x103c] sm:$0xf0] }
 0x11e   :  { %6158 = vmatpush.bf16.msrb.mxu2 %v10613_v11  ;;  %14625 = vst [vmem:[#allocation24_spill] sm:$0xff] %v14082_v8  ;;  %v11117_v11 = vor.u32 %v13245_v56, %v11114_v57  ;;  %v14090_v56 = vpop.f32.mrf.mxu3  ;;  %v13039_v8 = vld [vmem:[#allocation5 + $0xe2c] sm:$0xf0] }
 0x11f   :  { %6172 = vmatpush.bf16.msrb.mxu3 %v10805_v51  ;;  %v11090_v51 = vld [vmem:[#allocation5 + $0x1488] sm:$0xf0]  ;;  %14627 = vst [vmem:[#allocation26_spill] sm:$0xff] %v14090_v56 }
 0x120   :  { %6131 = vmatpush.bf16.msrb.mxu0 %v10205_v22  ;;  %v11666_v22 = vld [vmem:[#allocation5 + $0x1908] sm:$0xf0]  ;;  %v11093_v24 = vor.u32 %v13239_v14, %v11090_v51 }
 0x121   :  { %6145 = vmatpush.bf16.msrb.mxu1 %v10397_v27  ;;  %v13233_v27 = vld [vmem:[#allocation5 + $0x1444] sm:$0xf] }
 0x122   :  { %6159 = vmatpush.bf16.msrb.mxu2 %v10589_v29  ;;  %v11066_v29 = vld [vmem:[#allocation5 + $0x1458] sm:$0xf0] }
 0x123   :  { %6173 = vmatpush.bf16.msrb.mxu3 %v10781_v45  ;;  %6132 = vmatmul.bf16.vlgmr.msrb.gmra.mxu0 %v14013_v36  ;;  %v11669_v45 = vor.u32 %v13383_v23, %v11666_v22  ;;  %v11069_v62 = vor.u32 %v13233_v27, %v11066_v29  ;;  %v11621_v27 = vor.u32 %v13371_v20, %v11618_v21  ;;  %v13209_v20 = vld [vmem:[#allocation5 + $0x1384] sm:$0xf]  ;;  %v10970_v21 = vld [vmem:[#allocation5 + $0x1398] sm:$0xf0] }
 0x124   :  { %6180 = vmatpush.bf16.msra.mxu0 %v11141_v48  ;;  %6146 = vmatmul.bf16.vlgmr.msrb.gmra.mxu1 %v14011_v35  ;;  %v11258_v48 = vld [vmem:[#allocation5 + $0x15d8] sm:$0xf0]  ;;  %v5909_v57 = vpop.f32.mrf.mxu0 }
 0x125   :  { %6194 = vmatpush.bf16.msra.mxu1 %v11333_v50  ;;  %6160 = vmatmul.bf16.vlgmr.msrb.gmra.mxu2 %v14015_v40  ;;  %v13329_v50 = vld [vmem:[#allocation5 + $0x1744] sm:$0xf]  ;;  %v5910_v61 = vadd.f32 %v5909_v57, %v14078_v34  ;;  %v5923_v2 = vpop.f32.mrf.mxu1  ;;  %v11261_v6 = vor.u32 %v13281_v30, %v11258_v48  ;;  %v11210_v30 = vld [vmem:[#allocation5 + $0x1578] sm:$0xf0] }
 0x126   :  { %6208 = vmatpush.bf16.msra.mxu2 %v11525_v52  ;;  %6174 = vmatmul.bf16.vlgmr.msrb.gmra.mxu3 %v14021_v32  ;;  %v11450_v52 = vld [vmem:[#allocation5 + $0x1758] sm:$0xf0]  ;;  %v13365_v57 = vld [vmem:[#allocation5 + $0x1864] sm:$0xf] }
 0x127   :  { %6222 = vmatpush.bf16.msra.mxu3 %v11717_v60  ;;  %v11642_v60 = vld [vmem:[#allocation5 + $0x18d8] sm:$0xf0]  ;;  %v11453_v7 = vor.u32 %v13329_v50, %v11450_v52  ;;  %v5924_v51 = vadd.f32 %v5923_v2, %v5910_v61 }
 0x128   :  { %6181 = vmatpush.bf16.msra.mxu0 %v11117_v11  ;;  %v13227_v11 = vld [vmem:[#allocation5 + $0x1414] sm:$0xf]  ;;  %v11645_v14 = vor.u32 %v13377_v59, %v11642_v60  ;;  %v5937_v29 = vpop.f32.mrf.mxu2  ;;  %v11402_v48 = vld [vmem:[#allocation5 + $0x16f8] sm:$0xf0] }
 0x129   :  { %6195 = vmatpush.bf16.msra.mxu1 %v11309_v12  ;;  %v11042_v12 = vld [vmem:[#allocation5 + $0x1428] sm:$0xf0]  ;;  %v5938_v50 = vadd.f32 %v5937_v29, %v5924_v51  ;;  %v5951_v52 = vpop.f32.mrf.mxu3  ;;  %v11594_v59 = vld [vmem:[#allocation5 + $0x1878] sm:$0xf0]  ;;  %v13359_v51 = vld [vmem:[#allocation5 + $0x1834] sm:$0xf] }
 0x12a   :  { %6209 = vmatpush.bf16.msra.mxu2 %v11501_v13  ;;  %v13275_v13 = vld [vmem:[#allocation5 + $0x1594] sm:$0xf]  ;;  %v11045_v23 = vor.u32 %v13227_v11, %v11042_v12  ;;  %v11597_v12 = vor.u32 %v13365_v57, %v11594_v59  ;;  %v13353_v29 = vld [vmem:[#allocation5 + $0x1804] sm:$0xf]  ;;  %v12098_v57 = vld [vmem:[#allocation5 + $0x1c68] sm:$0xf0] }
 0x12b   :  { %6223 = vmatpush.bf16.msra.mxu3 %v11693_v16  ;;  %v13323_v16 = vld [vmem:[#allocation5 + $0x1714] sm:$0xf]  ;;  %v11237_v34 = vor.u32 %v13275_v13, %v11234_v15  ;;  %v14093_v61 = vadd.f32 %v5951_v52, %v5938_v50  ;;  %v11186_v13 = vld [vmem:[#allocation5 + $0x1548] sm:$0xf0]  ;;  %v10973_v52 = vor.u32 %v13209_v20, %v10970_v21  ;;  %v8648_v59 = vld [vmem:[#allocation5 + $0x158] sm:$0xf] }
 0x12c   :  { %6182 = vmatpush.bf16.msra.mxu0 %v11093_v24  ;;  %v11429_v22 = vor.u32 %v13323_v16, %v11426_v19  ;;  %v13221_v24 = vld [vmem:[#allocation5 + $0x13e4] sm:$0xf]  ;;  %v13263_v11 = vld [vmem:[#allocation5 + $0x1534] sm:$0xf]  ;;  %v11378_v15 = vld [vmem:[#allocation5 + $0x16c8] sm:$0xf0]  ;;  %v14095_v56 = vpop.f32.mrf.mxu0 }
 0x12d   :  { %6196 = vmatpush.bf16.msra.mxu1 %v11285_v25  ;;  %v11018_v25 = vld [vmem:[#allocation5 + $0x13f8] sm:$0xf0]  ;;  %v11570_v16 = vld [vmem:[#allocation5 + $0x1848] sm:$0xf0]  ;;  %v13491_v50 = vld [vmem:[#allocation5 + $0x1c54] sm:$0xf] }
 0x12e   :  { %6210 = vmatpush.bf16.msra.mxu2 %v11477_v26  ;;  %v13269_v26 = vld [vmem:[#allocation5 + $0x1564] sm:$0xf]  ;;  %v11021_v60 = vor.u32 %v13221_v24, %v11018_v25  ;;  %v11162_v24 = vld [vmem:[#allocation5 + $0x1518] sm:$0xf0]  ;;  %v8624_v21 = vld [vmem:[#allocation5 + $0x128] sm:$0xf] }
 0x12f   :  { %6224 = vmatpush.bf16.msra.mxu3 %v11669_v45  ;;  %v13317_v45 = vld [vmem:[#allocation5 + $0x16e4] sm:$0xf]  ;;  %v12074_v20 = vld [vmem:[#allocation5 + $0x1c38] sm:$0xf0]  ;;  %14628 = vst [vmem:[#allocation27_spill] sm:$0xff] %v14095_v56 }
 0x130   :  { %6183 = vmatpush.bf16.msra.mxu0 %v11069_v62  ;;  %v11213_v62 = vor.u32 %v13269_v26, %v11210_v30  ;;  %v11405_v2 = vor.u32 %v13317_v45, %v11402_v48  ;;  %v13305_v25 = vld [vmem:[#allocation5 + $0x1684] sm:$0xf]  ;;  %v11573_v26 = vor.u32 %v13359_v51, %v11570_v16  ;;  %v11546_v30 = vld [vmem:[#allocation5 + $0x1818] sm:$0xf0]  ;;  %v13443_v45 = vld [vmem:[#allocation5 + $0x1ad4] sm:$0xf] }
 0x131   :  { %6197 = vmatpush.bf16.msra.mxu1 %v11261_v6  ;;  %v13215_v6 = vld [vmem:[#allocation5 + $0x13b4] sm:$0xf]  ;;  %v11906_v48 = vld [vmem:[#allocation5 + $0x1ae8] sm:$0xf0]  ;;  %v11882_v51 = vld [vmem:[#allocation5 + $0x1ab8] sm:$0xf0] }
 0x132   :  { %6211 = vmatpush.bf16.msra.mxu2 %v11453_v7  ;;  %v10994_v7 = vld [vmem:[#allocation5 + $0x13c8] sm:$0xf0]  ;;  %v13485_v16 = vld [vmem:[#allocation5 + $0x1c24] sm:$0xf]  ;;  %v12913_v56 = vld [vmem:[#allocation5 + $0xa3c] sm:$0xf0] }
 0x133   :  { %6225 = vmatpush.bf16.msra.mxu3 %v11645_v14  ;;  %v13311_v14 = vld [vmem:[#allocation5 + $0x16b4] sm:$0xf]  ;;  %v10997_v19 = vor.u32 %v13215_v6, %v10994_v7  ;;  %v8840_v6 = vld [vmem:[#allocation5 + $0x2d8] sm:$0xf]  ;;  %v12679_v7 = vld [vmem:[#allocation5 + $0x2ec] sm:$0xf0] }
 0x134   :  { %6184 = vmatpush.bf16.msra.mxu0 %v11045_v23  ;;  %v11189_v23 = vor.u32 %v13263_v11, %v11186_v13  ;;  %v11549_v11 = vor.u32 %v13353_v29, %v11546_v30  ;;  %v12101_v13 = vor.u32 %v13491_v50, %v12098_v57  ;;  %v11858_v29 = vld [vmem:[#allocation5 + $0x1a88] sm:$0xf0]  ;;  %v13479_v30 = vld [vmem:[#allocation5 + $0x1bf4] sm:$0xf]  ;;  %v8600_v50 = vld [vmem:[#allocation5 + $0xf8] sm:$0xf] }
 0x135   :  { %6198 = vmatpush.bf16.msra.mxu1 %v11237_v34  ;;  %v11381_v34 = vor.u32 %v13311_v14, %v11378_v15  ;;  %v13437_v15 = vld [vmem:[#allocation5 + $0x1aa4] sm:$0xf]  ;;  %v8792_v57 = vld [vmem:[#allocation5 + $0x278] sm:$0xf] }
 0x136   :  { %6212 = vmatpush.bf16.msra.mxu2 %v11429_v22  ;;  %v13257_v22 = vld [vmem:[#allocation5 + $0x1504] sm:$0xf] }
 0x137   :  { %6226 = vmatpush.bf16.msra.mxu3 %v11621_v27  ;;  %v11354_v27 = vld [vmem:[#allocation5 + $0x1698] sm:$0xf0] }
 0x138   :  { %6185 = vmatpush.bf16.msra.mxu0 %v11021_v60  ;;  %v12631_v60 = vld [vmem:[#allocation5 + $0x16c] sm:$0xf0] }
 0x139   :  { %6199 = vmatpush.bf16.msra.mxu1 %v11213_v62  ;;  %v11165_v62 = vor.u32 %v13257_v22, %v11162_v24  ;;  %v8649_v14 = vor.u32 %v12631_v60, %v8648_v59  ;;  %v14097_v22 = vpop.f32.mrf.mxu1  ;;  %v11885_v24 = vor.u32 %v13437_v15, %v11882_v51  ;;  %v12667_v59 = vld [vmem:[#allocation5 + $0x28c] sm:$0xf0]  ;;  %v12613_v15 = vld [vmem:[#allocation5 + $0xdc] sm:$0xf0] }
 0x13a   :  { %6213 = vmatpush.bf16.msra.mxu2 %v11405_v2  ;;  %v11357_v2 = vor.u32 %v13305_v25, %v11354_v27  ;;  %14629 = vst [vmem:[#allocation28_spill] sm:$0xff] %v14097_v22  ;;  %v12077_v25 = vor.u32 %v13485_v16, %v12074_v20  ;;  %v13431_v27 = vld [vmem:[#allocation5 + $0x1a74] sm:$0xf]  ;;  %v8768_v16 = vld [vmem:[#allocation5 + $0x248] sm:$0xf] }
 0x13b   :  { %6227 = vmatpush.bf16.msra.mxu3 %v11597_v12  ;;  %v11909_v12 = vor.u32 %v13443_v45, %v11906_v48  ;;  %v12050_v48 = vld [vmem:[#allocation5 + $0x1c08] sm:$0xf0]  ;;  %v12817_v22 = vld [vmem:[#allocation5 + $0x73c] sm:$0xf0] }
 0x13c   :  { %6186 = vmatpush.bf16.msra.mxu0 %v10997_v19  ;;  %v8841_v19 = vor.u32 %v12679_v7, %v8840_v6  ;;  %v12053_v60 = vor.u32 %v13479_v30, %v12050_v48  ;;  %v11834_v6 = vld [vmem:[#allocation5 + $0x1a58] sm:$0xf0]  ;;  %v13473_v7 = vld [vmem:[#allocation5 + $0x1bc4] sm:$0xf]  ;;  %v8552_v48 = vld [vmem:[#allocation5 + $0x98] sm:$0xf] }
 0x13d   :  { %6200 = vmatpush.bf16.msra.mxu1 %v11189_v23  ;;  %v8816_v23 = vld [vmem:[#allocation5 + $0x2a8] sm:$0xf] }
 0x13e   :  { %6214 = vmatpush.bf16.msra.mxu2 %v11381_v34  ;;  %v12673_v34 = vld [vmem:[#allocation5 + $0x2bc] sm:$0xf0] }
 0x13f   :  { %6228 = vmatpush.bf16.msra.mxu3 %v11573_v26  ;;  %v8625_v26 = vor.u32 %v12625_v9, %v8624_v21  ;;  %v8817_v45 = vor.u32 %v12673_v34, %v8816_v23  ;;  %v11861_v9 = vor.u32 %v13431_v27, %v11858_v29  ;;  %v13467_v27 = vld [vmem:[#allocation5 + $0x1b94] sm:$0xf] }
 0x140   :  { %6187 = vmatpush.bf16.msra.mxu0 %v10973_v52  ;;  %v12619_v52 = vld [vmem:[#allocation5 + $0x10c] sm:$0xf0]  ;;  %v5965_v51 = vpop.f32.mrf.mxu0 }
 0x141   :  { %6201 = vmatpush.bf16.msra.mxu1 %v11165_v62  ;;  %v8601_v62 = vor.u32 %v12619_v52, %v8600_v50  ;;  %v5966_v20 = vadd.f32 %v5965_v51, %v14093_v61  ;;  %v5979_v23 = vpop.f32.mrf.mxu1  ;;  %v12607_v50 = vld [vmem:[#allocation5 + $0xac] sm:$0xf0]  ;;  %v8744_v52 = vld [vmem:[#allocation5 + $0x218] sm:$0xf]  ;;  %v8720_v51 = vld [vmem:[#allocation5 + $0x1e8] sm:$0xf] }
 0x142   :  { %6215 = vmatpush.bf16.msra.mxu2 %v11357_v2  ;;  %v13425_v2 = vld [vmem:[#allocation5 + $0x1a44] sm:$0xf] }
 0x143   :  { %6229 = vmatpush.bf16.msra.mxu3 %v11549_v11  ;;  %6188 = vmatmul.bf16.vlgmr.msra.gmra.mxu0 %v14025_v41  ;;  %v14103_v11 = vpop.f32.mrf.mxu2  ;;  %v11837_v21 = vor.u32 %v13425_v2, %v11834_v6  ;;  %v5980_v30 = vadd.f32 %v5979_v23, %v5966_v20  ;;  %v13461_v2 = vld [vmem:[#allocation5 + $0x1b64] sm:$0xf]  ;;  %v13407_v23 = vld [vmem:[#allocation5 + $0x19b4] sm:$0xf] }
 0x144   :  { %6236 = vmatpush.bf16.msrb.mxu0 %v11909_v12  ;;  %6202 = vmatmul.bf16.vlgmr.msra.gmra.mxu1 %v14023_v38  ;;  %14630 = vst [vmem:[#allocation29_spill] sm:$0xff] %v14103_v11  ;;  %v8793_v12 = vor.u32 %v12667_v59, %v8792_v57  ;;  %v12655_v57 = vld [vmem:[#allocation5 + $0x22c] sm:$0xf0]  ;;  %v9200_v11 = vld [vmem:[#allocation5 + $0x5a8] sm:$0xf] }
 0x145   :  { %6250 = vmatpush.bf16.msrb.mxu1 %v12101_v13  ;;  %6216 = vmatmul.bf16.vlgmr.msra.gmra.mxu2 %v14027_v46  ;;  %v12026_v13 = vld [vmem:[#allocation5 + $0x1bd8] sm:$0xf0]  ;;  %v8745_v6 = vor.u32 %v12655_v57, %v8744_v52  ;;  %v13401_v52 = vld [vmem:[#allocation5 + $0x1984] sm:$0xf] }
 0x146   :  { %6264 = vmatpush.bf16.msrb.mxu2 %v8649_v14  ;;  %6230 = vmatmul.bf16.vlgmr.msra.gmra.mxu3 %v14033_v49  ;;  %v8576_v14 = vld [vmem:[#allocation5 + $0xc8] sm:$0xf]  ;;  %v12029_v34 = vor.u32 %v13473_v7, %v12026_v13  ;;  %v11738_v57 = vld [vmem:[#allocation5 + $0x1998] sm:$0xf0] }
 0x147   :  { %6278 = vmatpush.bf16.msrb.mxu3 %v8841_v19  ;;  %v12661_v19 = vld [vmem:[#allocation5 + $0x25c] sm:$0xf0]  ;;  %v8528_v13 = vld [vmem:[#allocation5 + $0x68] sm:$0xf] }
 0x148   :  { %6237 = vmatpush.bf16.msrb.mxu0 %v11885_v24  ;;  %v8577_v24 = vor.u32 %v12613_v15, %v8576_v14  ;;  %v8769_v29 = vor.u32 %v12661_v19, %v8768_v16  ;;  %v12601_v14 = vld [vmem:[#allocation5 + $0x7c] sm:$0xf0] }
 0x149   :  { %6251 = vmatpush.bf16.msrb.mxu1 %v12077_v25  ;;  %v13419_v25 = vld [vmem:[#allocation5 + $0x1a14] sm:$0xf]  ;;  %v12649_v16 = vld [vmem:[#allocation5 + $0x1fc] sm:$0xf0] }
 0x14a   :  { %6265 = vmatpush.bf16.msrb.mxu2 %v8625_v26  ;;  %v11810_v26 = vld [vmem:[#allocation5 + $0x1a28] sm:$0xf0] }
 0x14b   :  { %6279 = vmatpush.bf16.msrb.mxu3 %v8817_v45  ;;  %v12002_v45 = vld [vmem:[#allocation5 + $0x1ba8] sm:$0xf0]  ;;  %v11813_v59 = vor.u32 %v13419_v25, %v11810_v26  ;;  %v5993_v7 = vpop.f32.mrf.mxu2  ;;  %v14108_v25 = vpop.f32.mrf.mxu3  ;;  %v8721_v26 = vor.u32 %v12649_v16, %v8720_v51  ;;  %v9224_v51 = vld [vmem:[#allocation5 + $0x5d8] sm:$0xf]  ;;  %v11741_v16 = vor.u32 %v13401_v52, %v11738_v57  ;;  %v12769_v52 = vld [vmem:[#allocation5 + $0x5bc] sm:$0xf0] }
 0x14c   :  { %6238 = vmatpush.bf16.msrb.mxu0 %v11861_v9  ;;  %v12005_v61 = vor.u32 %v13467_v27, %v12002_v45  ;;  %v8553_v9 = vor.u32 %v12607_v50, %v8552_v48  ;;  %v14106_v15 = vadd.f32 %v5993_v7, %v5980_v30  ;;  %14632 = vst [vmem:[#allocation31_spill] sm:$0xff] %v14108_v25  ;;  %v11954_v27 = vld [vmem:[#allocation5 + $0x1b48] sm:$0xf0]  ;;  %v12595_v45 = vld [vmem:[#allocation5 + $0x4c] sm:$0xf0] }
 0x14d   :  { %6252 = vmatpush.bf16.msrb.mxu1 %v12053_v60  ;;  %v13413_v60 = vld [vmem:[#allocation5 + $0x19e4] sm:$0xf]  ;;  %v8696_v30 = vld [vmem:[#allocation5 + $0x1b8] sm:$0xf]  ;;  %v12643_v48 = vld [vmem:[#allocation5 + $0x1cc] sm:$0xf0] }
 0x14e   :  { %6266 = vmatpush.bf16.msrb.mxu2 %v8601_v62  ;;  %v11786_v62 = vld [vmem:[#allocation5 + $0x19f8] sm:$0xf0]  ;;  %14631 = vst [vmem:[#allocation30_spill] sm:$0xff] %v14106_v15  ;;  %v8672_v7 = vld [vmem:[#allocation5 + $0x188] sm:$0xf] }
 0x14f   :  { %6280 = vmatpush.bf16.msrb.mxu3 %v8793_v12  ;;  %v11978_v12 = vld [vmem:[#allocation5 + $0x1b78] sm:$0xf0]  ;;  %v11789_v19 = vor.u32 %v13413_v60, %v11786_v62  ;;  %v8480_v62 = vld [vmem:[#allocation5 + $0x8] sm:$0xf]  ;;  %v12721_v25 = vld [vmem:[#allocation5 + $0x43c] sm:$0xf0] }
 0x150   :  { %6239 = vmatpush.bf16.msrb.mxu0 %v11837_v21  ;;  %v11981_v20 = vor.u32 %v13461_v2, %v11978_v12  ;;  %v8529_v21 = vor.u32 %v12601_v14, %v8528_v13  ;;  %v11930_v60 = vld [vmem:[#allocation5 + $0x1b18] sm:$0xf0]  ;;  %v8697_v2 = vor.u32 %v12643_v48, %v8696_v30  ;;  %v12637_v12 = vld [vmem:[#allocation5 + $0x19c] sm:$0xf0]  ;;  %v9032_v13 = vld [vmem:[#allocation5 + $0x458] sm:$0xf] }
 0x151   :  { %6253 = vmatpush.bf16.msrb.mxu1 %v12029_v34  ;;  %v11762_v34 = vld [vmem:[#allocation5 + $0x19c8] sm:$0xf0]  ;;  %v12727_v14 = vld [vmem:[#allocation5 + $0x46c] sm:$0xf0]  ;;  %v9008_v15 = vld [vmem:[#allocation5 + $0x428] sm:$0xf] }
 0x152   :  { %6267 = vmatpush.bf16.msrb.mxu2 %v8577_v24  ;;  %v13455_v24 = vld [vmem:[#allocation5 + $0x1b34] sm:$0xf]  ;;  %v11765_v50 = vor.u32 %v13407_v23, %v11762_v34  ;;  %v9416_v23 = vld [vmem:[#allocation5 + $0x758] sm:$0xf]  ;;  %v12823_v34 = vld [vmem:[#allocation5 + $0x76c] sm:$0xf0] }
 0x153   :  { %6281 = vmatpush.bf16.msrb.mxu3 %v8769_v29  ;;  %v8504_v29 = vld [vmem:[#allocation5 + $0x38] sm:$0xf]  ;;  %v9417_v48 = vor.u32 %v12823_v34, %v9416_v23  ;;  %v9392_v57 = vld [vmem:[#allocation5 + $0x728] sm:$0xf]  ;;  %v12859_v34 = vld [vmem:[#allocation5 + $0x88c] sm:$0xf0] }
 0x154   :  { %6240 = vmatpush.bf16.msrb.mxu0 %v11813_v59  ;;  %v11957_v59 = vor.u32 %v13455_v24, %v11954_v27  ;;  %v9608_v24 = vld [vmem:[#allocation5 + $0x8d8] sm:$0xf]  ;;  %v12871_v27 = vld [vmem:[#allocation5 + $0x8ec] sm:$0xf0] }
 0x155   :  { %6254 = vmatpush.bf16.msrb.mxu1 %v12005_v61  ;;  %v8505_v61 = vor.u32 %v12595_v45, %v8504_v29  ;;  %v9033_v29 = vor.u32 %v12727_v14, %v9032_v13  ;;  %v6007_v45 = vpop.f32.mrf.mxu3  ;;  %v8984_v13 = vld [vmem:[#allocation5 + $0x3f8] sm:$0xf]  ;;  %v12715_v14 = vld [vmem:[#allocation5 + $0x40c] sm:$0xf0] }
 0x156   :  { %6268 = vmatpush.bf16.msrb.mxu2 %v8553_v9  ;;  %v13449_v9 = vld [vmem:[#allocation5 + $0x1b04] sm:$0xf]  ;;  %v9368_v23 = vld [vmem:[#allocation5 + $0x6f8] sm:$0xf] }
 0x157   :  { %6282 = vmatpush.bf16.msrb.mxu3 %v8745_v6  ;;  %v12589_v6 = vld [vmem:[#allocation5 + $0x1c] sm:$0xf0] }
 0x158   :  { %6241 = vmatpush.bf16.msrb.mxu0 %v11789_v19  ;;  %v12775_v19 = vld [vmem:[#allocation5 + $0x5ec] sm:$0xf0] }
 0x159   :  { %6255 = vmatpush.bf16.msrb.mxu1 %v11981_v20  ;;  %v11933_v20 = vor.u32 %v13449_v9, %v11930_v60  ;;  %v9225_v30 = vor.u32 %v12775_v19, %v9224_v51  ;;  %v12865_v9 = vld [vmem:[#allocation5 + $0x8bc] sm:$0xf0]  ;;  %v9009_v60 = vor.u32 %v12721_v25, %v9008_v15  ;;  %v9176_v51 = vld [vmem:[#allocation5 + $0x578] sm:$0xf]  ;;  %v12763_v19 = vld [vmem:[#allocation5 + $0x58c] sm:$0xf0] }
 0x15a   :  { %6269 = vmatpush.bf16.msrb.mxu2 %v8529_v21  ;;  %v8481_v21 = vor.u32 %v12589_v6, %v8480_v62  ;;  %v14112_v62 = vld [vmem:[#allocation7] sm:$0x3f]  ;;  %v14115_v6 = vpop.f32.mrf.mxu1  ;;  %v12811_v15 = vld [vmem:[#allocation5 + $0x70c] sm:$0xf0]  ;;  %v9560_v25 = vld [vmem:[#allocation5 + $0x878] sm:$0xf] }
 0x15b   :  { %6283 = vmatpush.bf16.msrb.mxu3 %v8721_v26  ;;  %v8673_v26 = vor.u32 %v12637_v12, %v8672_v7  ;;  %14634 = vst [vmem:[#allocation33_spill] sm:$0xff] %v14115_v6  ;;  %v9201_v7 = vor.u32 %v12769_v52, %v9200_v11  ;;  %v9393_v12 = vor.u32 %v12817_v22, %v9392_v57  ;;  %v12805_v52 = vld [vmem:[#allocation5 + $0x6dc] sm:$0xf0]  ;;  %v12847_v6 = vld [vmem:[#allocation5 + $0x82c] sm:$0xf0] }
 0x15c   :  { %6242 = vmatpush.bf16.msrb.mxu0 %v11765_v50  ;;  %v9609_v50 = vor.u32 %v12871_v27, %v9608_v24  ;;  %v9177_v11 = vor.u32 %v12763_v19, %v9176_v51  ;;  %v8960_v24 = vld [vmem:[#allocation5 + $0x3c8] sm:$0xf]  ;;  %v12709_v27 = vld [vmem:[#allocation5 + $0x3dc] sm:$0xf0]  ;;  %v12703_v51 = vld [vmem:[#allocation5 + $0x3ac] sm:$0xf0] }
 0x15d   :  { %6256 = vmatpush.bf16.msrb.mxu1 %v11957_v59  ;;  %v14110_v59 = vpop.f32.mrf.mxu0  ;;  %v14125_v57 = vpop.f32.mrf.mxu3  ;;  %v9128_v19 = vld [vmem:[#allocation5 + $0x518] sm:$0xf] }
 0x15e   :  { %6270 = vmatpush.bf16.msrb.mxu2 %v8505_v61  ;;  %14633 = vst [vmem:[#allocation32_spill] sm:$0xff] %v14110_v59  ;;  %v9584_v61 = vld [vmem:[#allocation5 + $0x8a8] sm:$0xf] }
 0x15f   :  { %6284 = vmatpush.bf16.msrb.mxu3 %v8697_v2  ;;  %v14615_v2 = vperm.slane %v14112_v62, 1  ;;  %v9776_v59 = vld [vmem:[#allocation5 + $0xa28] sm:$0xf] }
 0x160   :  { %6243 = vmatpush.bf16.msrb.mxu0 %v11741_v16  ;;  %v9585_v16 = vor.u32 %v12865_v9, %v9584_v61  ;;  %v9536_v61 = vld [vmem:[#allocation5 + $0x848] sm:$0xf] }
 0x161   :  { %6257 = vmatpush.bf16.msrb.mxu1 %v11933_v20  ;;  %v8985_v20 = vor.u32 %v12715_v14, %v8984_v13  ;;  %v6008_v22 = vadd.f32 %v6007_v45, %v14615_v2  ;;  %v12853_v45 = vld [vmem:[#allocation5 + $0x85c] sm:$0xf0]  ;;  %v8936_v14 = vld [vmem:[#allocation5 + $0x398] sm:$0xf] }
 0x162   :  { %6271 = vmatpush.bf16.msrb.mxu2 %v8481_v21  ;;  %v9369_v21 = vor.u32 %v12811_v15, %v9368_v23  ;;  %v9537_v23 = vor.u32 %v12853_v45, %v9536_v61  ;;  %v12751_v15 = vld [vmem:[#allocation5 + $0x52c] sm:$0xf0]  ;;  %v9488_v61 = vld [vmem:[#allocation5 + $0x7e8] sm:$0xf]  ;;  %v12841_v45 = vld [vmem:[#allocation5 + $0x7fc] sm:$0xf0] }
 0x163   :  { %6285 = vmatpush.bf16.msrb.mxu3 %v8673_v26  ;;  %6244 = vmatmul.bf16.vlgmr.msrb.gmra.mxu0 %v14037_v54  ;;  %v9152_v26 = vld [vmem:[#allocation5 + $0x548] sm:$0xf] }
 0x164   :  { %6292 = vmatpush.bf16.msra.mxu0 %v9033_v29  ;;  %6258 = vmatmul.bf16.vlgmr.msrb.gmra.mxu1 %v14035_v53  ;;  %v14123_v29 = vpop.f32.mrf.mxu2 }
 0x165   :  { %6306 = vmatpush.bf16.msra.mxu1 %v9225_v30  ;;  %6272 = vmatmul.bf16.vlgmr.msrb.gmra.mxu2 %v13985_v58  ;;  %14635 = vst [vmem:[#allocation34_spill] sm:$0xff] %v14123_v29  ;;  %v9561_v30 = vor.u32 %v12859_v34, %v9560_v25  ;;  %v6021_v9 = vpop.f32.mrf.mxu0  ;;  %v9320_v25 = vld [vmem:[#allocation5 + $0x698] sm:$0xf]  ;;  %v12799_v34 = vld [vmem:[#allocation5 + $0x6ac] sm:$0xf0] }
 0x166   :  { %6320 = vmatpush.bf16.msra.mxu2 %v9417_v48  ;;  %6286 = vmatmul.bf16.vlgmr.msrb.gmra.mxu3 %v13991_v10  ;;  %v12757_v48 = vld [vmem:[#allocation5 + $0x55c] sm:$0xf0]  ;;  %v9512_v29 = vld [vmem:[#allocation5 + $0x818] sm:$0xf] }
 0x167   :  { %6334 = vmatpush.bf16.msra.mxu3 %v9609_v50  ;;  %v9344_v50 = vld [vmem:[#allocation5 + $0x6c8] sm:$0xf] }
 0x168   :  { %6293 = vmatpush.bf16.msra.mxu0 %v9009_v60  ;;  %v8961_v60 = vor.u32 %v12709_v27, %v8960_v24  ;;  %v9345_v13 = vor.u32 %v12805_v52, %v9344_v50  ;;  %v12697_v24 = vld [vmem:[#allocation5 + $0x37c] sm:$0xf0]  ;;  %v9104_v27 = vld [vmem:[#allocation5 + $0x4e8] sm:$0xf] }
 0x169   :  { %6307 = vmatpush.bf16.msra.mxu1 %v9201_v7  ;;  %v6022_v7 = vadd.f32 %v6021_v9, %v6008_v22  ;;  %v9129_v22 = vor.u32 %v12751_v15, %v9128_v19  ;;  %v12793_v50 = vld [vmem:[#allocation5 + $0x67c] sm:$0xf0]  ;;  %v9080_v19 = vld [vmem:[#allocation5 + $0x4b8] sm:$0xf]  ;;  %v12787_v15 = vld [vmem:[#allocation5 + $0x64c] sm:$0xf0] }
 0x16a   :  { %6321 = vmatpush.bf16.msra.mxu2 %v9393_v12  ;;  %v9153_v12 = vor.u32 %v12757_v48, %v9152_v26  ;;  %v9513_v26 = vor.u32 %v12847_v6, %v9512_v29  ;;  %v12745_v48 = vld [vmem:[#allocation5 + $0x4fc] sm:$0xf0]  ;;  %v9489_v6 = vor.u32 %v12841_v45, %v9488_v61  ;;  %v12739_v29 = vld [vmem:[#allocation5 + $0x4cc] sm:$0xf0]  ;;  %v9800_v61 = vld [vmem:[#allocation5 + $0xa58] sm:$0xf] }
 0x16b   :  { %6335 = vmatpush.bf16.msra.mxu3 %v9585_v16  ;;  %v6035_v16 = vpop.f32.mrf.mxu1  ;;  %v12919_v45 = vld [vmem:[#allocation5 + $0xa6c] sm:$0xf0] }
 0x16c   :  { %6294 = vmatpush.bf16.msra.mxu0 %v8985_v20  ;;  %v6036_v2 = vadd.f32 %v6035_v16, %v6022_v7  ;;  %v8937_v20 = vor.u32 %v12703_v51, %v8936_v14  ;;  %v6049_v52 = vpop.f32.mrf.mxu2  ;;  %v8888_v14 = vld [vmem:[#allocation5 + $0x338] sm:$0xf]  ;;  %v12691_v51 = vld [vmem:[#allocation5 + $0x34c] sm:$0xf0] }
 0x16d   :  { %6308 = vmatpush.bf16.msra.mxu1 %v9177_v11  ;;  %v9321_v11 = vor.u32 %v12799_v34, %v9320_v25  ;;  %v9464_v25 = vld [vmem:[#allocation5 + $0x7b8] sm:$0xf]  ;;  %v12835_v34 = vld [vmem:[#allocation5 + $0x7cc] sm:$0xf0] }
 0x16e   :  { %6322 = vmatpush.bf16.msra.mxu2 %v9369_v21  ;;  %v8912_v21 = vld [vmem:[#allocation5 + $0x368] sm:$0xf]  ;;  %v6050_v9 = vadd.f32 %v6049_v52, %v6036_v2  ;;  %v8889_v2 = vor.u32 %v12691_v51, %v8888_v14  ;;  %v12829_v52 = vld [vmem:[#allocation5 + $0x79c] sm:$0xf0]  ;;  %v10184_v14 = vld [vmem:[#allocation5 + $0xd58] sm:$0xf] }
 0x16f   :  { %6336 = vmatpush.bf16.msra.mxu3 %v9561_v30  ;;  %v9296_v30 = vld [vmem:[#allocation5 + $0x668] sm:$0xf]  ;;  %v8913_v7 = vor.u32 %v12697_v24, %v8912_v21  ;;  %v12685_v21 = vld [vmem:[#allocation5 + $0x31c] sm:$0xf0]  ;;  %v13015_v51 = vld [vmem:[#allocation5 + $0xd6c] sm:$0xf0] }
 0x170   :  { %6295 = vmatpush.bf16.msra.mxu0 %v8961_v60  ;;  %v6063_v60 = vpop.f32.mrf.mxu3  ;;  %v9056_v24 = vld [vmem:[#allocation5 + $0x488] sm:$0xf] }
 0x171   :  { %6309 = vmatpush.bf16.msra.mxu1 %v9153_v12  ;;  %v9105_v12 = vor.u32 %v12745_v48, %v9104_v27  ;;  %v14127_v16 = vadd.f32 %v6063_v60, %v6050_v9  ;;  %v12733_v27 = vld [vmem:[#allocation5 + $0x49c] sm:$0xf0]  ;;  %v9248_v48 = vld [vmem:[#allocation5 + $0x608] sm:$0xf]  ;;  %v9992_v9 = vld [vmem:[#allocation5 + $0xbd8] sm:$0xf] }
 0x172   :  { %6323 = vmatpush.bf16.msra.mxu2 %v9345_v13  ;;  %v9297_v13 = vor.u32 %v12793_v50, %v9296_v30  ;;  %v9465_v30 = vor.u32 %v12835_v34, %v9464_v25  ;;  %v9440_v50 = vld [vmem:[#allocation5 + $0x788] sm:$0xf]  ;;  %v12967_v60 = vld [vmem:[#allocation5 + $0xbec] sm:$0xf0]  ;;  %v10185_v25 = vor.u32 %v13015_v51, %v10184_v14  ;;  %v14129_v34 = vpop.f32.mrf.mxu0  ;;  %v10328_v14 = vld [vmem:[#allocation5 + $0xe78] sm:$0xf] }
 0x173   :  { %6337 = vmatpush.bf16.msra.mxu3 %v9537_v23  ;;  %v9272_v23 = vld [vmem:[#allocation5 + $0x638] sm:$0xf]  ;;  %v13051_v51 = vld [vmem:[#allocation5 + $0xe8c] sm:$0xf0] }
 0x174   :  { %6296 = vmatpush.bf16.msra.mxu0 %v8937_v20  ;;  %v8864_v20 = vld [vmem:[#allocation5 + $0x308] sm:$0xf] }
 0x175   :  { %6310 = vmatpush.bf16.msra.mxu1 %v9129_v22  ;;  %v9081_v22 = vor.u32 %v12739_v29, %v9080_v19  ;;  %v10376_v19 = vld [vmem:[#allocation5 + $0xed8] sm:$0xf]  ;;  %v13063_v29 = vld [vmem:[#allocation5 + $0xeec] sm:$0xf0] }
 0x176   :  { %6324 = vmatpush.bf16.msra.mxu2 %v9321_v11  ;;  %v9273_v11 = vor.u32 %v12787_v15, %v9272_v23  ;;  %v9801_v23 = vor.u32 %v12919_v45, %v9800_v61  ;;  %v9993_v15 = vor.u32 %v12967_v60, %v9992_v9  ;;  %v9944_v61 = vld [vmem:[#allocation5 + $0xb78] sm:$0xf]  ;;  %v12955_v9 = vld [vmem:[#allocation5 + $0xb8c] sm:$0xf0] }
 0x177   :  { %6338 = vmatpush.bf16.msra.mxu3 %v9513_v26  ;;  %v12781_v26 = vld [vmem:[#allocation5 + $0x61c] sm:$0xf0]  ;;  %v13003_v60 = vld [vmem:[#allocation5 + $0xd0c] sm:$0xf0] }
 0x178   :  { %6297 = vmatpush.bf16.msra.mxu0 %v8913_v7  ;;  %v8865_v7 = vor.u32 %v12685_v21, %v8864_v20  ;;  %v10377_v20 = vor.u32 %v13063_v29, %v10376_v19  ;;  %v12961_v21 = vld [vmem:[#allocation5 + $0xbbc] sm:$0xf0]  ;;  %v9920_v29 = vld [vmem:[#allocation5 + $0xb48] sm:$0xf] }
 0x179   :  { %6311 = vmatpush.bf16.msra.mxu1 %v9105_v12  ;;  %v9057_v12 = vor.u32 %v12733_v27, %v9056_v24  ;;  %v13057_v24 = vld [vmem:[#allocation5 + $0xebc] sm:$0xf0]  ;;  %v14131_v27 = vpop.f32.mrf.mxu1 }
 0x17a   :  { %6325 = vmatpush.bf16.msra.mxu2 %v9297_v13  ;;  %v9249_v13 = vor.u32 %v12781_v26, %v9248_v48  ;;  %v9777_v48 = vor.u32 %v12913_v56, %v9776_v59  ;;  %v14136_v59 = vpop.f32.mrf.mxu2  ;;  %v12901_v19 = vld [vmem:[#allocation5 + $0x9dc] sm:$0xf0] }
 0x17b   :  { %6339 = vmatpush.bf16.msra.mxu3 %v9489_v6  ;;  %v9441_v6 = vor.u32 %v12829_v52, %v9440_v50  ;;  %v9752_v50 = vld [vmem:[#allocation5 + $0x9f8] sm:$0xf]  ;;  %v12907_v52 = vld [vmem:[#allocation5 + $0xa0c] sm:$0xf0] }
 0x17c   :  { %6298 = vmatpush.bf16.msra.mxu0 %v8889_v2  ;;  %v9968_v2 = vld [vmem:[#allocation5 + $0xba8] sm:$0xf]  ;;  %v9753_v56 = vor.u32 %v12907_v52, %v9752_v50  ;;  %v9704_v50 = vld [vmem:[#allocation5 + $0x998] sm:$0xf]  ;;  %v12895_v52 = vld [vmem:[#allocation5 + $0x9ac] sm:$0xf0] }
 0x17d   :  { %6312 = vmatpush.bf16.msra.mxu1 %v9081_v22  ;;  %v13009_v22 = vld [vmem:[#allocation5 + $0xd3c] sm:$0xf0] }
 0x17e   :  { %6326 = vmatpush.bf16.msra.mxu2 %v9273_v11  ;;  %v10352_v11 = vld [vmem:[#allocation5 + $0xea8] sm:$0xf]  ;;  %v10161_v26 = vor.u32 %v13009_v22, %v10160_v33  ;;  %v9945_v33 = vor.u32 %v12955_v9, %v9944_v61  ;;  %v13045_v22 = vld [vmem:[#allocation5 + $0xe5c] sm:$0xf0]  ;;  %v9896_v61 = vld [vmem:[#allocation5 + $0xb18] sm:$0xf] }
 0x17f   :  { %6340 = vmatpush.bf16.msra.mxu3 %v9465_v30  ;;  %v9969_v30 = vor.u32 %v12961_v21, %v9968_v2  ;;  %v10353_v45 = vor.u32 %v13057_v24, %v10352_v11  ;;  %v12997_v2 = vld [vmem:[#allocation5 + $0xcdc] sm:$0xf0]  ;;  %v10304_v21 = vld [vmem:[#allocation5 + $0xe48] sm:$0xf] }
 0x180   :  { %6299 = vmatpush.bf16.msra.mxu0 %v8865_v7  ;;  %v10136_v7 = vld [vmem:[#allocation5 + $0xcf8] sm:$0xf] }
 0x181   :  { %6313 = vmatpush.bf16.msra.mxu1 %v9057_v12  ;;  %v10137_v12 = vor.u32 %v13003_v60, %v10136_v7  ;;  %v12943_v7 = vld [vmem:[#allocation5 + $0xb2c] sm:$0xf0]  ;;  %v10088_v60 = vld [vmem:[#allocation5 + $0xc98] sm:$0xf] }
 0x182   :  { %6327 = vmatpush.bf16.msra.mxu2 %v9249_v13  ;;  %v9728_v13 = vld [vmem:[#allocation5 + $0x9c8] sm:$0xf] }
 0x183   :  { %6341 = vmatpush.bf16.msra.mxu3 %v9441_v6  ;;  %6300 = vmatmul.bf16.vlgmr.msra.gmra.mxu0 %v13987_v1  ;;  %v10329_v6 = vor.u32 %v13051_v51, %v10328_v14  ;;  %v9729_v24 = vor.u32 %v12901_v19, %v9728_v13  ;;  %v12991_v14 = vld [vmem:[#allocation5 + $0xcac] sm:$0xf0]  ;;  %v10280_v51 = vld [vmem:[#allocation5 + $0xe18] sm:$0xf]  ;;  %v12889_v13 = vld [vmem:[#allocation5 + $0x97c] sm:$0xf0] }
 0x184   :  { %6348 = vmatpush.bf16.msrb.mxu0 %v9801_v23  ;;  %6314 = vmatmul.bf16.vlgmr.msra.gmra.mxu1 %v13993_v17  ;;  %v14139_v23 = vpop.f32.mrf.mxu3  ;;  %v9872_v19 = vld [vmem:[#allocation5 + $0xae8] sm:$0xf] }
 0x185   :  { %6362 = vmatpush.bf16.msrb.mxu1 %v9993_v15  ;;  %6328 = vmatmul.bf16.vlgmr.msra.gmra.mxu2 %v13997_v39  ;;  %14636 = vst [vmem:[#allocation35_spill] sm:$0xff] %v14139_v23  ;;  %v12949_v15 = vld [vmem:[#allocation5 + $0xb5c] sm:$0xf0] }
 0x186   :  { %6376 = vmatpush.bf16.msrb.mxu2 %v10185_v25  ;;  %6342 = vmatmul.bf16.vlgmr.msra.gmra.mxu3 %v14001_v44  ;;  %v10112_v25 = vld [vmem:[#allocation5 + $0xcc8] sm:$0xf]  ;;  %v13201_v23 = vld [vmem:[#allocation5 + $0x133c] sm:$0xf0] }
 0x187   :  { %6390 = vmatpush.bf16.msrb.mxu3 %v10377_v20  ;;  %v6077_v20 = vpop.f32.mrf.mxu0 }
 0x188   :  { %6349 = vmatpush.bf16.msrb.mxu0 %v9777_v48  ;;  %v6078_v11 = vadd.f32 %v6077_v20, %v14127_v16  ;;  %v9921_v48 = vor.u32 %v12949_v15, %v9920_v29  ;;  %v9897_v16 = vor.u32 %v12943_v7, %v9896_v61  ;;  %v10281_v29 = vor.u32 %v13039_v8, %v10280_v51  ;;  %v6105_v15 = vpop.f32.mrf.mxu2  ;;  %v9848_v61 = vld [vmem:[#allocation5 + $0xab8] sm:$0xf] }
 0x189   :  { %6363 = vmatpush.bf16.msrb.mxu1 %v9969_v30  ;;  %v10113_v30 = vor.u32 %v12997_v2, %v10112_v25  ;;  %v10064_v25 = vld [vmem:[#allocation5 + $0xc68] sm:$0xf]  ;;  %v12985_v2 = vld [vmem:[#allocation5 + $0xc7c] sm:$0xf0]  ;;  %v10040_v7 = vld [vmem:[#allocation5 + $0xc38] sm:$0xf] }
 0x18a   :  { %6377 = vmatpush.bf16.msrb.mxu2 %v10161_v26  ;;  %v6091_v26 = vpop.f32.mrf.mxu1 }
 0x18b   :  { %6391 = vmatpush.bf16.msrb.mxu3 %v10353_v45  ;;  %v10305_v45 = vor.u32 %v13045_v22, %v10304_v21  ;;  %v6092_v9 = vadd.f32 %v6091_v26, %v6078_v11  ;;  %v10256_v21 = vld [vmem:[#allocation5 + $0xde8] sm:$0xf]  ;;  %v13033_v22 = vld [vmem:[#allocation5 + $0xdfc] sm:$0xf0]  ;;  %v10065_v26 = vor.u32 %v12985_v2, %v10064_v25 }
 0x18c   :  { %6350 = vmatpush.bf16.msrb.mxu0 %v9753_v56  ;;  %v9705_v56 = vor.u32 %v12895_v52, %v9704_v50  ;;  %v6119_v11 = vpop.f32.mrf.mxu3  ;;  %v9656_v50 = vld [vmem:[#allocation5 + $0x938] sm:$0xf]  ;;  %v12883_v52 = vld [vmem:[#allocation5 + $0x94c] sm:$0xf0]  ;;  %v10257_v8 = vor.u32 %v13033_v22, %v10256_v21  ;;  %v10208_v25 = vld [vmem:[#allocation5 + $0xd88] sm:$0xf] }
 0x18d   :  { %6364 = vmatpush.bf16.msrb.mxu1 %v9945_v33  ;;  %v10089_v33 = vor.u32 %v12991_v14, %v10088_v60  ;;  %v6106_v20 = vadd.f32 %v6105_v15, %v6092_v9  ;;  %v12979_v60 = vld [vmem:[#allocation5 + $0xc4c] sm:$0xf0]  ;;  %v10232_v9 = vld [vmem:[#allocation5 + $0xdb8] sm:$0xf]  ;;  %v9657_v51 = vor.u32 %v12883_v52, %v9656_v50  ;;  %v10016_v15 = vld [vmem:[#allocation5 + $0xc08] sm:$0xf] }
 0x18e   :  { %6378 = vmatpush.bf16.msrb.mxu2 %v10137_v12  ;;  %v9680_v12 = vld [vmem:[#allocation5 + $0x968] sm:$0xf]  ;;  %v13027_v14 = vld [vmem:[#allocation5 + $0xdcc] sm:$0xf0]  ;;  %v13021_v2 = vld [vmem:[#allocation5 + $0xd9c] sm:$0xf0] }
 0x18f   :  { %6392 = vmatpush.bf16.msrb.mxu3 %v10329_v6  ;;  %v12937_v6 = vld [vmem:[#allocation5 + $0xafc] sm:$0xf0]  ;;  %v13111_v21 = vld [vmem:[#allocation5 + $0x106c] sm:$0xf0]  ;;  %v10760_v22 = vld [vmem:[#allocation5 + $0x11d8] sm:$0xf]  ;;  %v14144_v28 = vpop.f32.mrf.mxu0 }
 0x190   :  { %6351 = vmatpush.bf16.msrb.mxu0 %v9729_v24  ;;  %v9681_v24 = vor.u32 %v12889_v13, %v9680_v12  ;;  %v12877_v12 = vld [vmem:[#allocation5 + $0x91c] sm:$0xf0]  ;;  %v9824_v13 = vld [vmem:[#allocation5 + $0xa88] sm:$0xf]  ;;  %v10952_v50 = vld [vmem:[#allocation5 + $0x1358] sm:$0xf] }
 0x191   :  { %6365 = vmatpush.bf16.msrb.mxu1 %v9921_v48  ;;  %v14142_v48 = vadd.f32 %v6119_v11, %v6106_v20  ;;  %v10568_v20 = vld [vmem:[#allocation5 + $0x1058] sm:$0xf]  ;;  %v13207_v52 = vld [vmem:[#allocation5 + $0x136c] sm:$0xf0]  ;;  %14637 = vst [vmem:[#allocation36_spill] sm:$0xff] %v14144_v28 }
 0x192   :  { %6379 = vmatpush.bf16.msrb.mxu2 %v10113_v30  ;;  %v9873_v30 = vor.u32 %v12937_v6, %v9872_v19  ;;  %v12925_v19 = vld [vmem:[#allocation5 + $0xa9c] sm:$0xf0]  ;;  %v10233_v6 = vor.u32 %v13027_v14, %v10232_v9  ;;  %v10953_v9 = vor.u32 %v13207_v52, %v10952_v50  ;;  %v10544_v14 = vld [vmem:[#allocation5 + $0x1028] sm:$0xf] }
 0x193   :  { %6393 = vmatpush.bf16.msrb.mxu3 %v10305_v45  ;;  %v12931_v45 = vld [vmem:[#allocation5 + $0xacc] sm:$0xf0]  ;;  %v10496_v52 = vld [vmem:[#allocation5 + $0xfc8] sm:$0xf] }
 0x194   :  { %6352 = vmatpush.bf16.msrb.mxu0 %v9705_v56  ;;  %v9632_v56 = vld [vmem:[#allocation5 + $0x908] sm:$0xf] }
 0x195   :  { %6366 = vmatpush.bf16.msrb.mxu1 %v9897_v16  ;;  %v9849_v16 = vor.u32 %v12931_v45, %v9848_v61  ;;  %v9633_v11 = vor.u32 %v12877_v12, %v9632_v56  ;;  %v11144_v61 = vld [vmem:[#allocation5 + $0x14d8] sm:$0xf]  ;;  %v13255_v45 = vld [vmem:[#allocation5 + $0x14ec] sm:$0xf0]  ;;  %v13153_v56 = vld [vmem:[#allocation5 + $0x11bc] sm:$0xf0] }
 0x196   :  { %6380 = vmatpush.bf16.msrb.mxu2 %v10089_v33  ;;  %v10041_v33 = vor.u32 %v12979_v60, %v10040_v7  ;;  %v10569_v7 = vor.u32 %v13111_v21, %v10568_v20  ;;  %v10928_v12 = vld [vmem:[#allocation5 + $0x1328] sm:$0xf]  ;;  %v13147_v21 = vld [vmem:[#allocation5 + $0x118c] sm:$0xf0] }
 0x197   :  { %6394 = vmatpush.bf16.msrb.mxu3 %v10281_v29  ;;  %v12973_v29 = vld [vmem:[#allocation5 + $0xc1c] sm:$0xf0] }
 0x198   :  { %6353 = vmatpush.bf16.msrb.mxu0 %v9681_v24  ;;  %v13159_v24 = vld [vmem:[#allocation5 + $0x11ec] sm:$0xf0] }
 0x199   :  { %6367 = vmatpush.bf16.msrb.mxu1 %v9873_v30  ;;  %v9825_v30 = vor.u32 %v12925_v19, %v9824_v13  ;;  %v10761_v60 = vor.u32 %v13159_v24, %v10760_v22  ;;  %v14146_v13 = vpop.f32.mrf.mxu1  ;;  %v10545_v19 = vor.u32 %v13105_v3, %v10544_v14  ;;  %v10904_v22 = vld [vmem:[#allocation5 + $0x12f8] sm:$0xf]  ;;  %v13243_v3 = vld [vmem:[#allocation5 + $0x148c] sm:$0xf0] }
 0x19a   :  { %6381 = vmatpush.bf16.msrb.mxu2 %v10065_v26  ;;  %v10017_v26 = vor.u32 %v12973_v29, %v10016_v15  ;;  %14638 = vst [vmem:[#allocation37_spill] sm:$0xff] %v14146_v13  ;;  %v10737_v15 = vor.u32 %v13153_v56, %v10736_v42  ;;  %v10520_v29 = vld [vmem:[#allocation5 + $0xff8] sm:$0xf]  ;;  %v13237_v56 = vld [vmem:[#allocation5 + $0x145c] sm:$0xf0] }
 0x19b   :  { %6395 = vmatpush.bf16.msrb.mxu3 %v10257_v8  ;;  %v10209_v8 = vor.u32 %v13021_v2, %v10208_v25  ;;  %v13099_v25 = vld [vmem:[#allocation5 + $0x100c] sm:$0xf0]  ;;  %v10712_v2 = vld [vmem:[#allocation5 + $0x1178] sm:$0xf]  ;;  %v13393_v13 = vld [vmem:[#allocation5 + $0x193c] sm:$0xf0] }
 0x19c   :  { %6354 = vmatpush.bf16.msrb.mxu0 %v9657_v51  ;;  %v11145_v51 = vor.u32 %v13255_v45, %v11144_v61  ;;  %v11096_v24 = vld [vmem:[#allocation5 + $0x1478] sm:$0xf]  ;;  %v10521_v42 = vor.u32 %v13099_v25, %v10520_v29  ;;  %v14152_v61 = vpop.f32.mrf.mxu2  ;;  %v13087_v29 = vld [vmem:[#allocation5 + $0xfac] sm:$0xf0] }
 0x19d   :  { %6368 = vmatpush.bf16.msrb.mxu1 %v9849_v16  ;;  %v11120_v16 = vld [vmem:[#allocation5 + $0x14a8] sm:$0xf]  ;;  %14639 = vst [vmem:[#allocation38_spill] sm:$0xff] %v14152_v61  ;;  %v11097_v45 = vor.u32 %v13243_v3, %v11096_v24  ;;  %v10664_v25 = vld [vmem:[#allocation5 + $0x1118] sm:$0xf] }
 0x19e   :  { %6382 = vmatpush.bf16.msrb.mxu2 %v10041_v33  ;;  %v13249_v33 = vld [vmem:[#allocation5 + $0x14bc] sm:$0xf0]  ;;  %v11048_v24 = vld [vmem:[#allocation5 + $0x1418] sm:$0xf]  ;;  %v13231_v3 = vld [vmem:[#allocation5 + $0x142c] sm:$0xf0] }
 0x19f   :  { %6396 = vmatpush.bf16.msrb.mxu3 %v10233_v6  ;;  %v10929_v6 = vor.u32 %v13201_v23, %v10928_v12  ;;  %v11121_v20 = vor.u32 %v13249_v33, %v11120_v16  ;;  %v10713_v23 = vor.u32 %v13147_v21, %v10712_v2  ;;  %v13135_v21 = vld [vmem:[#allocation5 + $0x112c] sm:$0xf0]  ;;  %v11504_v61 = vld [vmem:[#allocation5 + $0x17a8] sm:$0xf] }
 0x1a0   :  { %6355 = vmatpush.bf16.msrb.mxu0 %v9633_v11  ;;  %v13195_v11 = vld [vmem:[#allocation5 + $0x130c] sm:$0xf0]  ;;  %v6133_v14 = vpop.f32.mrf.mxu0 }
 0x1a1   :  { %6369 = vmatpush.bf16.msrb.mxu1 %v9825_v30  ;;  %v10905_v50 = vor.u32 %v13195_v11, %v10904_v22  ;;  %v13093_v30 = vld [vmem:[#allocation5 + $0xfdc] sm:$0xf0]  ;;  %v6134_v12 = vadd.f32 %v6133_v14, %v14142_v48  ;;  %v6147_v33 = vpop.f32.mrf.mxu1  ;;  %v10856_v22 = vld [vmem:[#allocation5 + $0x1298] sm:$0xf]  ;;  %v13183_v11 = vld [vmem:[#allocation5 + $0x12ac] sm:$0xf0]  ;;  %v10665_v48 = vor.u32 %v13135_v21, %v10664_v25 }
 0x1a2   :  { %6383 = vmatpush.bf16.msrb.mxu2 %v10017_v26  ;;  %v10688_v26 = vld [vmem:[#allocation5 + $0x1148] sm:$0xf]  ;;  %v10497_v16 = vor.u32 %v13093_v30, %v10496_v52  ;;  %v13081_v52 = vld [vmem:[#allocation5 + $0xf7c] sm:$0xf0]  ;;  %v10616_v25 = vld [vmem:[#allocation5 + $0x10b8] sm:$0xf] }
 0x1a3   :  { %6397 = vmatpush.bf16.msrb.mxu3 %v10209_v8  ;;  %6356 = vmatmul.bf16.vlgmr.msrb.gmra.mxu0 %v13999_v43  ;;  %v13141_v8 = vld [vmem:[#allocation5 + $0x115c] sm:$0xf0]  ;;  %v10640_v30 = vld [vmem:[#allocation5 + $0x10e8] sm:$0xf]  ;;  %v13123_v21 = vld [vmem:[#allocation5 + $0x10cc] sm:$0xf0] }
 0x1a4   :  { %6404 = vmatpush.bf16.msra.mxu0 %v10569_v7  ;;  %6370 = vmatmul.bf16.vlgmr.msrb.gmra.mxu1 %v14003_v47  ;;  %v10880_v7 = vld [vmem:[#allocation5 + $0x12c8] sm:$0xf] }
 0x1a5   :  { %6418 = vmatpush.bf16.msra.mxu1 %v10761_v60  ;;  %6384 = vmatmul.bf16.vlgmr.msrb.gmra.mxu2 %v14009_v31  ;;  %v13189_v60 = vld [vmem:[#allocation5 + $0x12dc] sm:$0xf0] }
 0x1a6   :  { %6432 = vmatpush.bf16.msra.mxu2 %v10953_v9  ;;  %6398 = vmatmul.bf16.vlgmr.msrb.gmra.mxu3 %v14013_v36  ;;  %v14154_v9 = vpop.f32.mrf.mxu3 }
 0x1a7   :  { %6446 = vmatpush.bf16.msra.mxu3 %v11145_v51  ;;  %14640 = vst [vmem:[#allocation39_spill] sm:$0xff] %v14154_v9  ;;  %v11072_v51 = vld [vmem:[#allocation5 + $0x1448] sm:$0xf]  ;;  %v13297_v9 = vld [vmem:[#allocation5 + $0x163c] sm:$0xf0] }
 0x1a8   :  { %6405 = vmatpush.bf16.msra.mxu0 %v10545_v19  ;;  %v10689_v19 = vor.u32 %v13141_v8, %v10688_v26  ;;  %v11073_v2 = vor.u32 %v13237_v56, %v11072_v51  ;;  %v11049_v26 = vor.u32 %v13231_v3, %v11048_v24  ;;  %v6161_v8 = vpop.f32.mrf.mxu2  ;;  %v11024_v56 = vld [vmem:[#allocation5 + $0x13e8] sm:$0xf]  ;;  %v13219_v24 = vld [vmem:[#allocation5 + $0x13cc] sm:$0xf0]  ;;  %v14159_v28 = vpop.f32.mrf.mxu0 }
 0x1a9   :  { %6419 = vmatpush.bf16.msra.mxu1 %v10737_v15  ;;  %v10881_v15 = vor.u32 %v13189_v60, %v10880_v7  ;;  %v10832_v7 = vld [vmem:[#allocation5 + $0x1268] sm:$0xf]  ;;  %v13177_v60 = vld [vmem:[#allocation5 + $0x127c] sm:$0xf0]  ;;  %14641 = vst [vmem:[#allocation40_spill] sm:$0xff] %v14159_v28 }
 0x1aa   :  { %6433 = vmatpush.bf16.msra.mxu2 %v10929_v6  ;;  %v10472_v6 = vld [vmem:[#allocation5 + $0xf98] sm:$0xf] }
 0x1ab   :  { %6447 = vmatpush.bf16.msra.mxu3 %v11121_v20  ;;  %v6148_v20 = vadd.f32 %v6147_v33, %v6134_v12  ;;  %v13225_v12 = vld [vmem:[#allocation5 + $0x13fc] sm:$0xf0] }
 0x1ac   :  { %6406 = vmatpush.bf16.msra.mxu0 %v10521_v42  ;;  %v10473_v42 = vor.u32 %v13087_v29, %v10472_v6  ;;  %v10424_v6 = vld [vmem:[#allocation5 + $0xf38] sm:$0xf]  ;;  %v13075_v29 = vld [vmem:[#allocation5 + $0xf4c] sm:$0xf0] }
 0x1ad   :  { %6420 = vmatpush.bf16.msra.mxu1 %v10713_v23  ;;  %v10857_v23 = vor.u32 %v13183_v11, %v10856_v22  ;;  %v6162_v14 = vadd.f32 %v6161_v8, %v6148_v20  ;;  %v10808_v22 = vld [vmem:[#allocation5 + $0x1238] sm:$0xf]  ;;  %v13171_v11 = vld [vmem:[#allocation5 + $0x124c] sm:$0xf0]  ;;  %v10425_v3 = vor.u32 %v13075_v29, %v10424_v6  ;;  %v10784_v8 = vld [vmem:[#allocation5 + $0x1208] sm:$0xf] }
 0x1ae   :  { %6434 = vmatpush.bf16.msra.mxu2 %v10905_v50  ;;  %v10448_v50 = vld [vmem:[#allocation5 + $0xf68] sm:$0xf]  ;;  %v6175_v51 = vpop.f32.mrf.mxu3  ;;  %v11000_v20 = vld [vmem:[#allocation5 + $0x13b8] sm:$0xf]  ;;  %v13399_v29 = vld [vmem:[#allocation5 + $0x196c] sm:$0xf0] }
 0x1af   :  { %6448 = vmatpush.bf16.msra.mxu3 %v11097_v45  ;;  %v13129_v45 = vld [vmem:[#allocation5 + $0x10fc] sm:$0xf0]  ;;  %v14157_v33 = vadd.f32 %v6175_v51, %v6162_v14  ;;  %v11336_v14 = vld [vmem:[#allocation5 + $0x1658] sm:$0xf]  ;;  %v13303_v51 = vld [vmem:[#allocation5 + $0x166c] sm:$0xf0] }
 0x1b0   :  { %6407 = vmatpush.bf16.msra.mxu0 %v10497_v16  ;;  %v10449_v16 = vor.u32 %v13081_v52, %v10448_v50  ;;  %v13069_v50 = vld [vmem:[#allocation5 + $0xf1c] sm:$0xf0]  ;;  %v10592_v52 = vld [vmem:[#allocation5 + $0x1088] sm:$0xf]  ;;  %v11720_v6 = vld [vmem:[#allocation5 + $0x1958] sm:$0xf] }
 0x1b1   :  { %6421 = vmatpush.bf16.msra.mxu1 %v10689_v19  ;;  %v10641_v19 = vor.u32 %v13129_v45, %v10640_v30  ;;  %v13117_v30 = vld [vmem:[#allocation5 + $0x109c] sm:$0xf0]  ;;  %v11001_v45 = vor.u32 %v13219_v24, %v11000_v20  ;;  %v11721_v20 = vor.u32 %v13399_v29, %v11720_v6  ;;  %v11312_v24 = vld [vmem:[#allocation5 + $0x1628] sm:$0xf] }
 0x1b2   :  { %6435 = vmatpush.bf16.msra.mxu2 %v10881_v15  ;;  %v10833_v15 = vor.u32 %v13177_v60, %v10832_v7  ;;  %v10976_v7 = vld [vmem:[#allocation5 + $0x1388] sm:$0xf]  ;;  %v13213_v60 = vld [vmem:[#allocation5 + $0x139c] sm:$0xf0] }
 0x1b3   :  { %6449 = vmatpush.bf16.msra.mxu3 %v11073_v2  ;;  %v11025_v2 = vor.u32 %v13225_v12, %v11024_v56  ;;  %v11528_v56 = vld [vmem:[#allocation5 + $0x17d8] sm:$0xf]  ;;  %v11264_v29 = vld [vmem:[#allocation5 + $0x15c8] sm:$0xf] }
 0x1b4   :  { %6408 = vmatpush.bf16.msra.mxu0 %v10473_v42  ;;  %v10400_v42 = vld [vmem:[#allocation5 + $0xf08] sm:$0xf] }
 0x1b5   :  { %6422 = vmatpush.bf16.msra.mxu1 %v10665_v48  ;;  %v10617_v48 = vor.u32 %v13123_v21, %v10616_v25  ;;  %v10401_v12 = vor.u32 %v13069_v50, %v10400_v42  ;;  %v11912_v25 = vld [vmem:[#allocation5 + $0x1ad8] sm:$0xf]  ;;  %v13447_v21 = vld [vmem:[#allocation5 + $0x1aec] sm:$0xf0]  ;;  %v13345_v42 = vld [vmem:[#allocation5 + $0x17bc] sm:$0xf0] }
 0x1b6   :  { %6436 = vmatpush.bf16.msra.mxu2 %v10857_v23  ;;  %v10809_v23 = vor.u32 %v13171_v11, %v10808_v22  ;;  %v11337_v22 = vor.u32 %v13303_v51, %v11336_v14  ;;  %v11696_v50 = vld [vmem:[#allocation5 + $0x1928] sm:$0xf]  ;;  %v13339_v51 = vld [vmem:[#allocation5 + $0x178c] sm:$0xf0] }
 0x1b7   :  { %6450 = vmatpush.bf16.msra.mxu3 %v11049_v26  ;;  %v13165_v26 = vld [vmem:[#allocation5 + $0x121c] sm:$0xf0] }
 0x1b8   :  { %6409 = vmatpush.bf16.msra.mxu0 %v10449_v16  ;;  %v13351_v16 = vld [vmem:[#allocation5 + $0x17ec] sm:$0xf0] }
 0x1b9   :  { %6423 = vmatpush.bf16.msra.mxu1 %v10641_v19  ;;  %v10593_v19 = vor.u32 %v13117_v30, %v10592_v52  ;;  %v11529_v11 = vor.u32 %v13351_v16, %v11528_v56  ;;  %v14161_v52 = vpop.f32.mrf.mxu1  ;;  %v11313_v30 = vor.u32 %v13297_v9, %v11312_v24  ;;  %v11672_v56 = vld [vmem:[#allocation5 + $0x18f8] sm:$0xf]  ;;  %v13435_v9 = vld [vmem:[#allocation5 + $0x1a8c] sm:$0xf0] }
 0x1ba   :  { %6437 = vmatpush.bf16.msra.mxu2 %v10833_v15  ;;  %v10785_v15 = vor.u32 %v13165_v26, %v10784_v8  ;;  %14642 = vst [vmem:[#allocation41_spill] sm:$0xff] %v14161_v52  ;;  %v11505_v8 = vor.u32 %v13345_v42, %v11504_v61  ;;  %v11288_v26 = vld [vmem:[#allocation5 + $0x15f8] sm:$0xf]  ;;  %v13429_v42 = vld [vmem:[#allocation5 + $0x1a5c] sm:$0xf0] }
 0x1bb   :  { %6451 = vmatpush.bf16.msra.mxu3 %v11025_v2  ;;  %v10977_v2 = vor.u32 %v13213_v60, %v10976_v7  ;;  %v13291_v7 = vld [vmem:[#allocation5 + $0x160c] sm:$0xf0]  ;;  %v11480_v60 = vld [vmem:[#allocation5 + $0x1778] sm:$0xf]  ;;  %v8818_v52 = vld [vmem:[#allocation5 + $0x2c0] sm:$0xf0] }
 0x1bc   :  { %6410 = vmatpush.bf16.msra.mxu0 %v10425_v3  ;;  %v11913_v3 = vor.u32 %v13447_v21, %v11912_v25  ;;  %v11864_v16 = vld [vmem:[#allocation5 + $0x1a78] sm:$0xf]  ;;  %v11481_v61 = vor.u32 %v13339_v51, %v11480_v60  ;;  %v14167_v25 = vpop.f32.mrf.mxu2  ;;  %v13327_v51 = vld [vmem:[#allocation5 + $0x172c] sm:$0xf0] }
 0x1bd   :  { %6424 = vmatpush.bf16.msra.mxu1 %v10617_v48  ;;  %v11888_v48 = vld [vmem:[#allocation5 + $0x1aa8] sm:$0xf]  ;;  %14643 = vst [vmem:[#allocation42_spill] sm:$0xff] %v14167_v25  ;;  %v11865_v21 = vor.u32 %v13435_v9, %v11864_v16  ;;  %v11816_v16 = vld [vmem:[#allocation5 + $0x1a18] sm:$0xf] }
 0x1be   :  { %6438 = vmatpush.bf16.msra.mxu2 %v10809_v23  ;;  %v13441_v23 = vld [vmem:[#allocation5 + $0x1abc] sm:$0xf0]  ;;  %v13423_v9 = vld [vmem:[#allocation5 + $0x1a2c] sm:$0xf0]  ;;  %v12622_v25 = vld [vmem:[#allocation5 + $0x12c] sm:$0xf] }
 0x1bf   :  { %6452 = vmatpush.bf16.msra.mxu3 %v11001_v45  ;;  %v11697_v45 = vor.u32 %v13393_v13, %v11696_v50  ;;  %v11889_v14 = vor.u32 %v13441_v23, %v11888_v48  ;;  %v11289_v13 = vor.u32 %v13291_v7, %v11288_v26  ;;  %v13279_v26 = vld [vmem:[#allocation5 + $0x15ac] sm:$0xf0]  ;;  %v11432_v7 = vld [vmem:[#allocation5 + $0x1718] sm:$0xf] }
 0x1c0   :  { %6411 = vmatpush.bf16.msra.mxu0 %v10401_v12  ;;  %v13387_v12 = vld [vmem:[#allocation5 + $0x190c] sm:$0xf0]  ;;  %v6189_v24 = vpop.f32.mrf.mxu0 }
 0x1c1   :  { %6425 = vmatpush.bf16.msra.mxu1 %v10593_v19  ;;  %v11673_v6 = vor.u32 %v13387_v12, %v11672_v56  ;;  %v13285_v19 = vld [vmem:[#allocation5 + $0x15dc] sm:$0xf0]  ;;  %v6190_v50 = vadd.f32 %v6189_v24, %v14157_v33  ;;  %v6203_v23 = vpop.f32.mrf.mxu1  ;;  %v11624_v56 = vld [vmem:[#allocation5 + $0x1898] sm:$0xf]  ;;  %v13375_v12 = vld [vmem:[#allocation5 + $0x18ac] sm:$0xf0]  ;;  %v11433_v33 = vor.u32 %v13327_v51, %v11432_v7 }
 0x1c2   :  { %6439 = vmatpush.bf16.msra.mxu2 %v10785_v15  ;;  %v11456_v15 = vld [vmem:[#allocation5 + $0x1748] sm:$0xf]  ;;  %v11265_v48 = vor.u32 %v13285_v19, %v11264_v29  ;;  %v13273_v29 = vld [vmem:[#allocation5 + $0x157c] sm:$0xf0]  ;;  %v11384_v7 = vld [vmem:[#allocation5 + $0x16b8] sm:$0xf] }
 0x1c3   :  { %6453 = vmatpush.bf16.msra.mxu3 %v10977_v2  ;;  %6412 = vmatmul.bf16.vlgmr.msra.gmra.mxu0 %v14011_v35  ;;  %v13333_v2 = vld [vmem:[#allocation5 + $0x175c] sm:$0xf0]  ;;  %v11408_v19 = vld [vmem:[#allocation5 + $0x16e8] sm:$0xf]  ;;  %v13315_v51 = vld [vmem:[#allocation5 + $0x16cc] sm:$0xf0] }
 0x1c4   :  { %6460 = vmatpush.bf16.msrb.mxu0 %v11337_v22  ;;  %6426 = vmatmul.bf16.vlgmr.msra.gmra.mxu1 %v14015_v40  ;;  %v11648_v22 = vld [vmem:[#allocation5 + $0x18c8] sm:$0xf] }
 0x1c5   :  { %6474 = vmatpush.bf16.msrb.mxu1 %v11529_v11  ;;  %6440 = vmatmul.bf16.vlgmr.msra.gmra.mxu2 %v14021_v32  ;;  %v13381_v11 = vld [vmem:[#allocation5 + $0x18dc] sm:$0xf0] }
 0x1c6   :  { %6488 = vmatpush.bf16.msrb.mxu2 %v11721_v20  ;;  %6454 = vmatmul.bf16.vlgmr.msra.gmra.mxu3 %v14025_v41  ;;  %v14169_v20 = vpop.f32.mrf.mxu3 }
 0x1c7   :  { %6502 = vmatpush.bf16.msrb.mxu3 %v11913_v3  ;;  %14644 = vst [vmem:[#allocation43_spill] sm:$0xff] %v14169_v20  ;;  %v11840_v3 = vld [vmem:[#allocation5 + $0x1a48] sm:$0xf]  ;;  %v13489_v20 = vld [vmem:[#allocation5 + $0x1c3c] sm:$0xf0] }
 0x1c8   :  { %6461 = vmatpush.bf16.msrb.mxu0 %v11313_v30  ;;  %v11457_v30 = vor.u32 %v13333_v2, %v11456_v15  ;;  %v11841_v60 = vor.u32 %v13429_v42, %v11840_v3  ;;  %v11817_v15 = vor.u32 %v13423_v9, %v11816_v16  ;;  %v6217_v2 = vpop.f32.mrf.mxu2  ;;  %v11792_v42 = vld [vmem:[#allocation5 + $0x19e8] sm:$0xf]  ;;  %v13411_v16 = vld [vmem:[#allocation5 + $0x19cc] sm:$0xf0]  ;;  %v14174_v28 = vpop.f32.mrf.mxu0 }
 0x1c9   :  { %6475 = vmatpush.bf16.msrb.mxu1 %v11505_v8  ;;  %v11649_v8 = vor.u32 %v13381_v11, %v11648_v22  ;;  %v11600_v22 = vld [vmem:[#allocation5 + $0x1868] sm:$0xf]  ;;  %v13369_v11 = vld [vmem:[#allocation5 + $0x187c] sm:$0xf0]  ;;  %14645 = vst [vmem:[#allocation44_spill] sm:$0xff] %v14174_v28 }
 0x1ca   :  { %6489 = vmatpush.bf16.msrb.mxu2 %v11697_v45  ;;  %v11240_v45 = vld [vmem:[#allocation5 + $0x1598] sm:$0xf]  ;;  %v9586_v28 = vld [vmem:[#allocation5 + $0x8c0] sm:$0xf0] }
 0x1cb   :  { %6503 = vmatpush.bf16.msrb.mxu3 %v11889_v14  ;;  %v6204_v14 = vadd.f32 %v6203_v23, %v6190_v50  ;;  %v13417_v50 = vld [vmem:[#allocation5 + $0x19fc] sm:$0xf0] }
 0x1cc   :  { %6462 = vmatpush.bf16.msrb.mxu0 %v11289_v13  ;;  %v11241_v13 = vor.u32 %v13279_v26, %v11240_v45  ;;  %v11192_v45 = vld [vmem:[#allocation5 + $0x1538] sm:$0xf]  ;;  %v13267_v26 = vld [vmem:[#allocation5 + $0x154c] sm:$0xf0] }
 0x1cd   :  { %6476 = vmatpush.bf16.msrb.mxu1 %v11481_v61  ;;  %v11625_v61 = vor.u32 %v13375_v12, %v11624_v56  ;;  %v6218_v24 = vadd.f32 %v6217_v2, %v6204_v14  ;;  %v11576_v56 = vld [vmem:[#allocation5 + $0x1838] sm:$0xf]  ;;  %v13363_v12 = vld [vmem:[#allocation5 + $0x184c] sm:$0xf0]  ;;  %v11193_v9 = vor.u32 %v13267_v26, %v11192_v45  ;;  %v11552_v2 = vld [vmem:[#allocation5 + $0x1808] sm:$0xf] }
 0x1ce   :  { %6490 = vmatpush.bf16.msrb.mxu2 %v11673_v6  ;;  %v11216_v6 = vld [vmem:[#allocation5 + $0x1568] sm:$0xf]  ;;  %v6231_v3 = vpop.f32.mrf.mxu3  ;;  %v11768_v14 = vld [vmem:[#allocation5 + $0x19b8] sm:$0xf]  ;;  %v12676_v45 = vld [vmem:[#allocation5 + $0x2dc] sm:$0xf] }
 0x1cf   :  { %6504 = vmatpush.bf16.msrb.mxu3 %v11865_v21  ;;  %v13321_v21 = vld [vmem:[#allocation5 + $0x16fc] sm:$0xf0]  ;;  %v14172_v23 = vadd.f32 %v6231_v3, %v6218_v24  ;;  %v12104_v24 = vld [vmem:[#allocation5 + $0x1c58] sm:$0xf]  ;;  %v13495_v3 = vld [vmem:[#allocation5 + $0x1c6c] sm:$0xf0] }
 0x1d0   :  { %6463 = vmatpush.bf16.msrb.mxu0 %v11265_v48  ;;  %v11217_v48 = vor.u32 %v13273_v29, %v11216_v6  ;;  %v13261_v6 = vld [vmem:[#allocation5 + $0x151c] sm:$0xf0]  ;;  %v11360_v29 = vld [vmem:[#allocation5 + $0x1688] sm:$0xf]  ;;  %v8842_v26 = vld [vmem:[#allocation5 + $0x2f0] sm:$0xf0] }
 0x1d1   :  { %6477 = vmatpush.bf16.msrb.mxu1 %v11457_v30  ;;  %v11409_v30 = vor.u32 %v13321_v21, %v11408_v19  ;;  %v13309_v19 = vld [vmem:[#allocation5 + $0x169c] sm:$0xf0]  ;;  %v11769_v21 = vor.u32 %v13411_v16, %v11768_v14  ;;  %v8845_v14 = vor.u32 %v12676_v45, %v8842_v26  ;;  %v12080_v16 = vld [vmem:[#allocation5 + $0x1c28] sm:$0xf] }
 0x1d2   :  { %6491 = vmatpush.bf16.msrb.mxu2 %v11649_v8  ;;  %v11601_v8 = vor.u32 %v13369_v11, %v11600_v22  ;;  %v11744_v22 = vld [vmem:[#allocation5 + $0x1988] sm:$0xf]  ;;  %v13405_v11 = vld [vmem:[#allocation5 + $0x199c] sm:$0xf0] }
 0x1d3   :  { %6505 = vmatpush.bf16.msrb.mxu3 %v11841_v60  ;;  %v11793_v60 = vor.u32 %v13417_v50, %v11792_v42  ;;  %v12628_v42 = vld [vmem:[#allocation5 + $0x15c] sm:$0xf]  ;;  %v12032_v26 = vld [vmem:[#allocation5 + $0x1bc8] sm:$0xf] }
 0x1d4   :  { %6464 = vmatpush.bf16.msrb.mxu0 %v11241_v13  ;;  %v11168_v13 = vld [vmem:[#allocation5 + $0x1508] sm:$0xf] }
 0x1d5   :  { %6478 = vmatpush.bf16.msrb.mxu1 %v11433_v33  ;;  %v11385_v33 = vor.u32 %v13315_v51, %v11384_v7  ;;  %v11169_v50 = vor.u32 %v13261_v6, %v11168_v13  ;;  %v12724_v7 = vld [vmem:[#allocation5 + $0x45c] sm:$0xf]  ;;  %v9034_v51 = vld [vmem:[#allocation5 + $0x470] sm:$0xf0]  ;;  %v8626_v13 = vld [vmem:[#allocation5 + $0x140] sm:$0xf0] }
 0x1d6   :  { %6492 = vmatpush.bf16.msrb.mxu2 %v11625_v61  ;;  %v11577_v61 = vor.u32 %v13363_v12, %v11576_v56  ;;  %v12105_v56 = vor.u32 %v13495_v3, %v12104_v24  ;;  %v12670_v6 = vld [vmem:[#allocation5 + $0x2ac] sm:$0xf]  ;;  %v8602_v3 = vld [vmem:[#allocation5 + $0x110] sm:$0xf0] }
 0x1d7   :  { %6506 = vmatpush.bf16.msrb.mxu3 %v11817_v15  ;;  %v13357_v15 = vld [vmem:[#allocation5 + $0x181c] sm:$0xf0] }
 0x1d8   :  { %6465 = vmatpush.bf16.msrb.mxu0 %v11217_v48  ;;  %v8650_v48 = vld [vmem:[#allocation5 + $0x170] sm:$0xf0] }
 0x1d9   :  { %6479 = vmatpush.bf16.msrb.mxu1 %v11409_v30  ;;  %v11361_v30 = vor.u32 %v13309_v19, %v11360_v29  ;;  %v8653_v12 = vor.u32 %v12628_v42, %v8650_v48  ;;  %v14176_v29 = vpop.f32.mrf.mxu1  ;;  %v12081_v19 = vor.u32 %v13489_v20, %v12080_v16  ;;  %v12664_v42 = vld [vmem:[#allocation5 + $0x27c] sm:$0xf]  ;;  %v8986_v20 = vld [vmem:[#allocation5 + $0x410] sm:$0xf0]  ;;  %v12706_v16 = vld [vmem:[#allocation5 + $0x3cc] sm:$0xf] }
 0x1da   :  { %6493 = vmatpush.bf16.msrb.mxu2 %v11601_v8  ;;  %v11553_v8 = vor.u32 %v13357_v15, %v11552_v2  ;;  %14646 = vst [vmem:[#allocation45_spill] sm:$0xff] %v14176_v29  ;;  %v8629_v2 = vor.u32 %v12622_v25, %v8626_v13  ;;  %v12056_v15 = vld [vmem:[#allocation5 + $0x1bf8] sm:$0xf]  ;;  %v12712_v48 = vld [vmem:[#allocation5 + $0x3fc] sm:$0xf]  ;;  %v14184_v13 = vpop.f32.mrf.mxu3 }
 0x1db   :  { %6507 = vmatpush.bf16.msrb.mxu3 %v11793_v60  ;;  %v11745_v60 = vor.u32 %v13405_v11, %v11744_v22  ;;  %v13483_v22 = vld [vmem:[#allocation5 + $0x1c0c] sm:$0xf0]  ;;  %v12616_v11 = vld [vmem:[#allocation5 + $0xfc] sm:$0xf]  ;;  %14648 = vst [vmem:[#allocation47_spill] sm:$0xff] %v14184_v13 }
 0x1dc   :  { %6466 = vmatpush.bf16.msrb.mxu0 %v11193_v9  ;;  %v9037_v9 = vor.u32 %v12724_v7, %v9034_v51  ;;  %v8605_v25 = vor.u32 %v12616_v11, %v8602_v3  ;;  %v14182_v7 = vpop.f32.mrf.mxu2  ;;  %v8989_v51 = vor.u32 %v12712_v48, %v8986_v20  ;;  %v8554_v3 = vld [vmem:[#allocation5 + $0xb0] sm:$0xf0]  ;;  %v12700_v48 = vld [vmem:[#allocation5 + $0x39c] sm:$0xf]  ;;  %v12814_v29 = vld [vmem:[#allocation5 + $0x72c] sm:$0xf] }
 0x1dd   :  { %6480 = vmatpush.bf16.msrb.mxu1 %v11385_v33  ;;  %v12718_v33 = vld [vmem:[#allocation5 + $0x42c] sm:$0xf]  ;;  %14647 = vst [vmem:[#allocation46_spill] sm:$0xff] %v14182_v7  ;;  %v8938_v20 = vld [vmem:[#allocation5 + $0x3b0] sm:$0xf0] }
 0x1de   :  { %6494 = vmatpush.bf16.msrb.mxu2 %v11577_v61  ;;  %v9010_v61 = vld [vmem:[#allocation5 + $0x440] sm:$0xf0]  ;;  %v8890_v13 = vld [vmem:[#allocation5 + $0x350] sm:$0xf0] }
 0x1df   :  { %6508 = vmatpush.bf16.msrb.mxu3 %v11769_v21  ;;  %v8821_v21 = vor.u32 %v12670_v6, %v8818_v52  ;;  %v9013_v24 = vor.u32 %v12718_v33, %v9010_v61  ;;  %v12057_v52 = vor.u32 %v13483_v22, %v12056_v15  ;;  %v13471_v15 = vld [vmem:[#allocation5 + $0x1bac] sm:$0xf0]  ;;  %v12604_v22 = vld [vmem:[#allocation5 + $0x9c] sm:$0xf]  ;;  %v9202_v7 = vld [vmem:[#allocation5 + $0x5c0] sm:$0xf0] }
 0x1e0   :  { %6467 = vmatpush.bf16.msrb.mxu0 %v11169_v50  ;;  %v8794_v50 = vld [vmem:[#allocation5 + $0x290] sm:$0xf0] }
 0x1e1   :  { %6481 = vmatpush.bf16.msrb.mxu1 %v11361_v30  ;;  %v8797_v45 = vor.u32 %v12664_v42, %v8794_v50  ;;  %v13477_v30 = vld [vmem:[#allocation5 + $0x1bdc] sm:$0xf0]  ;;  %v6259_v61 = vpop.f32.mrf.mxu1  ;;  %v12652_v42 = vld [vmem:[#allocation5 + $0x21c] sm:$0xf]  ;;  %v8746_v50 = vld [vmem:[#allocation5 + $0x230] sm:$0xf0] }
 0x1e2   :  { %6495 = vmatpush.bf16.msrb.mxu2 %v11553_v8  ;;  %v12610_v8 = vld [vmem:[#allocation5 + $0xcc] sm:$0xf]  ;;  %v12033_v33 = vor.u32 %v13477_v30, %v12032_v26  ;;  %v8749_v26 = vor.u32 %v12652_v42, %v8746_v50  ;;  %v11984_v30 = vld [vmem:[#allocation5 + $0x1b68] sm:$0xf]  ;;  %v8506_v50 = vld [vmem:[#allocation5 + $0x50] sm:$0xf0] }
 0x1e3   :  { %6509 = vmatpush.bf16.msrb.mxu3 %v11745_v60  ;;  %6468 = vmatmul.bf16.vlgmr.msrb.gmra.mxu0 %v14023_v38  ;;  %v8578_v60 = vld [vmem:[#allocation5 + $0xe0] sm:$0xf0] }
 0x1e4   :  { %6516 = vmatpush.bf16.msra.mxu0 %v12105_v56  ;;  %6482 = vmatmul.bf16.vlgmr.msrb.gmra.mxu1 %v14027_v46  ;;  %v12658_v56 = vld [vmem:[#allocation5 + $0x24c] sm:$0xf] }
 0x1e5   :  { %6530 = vmatpush.bf16.msra.mxu1 %v8653_v12  ;;  %6496 = vmatmul.bf16.vlgmr.msrb.gmra.mxu2 %v14033_v49  ;;  %v8770_v12 = vld [vmem:[#allocation5 + $0x260] sm:$0xf0] }
 0x1e6   :  { %6544 = vmatpush.bf16.msra.mxu2 %v8845_v14  ;;  %6510 = vmatmul.bf16.vlgmr.msrb.gmra.mxu3 %v14037_v54  ;;  %v6245_v14 = vpop.f32.mrf.mxu0 }
 0x1e7   :  { %6558 = vmatpush.bf16.msra.mxu3 %v9037_v9  ;;  %v8962_v9 = vld [vmem:[#allocation5 + $0x3e0] sm:$0xf0]  ;;  %v6246_v6 = vadd.f32 %v6245_v14, %v14172_v23 }
 0x1e8   :  { %6517 = vmatpush.bf16.msra.mxu0 %v12081_v19  ;;  %v8581_v19 = vor.u32 %v12610_v8, %v8578_v60  ;;  %v8965_v11 = vor.u32 %v12706_v16, %v8962_v9  ;;  %v13465_v8 = vld [vmem:[#allocation5 + $0x1b7c] sm:$0xf0]  ;;  %v8941_v60 = vor.u32 %v12700_v48, %v8938_v20  ;;  %v8722_v14 = vld [vmem:[#allocation5 + $0x200] sm:$0xf0]  ;;  %v6273_v16 = vpop.f32.mrf.mxu2  ;;  %v12694_v9 = vld [vmem:[#allocation5 + $0x36c] sm:$0xf] }
 0x1e9   :  { %6531 = vmatpush.bf16.msra.mxu1 %v8629_v2  ;;  %v8773_v2 = vor.u32 %v12658_v56, %v8770_v12  ;;  %v8530_v56 = vld [vmem:[#allocation5 + $0x80] sm:$0xf0]  ;;  %v12646_v12 = vld [vmem:[#allocation5 + $0x1ec] sm:$0xf]  ;;  %v12640_v48 = vld [vmem:[#allocation5 + $0x1bc] sm:$0xf] }
 0x1ea   :  { %6545 = vmatpush.bf16.msra.mxu2 %v8821_v21  ;;  %v12008_v21 = vld [vmem:[#allocation5 + $0x1b98] sm:$0xf]  ;;  %v8698_v20 = vld [vmem:[#allocation5 + $0x1d0] sm:$0xf0] }
 0x1eb   :  { %6559 = vmatpush.bf16.msra.mxu3 %v9013_v24  ;;  %v14187_v24 = vadd.f32 %v6259_v61, %v6246_v6  ;;  %v12009_v23 = vor.u32 %v13471_v15, %v12008_v21  ;;  %v8914_v6 = vld [vmem:[#allocation5 + $0x380] sm:$0xf0]  ;;  %v11985_v61 = vor.u32 %v13465_v8, %v11984_v30  ;;  %v8725_v21 = vor.u32 %v12646_v12, %v8722_v14  ;;  %v11960_v15 = vld [vmem:[#allocation5 + $0x1b38] sm:$0xf]  ;;  %v11936_v30 = vld [vmem:[#allocation5 + $0x1b08] sm:$0xf] }
 0x1ec   :  { %6518 = vmatpush.bf16.msra.mxu0 %v12057_v52  ;;  %v14189_v52 = vld [vmem:[#allocation7] sm:$0x3f]  ;;  %v8917_v42 = vor.u32 %v12694_v9, %v8914_v6  ;;  %v12634_v12 = vld [vmem:[#allocation5 + $0x18c] sm:$0xf]  ;;  %v12772_v6 = vld [vmem:[#allocation5 + $0x5dc] sm:$0xf] }
 0x1ed   :  { %6532 = vmatpush.bf16.msra.mxu1 %v8605_v25  ;;  %14649 = vst [vmem:[#allocation48_spill] sm:$0xff] %v14187_v24  ;;  %v14616_v25 = vperm.slane %v14189_v52, 2  ;;  %v12688_v24 = vld [vmem:[#allocation5 + $0x33c] sm:$0xf]  ;;  %v13453_v8 = vld [vmem:[#allocation5 + $0x1b1c] sm:$0xf0] }
 0x1ee   :  { %6546 = vmatpush.bf16.msra.mxu2 %v8797_v45  ;;  %14650 = vst [vmem:[#allocation49_spill] sm:$0xff] %v14189_v52  ;;  %v8557_v45 = vor.u32 %v12604_v22, %v8554_v3  ;;  %v13459_v22 = vld [vmem:[#allocation5 + $0x1b4c] sm:$0xf0]  ;;  %v8893_v14 = vor.u32 %v12688_v24, %v8890_v13  ;;  %v8866_v9 = vld [vmem:[#allocation5 + $0x320] sm:$0xf0]  ;;  %v14196_v52 = vpop.f32.mrf.mxu0 }
 0x1ef   :  { %6560 = vmatpush.bf16.msra.mxu3 %v8989_v51  ;;  %v12598_v51 = vld [vmem:[#allocation5 + $0x6c] sm:$0xf]  ;;  %14651 = vst [vmem:[#allocation50_spill] sm:$0xff] %v14196_v52  ;;  %v9970_v52 = vld [vmem:[#allocation5 + $0xbc0] sm:$0xf0] }
 0x1f0   :  { %6519 = vmatpush.bf16.msra.mxu0 %v12033_v33  ;;  %v6274_v33 = vadd.f32 %v6273_v16, %v14616_v25  ;;  %v12682_v16 = vld [vmem:[#allocation5 + $0x30c] sm:$0xf]  ;;  %v9610_v25 = vld [vmem:[#allocation5 + $0x8f0] sm:$0xf0] }
 0x1f1   :  { %6533 = vmatpush.bf16.msra.mxu1 %v8581_v19  ;;  %v6287_v19 = vpop.f32.mrf.mxu3 }
 0x1f2   :  { %6547 = vmatpush.bf16.msra.mxu2 %v8773_v2  ;;  %v8533_v2 = vor.u32 %v12598_v51, %v8530_v56  ;;  %v14194_v3 = vadd.f32 %v6287_v19, %v6274_v33  ;;  %v12586_v51 = vld [vmem:[#allocation5 + $0xc] sm:$0xf]  ;;  %v8482_v56 = vld [vmem:[#allocation5 + $0x20] sm:$0xf0]  ;;  %v9226_v33 = vld [vmem:[#allocation5 + $0x5f0] sm:$0xf0] }
 0x1f3   :  { %6561 = vmatpush.bf16.msra.mxu3 %v8965_v11  ;;  %v12592_v11 = vld [vmem:[#allocation5 + $0x3c] sm:$0xf]  ;;  %v9229_v13 = vor.u32 %v12772_v6, %v9226_v33  ;;  %v9370_v6 = vld [vmem:[#allocation5 + $0x710] sm:$0xf0] }
 0x1f4   :  { %6520 = vmatpush.bf16.msra.mxu0 %v12009_v23  ;;  %v11961_v23 = vor.u32 %v13459_v22, %v11960_v15  ;;  %v12820_v19 = vld [vmem:[#allocation5 + $0x75c] sm:$0xf]  ;;  %v9418_v15 = vld [vmem:[#allocation5 + $0x770] sm:$0xf0] }
 0x1f5   :  { %6534 = vmatpush.bf16.msra.mxu1 %v8557_v45  ;;  %v8509_v45 = vor.u32 %v12592_v11, %v8506_v50  ;;  %v12868_v22 = vld [vmem:[#allocation5 + $0x8dc] sm:$0xf]  ;;  %v9802_v50 = vld [vmem:[#allocation5 + $0xa70] sm:$0xf0]  ;;  %v9421_v24 = vor.u32 %v12820_v19, %v9418_v15 }
 0x1f6   :  { %6548 = vmatpush.bf16.msra.mxu2 %v8749_v26  ;;  %v8701_v26 = vor.u32 %v12640_v48, %v8698_v20  ;;  %v12916_v11 = vld [vmem:[#allocation5 + $0xa5c] sm:$0xf]  ;;  %v9613_v48 = vor.u32 %v12868_v22, %v9610_v25  ;;  %v12766_v20 = vld [vmem:[#allocation5 + $0x5ac] sm:$0xf]  ;;  %v9562_v19 = vld [vmem:[#allocation5 + $0x890] sm:$0xf0] }
 0x1f7   :  { %6562 = vmatpush.bf16.msra.mxu3 %v8941_v60  ;;  %v8674_v60 = vld [vmem:[#allocation5 + $0x1a0] sm:$0xf0]  ;;  %v12856_v33 = vld [vmem:[#allocation5 + $0x87c] sm:$0xf]  ;;  %v9754_v15 = vld [vmem:[#allocation5 + $0xa10] sm:$0xf0] }
 0x1f8   :  { %6521 = vmatpush.bf16.msra.mxu0 %v11985_v61  ;;  %v11937_v61 = vor.u32 %v13453_v8, %v11936_v30  ;;  %v9394_v30 = vld [vmem:[#allocation5 + $0x740] sm:$0xf0]  ;;  %v12862_v8 = vld [vmem:[#allocation5 + $0x8ac] sm:$0xf]  ;;  %v9565_v22 = vor.u32 %v12856_v33, %v9562_v19  ;;  %v9514_v33 = vld [vmem:[#allocation5 + $0x830] sm:$0xf0] }
 0x1f9   :  { %6535 = vmatpush.bf16.msra.mxu1 %v8533_v2  ;;  %v8485_v2 = vor.u32 %v12586_v51, %v8482_v56  ;;  %v9205_v51 = vor.u32 %v12766_v20, %v9202_v7  ;;  %v14198_v56 = vpop.f32.mrf.mxu1  ;;  %v9397_v25 = vor.u32 %v12814_v29, %v9394_v30  ;;  %v12898_v20 = vld [vmem:[#allocation5 + $0x9cc] sm:$0xf] }
 0x1fa   :  { %6549 = vmatpush.bf16.msra.mxu2 %v8725_v21  ;;  %v8677_v21 = vor.u32 %v12634_v12, %v8674_v60  ;;  %14652 = vst [vmem:[#allocation51_spill] sm:$0xff] %v14198_v56  ;;  %v9589_v12 = vor.u32 %v12862_v8, %v9586_v28  ;;  %v9178_v60 = vld [vmem:[#allocation5 + $0x590] sm:$0xf0]  ;;  %v14204_v28 = vpop.f32.mrf.mxu2  ;;  %v12958_v56 = vld [vmem:[#allocation5 + $0xbac] sm:$0xf] }
 0x1fb   :  { %6563 = vmatpush.bf16.msra.mxu3 %v8917_v42  ;;  %v8869_v42 = vor.u32 %v12682_v16, %v8866_v9  ;;  %v12808_v16 = vld [vmem:[#allocation5 + $0x6fc] sm:$0xf]  ;;  %14653 = vst [vmem:[#allocation52_spill] sm:$0xff] %v14204_v28 }
 0x1fc   :  { %6522 = vmatpush.bf16.msra.mxu0 %v11961_v23  ;;  %v9805_v23 = vor.u32 %v12916_v11, %v9802_v50  ;;  %v9373_v29 = vor.u32 %v12808_v16, %v9370_v6  ;;  %v12802_v11 = vld [vmem:[#allocation5 + $0x6cc] sm:$0xf]  ;;  %v12844_v6 = vld [vmem:[#allocation5 + $0x81c] sm:$0xf] }
 0x1fd   :  { %6536 = vmatpush.bf16.msra.mxu1 %v8509_v45  ;;  %v12910_v45 = vld [vmem:[#allocation5 + $0xa2c] sm:$0xf] }
 0x1fe   :  { %6550 = vmatpush.bf16.msra.mxu2 %v8701_v26  ;;  %v9778_v26 = vld [vmem:[#allocation5 + $0xa40] sm:$0xf0] }
 0x1ff   :  { %6564 = vmatpush.bf16.msra.mxu3 %v8893_v14  ;;  %v12760_v14 = vld [vmem:[#allocation5 + $0x57c] sm:$0xf]  ;;  %v9781_v9 = vor.u32 %v12910_v45, %v9778_v26 }
 0x200   :  { %6523 = vmatpush.bf16.msra.mxu0 %v11937_v61  ;;  %v12904_v61 = vld [vmem:[#allocation5 + $0x9fc] sm:$0xf]  ;;  %v9181_v7 = vor.u32 %v12760_v14, %v9178_v60  ;;  %v6301_v30 = vpop.f32.mrf.mxu0 }
 0x201   :  { %6537 = vmatpush.bf16.msra.mxu1 %v8485_v2  ;;  %v12754_v2 = vld [vmem:[#allocation5 + $0x54c] sm:$0xf]  ;;  %v9757_v50 = vor.u32 %v12904_v61, %v9754_v15  ;;  %v6302_v45 = vadd.f32 %v6301_v30, %v14194_v3  ;;  %v12796_v14 = vld [vmem:[#allocation5 + $0x69c] sm:$0xf]  ;;  %v6315_v60 = vpop.f32.mrf.mxu1  ;;  %v9706_v15 = vld [vmem:[#allocation5 + $0x9b0] sm:$0xf0] }
 0x202   :  { %6551 = vmatpush.bf16.msra.mxu2 %v8677_v21  ;;  %v9154_v21 = vld [vmem:[#allocation5 + $0x560] sm:$0xf0]  ;;  %v12892_v61 = vld [vmem:[#allocation5 + $0x99c] sm:$0xf] }
 0x203   :  { %6565 = vmatpush.bf16.msra.mxu3 %v8869_v42  ;;  %6524 = vmatmul.bf16.vlgmr.msra.gmra.mxu0 %v14035_v53  ;;  %v9346_v42 = vld [vmem:[#allocation5 + $0x6e0] sm:$0xf0]  ;;  %v9157_v8 = vor.u32 %v12754_v2, %v9154_v21  ;;  %v6316_v19 = vadd.f32 %v6315_v60, %v6302_v45  ;;  %v12790_v21 = vld [vmem:[#allocation5 + $0x66c] sm:$0xf] }
 0x204   :  { %6572 = vmatpush.bf16.msrb.mxu0 %v9229_v13  ;;  %6538 = vmatmul.bf16.vlgmr.msra.gmra.mxu1 %v13985_v58  ;;  %v12850_v13 = vld [vmem:[#allocation5 + $0x84c] sm:$0xf]  ;;  %v9349_v26 = vor.u32 %v12802_v11, %v9346_v42  ;;  %v9106_v2 = vld [vmem:[#allocation5 + $0x500] sm:$0xf0]  ;;  %v9709_v11 = vor.u32 %v12892_v61, %v9706_v15  ;;  %v12880_v61 = vld [vmem:[#allocation5 + $0x93c] sm:$0xf] }
 0x205   :  { %6586 = vmatpush.bf16.msrb.mxu1 %v9421_v24  ;;  %6552 = vmatmul.bf16.vlgmr.msra.gmra.mxu2 %v13991_v10  ;;  %v9538_v24 = vld [vmem:[#allocation5 + $0x860] sm:$0xf0]  ;;  %v9658_v15 = vld [vmem:[#allocation5 + $0x950] sm:$0xf0] }
 0x206   :  { %6600 = vmatpush.bf16.msrb.mxu2 %v9613_v48  ;;  %6566 = vmatmul.bf16.vlgmr.msra.gmra.mxu3 %v13987_v1  ;;  %v14206_v48 = vpop.f32.mrf.mxu3  ;;  %v9298_v42 = vld [vmem:[#allocation5 + $0x680] sm:$0xf0] }
 0x207   :  { %6614 = vmatpush.bf16.msrb.mxu3 %v9805_v23  ;;  %14654 = vst [vmem:[#allocation53_spill] sm:$0xff] %v14206_v48  ;;  %v9730_v23 = vld [vmem:[#allocation5 + $0x9e0] sm:$0xf0]  ;;  %v13054_v48 = vld [vmem:[#allocation5 + $0xeac] sm:$0xf] }
 0x208   :  { %6573 = vmatpush.bf16.msrb.mxu0 %v9205_v51  ;;  %v9541_v51 = vor.u32 %v12850_v13, %v9538_v24  ;;  %v9733_v16 = vor.u32 %v12898_v20, %v9730_v23  ;;  %v9490_v13 = vld [vmem:[#allocation5 + $0x800] sm:$0xf0]  ;;  %v6329_v24 = vpop.f32.mrf.mxu2  ;;  %v12886_v20 = vld [vmem:[#allocation5 + $0x96c] sm:$0xf] }
 0x209   :  { %6587 = vmatpush.bf16.msrb.mxu1 %v9397_v25  ;;  %v12748_v25 = vld [vmem:[#allocation5 + $0x51c] sm:$0xf]  ;;  %v9682_v23 = vld [vmem:[#allocation5 + $0x980] sm:$0xf0]  ;;  %v6330_v30 = vadd.f32 %v6329_v24, %v6316_v19 }
 0x20a   :  { %6601 = vmatpush.bf16.msrb.mxu2 %v9589_v12  ;;  %v9130_v12 = vld [vmem:[#allocation5 + $0x530] sm:$0xf0]  ;;  %v9634_v24 = vld [vmem:[#allocation5 + $0x920] sm:$0xf0] }
 0x20b   :  { %6615 = vmatpush.bf16.msrb.mxu3 %v9781_v9  ;;  %v9322_v9 = vld [vmem:[#allocation5 + $0x6b0] sm:$0xf0] }
 0x20c   :  { %6574 = vmatpush.bf16.msrb.mxu0 %v9181_v7  ;;  %v9133_v7 = vor.u32 %v12748_v25, %v9130_v12  ;;  %v9325_v3 = vor.u32 %v12796_v14, %v9322_v9  ;;  %v12736_v25 = vld [vmem:[#allocation5 + $0x4bc] sm:$0xf]  ;;  %v9082_v12 = vld [vmem:[#allocation5 + $0x4d0] sm:$0xf0] }
 0x20d   :  { %6588 = vmatpush.bf16.msrb.mxu1 %v9373_v29  ;;  %v9517_v29 = vor.u32 %v12844_v6, %v9514_v33  ;;  %v12784_v14 = vld [vmem:[#allocation5 + $0x63c] sm:$0xf]  ;;  %v9274_v9 = vld [vmem:[#allocation5 + $0x650] sm:$0xf0]  ;;  %v9085_v19 = vor.u32 %v12736_v25, %v9082_v12 }
 0x20e   :  { %6602 = vmatpush.bf16.msrb.mxu2 %v9565_v22  ;;  %v12742_v22 = vld [vmem:[#allocation5 + $0x4ec] sm:$0xf]  ;;  %v12832_v6 = vld [vmem:[#allocation5 + $0x7bc] sm:$0xf]  ;;  %v9466_v33 = vld [vmem:[#allocation5 + $0x7d0] sm:$0xf0] }
 0x20f   :  { %6616 = vmatpush.bf16.msrb.mxu3 %v9757_v50  ;;  %v12838_v50 = vld [vmem:[#allocation5 + $0x7ec] sm:$0xf]  ;;  %v9109_v45 = vor.u32 %v12742_v22, %v9106_v2  ;;  %v9058_v22 = vld [vmem:[#allocation5 + $0x4a0] sm:$0xf0]  ;;  %v13060_v25 = vld [vmem:[#allocation5 + $0xedc] sm:$0xf] }
 0x210   :  { %6575 = vmatpush.bf16.msrb.mxu0 %v9157_v8  ;;  %v6343_v8 = vpop.f32.mrf.mxu3  ;;  %v12778_v2 = vld [vmem:[#allocation5 + $0x60c] sm:$0xf]  ;;  %v10378_v12 = vld [vmem:[#allocation5 + $0xef0] sm:$0xf0] }
 0x211   :  { %6589 = vmatpush.bf16.msrb.mxu1 %v9349_v26  ;;  %v9301_v26 = vor.u32 %v12790_v21, %v9298_v42  ;;  %v14209_v60 = vadd.f32 %v6343_v8, %v6330_v30  ;;  %v9250_v21 = vld [vmem:[#allocation5 + $0x620] sm:$0xf0]  ;;  %v12826_v42 = vld [vmem:[#allocation5 + $0x78c] sm:$0xf]  ;;  %v13012_v30 = vld [vmem:[#allocation5 + $0xd5c] sm:$0xf] }
 0x212   :  { %6603 = vmatpush.bf16.msrb.mxu2 %v9541_v51  ;;  %v9493_v51 = vor.u32 %v12838_v50, %v9490_v13  ;;  %v9661_v50 = vor.u32 %v12880_v61, %v9658_v15  ;;  %v12874_v13 = vld [vmem:[#allocation5 + $0x90c] sm:$0xf]  ;;  %v10186_v8 = vld [vmem:[#allocation5 + $0xd70] sm:$0xf0]  ;;  %v10381_v61 = vor.u32 %v13060_v25, %v10378_v12  ;;  %v14211_v15 = vpop.f32.mrf.mxu0  ;;  %v13096_v25 = vld [vmem:[#allocation5 + $0xffc] sm:$0xf] }
 0x213   :  { %6617 = vmatpush.bf16.msrb.mxu3 %v9733_v16  ;;  %v9685_v16 = vor.u32 %v12886_v20, %v9682_v23  ;;  %v12964_v20 = vld [vmem:[#allocation5 + $0xbdc] sm:$0xf]  ;;  %v9994_v23 = vld [vmem:[#allocation5 + $0xbf0] sm:$0xf0]  ;;  %14655 = vst [vmem:[#allocation54_spill] sm:$0xff] %v14211_v15 }
 0x214   :  { %6576 = vmatpush.bf16.msrb.mxu0 %v9133_v7  ;;  %v12730_v7 = vld [vmem:[#allocation5 + $0x48c] sm:$0xf]  ;;  %v11122_v15 = vld [vmem:[#allocation5 + $0x14c0] sm:$0xf0] }
 0x215   :  { %6590 = vmatpush.bf16.msrb.mxu1 %v9325_v3  ;;  %v9277_v3 = vor.u32 %v12784_v14, %v9274_v9  ;;  %v13108_v14 = vld [vmem:[#allocation5 + $0x105c] sm:$0xf]  ;;  %v10570_v9 = vld [vmem:[#allocation5 + $0x1070] sm:$0xf0] }
 0x216   :  { %6604 = vmatpush.bf16.msrb.mxu2 %v9517_v29  ;;  %v9469_v29 = vor.u32 %v12832_v6, %v9466_v33  ;;  %v9997_v6 = vor.u32 %v12964_v20, %v9994_v23  ;;  %v10189_v33 = vor.u32 %v13012_v30, %v10186_v8  ;;  %v13000_v20 = vld [vmem:[#allocation5 + $0xcfc] sm:$0xf]  ;;  %v10138_v30 = vld [vmem:[#allocation5 + $0xd10] sm:$0xf0] }
 0x217   :  { %6618 = vmatpush.bf16.msrb.mxu3 %v9709_v11  ;;  %v9442_v11 = vld [vmem:[#allocation5 + $0x7a0] sm:$0xf0]  ;;  %v10330_v8 = vld [vmem:[#allocation5 + $0xe90] sm:$0xf0]  ;;  %v10141_v12 = vor.u32 %v13000_v20, %v10138_v30  ;;  %v12988_v20 = vld [vmem:[#allocation5 + $0xc9c] sm:$0xf] }
 0x218   :  { %6577 = vmatpush.bf16.msrb.mxu0 %v9109_v45  ;;  %v9061_v45 = vor.u32 %v12730_v7, %v9058_v22  ;;  %v10573_v7 = vor.u32 %v13108_v14, %v10570_v9  ;;  %v10162_v22 = vld [vmem:[#allocation5 + $0xd40] sm:$0xf0]  ;;  %v12994_v9 = vld [vmem:[#allocation5 + $0xccc] sm:$0xf] }
 0x219   :  { %6591 = vmatpush.bf16.msrb.mxu1 %v9301_v26  ;;  %v9253_v26 = vor.u32 %v12778_v2, %v9250_v21  ;;  %v10546_v2 = vld [vmem:[#allocation5 + $0x1040] sm:$0xf0]  ;;  %v14213_v21 = vpop.f32.mrf.mxu1 }
 0x21a   :  { %6605 = vmatpush.bf16.msrb.mxu2 %v9493_v51  ;;  %v9445_v51 = vor.u32 %v12826_v42, %v9442_v11  ;;  %14656 = vst [vmem:[#allocation55_spill] sm:$0xff] %v14213_v21  ;;  %v9973_v42 = vor.u32 %v12958_v56, %v9970_v52  ;;  %v10522_v52 = vld [vmem:[#allocation5 + $0x1010] sm:$0xf0]  ;;  %v9922_v14 = vld [vmem:[#allocation5 + $0xb60] sm:$0xf0] }
 0x21b   :  { %6619 = vmatpush.bf16.msrb.mxu3 %v9685_v16  ;;  %v9637_v16 = vor.u32 %v12874_v13, %v9634_v24  ;;  %v12952_v13 = vld [vmem:[#allocation5 + $0xb7c] sm:$0xf]  ;;  %v9946_v24 = vld [vmem:[#allocation5 + $0xb90] sm:$0xf0]  ;;  %v13198_v21 = vld [vmem:[#allocation5 + $0x132c] sm:$0xf] }
 0x21c   :  { %6578 = vmatpush.bf16.msrb.mxu0 %v9085_v19  ;;  %v13006_v19 = vld [vmem:[#allocation5 + $0xd2c] sm:$0xf]  ;;  %v9949_v56 = vor.u32 %v12952_v13, %v9946_v24  ;;  %v12940_v13 = vld [vmem:[#allocation5 + $0xb1c] sm:$0xf]  ;;  %v9898_v24 = vld [vmem:[#allocation5 + $0xb30] sm:$0xf0] }
 0x21d   :  { %6592 = vmatpush.bf16.msrb.mxu1 %v9277_v3  ;;  %v10354_v3 = vld [vmem:[#allocation5 + $0xec0] sm:$0xf0] }
 0x21e   :  { %6606 = vmatpush.bf16.msrb.mxu2 %v9469_v29  ;;  %v13102_v29 = vld [vmem:[#allocation5 + $0x102c] sm:$0xf]  ;;  %v10357_v11 = vor.u32 %v13054_v48, %v10354_v3  ;;  %v14219_v48 = vpop.f32.mrf.mxu2  ;;  %v10498_v3 = vld [vmem:[#allocation5 + $0xfe0] sm:$0xf0] }
 0x21f   :  { %6620 = vmatpush.bf16.msrb.mxu3 %v9661_v50  ;;  %v10165_v50 = vor.u32 %v13006_v19, %v10162_v22  ;;  %v10549_v23 = vor.u32 %v13102_v29, %v10546_v2  ;;  %14657 = vst [vmem:[#allocation56_spill] sm:$0xff] %v14219_v48  ;;  %v10306_v19 = vld [vmem:[#allocation5 + $0xe60] sm:$0xf0]  ;;  %v13090_v22 = vld [vmem:[#allocation5 + $0xfcc] sm:$0xf] }
 0x220   :  { %6579 = vmatpush.bf16.msrb.mxu0 %v9061_v45  ;;  %v13048_v45 = vld [vmem:[#allocation5 + $0xe7c] sm:$0xf]  ;;  %v10738_v48 = vld [vmem:[#allocation5 + $0x11c0] sm:$0xf0] }
 0x221   :  { %6593 = vmatpush.bf16.msrb.mxu1 %v9253_v26  ;;  %v10333_v26 = vor.u32 %v13048_v45, %v10330_v8  ;;  %v10090_v45 = vld [vmem:[#allocation5 + $0xcb0] sm:$0xf0]  ;;  %v13036_v8 = vld [vmem:[#allocation5 + $0xe1c] sm:$0xf] }
 0x222   :  { %6607 = vmatpush.bf16.msrb.mxu2 %v9445_v51  ;;  %v12946_v51 = vld [vmem:[#allocation5 + $0xb4c] sm:$0xf] }
 0x223   :  { %6621 = vmatpush.bf16.msrb.mxu3 %v9637_v16  ;;  %6580 = vmatmul.bf16.vlgmr.msrb.gmra.mxu0 %v13993_v17  ;;  %v10525_v16 = vor.u32 %v13096_v25, %v10522_v52  ;;  %v9925_v2 = vor.u32 %v12946_v51, %v9922_v14  ;;  %v10282_v25 = vld [vmem:[#allocation5 + $0xe30] sm:$0xf0]  ;;  %v13084_v52 = vld [vmem:[#allocation5 + $0xf9c] sm:$0xf]  ;;  %v9874_v51 = vld [vmem:[#allocation5 + $0xb00] sm:$0xf0] }
 0x224   :  { %6628 = vmatpush.bf16.msra.mxu0 %v9997_v6  ;;  %6594 = vmatmul.bf16.vlgmr.msrb.gmra.mxu1 %v13997_v39  ;;  %v14221_v6 = vpop.f32.mrf.mxu3  ;;  %v12982_v14 = vld [vmem:[#allocation5 + $0xc6c] sm:$0xf] }
 0x225   :  { %6642 = vmatpush.bf16.msra.mxu1 %v10189_v33  ;;  %6608 = vmatmul.bf16.vlgmr.msrb.gmra.mxu2 %v14001_v44  ;;  %14658 = vst [vmem:[#allocation57_spill] sm:$0xff] %v14221_v6  ;;  %v10114_v33 = vld [vmem:[#allocation5 + $0xce0] sm:$0xf0]  ;;  %v10474_v6 = vld [vmem:[#allocation5 + $0xfb0] sm:$0xf0] }
 0x226   :  { %6656 = vmatpush.bf16.msra.mxu2 %v10381_v61  ;;  %6622 = vmatmul.bf16.vlgmr.msrb.gmra.mxu3 %v13999_v43  ;;  %v13042_v61 = vld [vmem:[#allocation5 + $0xe4c] sm:$0xf] }
 0x227   :  { %6670 = vmatpush.bf16.msra.mxu3 %v10573_v7  ;;  %v6357_v7 = vpop.f32.mrf.mxu0 }
 0x228   :  { %6629 = vmatpush.bf16.msra.mxu0 %v9973_v42  ;;  %v6358_v29 = vadd.f32 %v6357_v7, %v14209_v60  ;;  %v10117_v42 = vor.u32 %v12994_v9, %v10114_v33  ;;  %v10093_v60 = vor.u32 %v12988_v20, %v10090_v45  ;;  %v10477_v9 = vor.u32 %v13084_v52, %v10474_v6  ;;  %v6385_v33 = vpop.f32.mrf.mxu2  ;;  %v12976_v20 = vld [vmem:[#allocation5 + $0xc3c] sm:$0xf] }
 0x229   :  { %6643 = vmatpush.bf16.msra.mxu1 %v10165_v50  ;;  %v10309_v50 = vor.u32 %v13042_v61, %v10306_v19  ;;  %v13030_v61 = vld [vmem:[#allocation5 + $0xdec] sm:$0xf]  ;;  %v10258_v19 = vld [vmem:[#allocation5 + $0xe00] sm:$0xf0]  ;;  %v13024_v45 = vld [vmem:[#allocation5 + $0xdbc] sm:$0xf] }
 0x22a   :  { %6657 = vmatpush.bf16.msra.mxu2 %v10357_v11  ;;  %v6371_v11 = vpop.f32.mrf.mxu1 }
 0x22b   :  { %6671 = vmatpush.bf16.msra.mxu3 %v10549_v23  ;;  %v10501_v23 = vor.u32 %v13090_v22, %v10498_v3  ;;  %v6372_v30 = vadd.f32 %v6371_v11, %v6358_v29  ;;  %v13078_v22 = vld [vmem:[#allocation5 + $0xf6c] sm:$0xf]  ;;  %v10450_v3 = vld [vmem:[#allocation5 + $0xf80] sm:$0xf0]  ;;  %v10261_v11 = vor.u32 %v13030_v61, %v10258_v19 }
 0x22c   :  { %6630 = vmatpush.bf16.msra.mxu0 %v9949_v56  ;;  %v9901_v56 = vor.u32 %v12940_v13, %v9898_v24  ;;  %v6399_v29 = vpop.f32.mrf.mxu3  ;;  %v12928_v13 = vld [vmem:[#allocation5 + $0xabc] sm:$0xf]  ;;  %v9850_v24 = vld [vmem:[#allocation5 + $0xad0] sm:$0xf0]  ;;  %v10453_v6 = vor.u32 %v13078_v22, %v10450_v3  ;;  %v13066_v61 = vld [vmem:[#allocation5 + $0xf0c] sm:$0xf] }
 0x22d   :  { %6644 = vmatpush.bf16.msra.mxu1 %v10141_v12  ;;  %v10285_v12 = vor.u32 %v13036_v8, %v10282_v25  ;;  %v6386_v7 = vadd.f32 %v6385_v33, %v6372_v30  ;;  %v10234_v8 = vld [vmem:[#allocation5 + $0xdd0] sm:$0xf0]  ;;  %v13072_v30 = vld [vmem:[#allocation5 + $0xf3c] sm:$0xf]  ;;  %v9853_v52 = vor.u32 %v12928_v13, %v9850_v24  ;;  %v13018_v33 = vld [vmem:[#allocation5 + $0xd8c] sm:$0xf] }
 0x22e   :  { %6658 = vmatpush.bf16.msra.mxu2 %v10333_v26  ;;  %v12934_v26 = vld [vmem:[#allocation5 + $0xaec] sm:$0xf]  ;;  %v10426_v25 = vld [vmem:[#allocation5 + $0xf50] sm:$0xf0]  ;;  %v10402_v19 = vld [vmem:[#allocation5 + $0xf20] sm:$0xf0] }
 0x22f   :  { %6672 = vmatpush.bf16.msra.mxu3 %v10525_v16  ;;  %v10066_v16 = vld [vmem:[#allocation5 + $0xc80] sm:$0xf0]  ;;  %v10762_v22 = vld [vmem:[#allocation5 + $0x11f0] sm:$0xf0]  ;;  %v13204_v3 = vld [vmem:[#allocation5 + $0x135c] sm:$0xf]  ;;  %v14226_v28 = vpop.f32.mrf.mxu0 }
 0x230   :  { %6631 = vmatpush.bf16.msra.mxu0 %v9925_v2  ;;  %v9877_v2 = vor.u32 %v12934_v26, %v9874_v51  ;;  %v9826_v26 = vld [vmem:[#allocation5 + $0xaa0] sm:$0xf0]  ;;  %v12970_v51 = vld [vmem:[#allocation5 + $0xc0c] sm:$0xf]  ;;  %v13252_v13 = vld [vmem:[#allocation5 + $0x14dc] sm:$0xf] }
 0x231   :  { %6645 = vmatpush.bf16.msra.mxu1 %v10117_v42  ;;  %v14224_v42 = vadd.f32 %v6399_v29, %v6386_v7  ;;  %v13156_v7 = vld [vmem:[#allocation5 + $0x11dc] sm:$0xf]  ;;  %v11146_v24 = vld [vmem:[#allocation5 + $0x14f0] sm:$0xf0]  ;;  %14659 = vst [vmem:[#allocation58_spill] sm:$0xff] %v14226_v28 }
 0x232   :  { %6659 = vmatpush.bf16.msra.mxu2 %v10309_v50  ;;  %v10069_v50 = vor.u32 %v12982_v14, %v10066_v16  ;;  %v10018_v14 = vld [vmem:[#allocation5 + $0xc20] sm:$0xf0]  ;;  %v10429_v16 = vor.u32 %v13072_v30, %v10426_v25  ;;  %v11149_v30 = vor.u32 %v13252_v13, %v11146_v24  ;;  %v13150_v25 = vld [vmem:[#allocation5 + $0x11ac] sm:$0xf] }
 0x233   :  { %6673 = vmatpush.bf16.msra.mxu3 %v10501_v23  ;;  %v10042_v23 = vld [vmem:[#allocation5 + $0xc50] sm:$0xf0]  ;;  %v13138_v24 = vld [vmem:[#allocation5 + $0x114c] sm:$0xf] }
 0x234   :  { %6632 = vmatpush.bf16.msra.mxu0 %v9901_v56  ;;  %v12922_v56 = vld [vmem:[#allocation5 + $0xa8c] sm:$0xf] }
 0x235   :  { %6646 = vmatpush.bf16.msra.mxu1 %v10093_v60  ;;  %v10045_v60 = vor.u32 %v12976_v20, %v10042_v23  ;;  %v9829_v29 = vor.u32 %v12922_v56, %v9826_v26  ;;  %v13300_v20 = vld [vmem:[#allocation5 + $0x165c] sm:$0xf]  ;;  %v11338_v23 = vld [vmem:[#allocation5 + $0x1670] sm:$0xf0]  ;;  %v10930_v56 = vld [vmem:[#allocation5 + $0x1340] sm:$0xf0] }
 0x236   :  { %6660 = vmatpush.bf16.msra.mxu2 %v10285_v12  ;;  %v10237_v12 = vor.u32 %v13024_v45, %v10234_v8  ;;  %v10765_v45 = vor.u32 %v13156_v7, %v10762_v22  ;;  %v13246_v26 = vld [vmem:[#allocation5 + $0x14ac] sm:$0xf]  ;;  %v10906_v22 = vld [vmem:[#allocation5 + $0x1310] sm:$0xf0] }
 0x237   :  { %6674 = vmatpush.bf16.msra.mxu3 %v10477_v9  ;;  %v10210_v9 = vld [vmem:[#allocation5 + $0xda0] sm:$0xf0] }
 0x238   :  { %6633 = vmatpush.bf16.msra.mxu0 %v9877_v2  ;;  %v10954_v2 = vld [vmem:[#allocation5 + $0x1370] sm:$0xf0] }
 0x239   :  { %6647 = vmatpush.bf16.msra.mxu1 %v10069_v50  ;;  %v10021_v50 = vor.u32 %v12970_v51, %v10018_v14  ;;  %v10957_v8 = vor.u32 %v13204_v3, %v10954_v2  ;;  %v14228_v51 = vpop.f32.mrf.mxu1  ;;  %v10741_v14 = vor.u32 %v13150_v25, %v10738_v48  ;;  %v13240_v3 = vld [vmem:[#allocation5 + $0x147c] sm:$0xf]  ;;  %v11290_v48 = vld [vmem:[#allocation5 + $0x1610] sm:$0xf0] }
 0x23a   :  { %6661 = vmatpush.bf16.msra.mxu2 %v10261_v11  ;;  %v10213_v11 = vor.u32 %v13018_v33, %v10210_v9  ;;  %14660 = vst [vmem:[#allocation59_spill] sm:$0xff] %v14228_v51  ;;  %v10933_v33 = vor.u32 %v13198_v21, %v10930_v56  ;;  %v13144_v9 = vld [vmem:[#allocation5 + $0x117c] sm:$0xf]  ;;  %v11266_v56 = vld [vmem:[#allocation5 + $0x15e0] sm:$0xf0] }
 0x23b   :  { %6675 = vmatpush.bf16.msra.mxu3 %v10453_v6  ;;  %v10405_v6 = vor.u32 %v13066_v61, %v10402_v19  ;;  %v10714_v61 = vld [vmem:[#allocation5 + $0x1190] sm:$0xf0]  ;;  %v13192_v19 = vld [vmem:[#allocation5 + $0x12fc] sm:$0xf]  ;;  %v11890_v51 = vld [vmem:[#allocation5 + $0x1ac0] sm:$0xf0] }
 0x23c   :  { %6634 = vmatpush.bf16.msra.mxu0 %v9853_v52  ;;  %v11341_v52 = vor.u32 %v13300_v20, %v11338_v23  ;;  %v13288_v2 = vld [vmem:[#allocation5 + $0x15fc] sm:$0xf]  ;;  %v10909_v21 = vor.u32 %v13192_v19, %v10906_v22  ;;  %v14234_v20 = vpop.f32.mrf.mxu2  ;;  %v10858_v22 = vld [vmem:[#allocation5 + $0x12b0] sm:$0xf0] }
 0x23d   :  { %6648 = vmatpush.bf16.msra.mxu1 %v10045_v60  ;;  %v13294_v60 = vld [vmem:[#allocation5 + $0x162c] sm:$0xf]  ;;  %14661 = vst [vmem:[#allocation60_spill] sm:$0xff] %v14234_v20  ;;  %v11293_v23 = vor.u32 %v13288_v2, %v11290_v48  ;;  %v13276_v2 = vld [vmem:[#allocation5 + $0x159c] sm:$0xf] }
 0x23e   :  { %6662 = vmatpush.bf16.msra.mxu2 %v10237_v12  ;;  %v11314_v12 = vld [vmem:[#allocation5 + $0x1640] sm:$0xf0]  ;;  %v11242_v48 = vld [vmem:[#allocation5 + $0x15b0] sm:$0xf0]  ;;  %v13390_v20 = vld [vmem:[#allocation5 + $0x192c] sm:$0xf] }
 0x23f   :  { %6676 = vmatpush.bf16.msra.mxu3 %v10429_v16  ;;  %v11125_v16 = vor.u32 %v13246_v26, %v11122_v15  ;;  %v11317_v7 = vor.u32 %v13294_v60, %v11314_v12  ;;  %v10717_v15 = vor.u32 %v13144_v9, %v10714_v61  ;;  %v10666_v9 = vld [vmem:[#allocation5 + $0x1130] sm:$0xf0]  ;;  %v13180_v61 = vld [vmem:[#allocation5 + $0x129c] sm:$0xf] }
 0x240   :  { %6635 = vmatpush.bf16.msra.mxu0 %v9829_v29  ;;  %v11098_v29 = vld [vmem:[#allocation5 + $0x1490] sm:$0xf0]  ;;  %v6413_v25 = vpop.f32.mrf.mxu0 }
 0x241   :  { %6649 = vmatpush.bf16.msra.mxu1 %v10021_v50  ;;  %v11101_v13 = vor.u32 %v13240_v3, %v11098_v29  ;;  %v10690_v50 = vld [vmem:[#allocation5 + $0x1160] sm:$0xf0]  ;;  %v6414_v26 = vadd.f32 %v6413_v25, %v14224_v42  ;;  %v6427_v12 = vpop.f32.mrf.mxu1  ;;  %v13228_v3 = vld [vmem:[#allocation5 + $0x141c] sm:$0xf]  ;;  %v11050_v29 = vld [vmem:[#allocation5 + $0x1430] sm:$0xf0]  ;;  %v10861_v42 = vor.u32 %v13180_v61, %v10858_v22 }
 0x242   :  { %6663 = vmatpush.bf16.msra.mxu2 %v10213_v11  ;;  %v13186_v11 = vld [vmem:[#allocation5 + $0x12cc] sm:$0xf]  ;;  %v10693_v60 = vor.u32 %v13138_v24, %v10690_v50  ;;  %v10642_v24 = vld [vmem:[#allocation5 + $0x1100] sm:$0xf0]  ;;  %v13168_v61 = vld [vmem:[#allocation5 + $0x123c] sm:$0xf] }
 0x243   :  { %6677 = vmatpush.bf16.msra.mxu3 %v10405_v6  ;;  %6636 = vmatmul.bf16.vlgmr.msra.gmra.mxu0 %v14003_v47  ;;  %v10882_v6 = vld [vmem:[#allocation5 + $0x12e0] sm:$0xf0]  ;;  %v13174_v50 = vld [vmem:[#allocation5 + $0x126c] sm:$0xf]  ;;  %v10810_v22 = vld [vmem:[#allocation5 + $0x1250] sm:$0xf0] }
 0x244   :  { %6684 = vmatpush.bf16.msrb.mxu0 %v10765_v45  ;;  %6650 = vmatmul.bf16.vlgmr.msra.gmra.mxu1 %v14009_v31  ;;  %v13234_v45 = vld [vmem:[#allocation5 + $0x144c] sm:$0xf] }
 0x245   :  { %6698 = vmatpush.bf16.msrb.mxu1 %v10957_v8  ;;  %6664 = vmatmul.bf16.vlgmr.msra.gmra.mxu2 %v14013_v36  ;;  %v11074_v8 = vld [vmem:[#allocation5 + $0x1460] sm:$0xf0] }
 0x246   :  { %6712 = vmatpush.bf16.msrb.mxu2 %v11149_v30  ;;  %6678 = vmatmul.bf16.vlgmr.msra.gmra.mxu3 %v14011_v35  ;;  %v14236_v30 = vpop.f32.mrf.mxu3 }
 0x247   :  { %6726 = vmatpush.bf16.msrb.mxu3 %v11341_v52  ;;  %14662 = vst [vmem:[#allocation61_spill] sm:$0xff] %v14236_v30  ;;  %v13282_v52 = vld [vmem:[#allocation5 + $0x15cc] sm:$0xf]  ;;  %v11506_v30 = vld [vmem:[#allocation5 + $0x17c0] sm:$0xf0] }
 0x248   :  { %6685 = vmatpush.bf16.msrb.mxu0 %v10741_v14  ;;  %v10885_v14 = vor.u32 %v13186_v11, %v10882_v6  ;;  %v11269_v19 = vor.u32 %v13282_v52, %v11266_v56  ;;  %v11245_v11 = vor.u32 %v13276_v2, %v11242_v48  ;;  %v6441_v6 = vpop.f32.mrf.mxu2  ;;  %v13270_v56 = vld [vmem:[#allocation5 + $0x156c] sm:$0xf]  ;;  %v11194_v2 = vld [vmem:[#allocation5 + $0x1550] sm:$0xf0]  ;;  %v14241_v28 = vpop.f32.mrf.mxu0 }
 0x249   :  { %6699 = vmatpush.bf16.msrb.mxu1 %v10933_v33  ;;  %v11077_v33 = vor.u32 %v13234_v45, %v11074_v8  ;;  %v13222_v45 = vld [vmem:[#allocation5 + $0x13ec] sm:$0xf]  ;;  %v11026_v8 = vld [vmem:[#allocation5 + $0x1400] sm:$0xf0]  ;;  %14663 = vst [vmem:[#allocation62_spill] sm:$0xff] %v14241_v28 }
 0x24a   :  { %6713 = vmatpush.bf16.msrb.mxu2 %v11125_v16  ;;  %v13132_v16 = vld [vmem:[#allocation5 + $0x111c] sm:$0xf] }
 0x24b   :  { %6727 = vmatpush.bf16.msrb.mxu3 %v11317_v7  ;;  %v6428_v7 = vadd.f32 %v6427_v12, %v6414_v26  ;;  %v11218_v26 = vld [vmem:[#allocation5 + $0x1580] sm:$0xf0] }
 0x24c   :  { %6686 = vmatpush.bf16.msrb.mxu0 %v10717_v15  ;;  %v10669_v15 = vor.u32 %v13132_v16, %v10666_v9  ;;  %v13120_v16 = vld [vmem:[#allocation5 + $0x10bc] sm:$0xf]  ;;  %v10618_v9 = vld [vmem:[#allocation5 + $0x10d0] sm:$0xf0] }
 0x24d   :  { %6700 = vmatpush.bf16.msrb.mxu1 %v10909_v21  ;;  %v11053_v21 = vor.u32 %v13228_v3, %v11050_v29  ;;  %v6442_v25 = vadd.f32 %v6441_v6, %v6428_v7  ;;  %v13216_v3 = vld [vmem:[#allocation5 + $0x13bc] sm:$0xf]  ;;  %v11002_v29 = vld [vmem:[#allocation5 + $0x13d0] sm:$0xf0]  ;;  %v10621_v48 = vor.u32 %v13120_v16, %v10618_v9  ;;  %v13210_v6 = vld [vmem:[#allocation5 + $0x138c] sm:$0xf] }
 0x24e   :  { %6714 = vmatpush.bf16.msrb.mxu2 %v11101_v13  ;;  %v13126_v13 = vld [vmem:[#allocation5 + $0x10ec] sm:$0xf]  ;;  %v6455_v52 = vpop.f32.mrf.mxu3  ;;  %v13264_v7 = vld [vmem:[#allocation5 + $0x153c] sm:$0xf]  ;;  %v11914_v9 = vld [vmem:[#allocation5 + $0x1af0] sm:$0xf0] }
 0x24f   :  { %6728 = vmatpush.bf16.msrb.mxu3 %v11293_v23  ;;  %v10834_v23 = vld [vmem:[#allocation5 + $0x1280] sm:$0xf0]  ;;  %v14239_v12 = vadd.f32 %v6455_v52, %v6442_v25  ;;  %v13348_v25 = vld [vmem:[#allocation5 + $0x17dc] sm:$0xf]  ;;  %v11530_v52 = vld [vmem:[#allocation5 + $0x17f0] sm:$0xf0] }
 0x250   :  { %6687 = vmatpush.bf16.msrb.mxu0 %v10693_v60  ;;  %v10645_v60 = vor.u32 %v13126_v13, %v10642_v24  ;;  %v10594_v13 = vld [vmem:[#allocation5 + $0x10a0] sm:$0xf0]  ;;  %v13162_v24 = vld [vmem:[#allocation5 + $0x120c] sm:$0xf]  ;;  %v13444_v16 = vld [vmem:[#allocation5 + $0x1adc] sm:$0xf] }
 0x251   :  { %6701 = vmatpush.bf16.msrb.mxu1 %v10885_v14  ;;  %v10837_v14 = vor.u32 %v13174_v50, %v10834_v23  ;;  %v10786_v50 = vld [vmem:[#allocation5 + $0x1220] sm:$0xf0]  ;;  %v11197_v23 = vor.u32 %v13264_v7, %v11194_v2  ;;  %v11917_v7 = vor.u32 %v13444_v16, %v11914_v9  ;;  %v13342_v2 = vld [vmem:[#allocation5 + $0x17ac] sm:$0xf] }
 0x252   :  { %6715 = vmatpush.bf16.msrb.mxu2 %v11077_v33  ;;  %v11029_v33 = vor.u32 %v13222_v45, %v11026_v8  ;;  %v13258_v45 = vld [vmem:[#allocation5 + $0x150c] sm:$0xf]  ;;  %v11170_v8 = vld [vmem:[#allocation5 + $0x1520] sm:$0xf0] }
 0x253   :  { %6729 = vmatpush.bf16.msrb.mxu3 %v11269_v19  ;;  %v11221_v19 = vor.u32 %v13270_v56, %v11218_v26  ;;  %v13396_v56 = vld [vmem:[#allocation5 + $0x195c] sm:$0xf]  ;;  %v13330_v9 = vld [vmem:[#allocation5 + $0x174c] sm:$0xf] }
 0x254   :  { %6688 = vmatpush.bf16.msrb.mxu0 %v10669_v15  ;;  %v13114_v15 = vld [vmem:[#allocation5 + $0x108c] sm:$0xf] }
 0x255   :  { %6702 = vmatpush.bf16.msrb.mxu1 %v10861_v42  ;;  %v10813_v42 = vor.u32 %v13168_v61, %v10810_v22  ;;  %v10597_v26 = vor.u32 %v13114_v15, %v10594_v13  ;;  %v13492_v61 = vld [vmem:[#allocation5 + $0x1c5c] sm:$0xf]  ;;  %v12106_v22 = vld [vmem:[#allocation5 + $0x1c70] sm:$0xf0]  ;;  %v11698_v15 = vld [vmem:[#allocation5 + $0x1940] sm:$0xf0] }
 0x256   :  { %6716 = vmatpush.bf16.msrb.mxu2 %v11053_v21  ;;  %v11005_v21 = vor.u32 %v13216_v3, %v11002_v29  ;;  %v11533_v3 = vor.u32 %v13348_v25, %v11530_v52  ;;  %v13438_v13 = vld [vmem:[#allocation5 + $0x1aac] sm:$0xf]  ;;  %v11674_v52 = vld [vmem:[#allocation5 + $0x1910] sm:$0xf0] }
 0x257   :  { %6730 = vmatpush.bf16.msrb.mxu3 %v11245_v11  ;;  %v10978_v11 = vld [vmem:[#allocation5 + $0x13a0] sm:$0xf0] }
 0x258   :  { %6689 = vmatpush.bf16.msrb.mxu0 %v10645_v60  ;;  %v11722_v60 = vld [vmem:[#allocation5 + $0x1970] sm:$0xf0] }
 0x259   :  { %6703 = vmatpush.bf16.msrb.mxu1 %v10837_v14  ;;  %v10789_v14 = vor.u32 %v13162_v24, %v10786_v50  ;;  %v11725_v29 = vor.u32 %v13396_v56, %v11722_v60  ;;  %v14243_v24 = vpop.f32.mrf.mxu1  ;;  %v11509_v50 = vor.u32 %v13342_v2, %v11506_v30  ;;  %v13432_v56 = vld [vmem:[#allocation5 + $0x1a7c] sm:$0xf]  ;;  %v12058_v30 = vld [vmem:[#allocation5 + $0x1c10] sm:$0xf0] }
 0x25a   :  { %6717 = vmatpush.bf16.msrb.mxu2 %v11029_v33  ;;  %v10981_v33 = vor.u32 %v13210_v6, %v10978_v11  ;;  %14664 = vst [vmem:[#allocation63_spill] sm:$0xff] %v14243_v24  ;;  %v11701_v6 = vor.u32 %v13390_v20, %v11698_v15  ;;  %v13336_v11 = vld [vmem:[#allocation5 + $0x177c] sm:$0xf]  ;;  %v12034_v15 = vld [vmem:[#allocation5 + $0x1be0] sm:$0xf0] }
 0x25b   :  { %6731 = vmatpush.bf16.msrb.mxu3 %v11221_v19  ;;  %v11173_v19 = vor.u32 %v13258_v45, %v11170_v8  ;;  %v11482_v45 = vld [vmem:[#allocation5 + $0x1790] sm:$0xf0]  ;;  %v13384_v8 = vld [vmem:[#allocation5 + $0x18fc] sm:$0xf]  ;;  %v12722_v24 = vld [vmem:[#allocation5 + $0x444] sm:$0xf0] }
 0x25c   :  { %6690 = vmatpush.bf16.msrb.mxu0 %v10621_v48  ;;  %v12109_v48 = vor.u32 %v13492_v61, %v12106_v22  ;;  %v13480_v60 = vld [vmem:[#allocation5 + $0x1bfc] sm:$0xf]  ;;  %v11677_v20 = vor.u32 %v13384_v8, %v11674_v52  ;;  %v14249_v61 = vpop.f32.mrf.mxu2  ;;  %v11626_v52 = vld [vmem:[#allocation5 + $0x18b0] sm:$0xf0] }
 0x25d   :  { %6704 = vmatpush.bf16.msrb.mxu1 %v10813_v42  ;;  %v13486_v42 = vld [vmem:[#allocation5 + $0x1c2c] sm:$0xf]  ;;  %14665 = vst [vmem:[#allocation64_spill] sm:$0xff] %v14249_v61  ;;  %v12061_v22 = vor.u32 %v13480_v60, %v12058_v30  ;;  %v13468_v60 = vld [vmem:[#allocation5 + $0x1b9c] sm:$0xf] }
 0x25e   :  { %6718 = vmatpush.bf16.msrb.mxu2 %v11005_v21  ;;  %v12082_v21 = vld [vmem:[#allocation5 + $0x1c40] sm:$0xf0]  ;;  %v12010_v30 = vld [vmem:[#allocation5 + $0x1bb0] sm:$0xf0]  ;;  %v8824_v61 = vld [vmem:[#allocation5 + $0x2b0] sm:$0xf] }
 0x25f   :  { %6732 = vmatpush.bf16.msrb.mxu3 %v11197_v23  ;;  %v11893_v23 = vor.u32 %v13438_v13, %v11890_v51  ;;  %v12085_v25 = vor.u32 %v13486_v42, %v12082_v21  ;;  %v11485_v51 = vor.u32 %v13336_v11, %v11482_v45  ;;  %v11434_v11 = vld [vmem:[#allocation5 + $0x1730] sm:$0xf0]  ;;  %v13372_v45 = vld [vmem:[#allocation5 + $0x189c] sm:$0xf] }
 0x260   :  { %6691 = vmatpush.bf16.msrb.mxu0 %v10597_v26  ;;  %v11866_v26 = vld [vmem:[#allocation5 + $0x1a90] sm:$0xf0]  ;;  %v6469_v2 = vpop.f32.mrf.mxu0 }
 0x261   :  { %6705 = vmatpush.bf16.msrb.mxu1 %v10789_v14  ;;  %v11869_v16 = vor.u32 %v13432_v56, %v11866_v26  ;;  %v11458_v14 = vld [vmem:[#allocation5 + $0x1760] sm:$0xf0]  ;;  %v6470_v13 = vadd.f32 %v6469_v2, %v14239_v12  ;;  %v6483_v21 = vpop.f32.mrf.mxu1  ;;  %v13420_v56 = vld [vmem:[#allocation5 + $0x1a1c] sm:$0xf]  ;;  %v11818_v26 = vld [vmem:[#allocation5 + $0x1a30] sm:$0xf0]  ;;  %v11629_v12 = vor.u32 %v13372_v45, %v11626_v52 }
 0x262   :  { %6719 = vmatpush.bf16.msrb.mxu2 %v10981_v33  ;;  %v13378_v33 = vld [vmem:[#allocation5 + $0x18cc] sm:$0xf]  ;;  %v11461_v42 = vor.u32 %v13330_v9, %v11458_v14  ;;  %v11410_v9 = vld [vmem:[#allocation5 + $0x1700] sm:$0xf0]  ;;  %v13360_v45 = vld [vmem:[#allocation5 + $0x183c] sm:$0xf] }
 0x263   :  { %6733 = vmatpush.bf16.msrb.mxu3 %v11173_v19  ;;  %6692 = vmatmul.bf16.vlgmr.msrb.gmra.mxu0 %v14015_v40  ;;  %v11650_v19 = vld [vmem:[#allocation5 + $0x18e0] sm:$0xf0]  ;;  %v13366_v14 = vld [vmem:[#allocation5 + $0x186c] sm:$0xf]  ;;  %v11578_v52 = vld [vmem:[#allocation5 + $0x1850] sm:$0xf0] }
 0x264   :  { %6740 = vmatpush.bf16.msra.mxu0 %v11533_v3  ;;  %6706 = vmatmul.bf16.vlgmr.msrb.gmra.mxu1 %v14021_v32  ;;  %v13426_v3 = vld [vmem:[#allocation5 + $0x1a4c] sm:$0xf] }
 0x265   :  { %6754 = vmatpush.bf16.msra.mxu1 %v11725_v29  ;;  %6720 = vmatmul.bf16.vlgmr.msrb.gmra.mxu2 %v14025_v41  ;;  %v11842_v29 = vld [vmem:[#allocation5 + $0x1a60] sm:$0xf0] }
 0x266   :  { %6768 = vmatpush.bf16.msra.mxu2 %v11917_v7  ;;  %6734 = vmatmul.bf16.vlgmr.msrb.gmra.mxu3 %v14023_v38  ;;  %v14251_v7 = vpop.f32.mrf.mxu3 }
 0x267   :  { %6782 = vmatpush.bf16.msra.mxu3 %v12109_v48  ;;  %14666 = vst [vmem:[#allocation65_spill] sm:$0xff] %v14251_v7  ;;  %v13474_v48 = vld [vmem:[#allocation5 + $0x1bcc] sm:$0xf]  ;;  %v12626_v7 = vld [vmem:[#allocation5 + $0x144] sm:$0xf0] }
 0x268   :  { %6741 = vmatpush.bf16.msra.mxu0 %v11509_v50  ;;  %v11653_v50 = vor.u32 %v13378_v33, %v11650_v19  ;;  %v12037_v8 = vor.u32 %v13474_v48, %v12034_v15  ;;  %v12013_v33 = vor.u32 %v13468_v60, %v12010_v30  ;;  %v6497_v19 = vpop.f32.mrf.mxu2  ;;  %v13462_v15 = vld [vmem:[#allocation5 + $0x1b6c] sm:$0xf]  ;;  %v11962_v60 = vld [vmem:[#allocation5 + $0x1b50] sm:$0xf0]  ;;  %v14256_v28 = vpop.f32.mrf.mxu0 }
 0x269   :  { %6755 = vmatpush.bf16.msra.mxu1 %v11701_v6  ;;  %v11845_v6 = vor.u32 %v13426_v3, %v11842_v29  ;;  %v13414_v3 = vld [vmem:[#allocation5 + $0x19ec] sm:$0xf]  ;;  %v11794_v29 = vld [vmem:[#allocation5 + $0x1a00] sm:$0xf0]  ;;  %14667 = vst [vmem:[#allocation66_spill] sm:$0xff] %v14256_v28 }
 0x26a   :  { %6769 = vmatpush.bf16.msra.mxu2 %v11893_v23  ;;  %v13324_v23 = vld [vmem:[#allocation5 + $0x171c] sm:$0xf]  ;;  %v12914_v28 = vld [vmem:[#allocation5 + $0xa44] sm:$0xf0] }
 0x26b   :  { %6783 = vmatpush.bf16.msra.mxu3 %v12085_v25  ;;  %v6484_v25 = vadd.f32 %v6483_v21, %v6470_v13  ;;  %v11986_v13 = vld [vmem:[#allocation5 + $0x1b80] sm:$0xf0] }
 0x26c   :  { %6742 = vmatpush.bf16.msra.mxu0 %v11485_v51  ;;  %v11437_v51 = vor.u32 %v13324_v23, %v11434_v11  ;;  %v13312_v23 = vld [vmem:[#allocation5 + $0x16bc] sm:$0xf]  ;;  %v11386_v11 = vld [vmem:[#allocation5 + $0x16d0] sm:$0xf0] }
 0x26d   :  { %6756 = vmatpush.bf16.msra.mxu1 %v11677_v20  ;;  %v11821_v20 = vor.u32 %v13420_v56, %v11818_v26  ;;  %v6498_v2 = vadd.f32 %v6497_v19, %v6484_v25  ;;  %v13408_v56 = vld [vmem:[#allocation5 + $0x19bc] sm:$0xf]  ;;  %v11770_v26 = vld [vmem:[#allocation5 + $0x19d0] sm:$0xf0]  ;;  %v11389_v30 = vor.u32 %v13312_v23, %v11386_v11  ;;  %v13402_v19 = vld [vmem:[#allocation5 + $0x198c] sm:$0xf] }
 0x26e   :  { %6770 = vmatpush.bf16.msra.mxu2 %v11869_v16  ;;  %v13318_v16 = vld [vmem:[#allocation5 + $0x16ec] sm:$0xf]  ;;  %v6511_v48 = vpop.f32.mrf.mxu3  ;;  %v13456_v25 = vld [vmem:[#allocation5 + $0x1b3c] sm:$0xf]  ;;  %v9040_v23 = vld [vmem:[#allocation5 + $0x460] sm:$0xf] }
 0x26f   :  { %6784 = vmatpush.bf16.msra.mxu3 %v12061_v22  ;;  %v11602_v22 = vld [vmem:[#allocation5 + $0x1880] sm:$0xf0]  ;;  %v14254_v21 = vadd.f32 %v6511_v48, %v6498_v2  ;;  %v8656_v2 = vld [vmem:[#allocation5 + $0x160] sm:$0xf]  ;;  %v12632_v48 = vld [vmem:[#allocation5 + $0x174] sm:$0xf0] }
 0x270   :  { %6743 = vmatpush.bf16.msra.mxu0 %v11461_v42  ;;  %v11413_v42 = vor.u32 %v13318_v16, %v11410_v9  ;;  %v11362_v16 = vld [vmem:[#allocation5 + $0x16a0] sm:$0xf0]  ;;  %v13354_v9 = vld [vmem:[#allocation5 + $0x180c] sm:$0xf]  ;;  %v12728_v11 = vld [vmem:[#allocation5 + $0x474] sm:$0xf0] }
 0x271   :  { %6757 = vmatpush.bf16.msra.mxu1 %v11653_v50  ;;  %v11605_v50 = vor.u32 %v13366_v14, %v11602_v22  ;;  %v11554_v14 = vld [vmem:[#allocation5 + $0x1820] sm:$0xf0]  ;;  %v11965_v22 = vor.u32 %v13456_v25, %v11962_v60  ;;  %v9041_v25 = vor.u32 %v12728_v11, %v9040_v23  ;;  %v8632_v60 = vld [vmem:[#allocation5 + $0x130] sm:$0xf] }
 0x272   :  { %6771 = vmatpush.bf16.msra.mxu2 %v11845_v6  ;;  %v11797_v6 = vor.u32 %v13414_v3, %v11794_v29  ;;  %v13450_v3 = vld [vmem:[#allocation5 + $0x1b0c] sm:$0xf]  ;;  %v11938_v29 = vld [vmem:[#allocation5 + $0x1b20] sm:$0xf0]  ;;  %v8584_v11 = vld [vmem:[#allocation5 + $0xd0] sm:$0xf] }
 0x273   :  { %6785 = vmatpush.bf16.msra.mxu3 %v12037_v8  ;;  %v11989_v8 = vor.u32 %v13462_v15, %v11986_v13  ;;  %v8848_v15 = vld [vmem:[#allocation5 + $0x2e0] sm:$0xf] }
 0x274   :  { %6744 = vmatpush.bf16.msra.mxu0 %v11437_v51  ;;  %v13306_v51 = vld [vmem:[#allocation5 + $0x168c] sm:$0xf] }
 0x275   :  { %6758 = vmatpush.bf16.msra.mxu1 %v11629_v12  ;;  %v11581_v12 = vor.u32 %v13360_v45, %v11578_v52  ;;  %v11365_v13 = vor.u32 %v13306_v51, %v11362_v16  ;;  %v9232_v45 = vld [vmem:[#allocation5 + $0x5e0] sm:$0xf]  ;;  %v12776_v52 = vld [vmem:[#allocation5 + $0x5f4] sm:$0xf0]  ;;  %v12674_v51 = vld [vmem:[#allocation5 + $0x2c4] sm:$0xf0] }
 0x276   :  { %6772 = vmatpush.bf16.msra.mxu2 %v11821_v20  ;;  %v11773_v20 = vor.u32 %v13408_v56, %v11770_v26  ;;  %v8657_v56 = vor.u32 %v12632_v48, %v8656_v2  ;;  %v9016_v16 = vld [vmem:[#allocation5 + $0x430] sm:$0xf]  ;;  %v12668_v48 = vld [vmem:[#allocation5 + $0x294] sm:$0xf0] }
 0x277   :  { %6786 = vmatpush.bf16.msra.mxu3 %v12013_v33  ;;  %v11746_v33 = vld [vmem:[#allocation5 + $0x19a0] sm:$0xf0] }
 0x278   :  { %6745 = vmatpush.bf16.msra.mxu0 %v11413_v42  ;;  %v12680_v42 = vld [vmem:[#allocation5 + $0x2f4] sm:$0xf0] }
 0x279   :  { %6759 = vmatpush.bf16.msra.mxu1 %v11605_v50  ;;  %v11557_v50 = vor.u32 %v13354_v9, %v11554_v14  ;;  %v8849_v26 = vor.u32 %v12680_v42, %v8848_v15  ;;  %v8633_v9 = vor.u32 %v12626_v7, %v8632_v60  ;;  %v8825_v14 = vor.u32 %v12674_v51, %v8824_v61  ;;  %v8992_v15 = vld [vmem:[#allocation5 + $0x400] sm:$0xf]  ;;  %v12764_v42 = vld [vmem:[#allocation5 + $0x594] sm:$0xf0]  ;;  %v9160_v60 = vld [vmem:[#allocation5 + $0x550] sm:$0xf] }
 0x27a   :  { %6773 = vmatpush.bf16.msra.mxu2 %v11797_v6  ;;  %v11749_v6 = vor.u32 %v13402_v19, %v11746_v33  ;;  %v9017_v19 = vor.u32 %v12722_v24, %v9016_v16  ;;  %v12620_v33 = vld [vmem:[#allocation5 + $0x114] sm:$0xf0]  ;;  %v9184_v7 = vld [vmem:[#allocation5 + $0x580] sm:$0xf] }
 0x27b   :  { %6787 = vmatpush.bf16.msra.mxu3 %v11989_v8  ;;  %v11941_v8 = vor.u32 %v13450_v3, %v11938_v29  ;;  %v8800_v3 = vld [vmem:[#allocation5 + $0x280] sm:$0xf]  ;;  %v14258_v29 = vpop.f32.mrf.mxu1  ;;  %v12752_v16 = vld [vmem:[#allocation5 + $0x534] sm:$0xf0] }
 0x27c   :  { %6746 = vmatpush.bf16.msra.mxu0 %v11389_v30  ;;  %v9233_v30 = vor.u32 %v12776_v52, %v9232_v45  ;;  %14668 = vst [vmem:[#allocation67_spill] sm:$0xff] %v14258_v29  ;;  %v8801_v61 = vor.u32 %v12668_v48, %v8800_v3  ;;  %v14264_v45 = vpop.f32.mrf.mxu2  ;;  %v9185_v52 = vor.u32 %v12764_v42, %v9184_v7  ;;  %v14266_v51 = vld [vmem:[#allocation7] sm:$0x3f]  ;;  %v12656_v48 = vld [vmem:[#allocation5 + $0x234] sm:$0xf0] }
 0x27d   :  { %6760 = vmatpush.bf16.msra.mxu1 %v11581_v12  ;;  %v9208_v12 = vld [vmem:[#allocation5 + $0x5b0] sm:$0xf]  ;;  %14669 = vst [vmem:[#allocation68_spill] sm:$0xff] %v14264_v45  ;;  %v8752_v3 = vld [vmem:[#allocation5 + $0x220] sm:$0xf] }
 0x27e   :  { %6774 = vmatpush.bf16.msra.mxu2 %v11773_v20  ;;  %v12770_v20 = vld [vmem:[#allocation5 + $0x5c4] sm:$0xf0]  ;;  %14670 = vst [vmem:[#allocation69_spill] sm:$0xff] %v14266_v51  ;;  %v9136_v42 = vld [vmem:[#allocation5 + $0x520] sm:$0xf] }
 0x27f   :  { %6788 = vmatpush.bf16.msra.mxu3 %v11965_v22  ;;  %v8608_v22 = vld [vmem:[#allocation5 + $0x100] sm:$0xf]  ;;  %v9209_v2 = vor.u32 %v12770_v20, %v9208_v12  ;;  %v14269_v12 = vpop.f32.mrf.mxu3  ;;  %v12818_v45 = vld [vmem:[#allocation5 + $0x744] sm:$0xf0]  ;;  %v9592_v29 = vld [vmem:[#allocation5 + $0x8b0] sm:$0xf] }
 0x280   :  { %6747 = vmatpush.bf16.msra.mxu0 %v11365_v13  ;;  %v12716_v13 = vld [vmem:[#allocation5 + $0x414] sm:$0xf0]  ;;  %v8609_v24 = vor.u32 %v12620_v33, %v8608_v22  ;;  %14671 = vst [vmem:[#allocation70_spill] sm:$0xff] %v14269_v12  ;;  %v8560_v22 = vld [vmem:[#allocation5 + $0xa0] sm:$0xf] }
 0x281   :  { %6761 = vmatpush.bf16.msra.mxu1 %v11557_v50  ;;  %v8993_v23 = vor.u32 %v12716_v13, %v8992_v15  ;;  %v12614_v50 = vld [vmem:[#allocation5 + $0xe4] sm:$0xf0]  ;;  %v12608_v33 = vld [vmem:[#allocation5 + $0xb4] sm:$0xf0]  ;;  %v8944_v15 = vld [vmem:[#allocation5 + $0x3a0] sm:$0xf] }
 0x282   :  { %6775 = vmatpush.bf16.msra.mxu2 %v11749_v6  ;;  %v8776_v6 = vld [vmem:[#allocation5 + $0x250] sm:$0xf]  ;;  %v12704_v13 = vld [vmem:[#allocation5 + $0x3b4] sm:$0xf0] }
 0x283   :  { %6789 = vmatpush.bf16.msra.mxu3 %v11941_v8  ;;  %6748 = vmatmul.bf16.vlgmr.msra.gmra.mxu0 %v14027_v46  ;;  %v12662_v8 = vld [vmem:[#allocation5 + $0x264] sm:$0xf0]  ;;  %v6539_v7 = vpop.f32.mrf.mxu1 }
 0x284   :  { %6796 = vmatpush.bf16.msrb.mxu0 %v8657_v56  ;;  %6762 = vmatmul.bf16.vlgmr.msra.gmra.mxu1 %v14033_v49  ;;  %v8968_v56 = vld [vmem:[#allocation5 + $0x3d0] sm:$0xf] }
 0x285   :  { %6810 = vmatpush.bf16.msrb.mxu1 %v8849_v26  ;;  %6776 = vmatmul.bf16.vlgmr.msra.gmra.mxu2 %v14037_v54  ;;  %v12710_v26 = vld [vmem:[#allocation5 + $0x3e4] sm:$0xf0] }
 0x286   :  { %6824 = vmatpush.bf16.msrb.mxu2 %v9041_v25  ;;  %6790 = vmatmul.bf16.vlgmr.msra.gmra.mxu3 %v14035_v53  ;;  %v6525_v25 = vpop.f32.mrf.mxu0 }
 0x287   :  { %6838 = vmatpush.bf16.msrb.mxu3 %v9233_v30  ;;  %v12758_v30 = vld [vmem:[#allocation5 + $0x564] sm:$0xf0]  ;;  %v14272_v20 = vadd.f32 %v6525_v25, %v14254_v21 }
 0x288   :  { %6797 = vmatpush.bf16.msrb.mxu0 %v8633_v9  ;;  %v8585_v9 = vor.u32 %v12614_v50, %v8584_v11  ;;  %v8561_v11 = vor.u32 %v12608_v33, %v8560_v22  ;;  %v8536_v50 = vld [vmem:[#allocation5 + $0x70] sm:$0xf]  ;;  %v12698_v25 = vld [vmem:[#allocation5 + $0x384] sm:$0xf0]  ;;  %v8512_v22 = vld [vmem:[#allocation5 + $0x40] sm:$0xf] }
 0x289   :  { %6811 = vmatpush.bf16.msrb.mxu1 %v8825_v14  ;;  %14672 = vst [vmem:[#allocation71_spill] sm:$0xff] %v14272_v20  ;;  %v8777_v14 = vor.u32 %v12662_v8, %v8776_v6  ;;  %v12602_v6 = vld [vmem:[#allocation5 + $0x84] sm:$0xf0]  ;;  %v8728_v8 = vld [vmem:[#allocation5 + $0x1f0] sm:$0xf] }
 0x28a   :  { %6825 = vmatpush.bf16.msrb.mxu2 %v9017_v19  ;;  %v8969_v19 = vor.u32 %v12710_v26, %v8968_v56  ;;  %v12650_v56 = vld [vmem:[#allocation5 + $0x204] sm:$0xf0]  ;;  %v8920_v26 = vld [vmem:[#allocation5 + $0x370] sm:$0xf]  ;;  %v12596_v33 = vld [vmem:[#allocation5 + $0x54] sm:$0xf0] }
 0x28b   :  { %6839 = vmatpush.bf16.msrb.mxu3 %v9209_v2  ;;  %v9161_v2 = vor.u32 %v12758_v30, %v9160_v60  ;;  %v6553_v60 = vpop.f32.mrf.mxu2  ;;  %v9112_v30 = vld [vmem:[#allocation5 + $0x4f0] sm:$0xf]  ;;  %v12746_v20 = vld [vmem:[#allocation5 + $0x504] sm:$0xf0] }
 0x28c   :  { %6798 = vmatpush.bf16.msrb.mxu0 %v8609_v24  ;;  %v14673_v24 = vperm.slane %v14266_v51, 3 }
 0x28d   :  { %6812 = vmatpush.bf16.msrb.mxu1 %v8801_v61  ;;  %v8753_v61 = vor.u32 %v12656_v48, %v8752_v3  ;;  %v8704_v3 = vld [vmem:[#allocation5 + $0x1c0] sm:$0xf] }
 0x28e   :  { %6826 = vmatpush.bf16.msrb.mxu2 %v8993_v23  ;;  %v6540_v21 = vadd.f32 %v6539_v7, %v14673_v24  ;;  %v8945_v23 = vor.u32 %v12704_v13, %v8944_v15  ;;  %v8537_v7 = vor.u32 %v12602_v6, %v8536_v50  ;;  %v8896_v15 = vld [vmem:[#allocation5 + $0x340] sm:$0xf]  ;;  %v12692_v13 = vld [vmem:[#allocation5 + $0x354] sm:$0xf0]  ;;  %v12590_v50 = vld [vmem:[#allocation5 + $0x24] sm:$0xf0]  ;;  %v14278_v51 = vpop.f32.mrf.mxu0 }
 0x28f   :  { %6840 = vmatpush.bf16.msrb.mxu3 %v9185_v52  ;;  %v9137_v52 = vor.u32 %v12752_v16, %v9136_v42  ;;  %v9113_v16 = vor.u32 %v12746_v20, %v9112_v30  ;;  %v9088_v42 = vld [vmem:[#allocation5 + $0x4c0] sm:$0xf]  ;;  %v12740_v24 = vld [vmem:[#allocation5 + $0x4d4] sm:$0xf0]  ;;  %v8680_v6 = vld [vmem:[#allocation5 + $0x190] sm:$0xf] }
 0x290   :  { %6799 = vmatpush.bf16.msrb.mxu0 %v8585_v9  ;;  %v6554_v12 = vadd.f32 %v6553_v60, %v6540_v21  ;;  %v6567_v9 = vpop.f32.mrf.mxu3  ;;  %v8513_v21 = vor.u32 %v12596_v33, %v8512_v22  ;;  %v9064_v20 = vld [vmem:[#allocation5 + $0x490] sm:$0xf]  ;;  %v12824_v60 = vld [vmem:[#allocation5 + $0x774] sm:$0xf0]  ;;  %v9616_v30 = vld [vmem:[#allocation5 + $0x8e0] sm:$0xf] }
 0x291   :  { %6813 = vmatpush.bf16.msrb.mxu1 %v8777_v14  ;;  %v8729_v14 = vor.u32 %v12650_v56, %v8728_v8  ;;  %v12638_v8 = vld [vmem:[#allocation5 + $0x1a4] sm:$0xf0]  ;;  %v8872_v56 = vld [vmem:[#allocation5 + $0x310] sm:$0xf]  ;;  %v9808_v22 = vld [vmem:[#allocation5 + $0xa60] sm:$0xf] }
 0x292   :  { %6827 = vmatpush.bf16.msrb.mxu2 %v8969_v19  ;;  %v8921_v19 = vor.u32 %v12698_v25, %v8920_v26  ;;  %v14276_v48 = vadd.f32 %v6567_v9, %v6554_v12  ;;  %v9089_v12 = vor.u32 %v12740_v24, %v9088_v42  ;;  %v12734_v26 = vld [vmem:[#allocation5 + $0x4a4] sm:$0xf0]  ;;  %v9424_v25 = vld [vmem:[#allocation5 + $0x760] sm:$0xf]  ;;  %v12872_v9 = vld [vmem:[#allocation5 + $0x8f4] sm:$0xf0] }
 0x293   :  { %6841 = vmatpush.bf16.msrb.mxu3 %v9161_v2  ;;  %v12644_v2 = vld [vmem:[#allocation5 + $0x1d4] sm:$0xf0]  ;;  %v9400_v24 = vld [vmem:[#allocation5 + $0x730] sm:$0xf]  ;;  %14674 = vst [vmem:[#allocation72_spill] sm:$0xff] %v14278_v51 }
 0x294   :  { %6800 = vmatpush.bf16.msrb.mxu0 %v8561_v11  ;;  %v8488_v11 = vld [vmem:[#allocation5 + $0x10] sm:$0xf]  ;;  %v12920_v33 = vld [vmem:[#allocation5 + $0xa74] sm:$0xf0]  ;;  %v13010_v51 = vld [vmem:[#allocation5 + $0xd44] sm:$0xf0] }
 0x295   :  { %6814 = vmatpush.bf16.msrb.mxu1 %v8753_v61  ;;  %v8705_v61 = vor.u32 %v12644_v2, %v8704_v3  ;;  %v10000_v3 = vld [vmem:[#allocation5 + $0xbe0] sm:$0xf]  ;;  %v12968_v2 = vld [vmem:[#allocation5 + $0xbf4] sm:$0xf0]  ;;  %v9809_v42 = vor.u32 %v12920_v33, %v9808_v22 }
 0x296   :  { %6828 = vmatpush.bf16.msrb.mxu2 %v8945_v23  ;;  %v8897_v23 = vor.u32 %v12692_v13, %v8896_v15  ;;  %v9425_v15 = vor.u32 %v12824_v60, %v9424_v25  ;;  %v9617_v13 = vor.u32 %v12872_v9, %v9616_v30  ;;  %v12860_v60 = vld [vmem:[#allocation5 + $0x894] sm:$0xf0]  ;;  %v9760_v30 = vld [vmem:[#allocation5 + $0xa00] sm:$0xf] }
 0x297   :  { %6842 = vmatpush.bf16.msrb.mxu3 %v9137_v52  ;;  %v12686_v52 = vld [vmem:[#allocation5 + $0x324] sm:$0xf0]  ;;  %v9952_v9 = vld [vmem:[#allocation5 + $0xb80] sm:$0xf]  ;;  %v12956_v22 = vld [vmem:[#allocation5 + $0xb94] sm:$0xf0] }
 0x298   :  { %6801 = vmatpush.bf16.msrb.mxu0 %v8537_v7  ;;  %v8489_v7 = vor.u32 %v12590_v50, %v8488_v11  ;;  %v12866_v11 = vld [vmem:[#allocation5 + $0x8c4] sm:$0xf0]  ;;  %v9784_v50 = vld [vmem:[#allocation5 + $0xa30] sm:$0xf] }
 0x299   :  { %6815 = vmatpush.bf16.msrb.mxu1 %v8729_v14  ;;  %v8681_v14 = vor.u32 %v12638_v8, %v8680_v6  ;;  %v14280_v6 = vpop.f32.mrf.mxu1  ;;  %v9401_v8 = vor.u32 %v12818_v45, %v9400_v24 }
 0x29a   :  { %6829 = vmatpush.bf16.msrb.mxu2 %v8921_v19  ;;  %v8873_v19 = vor.u32 %v12686_v52, %v8872_v56  ;;  %14675 = vst [vmem:[#allocation73_spill] sm:$0xff] %v14280_v6  ;;  %v9593_v56 = vor.u32 %v12866_v11, %v9592_v29  ;;  %v9376_v52 = vld [vmem:[#allocation5 + $0x700] sm:$0xf]  ;;  %v14285_v29 = vpop.f32.mrf.mxu2  ;;  %v12950_v11 = vld [vmem:[#allocation5 + $0xb64] sm:$0xf0] }
 0x29b   :  { %6843 = vmatpush.bf16.msrb.mxu3 %v9113_v16  ;;  %v9065_v16 = vor.u32 %v12734_v26, %v9064_v20  ;;  %v12812_v20 = vld [vmem:[#allocation5 + $0x714] sm:$0xf0]  ;;  %v9568_v26 = vld [vmem:[#allocation5 + $0x880] sm:$0xf]  ;;  %14676 = vst [vmem:[#allocation74_spill] sm:$0xff] %v14285_v29 }
 0x29c   :  { %6802 = vmatpush.bf16.msrb.mxu0 %v8513_v21  ;;  %v10001_v21 = vor.u32 %v12968_v2, %v10000_v3  ;;  %v9377_v45 = vor.u32 %v12812_v20, %v9376_v52  ;;  %v9544_v3 = vld [vmem:[#allocation5 + $0x850] sm:$0xf]  ;;  %v9953_v2 = vor.u32 %v12956_v22, %v9952_v9  ;;  %v12800_v52 = vld [vmem:[#allocation5 + $0x6b4] sm:$0xf0]  ;;  %v9520_v20 = vld [vmem:[#allocation5 + $0x820] sm:$0xf] }
 0x29d   :  { %6816 = vmatpush.bf16.msrb.mxu1 %v8705_v61  ;;  %v9976_v61 = vld [vmem:[#allocation5 + $0xbb0] sm:$0xf]  ;;  %v9904_v9 = vld [vmem:[#allocation5 + $0xb20] sm:$0xf]  ;;  %v12944_v22 = vld [vmem:[#allocation5 + $0xb34] sm:$0xf0] }
 0x29e   :  { %6830 = vmatpush.bf16.msrb.mxu2 %v8897_v23  ;;  %v12962_v23 = vld [vmem:[#allocation5 + $0xbc4] sm:$0xf0] }
 0x29f   :  { %6844 = vmatpush.bf16.msrb.mxu3 %v9089_v12  ;;  %v9785_v12 = vor.u32 %v12914_v28, %v9784_v50  ;;  %v9977_v25 = vor.u32 %v12962_v23, %v9976_v61  ;;  %v9569_v28 = vor.u32 %v12860_v60, %v9568_v26  ;;  %v12848_v60 = vld [vmem:[#allocation5 + $0x834] sm:$0xf0]  ;;  %v13106_v29 = vld [vmem:[#allocation5 + $0x1044] sm:$0xf0] }
 0x2a0   :  { %6803 = vmatpush.bf16.msrb.mxu0 %v8489_v7  ;;  %v12908_v7 = vld [vmem:[#allocation5 + $0xa14] sm:$0xf0]  ;;  %v6581_v24 = vpop.f32.mrf.mxu0 }
 0x2a1   :  { %6817 = vmatpush.bf16.msrb.mxu1 %v8681_v14  ;;  %v9761_v33 = vor.u32 %v12908_v7, %v9760_v30  ;;  %v9352_v14 = vld [vmem:[#allocation5 + $0x6d0] sm:$0xf]  ;;  %v6582_v50 = vadd.f32 %v6581_v24, %v14276_v48  ;;  %v9712_v30 = vld [vmem:[#allocation5 + $0x9a0] sm:$0xf]  ;;  %v12896_v7 = vld [vmem:[#allocation5 + $0x9b4] sm:$0xf0]  ;;  %v9521_v48 = vor.u32 %v12848_v60, %v9520_v20 }
 0x2a2   :  { %6831 = vmatpush.bf16.msrb.mxu2 %v8873_v19  ;;  %v12806_v19 = vld [vmem:[#allocation5 + $0x6e4] sm:$0xf0]  ;;  %v9472_v20 = vld [vmem:[#allocation5 + $0x7c0] sm:$0xf]  ;;  %v12836_v60 = vld [vmem:[#allocation5 + $0x7d4] sm:$0xf0] }
 0x2a3   :  { %6845 = vmatpush.bf16.msrb.mxu3 %v9065_v16  ;;  %6804 = vmatmul.bf16.vlgmr.msrb.gmra.mxu0 %v13985_v58  ;;  %v14288_v16 = vpop.f32.mrf.mxu3  ;;  %v9353_v61 = vor.u32 %v12806_v19, %v9352_v14  ;;  %v12794_v14 = vld [vmem:[#allocation5 + $0x684] sm:$0xf0]  ;;  %v9496_v19 = vld [vmem:[#allocation5 + $0x7f0] sm:$0xf] }
 0x2a4   :  { %6852 = vmatpush.bf16.msra.mxu0 %v9425_v15  ;;  %6818 = vmatmul.bf16.vlgmr.msrb.gmra.mxu1 %v13991_v10  ;;  %14677 = vst [vmem:[#allocation75_spill] sm:$0xff] %v14288_v16  ;;  %v12854_v15 = vld [vmem:[#allocation5 + $0x864] sm:$0xf0]  ;;  %v10360_v16 = vld [vmem:[#allocation5 + $0xeb0] sm:$0xf] }
 0x2a5   :  { %6866 = vmatpush.bf16.msra.mxu1 %v9617_v13  ;;  %6832 = vmatmul.bf16.vlgmr.msrb.gmra.mxu2 %v13987_v1  ;;  %v9736_v13 = vld [vmem:[#allocation5 + $0x9d0] sm:$0xf]  ;;  %v9545_v23 = vor.u32 %v12854_v15, %v9544_v3  ;;  %v9905_v3 = vor.u32 %v12944_v22, %v9904_v9  ;;  %v12932_v9 = vld [vmem:[#allocation5 + $0xad4] sm:$0xf0] }
 0x2a6   :  { %6880 = vmatpush.bf16.msra.mxu2 %v9809_v42  ;;  %6846 = vmatmul.bf16.vlgmr.msrb.gmra.mxu3 %v13993_v17  ;;  %v12902_v42 = vld [vmem:[#allocation5 + $0x9e4] sm:$0xf0] }
 0x2a7   :  { %6894 = vmatpush.bf16.msra.mxu3 %v10001_v21  ;;  %v9928_v21 = vld [vmem:[#allocation5 + $0xb50] sm:$0xf] }
 0x2a8   :  { %6853 = vmatpush.bf16.msra.mxu0 %v9401_v8  ;;  %v9737_v8 = vor.u32 %v12902_v42, %v9736_v13  ;;  %v9929_v26 = vor.u32 %v12950_v11, %v9928_v21  ;;  %v6609_v15 = vpop.f32.mrf.mxu2  ;;  %v9688_v13 = vld [vmem:[#allocation5 + $0x970] sm:$0xf]  ;;  %v12890_v42 = vld [vmem:[#allocation5 + $0x984] sm:$0xf0]  ;;  %v14293_v6 = vpop.f32.mrf.mxu0 }
 0x2a9   :  { %6867 = vmatpush.bf16.msra.mxu1 %v9593_v56  ;;  %v6595_v56 = vpop.f32.mrf.mxu1  ;;  %v9880_v21 = vld [vmem:[#allocation5 + $0xaf0] sm:$0xf]  ;;  %v12938_v11 = vld [vmem:[#allocation5 + $0xb04] sm:$0xf0]  ;;  %14678 = vst [vmem:[#allocation76_spill] sm:$0xff] %v14293_v6 }
 0x2aa   :  { %6881 = vmatpush.bf16.msra.mxu2 %v9785_v12  ;;  %v9328_v12 = vld [vmem:[#allocation5 + $0x6a0] sm:$0xf] }
 0x2ab   :  { %6895 = vmatpush.bf16.msra.mxu3 %v9977_v25  ;;  %v6596_v25 = vadd.f32 %v6595_v56, %v6582_v50  ;;  %v6623_v50 = vpop.f32.mrf.mxu3  ;;  %v9689_v56 = vor.u32 %v12890_v42, %v9688_v13  ;;  %v9832_v13 = vld [vmem:[#allocation5 + $0xa90] sm:$0xf]  ;;  %v12926_v42 = vld [vmem:[#allocation5 + $0xaa4] sm:$0xf0] }
 0x2ac   :  { %6854 = vmatpush.bf16.msra.mxu0 %v9377_v45  ;;  %v9329_v45 = vor.u32 %v12800_v52, %v9328_v12  ;;  %v9280_v12 = vld [vmem:[#allocation5 + $0x640] sm:$0xf]  ;;  %v12788_v52 = vld [vmem:[#allocation5 + $0x654] sm:$0xf0] }
 0x2ad   :  { %6868 = vmatpush.bf16.msra.mxu1 %v9569_v28  ;;  %v9713_v28 = vor.u32 %v12896_v7, %v9712_v30  ;;  %v6610_v24 = vadd.f32 %v6609_v15, %v6596_v25  ;;  %v9664_v30 = vld [vmem:[#allocation5 + $0x940] sm:$0xf]  ;;  %v12884_v7 = vld [vmem:[#allocation5 + $0x954] sm:$0xf0]  ;;  %v9281_v22 = vor.u32 %v12788_v52, %v9280_v12  ;;  %v9640_v15 = vld [vmem:[#allocation5 + $0x910] sm:$0xf] }
 0x2ae   :  { %6882 = vmatpush.bf16.msra.mxu2 %v9761_v33  ;;  %v9304_v33 = vld [vmem:[#allocation5 + $0x670] sm:$0xf]  ;;  %v9856_v25 = vld [vmem:[#allocation5 + $0xac0] sm:$0xf]  ;;  %v13112_v52 = vld [vmem:[#allocation5 + $0x1074] sm:$0xf0] }
 0x2af   :  { %6896 = vmatpush.bf16.msra.mxu3 %v9953_v2  ;;  %v12842_v2 = vld [vmem:[#allocation5 + $0x804] sm:$0xf0]  ;;  %v10576_v12 = vld [vmem:[#allocation5 + $0x1060] sm:$0xf] }
 0x2b0   :  { %6855 = vmatpush.bf16.msra.mxu0 %v9353_v61  ;;  %v9305_v61 = vor.u32 %v12794_v14, %v9304_v33  ;;  %v12782_v33 = vld [vmem:[#allocation5 + $0x624] sm:$0xf0]  ;;  %v9448_v14 = vld [vmem:[#allocation5 + $0x790] sm:$0xf] }
 0x2b1   :  { %6869 = vmatpush.bf16.msra.mxu1 %v9545_v23  ;;  %v14291_v23 = vadd.f32 %v6623_v50, %v6610_v24  ;;  %v10192_v24 = vld [vmem:[#allocation5 + $0xd60] sm:$0xf] }
 0x2b2   :  { %6883 = vmatpush.bf16.msra.mxu2 %v9737_v8  ;;  %v9497_v8 = vor.u32 %v12842_v2, %v9496_v19  ;;  %v12830_v19 = vld [vmem:[#allocation5 + $0x7a4] sm:$0xf0]  ;;  %v9857_v2 = vor.u32 %v12932_v9, %v9856_v25  ;;  %v10577_v25 = vor.u32 %v13112_v52, %v10576_v12  ;;  %v10168_v9 = vld [vmem:[#allocation5 + $0xd30] sm:$0xf] }
 0x2b3   :  { %6897 = vmatpush.bf16.msra.mxu3 %v9929_v26  ;;  %v9881_v26 = vor.u32 %v12938_v11, %v9880_v21  ;;  %v13016_v21 = vld [vmem:[#allocation5 + $0xd74] sm:$0xf0]  ;;  %v10384_v11 = vld [vmem:[#allocation5 + $0xee0] sm:$0xf]  ;;  %v10120_v52 = vld [vmem:[#allocation5 + $0xcd0] sm:$0xf] }
 0x2b4   :  { %6856 = vmatpush.bf16.msra.mxu0 %v9329_v45  ;;  %v9256_v45 = vld [vmem:[#allocation5 + $0x610] sm:$0xf] }
 0x2b5   :  { %6870 = vmatpush.bf16.msra.mxu1 %v9521_v48  ;;  %v9473_v48 = vor.u32 %v12836_v60, %v9472_v20  ;;  %v9257_v50 = vor.u32 %v12782_v33, %v9256_v45  ;;  %v10768_v20 = vld [vmem:[#allocation5 + $0x11e0] sm:$0xf]  ;;  %v13160_v60 = vld [vmem:[#allocation5 + $0x11f4] sm:$0xf0]  ;;  %v13058_v45 = vld [vmem:[#allocation5 + $0xec4] sm:$0xf0] }
 0x2b6   :  { %6884 = vmatpush.bf16.msra.mxu2 %v9713_v28  ;;  %v9665_v28 = vor.u32 %v12884_v7, %v9664_v30  ;;  %v10193_v30 = vor.u32 %v13016_v21, %v10192_v24  ;;  %v10552_v33 = vld [vmem:[#allocation5 + $0x1030] sm:$0xf]  ;;  %v13052_v21 = vld [vmem:[#allocation5 + $0xe94] sm:$0xf0] }
 0x2b7   :  { %6898 = vmatpush.bf16.msra.mxu3 %v9905_v3  ;;  %v12878_v3 = vld [vmem:[#allocation5 + $0x924] sm:$0xf0] }
 0x2b8   :  { %6857 = vmatpush.bf16.msra.mxu0 %v9305_v61  ;;  %v13064_v61 = vld [vmem:[#allocation5 + $0xef4] sm:$0xf0] }
 0x2b9   :  { %6871 = vmatpush.bf16.msra.mxu1 %v9497_v8  ;;  %v9449_v8 = vor.u32 %v12830_v19, %v9448_v14  ;;  %v10385_v7 = vor.u32 %v13064_v61, %v10384_v11  ;;  %v14295_v14 = vpop.f32.mrf.mxu1  ;;  %v10169_v19 = vor.u32 %v13010_v51, %v10168_v9  ;;  %v10528_v11 = vld [vmem:[#allocation5 + $0x1000] sm:$0xf]  ;;  %v13148_v51 = vld [vmem:[#allocation5 + $0x1194] sm:$0xf0] }
 0x2ba   :  { %6885 = vmatpush.bf16.msra.mxu2 %v9689_v56  ;;  %v9641_v56 = vor.u32 %v12878_v3, %v9640_v15  ;;  %14679 = vst [vmem:[#allocation77_spill] sm:$0xff] %v14295_v14  ;;  %v10361_v15 = vor.u32 %v13058_v45, %v10360_v16  ;;  %v10144_v3 = vld [vmem:[#allocation5 + $0xd00] sm:$0xf]  ;;  %v13142_v45 = vld [vmem:[#allocation5 + $0x1164] sm:$0xf0] }
 0x2bb   :  { %6899 = vmatpush.bf16.msra.mxu3 %v9881_v26  ;;  %v9833_v26 = vor.u32 %v12926_v42, %v9832_v13  ;;  %v13004_v13 = vld [vmem:[#allocation5 + $0xd14] sm:$0xf0]  ;;  %v10336_v42 = vld [vmem:[#allocation5 + $0xe80] sm:$0xf]  ;;  %v13298_v14 = vld [vmem:[#allocation5 + $0x1644] sm:$0xf0] }
 0x2bc   :  { %6858 = vmatpush.bf16.msra.mxu0 %v9281_v22  ;;  %v10769_v22 = vor.u32 %v13160_v60, %v10768_v20  ;;  %v10720_v61 = vld [vmem:[#allocation5 + $0x1180] sm:$0xf]  ;;  %v10337_v16 = vor.u32 %v13052_v21, %v10336_v42  ;;  %v14301_v20 = vpop.f32.mrf.mxu2  ;;  %v13040_v21 = vld [vmem:[#allocation5 + $0xe34] sm:$0xf0] }
 0x2bd   :  { %6872 = vmatpush.bf16.msra.mxu1 %v9473_v48  ;;  %v10744_v48 = vld [vmem:[#allocation5 + $0x11b0] sm:$0xf]  ;;  %14680 = vst [vmem:[#allocation78_spill] sm:$0xff] %v14301_v20  ;;  %v10721_v60 = vor.u32 %v13148_v51, %v10720_v61  ;;  %v10672_v61 = vld [vmem:[#allocation5 + $0x1120] sm:$0xf] }
 0x2be   :  { %6886 = vmatpush.bf16.msra.mxu2 %v9665_v28  ;;  %v13154_v28 = vld [vmem:[#allocation5 + $0x11c4] sm:$0xf0]  ;;  %v13136_v51 = vld [vmem:[#allocation5 + $0x1134] sm:$0xf0]  ;;  %v11128_v20 = vld [vmem:[#allocation5 + $0x14b0] sm:$0xf] }
 0x2bf   :  { %6900 = vmatpush.bf16.msra.mxu3 %v9857_v2  ;;  %v10553_v2 = vor.u32 %v13106_v29, %v10552_v33  ;;  %v10745_v24 = vor.u32 %v13154_v28, %v10744_v48  ;;  %v10145_v29 = vor.u32 %v13004_v13, %v10144_v3  ;;  %v12992_v3 = vld [vmem:[#allocation5 + $0xcb4] sm:$0xf0]  ;;  %v10288_v13 = vld [vmem:[#allocation5 + $0xe20] sm:$0xf] }
 0x2c0   :  { %6859 = vmatpush.bf16.msra.mxu0 %v9257_v50  ;;  %v13100_v50 = vld [vmem:[#allocation5 + $0x1014] sm:$0xf0]  ;;  %v6637_v9 = vpop.f32.mrf.mxu0 }
 0x2c1   :  { %6873 = vmatpush.bf16.msra.mxu1 %v9449_v8  ;;  %v10529_v12 = vor.u32 %v13100_v50, %v10528_v11  ;;  %v12998_v8 = vld [vmem:[#allocation5 + $0xce4] sm:$0xf0]  ;;  %v6638_v33 = vadd.f32 %v6637_v9, %v14291_v23  ;;  %v6651_v28 = vpop.f32.mrf.mxu1  ;;  %v10480_v11 = vld [vmem:[#allocation5 + $0xfa0] sm:$0xf]  ;;  %v13088_v50 = vld [vmem:[#allocation5 + $0xfb4] sm:$0xf0]  ;;  %v10289_v23 = vor.u32 %v13040_v21, %v10288_v13 }
 0x2c2   :  { %6887 = vmatpush.bf16.msra.mxu2 %v9641_v56  ;;  %v10312_v56 = vld [vmem:[#allocation5 + $0xe50] sm:$0xf]  ;;  %v10121_v48 = vor.u32 %v12998_v8, %v10120_v52  ;;  %v12986_v52 = vld [vmem:[#allocation5 + $0xc84] sm:$0xf0]  ;;  %v10240_v13 = vld [vmem:[#allocation5 + $0xdc0] sm:$0xf] }
 0x2c3   :  { %6901 = vmatpush.bf16.msra.mxu3 %v9833_v26  ;;  %6860 = vmatmul.bf16.vlgmr.msra.gmra.mxu0 %v13997_v39  ;;  %v13046_v26 = vld [vmem:[#allocation5 + $0xe64] sm:$0xf0]  ;;  %v10264_v8 = vld [vmem:[#allocation5 + $0xdf0] sm:$0xf]  ;;  %v13028_v21 = vld [vmem:[#allocation5 + $0xdd4] sm:$0xf0] }
 0x2c4   :  { %6908 = vmatpush.bf16.msrb.mxu0 %v10193_v30  ;;  %6874 = vmatmul.bf16.vlgmr.msra.gmra.mxu1 %v14001_v44  ;;  %v10504_v30 = vld [vmem:[#allocation5 + $0xfd0] sm:$0xf] }
 0x2c5   :  { %6922 = vmatpush.bf16.msrb.mxu1 %v10385_v7  ;;  %6888 = vmatmul.bf16.vlgmr.msra.gmra.mxu2 %v13999_v43  ;;  %v13094_v7 = vld [vmem:[#allocation5 + $0xfe4] sm:$0xf0] }
 0x2c6   :  { %6936 = vmatpush.bf16.msrb.mxu2 %v10577_v25  ;;  %6902 = vmatmul.bf16.vlgmr.msra.gmra.mxu3 %v14003_v47  ;;  %v14303_v25 = vpop.f32.mrf.mxu3 }
 0x2c7   :  { %6950 = vmatpush.bf16.msrb.mxu3 %v10769_v22  ;;  %14681 = vst [vmem:[#allocation79_spill] sm:$0xff] %v14303_v25  ;;  %v10696_v22 = vld [vmem:[#allocation5 + $0x1150] sm:$0xf]  ;;  %v13202_v25 = vld [vmem:[#allocation5 + $0x1344] sm:$0xf0] }
 0x2c8   :  { %6909 = vmatpush.bf16.msrb.mxu0 %v10169_v19  ;;  %v10313_v19 = vor.u32 %v13046_v26, %v10312_v56  ;;  %v10697_v42 = vor.u32 %v13142_v45, %v10696_v22  ;;  %v10673_v56 = vor.u32 %v13136_v51, %v10672_v61  ;;  %v6665_v26 = vpop.f32.mrf.mxu2  ;;  %v10648_v45 = vld [vmem:[#allocation5 + $0x10f0] sm:$0xf]  ;;  %v13124_v61 = vld [vmem:[#allocation5 + $0x10d4] sm:$0xf0]  ;;  %v14308_v6 = vpop.f32.mrf.mxu0 }
 0x2c9   :  { %6923 = vmatpush.bf16.msrb.mxu1 %v10361_v15  ;;  %v10505_v15 = vor.u32 %v13094_v7, %v10504_v30  ;;  %v10456_v30 = vld [vmem:[#allocation5 + $0xf70] sm:$0xf]  ;;  %v13082_v7 = vld [vmem:[#allocation5 + $0xf84] sm:$0xf0]  ;;  %14682 = vst [vmem:[#allocation80_spill] sm:$0xff] %v14308_v6 }
 0x2ca   :  { %6937 = vmatpush.bf16.msrb.mxu2 %v10553_v2  ;;  %v10096_v2 = vld [vmem:[#allocation5 + $0xca0] sm:$0xf] }
 0x2cb   :  { %6951 = vmatpush.bf16.msrb.mxu3 %v10745_v24  ;;  %v6652_v24 = vadd.f32 %v6651_v28, %v6638_v33  ;;  %v13130_v33 = vld [vmem:[#allocation5 + $0x1104] sm:$0xf0] }
 0x2cc   :  { %6910 = vmatpush.bf16.msrb.mxu0 %v10145_v29  ;;  %v10097_v29 = vor.u32 %v12992_v3, %v10096_v2  ;;  %v10048_v2 = vld [vmem:[#allocation5 + $0xc40] sm:$0xf]  ;;  %v12980_v3 = vld [vmem:[#allocation5 + $0xc54] sm:$0xf0] }
 0x2cd   :  { %6924 = vmatpush.bf16.msrb.mxu1 %v10337_v16  ;;  %v10481_v16 = vor.u32 %v13088_v50, %v10480_v11  ;;  %v6666_v9 = vadd.f32 %v6665_v26, %v6652_v24  ;;  %v10432_v11 = vld [vmem:[#allocation5 + $0xf40] sm:$0xf]  ;;  %v13076_v50 = vld [vmem:[#allocation5 + $0xf54] sm:$0xf0]  ;;  %v10049_v51 = vor.u32 %v12980_v3, %v10048_v2  ;;  %v10408_v26 = vld [vmem:[#allocation5 + $0xf10] sm:$0xf] }
 0x2ce   :  { %6938 = vmatpush.bf16.msrb.mxu2 %v10529_v12  ;;  %v10072_v12 = vld [vmem:[#allocation5 + $0xc70] sm:$0xf]  ;;  %v6679_v22 = vpop.f32.mrf.mxu3  ;;  %v10624_v24 = vld [vmem:[#allocation5 + $0x10c0] sm:$0xf]  ;;  %v13304_v3 = vld [vmem:[#allocation5 + $0x1674] sm:$0xf0] }
 0x2cf   :  { %6952 = vmatpush.bf16.msrb.mxu3 %v10721_v60  ;;  %v13034_v60 = vld [vmem:[#allocation5 + $0xe04] sm:$0xf0]  ;;  %v14306_v28 = vadd.f32 %v6679_v22, %v6666_v9  ;;  %v10960_v9 = vld [vmem:[#allocation5 + $0x1360] sm:$0xf]  ;;  %v13208_v22 = vld [vmem:[#allocation5 + $0x1374] sm:$0xf0] }
 0x2d0   :  { %6911 = vmatpush.bf16.msrb.mxu0 %v10121_v48  ;;  %v10073_v48 = vor.u32 %v12986_v52, %v10072_v12  ;;  %v12974_v12 = vld [vmem:[#allocation5 + $0xc24] sm:$0xf0]  ;;  %v10216_v52 = vld [vmem:[#allocation5 + $0xd90] sm:$0xf]  ;;  %v11344_v2 = vld [vmem:[#allocation5 + $0x1660] sm:$0xf] }
 0x2d1   :  { %6925 = vmatpush.bf16.msrb.mxu1 %v10313_v19  ;;  %v10265_v19 = vor.u32 %v13034_v60, %v10264_v8  ;;  %v13022_v8 = vld [vmem:[#allocation5 + $0xda4] sm:$0xf0]  ;;  %v10625_v60 = vor.u32 %v13124_v61, %v10624_v24  ;;  %v11345_v24 = vor.u32 %v13304_v3, %v11344_v2  ;;  %v10936_v61 = vld [vmem:[#allocation5 + $0x1330] sm:$0xf] }
 0x2d2   :  { %6939 = vmatpush.bf16.msrb.mxu2 %v10505_v15  ;;  %v10457_v15 = vor.u32 %v13082_v7, %v10456_v30  ;;  %v10600_v30 = vld [vmem:[#allocation5 + $0x1090] sm:$0xf]  ;;  %v13118_v7 = vld [vmem:[#allocation5 + $0x10a4] sm:$0xf0] }
 0x2d3   :  { %6953 = vmatpush.bf16.msrb.mxu3 %v10697_v42  ;;  %v10649_v42 = vor.u32 %v13130_v33, %v10648_v45  ;;  %v11152_v45 = vld [vmem:[#allocation5 + $0x14e0] sm:$0xf]  ;;  %v10888_v3 = vld [vmem:[#allocation5 + $0x12d0] sm:$0xf] }
 0x2d4   :  { %6912 = vmatpush.bf16.msrb.mxu0 %v10097_v29  ;;  %v10024_v29 = vld [vmem:[#allocation5 + $0xc10] sm:$0xf] }
 0x2d5   :  { %6926 = vmatpush.bf16.msrb.mxu1 %v10289_v23  ;;  %v10241_v23 = vor.u32 %v13028_v21, %v10240_v13  ;;  %v10025_v33 = vor.u32 %v12974_v12, %v10024_v29  ;;  %v11536_v13 = vld [vmem:[#allocation5 + $0x17e0] sm:$0xf]  ;;  %v13352_v21 = vld [vmem:[#allocation5 + $0x17f4] sm:$0xf0]  ;;  %v13250_v29 = vld [vmem:[#allocation5 + $0x14c4] sm:$0xf0] }
 0x2d6   :  { %6940 = vmatpush.bf16.msrb.mxu2 %v10481_v16  ;;  %v10433_v16 = vor.u32 %v13076_v50, %v10432_v11  ;;  %v10961_v11 = vor.u32 %v13208_v22, %v10960_v9  ;;  %v11320_v12 = vld [vmem:[#allocation5 + $0x1630] sm:$0xf]  ;;  %v13244_v22 = vld [vmem:[#allocation5 + $0x1494] sm:$0xf0] }
 0x2d7   :  { %6954 = vmatpush.bf16.msrb.mxu3 %v10673_v56  ;;  %v13070_v56 = vld [vmem:[#allocation5 + $0xf24] sm:$0xf0] }
 0x2d8   :  { %6913 = vmatpush.bf16.msrb.mxu0 %v10073_v48  ;;  %v13256_v48 = vld [vmem:[#allocation5 + $0x14f4] sm:$0xf0] }
 0x2d9   :  { %6927 = vmatpush.bf16.msrb.mxu1 %v10265_v19  ;;  %v10217_v19 = vor.u32 %v13022_v8, %v10216_v52  ;;  %v11153_v50 = vor.u32 %v13256_v48, %v11152_v45  ;;  %v14310_v52 = vpop.f32.mrf.mxu1  ;;  %v10937_v8 = vor.u32 %v13202_v25, %v10936_v61  ;;  %v11296_v45 = vld [vmem:[#allocation5 + $0x1600] sm:$0xf]  ;;  %v13340_v25 = vld [vmem:[#allocation5 + $0x1794] sm:$0xf0] }
 0x2da   :  { %6941 = vmatpush.bf16.msrb.mxu2 %v10457_v15  ;;  %v10409_v15 = vor.u32 %v13070_v56, %v10408_v26  ;;  %14683 = vst [vmem:[#allocation81_spill] sm:$0xff] %v14310_v52  ;;  %v11129_v26 = vor.u32 %v13250_v29, %v11128_v20  ;;  %v10912_v56 = vld [vmem:[#allocation5 + $0x1300] sm:$0xf]  ;;  %v13334_v29 = vld [vmem:[#allocation5 + $0x1764] sm:$0xf0] }
 0x2db   :  { %6955 = vmatpush.bf16.msrb.mxu3 %v10649_v42  ;;  %v10601_v42 = vor.u32 %v13118_v7, %v10600_v30  ;;  %v13196_v30 = vld [vmem:[#allocation5 + $0x1314] sm:$0xf0]  ;;  %v11104_v7 = vld [vmem:[#allocation5 + $0x1480] sm:$0xf]  ;;  %v13490_v52 = vld [vmem:[#allocation5 + $0x1c44] sm:$0xf0] }
 0x2dc   :  { %6914 = vmatpush.bf16.msrb.mxu0 %v10049_v51  ;;  %v11537_v51 = vor.u32 %v13352_v21, %v11536_v13  ;;  %v11488_v48 = vld [vmem:[#allocation5 + $0x1780] sm:$0xf]  ;;  %v11105_v20 = vor.u32 %v13244_v22, %v11104_v7  ;;  %v14316_v13 = vpop.f32.mrf.mxu2  ;;  %v13232_v22 = vld [vmem:[#allocation5 + $0x1434] sm:$0xf0] }
 0x2dd   :  { %6928 = vmatpush.bf16.msrb.mxu1 %v10241_v23  ;;  %v11512_v23 = vld [vmem:[#allocation5 + $0x17b0] sm:$0xf]  ;;  %14684 = vst [vmem:[#allocation82_spill] sm:$0xff] %v14316_v13  ;;  %v11489_v21 = vor.u32 %v13340_v25, %v11488_v48  ;;  %v11440_v48 = vld [vmem:[#allocation5 + $0x1720] sm:$0xf] }
 0x2de   :  { %6942 = vmatpush.bf16.msrb.mxu2 %v10433_v16  ;;  %v13346_v16 = vld [vmem:[#allocation5 + $0x17c4] sm:$0xf0]  ;;  %v13328_v25 = vld [vmem:[#allocation5 + $0x1734] sm:$0xf0]  ;;  %v11896_v13 = vld [vmem:[#allocation5 + $0x1ab0] sm:$0xf] }
 0x2df   :  { %6956 = vmatpush.bf16.msrb.mxu3 %v10625_v60  ;;  %v11321_v60 = vor.u32 %v13298_v14, %v11320_v12  ;;  %v11513_v9 = vor.u32 %v13346_v16, %v11512_v23  ;;  %v10913_v14 = vor.u32 %v13196_v30, %v10912_v56  ;;  %v13184_v56 = vld [vmem:[#allocation5 + $0x12b4] sm:$0xf0]  ;;  %v11056_v30 = vld [vmem:[#allocation5 + $0x1420] sm:$0xf] }
 0x2e0   :  { %6915 = vmatpush.bf16.msrb.mxu0 %v10025_v33  ;;  %v13292_v33 = vld [vmem:[#allocation5 + $0x1614] sm:$0xf0]  ;;  %v6693_v61 = vpop.f32.mrf.mxu0 }
 0x2e1   :  { %6929 = vmatpush.bf16.msrb.mxu1 %v10217_v19  ;;  %v11297_v2 = vor.u32 %v13292_v33, %v11296_v45  ;;  %v13190_v19 = vld [vmem:[#allocation5 + $0x12e4] sm:$0xf0]  ;;  %v6694_v12 = vadd.f32 %v6693_v61, %v14306_v28  ;;  %v6707_v16 = vpop.f32.mrf.mxu1  ;;  %v11248_v45 = vld [vmem:[#allocation5 + $0x15a0] sm:$0xf]  ;;  %v13280_v33 = vld [vmem:[#allocation5 + $0x15b4] sm:$0xf0]  ;;  %v11057_v28 = vor.u32 %v13232_v22, %v11056_v30 }
 0x2e2   :  { %6943 = vmatpush.bf16.msrb.mxu2 %v10409_v15  ;;  %v11080_v15 = vld [vmem:[#allocation5 + $0x1450] sm:$0xf]  ;;  %v10889_v23 = vor.u32 %v13190_v19, %v10888_v3  ;;  %v13178_v3 = vld [vmem:[#allocation5 + $0x1284] sm:$0xf0]  ;;  %v11008_v30 = vld [vmem:[#allocation5 + $0x13c0] sm:$0xf] }
 0x2e3   :  { %6957 = vmatpush.bf16.msrb.mxu3 %v10601_v42  ;;  %6916 = vmatmul.bf16.vlgmr.msrb.gmra.mxu0 %v14009_v31  ;;  %v13238_v42 = vld [vmem:[#allocation5 + $0x1464] sm:$0xf0]  ;;  %v11032_v19 = vld [vmem:[#allocation5 + $0x13f0] sm:$0xf]  ;;  %v13220_v22 = vld [vmem:[#allocation5 + $0x13d4] sm:$0xf0] }
 0x2e4   :  { %6964 = vmatpush.bf16.msra.mxu0 %v10961_v11  ;;  %6930 = vmatmul.bf16.vlgmr.msrb.gmra.mxu1 %v14013_v36  ;;  %v11272_v11 = vld [vmem:[#allocation5 + $0x15d0] sm:$0xf] }
 0x2e5   :  { %6978 = vmatpush.bf16.msra.mxu1 %v11153_v50  ;;  %6944 = vmatmul.bf16.vlgmr.msrb.gmra.mxu2 %v14011_v35  ;;  %v13286_v50 = vld [vmem:[#allocation5 + $0x15e4] sm:$0xf0] }
 0x2e6   :  { %6992 = vmatpush.bf16.msra.mxu2 %v11345_v24  ;;  %6958 = vmatmul.bf16.vlgmr.msrb.gmra.mxu3 %v14015_v40  ;;  %v14318_v24 = vpop.f32.mrf.mxu3 }
 0x2e7   :  { %7006 = vmatpush.bf16.msra.mxu3 %v11537_v51  ;;  %14685 = vst [vmem:[#allocation83_spill] sm:$0xff] %v14318_v24  ;;  %v11464_v51 = vld [vmem:[#allocation5 + $0x1750] sm:$0xf]  ;;  %v13394_v24 = vld [vmem:[#allocation5 + $0x1944] sm:$0xf0] }
 0x2e8   :  { %6965 = vmatpush.bf16.msra.mxu0 %v10937_v8  ;;  %v11081_v8 = vor.u32 %v13238_v42, %v11080_v15  ;;  %v11465_v7 = vor.u32 %v13334_v29, %v11464_v51  ;;  %v11441_v15 = vor.u32 %v13328_v25, %v11440_v48  ;;  %v6721_v42 = vpop.f32.mrf.mxu2  ;;  %v11416_v29 = vld [vmem:[#allocation5 + $0x16f0] sm:$0xf]  ;;  %v13316_v48 = vld [vmem:[#allocation5 + $0x16d4] sm:$0xf0]  ;;  %v14323_v6 = vpop.f32.mrf.mxu0 }
 0x2e9   :  { %6979 = vmatpush.bf16.msra.mxu1 %v11129_v26  ;;  %v11273_v26 = vor.u32 %v13286_v50, %v11272_v11  ;;  %v11224_v11 = vld [vmem:[#allocation5 + $0x1570] sm:$0xf]  ;;  %v13274_v50 = vld [vmem:[#allocation5 + $0x1584] sm:$0xf0] }
 0x2ea   :  { %6993 = vmatpush.bf16.msra.mxu2 %v11321_v60  ;;  %v10864_v60 = vld [vmem:[#allocation5 + $0x12a0] sm:$0xf] }
 0x2eb   :  { %7007 = vmatpush.bf16.msra.mxu3 %v11513_v9  ;;  %v6708_v9 = vadd.f32 %v6707_v16, %v6694_v12  ;;  %v13322_v12 = vld [vmem:[#allocation5 + $0x1704] sm:$0xf0] }
 0x2ec   :  { %6966 = vmatpush.bf16.msra.mxu0 %v10913_v14  ;;  %v10865_v14 = vor.u32 %v13184_v56, %v10864_v60  ;;  %v10816_v60 = vld [vmem:[#allocation5 + $0x1240] sm:$0xf]  ;;  %v13172_v56 = vld [vmem:[#allocation5 + $0x1254] sm:$0xf0] }
 0x2ed   :  { %6980 = vmatpush.bf16.msra.mxu1 %v11105_v20  ;;  %v11249_v20 = vor.u32 %v13280_v33, %v11248_v45  ;;  %v6722_v61 = vadd.f32 %v6721_v42, %v6708_v9  ;;  %v11200_v45 = vld [vmem:[#allocation5 + $0x1540] sm:$0xf]  ;;  %v13268_v33 = vld [vmem:[#allocation5 + $0x1554] sm:$0xf0]  ;;  %v10817_v25 = vor.u32 %v13172_v56, %v10816_v60  ;;  %v11176_v42 = vld [vmem:[#allocation5 + $0x1510] sm:$0xf] }
 0x2ee   :  { %6994 = vmatpush.bf16.msra.mxu2 %v11297_v2  ;;  %v10840_v2 = vld [vmem:[#allocation5 + $0x1270] sm:$0xf]  ;;  %v6735_v51 = vpop.f32.mrf.mxu3  ;;  %v11392_v9 = vld [vmem:[#allocation5 + $0x16c0] sm:$0xf]  ;;  %v13496_v56 = vld [vmem:[#allocation5 + $0x1c74] sm:$0xf0] }
 0x2ef   :  { %7008 = vmatpush.bf16.msra.mxu3 %v11489_v21  ;;  %v13226_v21 = vld [vmem:[#allocation5 + $0x1404] sm:$0xf0]  ;;  %v14321_v16 = vadd.f32 %v6735_v51, %v6722_v61  ;;  %v11728_v61 = vld [vmem:[#allocation5 + $0x1960] sm:$0xf]  ;;  %v13400_v51 = vld [vmem:[#allocation5 + $0x1974] sm:$0xf0] }
 0x2f0   :  { %6967 = vmatpush.bf16.msra.mxu0 %v10889_v23  ;;  %v10841_v23 = vor.u32 %v13178_v3, %v10840_v2  ;;  %v13166_v2 = vld [vmem:[#allocation5 + $0x1224] sm:$0xf0]  ;;  %v10984_v3 = vld [vmem:[#allocation5 + $0x1390] sm:$0xf]  ;;  %v12112_v60 = vld [vmem:[#allocation5 + $0x1c60] sm:$0xf] }
 0x2f1   :  { %6981 = vmatpush.bf16.msra.mxu1 %v11081_v8  ;;  %v11033_v8 = vor.u32 %v13226_v21, %v11032_v19  ;;  %v13214_v19 = vld [vmem:[#allocation5 + $0x13a4] sm:$0xf0]  ;;  %v11393_v21 = vor.u32 %v13316_v48, %v11392_v9  ;;  %v12113_v9 = vor.u32 %v13496_v56, %v12112_v60  ;;  %v11704_v48 = vld [vmem:[#allocation5 + $0x1930] sm:$0xf] }
 0x2f2   :  { %6995 = vmatpush.bf16.msra.mxu2 %v11273_v26  ;;  %v11225_v26 = vor.u32 %v13274_v50, %v11224_v11  ;;  %v11368_v11 = vld [vmem:[#allocation5 + $0x1690] sm:$0xf]  ;;  %v13310_v50 = vld [vmem:[#allocation5 + $0x16a4] sm:$0xf0] }
 0x2f3   :  { %7009 = vmatpush.bf16.msra.mxu3 %v11465_v7  ;;  %v11417_v7 = vor.u32 %v13322_v12, %v11416_v29  ;;  %v11920_v29 = vld [vmem:[#allocation5 + $0x1ae0] sm:$0xf]  ;;  %v11656_v56 = vld [vmem:[#allocation5 + $0x18d0] sm:$0xf] }
 0x2f4   :  { %6968 = vmatpush.bf16.msra.mxu0 %v10865_v14  ;;  %v10792_v14 = vld [vmem:[#allocation5 + $0x1210] sm:$0xf] }
 0x2f5   :  { %6982 = vmatpush.bf16.msra.mxu1 %v11057_v28  ;;  %v11009_v28 = vor.u32 %v13220_v22, %v11008_v30  ;;  %v10793_v12 = vor.u32 %v13166_v2, %v10792_v14  ;;  %v12629_v30 = vld [vmem:[#allocation5 + $0x164] sm:$0xf]  ;;  %v8658_v22 = vld [vmem:[#allocation5 + $0x178] sm:$0xf0]  ;;  %v13442_v14 = vld [vmem:[#allocation5 + $0x1ac4] sm:$0xf0] }
 0x2f6   :  { %6996 = vmatpush.bf16.msra.mxu2 %v11249_v20  ;;  %v11201_v20 = vor.u32 %v13268_v33, %v11200_v45  ;;  %v11729_v45 = vor.u32 %v13400_v51, %v11728_v61  ;;  %v12088_v2 = vld [vmem:[#allocation5 + $0x1c30] sm:$0xf]  ;;  %v13436_v51 = vld [vmem:[#allocation5 + $0x1a94] sm:$0xf0] }
 0x2f7   :  { %7010 = vmatpush.bf16.msra.mxu3 %v11441_v15  ;;  %v13262_v15 = vld [vmem:[#allocation5 + $0x1524] sm:$0xf0] }
 0x2f8   :  { %6969 = vmatpush.bf16.msra.mxu0 %v10841_v23  ;;  %v13448_v23 = vld [vmem:[#allocation5 + $0x1af4] sm:$0xf0] }
 0x2f9   :  { %6983 = vmatpush.bf16.msra.mxu1 %v11033_v8  ;;  %v10985_v8 = vor.u32 %v13214_v19, %v10984_v3  ;;  %v11921_v33 = vor.u32 %v13448_v23, %v11920_v29  ;;  %v14325_v3 = vpop.f32.mrf.mxu1  ;;  %v11705_v19 = vor.u32 %v13394_v24, %v11704_v48  ;;  %v12064_v29 = vld [vmem:[#allocation5 + $0x1c00] sm:$0xf]  ;;  %v12617_v23 = vld [vmem:[#allocation5 + $0x104] sm:$0xf]  ;;  %v8610_v24 = vld [vmem:[#allocation5 + $0x118] sm:$0xf0] }
 0x2fa   :  { %6997 = vmatpush.bf16.msra.mxu2 %v11225_v26  ;;  %v11177_v26 = vor.u32 %v13262_v15, %v11176_v42  ;;  %v11897_v42 = vor.u32 %v13442_v14, %v11896_v13  ;;  %v11680_v15 = vld [vmem:[#allocation5 + $0x1900] sm:$0xf]  ;;  %v8586_v14 = vld [vmem:[#allocation5 + $0xe8] sm:$0xf0] }
 0x2fb   :  { %7011 = vmatpush.bf16.msra.mxu3 %v11417_v7  ;;  %v11369_v7 = vor.u32 %v13310_v50, %v11368_v11  ;;  %v13388_v11 = vld [vmem:[#allocation5 + $0x1914] sm:$0xf0]  ;;  %v11872_v50 = vld [vmem:[#allocation5 + $0x1a80] sm:$0xf] }
 0x2fc   :  { %6970 = vmatpush.bf16.msra.mxu0 %v10817_v25  ;;  %v8661_v25 = vor.u32 %v12629_v30, %v8658_v22  ;;  %v11873_v13 = vor.u32 %v13436_v51, %v11872_v50  ;;  %v14331_v30 = vpop.f32.mrf.mxu2  ;;  %v8613_v22 = vor.u32 %v12617_v23, %v8610_v24  ;;  %v13424_v51 = vld [vmem:[#allocation5 + $0x1a34] sm:$0xf0]  ;;  %v12605_v23 = vld [vmem:[#allocation5 + $0xa4] sm:$0xf]  ;;  %v8562_v24 = vld [vmem:[#allocation5 + $0xb8] sm:$0xf0] }
 0x2fd   :  { %6984 = vmatpush.bf16.msra.mxu1 %v11009_v28  ;;  %v12623_v28 = vld [vmem:[#allocation5 + $0x134] sm:$0xf]  ;;  %14686 = vst [vmem:[#allocation84_spill] sm:$0xff] %v14331_v30  ;;  %v9210_v30 = vld [vmem:[#allocation5 + $0x5c8] sm:$0xf0] }
 0x2fe   :  { %6998 = vmatpush.bf16.msra.mxu2 %v11201_v20  ;;  %v8634_v20 = vld [vmem:[#allocation5 + $0x148] sm:$0xf0] }
 0x2ff   :  { %7012 = vmatpush.bf16.msra.mxu3 %v11393_v21  ;;  %v12089_v21 = vor.u32 %v13490_v52, %v12088_v2  ;;  %v8637_v61 = vor.u32 %v12623_v28, %v8634_v20  ;;  %v11681_v52 = vor.u32 %v13388_v11, %v11680_v15  ;;  %v13376_v15 = vld [vmem:[#allocation5 + $0x18b4] sm:$0xf0]  ;;  %v11824_v11 = vld [vmem:[#allocation5 + $0x1a20] sm:$0xf] }
 0x300   :  { %6971 = vmatpush.bf16.msra.mxu0 %v10793_v12  ;;  %v13484_v12 = vld [vmem:[#allocation5 + $0x1c14] sm:$0xf0]  ;;  %v6749_v48 = vpop.f32.mrf.mxu0 }
 0x301   :  { %6985 = vmatpush.bf16.msra.mxu1 %v10985_v8  ;;  %v12065_v60 = vor.u32 %v13484_v12, %v12064_v29  ;;  %v13382_v8 = vld [vmem:[#allocation5 + $0x18e4] sm:$0xf0]  ;;  %v6750_v2 = vadd.f32 %v6749_v48, %v14321_v16  ;;  %v6763_v20 = vpop.f32.mrf.mxu1  ;;  %v12016_v29 = vld [vmem:[#allocation5 + $0x1ba0] sm:$0xf]  ;;  %v13472_v12 = vld [vmem:[#allocation5 + $0x1bb4] sm:$0xf0]  ;;  %v11825_v16 = vor.u32 %v13424_v51, %v11824_v11 }
 0x302   :  { %6999 = vmatpush.bf16.msra.mxu2 %v11177_v26  ;;  %v11848_v26 = vld [vmem:[#allocation5 + $0x1a50] sm:$0xf]  ;;  %v11657_v28 = vor.u32 %v13382_v8, %v11656_v56  ;;  %v13370_v56 = vld [vmem:[#allocation5 + $0x1884] sm:$0xf0]  ;;  %v11776_v11 = vld [vmem:[#allocation5 + $0x19c0] sm:$0xf] }
 0x303   :  { %7013 = vmatpush.bf16.msra.mxu3 %v11369_v7  ;;  %6972 = vmatmul.bf16.vlgmr.msra.gmra.mxu0 %v14021_v32  ;;  %v13430_v7 = vld [vmem:[#allocation5 + $0x1a64] sm:$0xf0]  ;;  %v11800_v8 = vld [vmem:[#allocation5 + $0x19f0] sm:$0xf]  ;;  %v13412_v51 = vld [vmem:[#allocation5 + $0x19d4] sm:$0xf0] }
 0x304   :  { %7020 = vmatpush.bf16.msrb.mxu0 %v11729_v45  ;;  %6986 = vmatmul.bf16.vlgmr.msra.gmra.mxu1 %v14025_v41  ;;  %v12040_v45 = vld [vmem:[#allocation5 + $0x1bd0] sm:$0xf] }
 0x305   :  { %7034 = vmatpush.bf16.msrb.mxu1 %v11921_v33  ;;  %7000 = vmatmul.bf16.vlgmr.msra.gmra.mxu2 %v14023_v38  ;;  %v13478_v33 = vld [vmem:[#allocation5 + $0x1be4] sm:$0xf0] }
 0x306   :  { %7048 = vmatpush.bf16.msrb.mxu2 %v12113_v9  ;;  %7014 = vmatmul.bf16.vlgmr.msra.gmra.mxu3 %v14027_v46  ;;  %v14333_v9 = vpop.f32.mrf.mxu3 }
 0x307   :  { %7062 = vmatpush.bf16.msrb.mxu3 %v8661_v25  ;;  %14687 = vst [vmem:[#allocation85_spill] sm:$0xff] %v14333_v9  ;;  %v12611_v25 = vld [vmem:[#allocation5 + $0xd4] sm:$0xf] }
 0x308   :  { %7021 = vmatpush.bf16.msrb.mxu0 %v11705_v19  ;;  %v11849_v19 = vor.u32 %v13430_v7, %v11848_v26  ;;  %v8589_v50 = vor.u32 %v12611_v25, %v8586_v14  ;;  %v8565_v26 = vor.u32 %v12605_v23, %v8562_v24  ;;  %v6777_v7 = vpop.f32.mrf.mxu2  ;;  %v12599_v14 = vld [vmem:[#allocation5 + $0x74] sm:$0xf]  ;;  %v8514_v23 = vld [vmem:[#allocation5 + $0x58] sm:$0xf0] }
 0x309   :  { %7035 = vmatpush.bf16.msrb.mxu1 %v11897_v42  ;;  %v12041_v42 = vor.u32 %v13478_v33, %v12040_v45  ;;  %v11992_v45 = vld [vmem:[#allocation5 + $0x1b70] sm:$0xf]  ;;  %v13466_v33 = vld [vmem:[#allocation5 + $0x1b84] sm:$0xf0]  ;;  %v12719_v9 = vld [vmem:[#allocation5 + $0x434] sm:$0xf] }
 0x30a   :  { %7049 = vmatpush.bf16.msrb.mxu2 %v12089_v21  ;;  %v11632_v21 = vld [vmem:[#allocation5 + $0x18a0] sm:$0xf] }
 0x30b   :  { %7063 = vmatpush.bf16.msrb.mxu3 %v8637_v61  ;;  %v6764_v61 = vadd.f32 %v6763_v20, %v6750_v2  ;;  %v8538_v2 = vld [vmem:[#allocation5 + $0x88] sm:$0xf0] }
 0x30c   :  { %7022 = vmatpush.bf16.msrb.mxu0 %v11681_v52  ;;  %v11633_v52 = vor.u32 %v13376_v15, %v11632_v21  ;;  %v11584_v21 = vld [vmem:[#allocation5 + $0x1840] sm:$0xf]  ;;  %v13364_v15 = vld [vmem:[#allocation5 + $0x1854] sm:$0xf0] }
 0x30d   :  { %7036 = vmatpush.bf16.msrb.mxu1 %v11873_v13  ;;  %v12017_v13 = vor.u32 %v13472_v12, %v12016_v29  ;;  %v6778_v48 = vadd.f32 %v6777_v7, %v6764_v61  ;;  %v11968_v29 = vld [vmem:[#allocation5 + $0x1b40] sm:$0xf]  ;;  %v13460_v12 = vld [vmem:[#allocation5 + $0x1b54] sm:$0xf0]  ;;  %v12593_v61 = vld [vmem:[#allocation5 + $0x44] sm:$0xf]  ;;  %v11585_v24 = vor.u32 %v13364_v15, %v11584_v21 }
 0x30e   :  { %7050 = vmatpush.bf16.msrb.mxu2 %v12065_v60  ;;  %v11608_v60 = vld [vmem:[#allocation5 + $0x1870] sm:$0xf]  ;;  %v6791_v25 = vpop.f32.mrf.mxu3  ;;  %v12773_v21 = vld [vmem:[#allocation5 + $0x5e4] sm:$0xf]  ;;  %v9234_v15 = vld [vmem:[#allocation5 + $0x5f8] sm:$0xf0] }
 0x30f   :  { %7064 = vmatpush.bf16.msrb.mxu3 %v8613_v22  ;;  %v13418_v22 = vld [vmem:[#allocation5 + $0x1a04] sm:$0xf0]  ;;  %v14336_v20 = vadd.f32 %v6791_v25, %v6778_v48  ;;  %v11944_v7 = vld [vmem:[#allocation5 + $0x1b10] sm:$0xf]  ;;  %v12677_v48 = vld [vmem:[#allocation5 + $0x2e4] sm:$0xf] }
 0x310   :  { %7023 = vmatpush.bf16.msrb.mxu0 %v11657_v28  ;;  %v11609_v28 = vor.u32 %v13370_v56, %v11608_v60  ;;  %v13358_v60 = vld [vmem:[#allocation5 + $0x1824] sm:$0xf0]  ;;  %v11752_v56 = vld [vmem:[#allocation5 + $0x1990] sm:$0xf]  ;;  %v8850_v25 = vld [vmem:[#allocation5 + $0x2f8] sm:$0xf0] }
 0x311   :  { %7037 = vmatpush.bf16.msrb.mxu1 %v11849_v19  ;;  %14688 = vst [vmem:[#allocation86_spill] sm:$0xff] %v14336_v20  ;;  %v11801_v19 = vor.u32 %v13418_v22, %v11800_v8  ;;  %v13406_v8 = vld [vmem:[#allocation5 + $0x19a4] sm:$0xf0]  ;;  %v8517_v22 = vor.u32 %v12593_v61, %v8514_v23  ;;  %v9237_v61 = vor.u32 %v12773_v21, %v9234_v15  ;;  %v12671_v23 = vld [vmem:[#allocation5 + $0x2b4] sm:$0xf] }
 0x312   :  { %7051 = vmatpush.bf16.msrb.mxu2 %v12041_v42  ;;  %v11993_v42 = vor.u32 %v13466_v33, %v11992_v45  ;;  %v12587_v45 = vld [vmem:[#allocation5 + $0x14] sm:$0xf]  ;;  %v8490_v33 = vld [vmem:[#allocation5 + $0x28] sm:$0xf0] }
 0x313   :  { %7065 = vmatpush.bf16.msrb.mxu3 %v8589_v50  ;;  %v8541_v50 = vor.u32 %v12599_v14, %v8538_v2  ;;  %v12725_v14 = vld [vmem:[#allocation5 + $0x464] sm:$0xf]  ;;  %v8826_v20 = vld [vmem:[#allocation5 + $0x2c8] sm:$0xf0]  ;;  %v12659_v21 = vld [vmem:[#allocation5 + $0x254] sm:$0xf] }
 0x314   :  { %7024 = vmatpush.bf16.msrb.mxu0 %v11633_v52  ;;  %v11560_v52 = vld [vmem:[#allocation5 + $0x1810] sm:$0xf]  ;;  %v8778_v15 = vld [vmem:[#allocation5 + $0x268] sm:$0xf0] }
 0x315   :  { %7038 = vmatpush.bf16.msrb.mxu1 %v11825_v16  ;;  %v11777_v16 = vor.u32 %v13412_v51, %v11776_v11  ;;  %v11561_v2 = vor.u32 %v13358_v60, %v11560_v52  ;;  %v12821_v11 = vld [vmem:[#allocation5 + $0x764] sm:$0xf]  ;;  %v9426_v51 = vld [vmem:[#allocation5 + $0x778] sm:$0xf0]  ;;  %v9018_v52 = vld [vmem:[#allocation5 + $0x448] sm:$0xf0] }
 0x316   :  { %7052 = vmatpush.bf16.msrb.mxu2 %v12017_v13  ;;  %v11969_v13 = vor.u32 %v13460_v12, %v11968_v29  ;;  %v8853_v29 = vor.u32 %v12677_v48, %v8850_v25  ;;  %v12767_v60 = vld [vmem:[#allocation5 + $0x5b4] sm:$0xf]  ;;  %v8994_v48 = vld [vmem:[#allocation5 + $0x418] sm:$0xf0]  ;;  %v12761_v25 = vld [vmem:[#allocation5 + $0x584] sm:$0xf] }
 0x317   :  { %7066 = vmatpush.bf16.msrb.mxu3 %v8565_v26  ;;  %v13454_v26 = vld [vmem:[#allocation5 + $0x1b24] sm:$0xf0] }
 0x318   :  { %7025 = vmatpush.bf16.msrb.mxu0 %v11609_v28  ;;  %v9042_v28 = vld [vmem:[#allocation5 + $0x478] sm:$0xf0] }
 0x319   :  { %7039 = vmatpush.bf16.msrb.mxu1 %v11801_v19  ;;  %v11753_v19 = vor.u32 %v13406_v8, %v11752_v56  ;;  %v9045_v12 = vor.u32 %v12725_v14, %v9042_v28  ;;  %v8829_v56 = vor.u32 %v12671_v23, %v8826_v20  ;;  %v9021_v8 = vor.u32 %v12719_v9, %v9018_v52  ;;  %v9186_v14 = vld [vmem:[#allocation5 + $0x598] sm:$0xf0] }
 0x31a   :  { %7053 = vmatpush.bf16.msrb.mxu2 %v11993_v42  ;;  %v11945_v42 = vor.u32 %v13454_v26, %v11944_v7  ;;  %v9213_v7 = vor.u32 %v12767_v60, %v9210_v30  ;;  %v8802_v26 = vld [vmem:[#allocation5 + $0x298] sm:$0xf0]  ;;  %v9189_v9 = vor.u32 %v12761_v25, %v9186_v14  ;;  %v12701_v60 = vld [vmem:[#allocation5 + $0x3a4] sm:$0xf]  ;;  %v8730_v25 = vld [vmem:[#allocation5 + $0x208] sm:$0xf0] }
 0x31b   :  { %7067 = vmatpush.bf16.msrb.mxu3 %v8541_v50  ;;  %v8493_v50 = vor.u32 %v12587_v45, %v8490_v33  ;;  %v12713_v45 = vld [vmem:[#allocation5 + $0x404] sm:$0xf]  ;;  %v9378_v20 = vld [vmem:[#allocation5 + $0x718] sm:$0xf0]  ;;  %v12695_v14 = vld [vmem:[#allocation5 + $0x374] sm:$0xf] }
 0x31c   :  { %7026 = vmatpush.bf16.msrb.mxu0 %v11585_v24  ;;  %v9429_v24 = vor.u32 %v12821_v11, %v9426_v51  ;;  %v8997_v30 = vor.u32 %v12713_v45, %v8994_v48  ;;  %v8970_v11 = vld [vmem:[#allocation5 + $0x3e8] sm:$0xf0]  ;;  %v12755_v51 = vld [vmem:[#allocation5 + $0x554] sm:$0xf]  ;;  %v8754_v52 = vld [vmem:[#allocation5 + $0x238] sm:$0xf0] }
 0x31d   :  { %7040 = vmatpush.bf16.msrb.mxu1 %v11777_v16  ;;  %v12815_v16 = vld [vmem:[#allocation5 + $0x734] sm:$0xf] }
 0x31e   :  { %7054 = vmatpush.bf16.msrb.mxu2 %v11969_v13  ;;  %v9402_v13 = vld [vmem:[#allocation5 + $0x748] sm:$0xf0]  ;;  %v12647_v48 = vld [vmem:[#allocation5 + $0x1f4] sm:$0xf] }
 0x31f   :  { %7068 = vmatpush.bf16.msrb.mxu3 %v8517_v22  ;;  %v12665_v22 = vld [vmem:[#allocation5 + $0x284] sm:$0xf]  ;;  %v9405_v33 = vor.u32 %v12815_v16, %v9402_v13  ;;  %v8946_v13 = vld [vmem:[#allocation5 + $0x3b8] sm:$0xf0] }
 0x320   :  { %7027 = vmatpush.bf16.msrb.mxu0 %v11561_v2  ;;  %v12809_v2 = vld [vmem:[#allocation5 + $0x704] sm:$0xf]  ;;  %v8805_v28 = vor.u32 %v12665_v22, %v8802_v26  ;;  %v9330_v22 = vld [vmem:[#allocation5 + $0x6b8] sm:$0xf0]  ;;  %v8949_v45 = vor.u32 %v12701_v60, %v8946_v13  ;;  %v12635_v60 = vld [vmem:[#allocation5 + $0x194] sm:$0xf] }
 0x321   :  { %7041 = vmatpush.bf16.msrb.mxu1 %v11753_v19  ;;  %v12707_v19 = vld [vmem:[#allocation5 + $0x3d4] sm:$0xf] }
 0x322   :  { %7055 = vmatpush.bf16.msrb.mxu2 %v11945_v42  ;;  %v9381_v42 = vor.u32 %v12809_v2, %v9378_v20  ;;  %v8973_v23 = vor.u32 %v12707_v19, %v8970_v11  ;;  %v8922_v20 = vld [vmem:[#allocation5 + $0x388] sm:$0xf0]  ;;  %v12641_v11 = vld [vmem:[#allocation5 + $0x1c4] sm:$0xf] }
 0x323   :  { %7069 = vmatpush.bf16.msrb.mxu3 %v8493_v50  ;;  %7028 = vmatmul.bf16.vlgmr.msrb.gmra.mxu0 %v14033_v49  ;;  %v9162_v50 = vld [vmem:[#allocation5 + $0x568] sm:$0xf0]  ;;  %v8925_v19 = vor.u32 %v12695_v14, %v8922_v20  ;;  %v9618_v14 = vld [vmem:[#allocation5 + $0x8f8] sm:$0xf0] }
 0x324   :  { %7076 = vmatpush.bf16.msra.mxu0 %v8853_v29  ;;  %7042 = vmatmul.bf16.vlgmr.msrb.gmra.mxu1 %v14037_v54  ;;  %v12803_v29 = vld [vmem:[#allocation5 + $0x6d4] sm:$0xf] }
 0x325   :  { %7090 = vmatpush.bf16.msra.mxu1 %v9045_v12  ;;  %7056 = vmatmul.bf16.vlgmr.msrb.gmra.mxu2 %v14035_v53  ;;  %v9354_v12 = vld [vmem:[#allocation5 + $0x6e8] sm:$0xf0] }
 0x326   :  { %7104 = vmatpush.bf16.msra.mxu2 %v9237_v61  ;;  %7070 = vmatmul.bf16.vlgmr.msrb.gmra.mxu3 %v13985_v58  ;;  %v8781_v61 = vor.u32 %v12659_v21, %v8778_v15  ;;  %v9165_v58 = vor.u32 %v12755_v51, %v9162_v50  ;;  %v9357_v16 = vor.u32 %v12803_v29, %v9354_v12  ;;  %v9306_v21 = vld [vmem:[#allocation5 + $0x688] sm:$0xf0]  ;;  %v8706_v51 = vld [vmem:[#allocation5 + $0x1d8] sm:$0xf0]  ;;  %v12689_v50 = vld [vmem:[#allocation5 + $0x344] sm:$0xf] }
 0x327   :  { %7118 = vmatpush.bf16.msra.mxu3 %v9429_v24  ;;  %v12653_v24 = vld [vmem:[#allocation5 + $0x224] sm:$0xf]  ;;  %v8733_v15 = vor.u32 %v12647_v48, %v8730_v25  ;;  %v8898_v12 = vld [vmem:[#allocation5 + $0x358] sm:$0xf0]  ;;  %v9258_v48 = vld [vmem:[#allocation5 + $0x628] sm:$0xf0] }
 0x328   :  { %7077 = vmatpush.bf16.msra.mxu0 %v8829_v56  ;;  %v12749_v56 = vld [vmem:[#allocation5 + $0x524] sm:$0xf]  ;;  %v8757_v26 = vor.u32 %v12653_v24, %v8754_v52  ;;  %v9282_v24 = vld [vmem:[#allocation5 + $0x658] sm:$0xf0]  ;;  %v8709_v52 = vor.u32 %v12641_v11, %v8706_v51  ;;  %v8901_v13 = vor.u32 %v12689_v50, %v8898_v12  ;;  %v12863_v12 = vld [vmem:[#allocation5 + $0x8b4] sm:$0xf] }
 0x329   :  { %7091 = vmatpush.bf16.msra.mxu1 %v9021_v8  ;;  %v9138_v8 = vld [vmem:[#allocation5 + $0x538] sm:$0xf0]  ;;  %v12869_v25 = vld [vmem:[#allocation5 + $0x8e4] sm:$0xf]  ;;  %v11130_v53 = vld [vmem:[#allocation5 + $0x14c8] sm:$0xf0] }
 0x32a   :  { %7105 = vmatpush.bf16.msra.mxu2 %v9213_v7  ;;  %v12797_v7 = vld [vmem:[#allocation5 + $0x6a4] sm:$0xf]  ;;  %v9621_v51 = vor.u32 %v12869_v25, %v9618_v14  ;;  %v9954_v14 = vld [vmem:[#allocation5 + $0xb98] sm:$0xf0] }
 0x32b   :  { %7119 = vmatpush.bf16.msra.mxu3 %v9405_v33  ;;  %v9141_v33 = vor.u32 %v12749_v56, %v9138_v8  ;;  %v9333_v2 = vor.u32 %v12797_v7, %v9330_v22  ;;  %v12683_v8 = vld [vmem:[#allocation5 + $0x314] sm:$0xf]  ;;  %v8874_v7 = vld [vmem:[#allocation5 + $0x328] sm:$0xf0]  ;;  %v12953_v25 = vld [vmem:[#allocation5 + $0xb84] sm:$0xf] }
 0x32c   :  { %7078 = vmatpush.bf16.msra.mxu0 %v8805_v28  ;;  %v12743_v28 = vld [vmem:[#allocation5 + $0x4f4] sm:$0xf] }
 0x32d   :  { %7092 = vmatpush.bf16.msra.mxu1 %v8997_v30  ;;  %v9114_v30 = vld [vmem:[#allocation5 + $0x508] sm:$0xf0]  ;;  %v12731_v22 = vld [vmem:[#allocation5 + $0x494] sm:$0xf] }
 0x32e   :  { %7106 = vmatpush.bf16.msra.mxu2 %v9189_v9  ;;  %v12791_v9 = vld [vmem:[#allocation5 + $0x674] sm:$0xf] }
 0x32f   :  { %7120 = vmatpush.bf16.msra.mxu3 %v9381_v42  ;;  %v9117_v42 = vor.u32 %v12743_v28, %v9114_v30  ;;  %v9309_v29 = vor.u32 %v12791_v9, %v9306_v21  ;;  %v9810_v28 = vld [vmem:[#allocation5 + $0xa78] sm:$0xf0]  ;;  %v12965_v30 = vld [vmem:[#allocation5 + $0xbe4] sm:$0xf]  ;;  %v8877_v21 = vor.u32 %v12683_v8, %v8874_v7 }
 0x330   :  { %7079 = vmatpush.bf16.msra.mxu0 %v8781_v61  ;;  %v12737_v61 = vld [vmem:[#allocation5 + $0x4c4] sm:$0xf]  ;;  %v10002_v9 = vld [vmem:[#allocation5 + $0xbf8] sm:$0xf0] }
 0x331   :  { %7093 = vmatpush.bf16.msra.mxu1 %v8973_v23  ;;  %v9090_v23 = vld [vmem:[#allocation5 + $0x4d8] sm:$0xf0] }
 0x332   :  { %7107 = vmatpush.bf16.msra.mxu2 %v9165_v58  ;;  %v12785_v58 = vld [vmem:[#allocation5 + $0x644] sm:$0xf]  ;;  %v9093_v56 = vor.u32 %v12737_v61, %v9090_v23  ;;  %v9594_v61 = vld [vmem:[#allocation5 + $0x8c8] sm:$0xf0]  ;;  %v12911_v23 = vld [vmem:[#allocation5 + $0xa34] sm:$0xf] }
 0x333   :  { %7121 = vmatpush.bf16.msra.mxu3 %v9357_v16  ;;  %v8682_v16 = vld [vmem:[#allocation5 + $0x1a8] sm:$0xf0] }
 0x334   :  { %7080 = vmatpush.bf16.msra.mxu0 %v8757_v26  ;;  %v9285_v26 = vor.u32 %v12785_v58, %v9282_v24  ;;  %v8685_v20 = vor.u32 %v12635_v60, %v8682_v16  ;;  %v9786_v24 = vld [vmem:[#allocation5 + $0xa48] sm:$0xf0]  ;;  %v13007_v16 = vld [vmem:[#allocation5 + $0xd34] sm:$0xf] }
 0x335   :  { %7094 = vmatpush.bf16.msra.mxu1 %v8949_v45  ;;  %v9066_v45 = vld [vmem:[#allocation5 + $0x4a8] sm:$0xf0]  ;;  %v9789_v8 = vor.u32 %v12911_v23, %v9786_v24  ;;  %v12893_v23 = vld [vmem:[#allocation5 + $0x9a4] sm:$0xf]  ;;  %v9714_v24 = vld [vmem:[#allocation5 + $0x9b8] sm:$0xf0] }
 0x336   :  { %7108 = vmatpush.bf16.msra.mxu2 %v9141_v33  ;;  %v12779_v33 = vld [vmem:[#allocation5 + $0x614] sm:$0xf]  ;;  %v9978_v60 = vld [vmem:[#allocation5 + $0xbc8] sm:$0xf0] }
 0x337   :  { %7122 = vmatpush.bf16.msra.mxu3 %v9333_v2  ;;  %v12917_v2 = vld [vmem:[#allocation5 + $0xa64] sm:$0xf]  ;;  %v9261_v11 = vor.u32 %v12779_v33, %v9258_v48  ;;  %v9762_v48 = vld [vmem:[#allocation5 + $0xa18] sm:$0xf0] }
 0x338   :  { %7081 = vmatpush.bf16.msra.mxu0 %v8733_v15  ;;  %v9069_v15 = vor.u32 %v12731_v22, %v9066_v45  ;;  %v9813_v50 = vor.u32 %v12917_v2, %v9810_v28  ;;  %v12857_v22 = vld [vmem:[#allocation5 + $0x884] sm:$0xf] }
 0x339   :  { %7095 = vmatpush.bf16.msra.mxu1 %v8925_v19  ;;  %v13013_v19 = vld [vmem:[#allocation5 + $0xd64] sm:$0xf] }
 0x33a   :  { %7109 = vmatpush.bf16.msra.mxu2 %v9117_v42  ;;  %v10194_v42 = vld [vmem:[#allocation5 + $0xd78] sm:$0xf0]  ;;  %v12905_v45 = vld [vmem:[#allocation5 + $0xa04] sm:$0xf] }
 0x33b   :  { %7123 = vmatpush.bf16.msra.mxu3 %v9309_v29  ;;  %v10005_v29 = vor.u32 %v12965_v30, %v10002_v9  ;;  %v10197_v58 = vor.u32 %v13013_v19, %v10194_v42  ;;  %v13001_v2 = vld [vmem:[#allocation5 + $0xd04] sm:$0xf]  ;;  %v9765_v30 = vor.u32 %v12905_v45, %v9762_v48  ;;  %v9957_v9 = vor.u32 %v12953_v25, %v9954_v14  ;;  %v12899_v19 = vld [vmem:[#allocation5 + $0x9d4] sm:$0xf]  ;;  %v9690_v48 = vld [vmem:[#allocation5 + $0x988] sm:$0xf0] }
 0x33c   :  { %7082 = vmatpush.bf16.msra.mxu0 %v8709_v52  ;;  %v12959_v52 = vld [vmem:[#allocation5 + $0xbb4] sm:$0xf]  ;;  %v9882_v14 = vld [vmem:[#allocation5 + $0xb08] sm:$0xf0] }
 0x33d   :  { %7096 = vmatpush.bf16.msra.mxu1 %v8901_v13  ;;  %v10170_v13 = vld [vmem:[#allocation5 + $0xd48] sm:$0xf0]  ;;  %v9981_v7 = vor.u32 %v12959_v52, %v9978_v60  ;;  %v12941_v52 = vld [vmem:[#allocation5 + $0xb24] sm:$0xf]  ;;  %v9906_v60 = vld [vmem:[#allocation5 + $0xb38] sm:$0xf0] }
 0x33e   :  { %7110 = vmatpush.bf16.msra.mxu2 %v9093_v56  ;;  %v9597_v56 = vor.u32 %v12863_v12, %v9594_v61  ;;  %v10173_v33 = vor.u32 %v13007_v16, %v10170_v13  ;;  %v12845_v12 = vld [vmem:[#allocation5 + $0x824] sm:$0xf]  ;;  %v9522_v61 = vld [vmem:[#allocation5 + $0x838] sm:$0xf0]  ;;  %v12887_v45 = vld [vmem:[#allocation5 + $0x974] sm:$0xf] }
 0x33f   :  { %7124 = vmatpush.bf16.msra.mxu3 %v9285_v26  ;;  %v9570_v26 = vld [vmem:[#allocation5 + $0x898] sm:$0xf0]  ;;  %v12989_v16 = vld [vmem:[#allocation5 + $0xca4] sm:$0xf]  ;;  %v12935_v25 = vld [vmem:[#allocation5 + $0xaf4] sm:$0xf] }
 0x340   :  { %7083 = vmatpush.bf16.msra.mxu0 %v8685_v20  ;;  %v10146_v20 = vld [vmem:[#allocation5 + $0xd18] sm:$0xf0]  ;;  %v9573_v28 = vor.u32 %v12857_v22, %v9570_v26  ;;  %v12839_v22 = vld [vmem:[#allocation5 + $0x7f4] sm:$0xf]  ;;  %v9498_v26 = vld [vmem:[#allocation5 + $0x808] sm:$0xf0] }
 0x341   :  { %7097 = vmatpush.bf16.msra.mxu1 %v8877_v21  ;;  %v12851_v21 = vld [vmem:[#allocation5 + $0x854] sm:$0xf]  ;;  %v10149_v42 = vor.u32 %v13001_v2, %v10146_v20  ;;  %v10098_v13 = vld [vmem:[#allocation5 + $0xcb8] sm:$0xf0]  ;;  %v14346_v2 = vpop.f32.mrf.mxu0 }
 0x342   :  { %7111 = vmatpush.bf16.msra.mxu2 %v9069_v15  ;;  %v9546_v15 = vld [vmem:[#allocation5 + $0x868] sm:$0xf0]  ;;  %v12983_v20 = vld [vmem:[#allocation5 + $0xc74] sm:$0xf] }
 0x343   :  { %7125 = vmatpush.bf16.msra.mxu3 %v9261_v11  ;;  %7084 = vmatmul.bf16.vlgmr.msra.gmra.mxu0 %v13991_v10  ;;  %v9738_v10 = vld [vmem:[#allocation5 + $0x9e8] sm:$0xf0]  ;;  %v12947_v11 = vld [vmem:[#allocation5 + $0xb54] sm:$0xf] }
 0x344   :  { %7132 = vmatpush.bf16.msrb.mxu0 %v9621_v51  ;;  %7098 = vmatmul.bf16.vlgmr.msra.gmra.mxu1 %v13987_v1  ;;  %v9930_v51 = vld [vmem:[#allocation5 + $0xb68] sm:$0xf0]  ;;  %v9549_v1 = vor.u32 %v12851_v21, %v9546_v15  ;;  %v9501_v21 = vor.u32 %v12839_v22, %v9498_v26  ;;  %v9693_v15 = vor.u32 %v12887_v45, %v9690_v48  ;;  %v10386_v48 = vld [vmem:[#allocation5 + $0xef8] sm:$0xf0] }
 0x345   :  { %7146 = vmatpush.bf16.msrb.mxu1 %v9813_v50  ;;  %7112 = vmatmul.bf16.vlgmr.msra.gmra.mxu2 %v13993_v17  ;;  %v12995_v50 = vld [vmem:[#allocation5 + $0xcd4] sm:$0xf]  ;;  %v10122_v17 = vld [vmem:[#allocation5 + $0xce8] sm:$0xf0] }
 0x346   :  { %7160 = vmatpush.bf16.msrb.mxu2 %v10005_v29  ;;  %7126 = vmatmul.bf16.vlgmr.msra.gmra.mxu3 %v13997_v39  ;;  %v9741_v29 = vor.u32 %v12899_v19, %v9738_v10  ;;  %v9933_v39 = vor.u32 %v12947_v11, %v9930_v51  ;;  %v9885_v19 = vor.u32 %v12935_v25, %v9882_v14  ;;  %v9474_v10 = vld [vmem:[#allocation5 + $0x7d8] sm:$0xf0]  ;;  %v12881_v11 = vld [vmem:[#allocation5 + $0x944] sm:$0xf]  ;;  %v10026_v22 = vld [vmem:[#allocation5 + $0xc28] sm:$0xf0] }
 0x347   :  { %7174 = vmatpush.bf16.msrb.mxu3 %v10197_v58  ;;  %v10125_v58 = vor.u32 %v12995_v50, %v10122_v17  ;;  %v9666_v50 = vld [vmem:[#allocation5 + $0x958] sm:$0xf0]  ;;  %v12929_v17 = vld [vmem:[#allocation5 + $0xac4] sm:$0xf] }
 0x348   :  { %7133 = vmatpush.bf16.msrb.mxu0 %v9597_v56  ;;  %v9525_v56 = vor.u32 %v12845_v12, %v9522_v61  ;;  %v12827_v61 = vld [vmem:[#allocation5 + $0x794] sm:$0xf]  ;;  %v13109_v25 = vld [vmem:[#allocation5 + $0x1064] sm:$0xf] }
 0x349   :  { %7147 = vmatpush.bf16.msrb.mxu1 %v9789_v8  ;;  %v9717_v8 = vor.u32 %v12893_v23, %v9714_v24  ;;  %v9450_v23 = vld [vmem:[#allocation5 + $0x7a8] sm:$0xf0]  ;;  %v14359_v45 = vpop.f32.mrf.mxu0 }
 0x34a   :  { %7161 = vmatpush.bf16.msrb.mxu2 %v9981_v7  ;;  %v9909_v7 = vor.u32 %v12941_v52, %v9906_v60  ;;  %v12875_v52 = vld [vmem:[#allocation5 + $0x914] sm:$0xf]  ;;  %v9642_v60 = vld [vmem:[#allocation5 + $0x928] sm:$0xf0] }
 0x34b   :  { %7175 = vmatpush.bf16.msrb.mxu3 %v10173_v33  ;;  %v10101_v33 = vor.u32 %v12989_v16, %v10098_v13  ;;  %v12923_v16 = vld [vmem:[#allocation5 + $0xa94] sm:$0xf]  ;;  %v14354_v13 = vpop.f32.mrf.mxu2 }
 0x34c   :  { %7134 = vmatpush.bf16.msrb.mxu0 %v9573_v28  ;;  %v10074_v28 = vld [vmem:[#allocation5 + $0xc88] sm:$0xf0] }
 0x34d   :  { %7148 = vmatpush.bf16.msrb.mxu1 %v9765_v30  ;;  %v14689_v30 = vperm.slane %v14039_v0, 0  ;;  %v10077_v51 = vor.u32 %v12983_v20, %v10074_v28  ;;  %v10050_v0 = vld [vmem:[#allocation5 + $0xc58] sm:$0xf0]  ;;  %v9453_v20 = vor.u32 %v12827_v61, %v9450_v23  ;;  %v10746_v61 = vld [vmem:[#allocation5 + $0x11c8] sm:$0xf0] }
 0x34e   :  { %7162 = vmatpush.bf16.msrb.mxu2 %v9957_v9  ;;  %v10578_v28 = vld [vmem:[#allocation5 + $0x1078] sm:$0xf0]  ;;  %v13199_v23 = vld [vmem:[#allocation5 + $0x1334] sm:$0xf] }
 0x34f   :  { %7176 = vmatpush.bf16.msrb.mxu3 %v10149_v42  ;;  %v5744_v9 = vadd.f32 %v14050_v5, %v14689_v30  ;;  %v12833_v42 = vld [vmem:[#allocation5 + $0x7c4] sm:$0xf] }
 0x350   :  { %7135 = vmatpush.bf16.msrb.mxu0 %v9549_v1  ;;  %v9858_v1 = vld [vmem:[#allocation5 + $0xad8] sm:$0xf0]  ;;  %v9477_v12 = vor.u32 %v12833_v42, %v9474_v10  ;;  %v13157_v30 = vld [vmem:[#allocation5 + $0x11e4] sm:$0xf] }
 0x351   :  { %7149 = vmatpush.bf16.msrb.mxu1 %v9741_v29  ;;  %v14351_v29 = vpop.f32.mrf.mxu1  ;;  %v5758_v5 = vadd.f32 %v14052_v18, %v5744_v9  ;;  %v9861_v24 = vor.u32 %v12929_v17, %v9858_v1  ;;  %v14690_v18 = vperm.slane %v14112_v62, 1  ;;  %v10770_v9 = vld [vmem:[#allocation5 + $0x11f8] sm:$0xf0]  ;;  %v10362_v17 = vld [vmem:[#allocation5 + $0xec8] sm:$0xf0] }
 0x352   :  { %7163 = vmatpush.bf16.msrb.mxu2 %v9933_v39  ;;  %v12977_v39 = vld [vmem:[#allocation5 + $0xc44] sm:$0xf]  ;;  %v10962_v62 = vld [vmem:[#allocation5 + $0x1378] sm:$0xf0]  ;;  %v13103_v1 = vld [vmem:[#allocation5 + $0x1034] sm:$0xf] }
 0x353   :  { %7177 = vmatpush.bf16.msrb.mxu3 %v10125_v58  ;;  %v9669_v58 = vor.u32 %v12881_v11, %v9666_v50  ;;  %v6010_v26 = vadd.f32 %v14125_v57, %v14690_v18  ;;  %v5772_v14 = vadd.f32 %v14057_v37, %v5758_v5  ;;  %v10773_v37 = vor.u32 %v13157_v30, %v10770_v9  ;;  %v13055_v50 = vld [vmem:[#allocation5 + $0xeb4] sm:$0xf]  ;;  %v10554_v5 = vld [vmem:[#allocation5 + $0x1048] sm:$0xf0]  ;;  %v10530_v18 = vld [vmem:[#allocation5 + $0x1018] sm:$0xf0] }
 0x354   :  { %7136 = vmatpush.bf16.msrb.mxu0 %v9525_v56  ;;  %v10053_v56 = vor.u32 %v12977_v39, %v10050_v0  ;;  %v13043_v9 = vld [vmem:[#allocation5 + $0xe54] sm:$0xf] }
 0x355   :  { %7150 = vmatpush.bf16.msrb.mxu1 %v9717_v8  ;;  %v9834_v8 = vld [vmem:[#allocation5 + $0xaa8] sm:$0xf0]  ;;  %v6024_v10 = vadd.f32 %v14129_v34, %v6010_v26  ;;  %v5786_v39 = vadd.f32 %v14060_v55, %v5772_v14  ;;  %v10557_v55 = vor.u32 %v13103_v1, %v10554_v5  ;;  %v13145_v26 = vld [vmem:[#allocation5 + $0x1184] sm:$0xf] }
 0x356   :  { %7164 = vmatpush.bf16.msrb.mxu2 %v9909_v7  ;;  %v12971_v7 = vld [vmem:[#allocation5 + $0xc14] sm:$0xf]  ;;  %v13085_v5 = vld [vmem:[#allocation5 + $0xfa4] sm:$0xf] }
 0x357   :  { %7178 = vmatpush.bf16.msrb.mxu3 %v10101_v33  ;;  %v13061_v33 = vld [vmem:[#allocation5 + $0xee4] sm:$0xf]  ;;  %v10029_v57 = vor.u32 %v12971_v7, %v10026_v22  ;;  %v5800_v34 = vadd.f32 %v14065_v63, %v5786_v39  ;;  %v10338_v7 = vld [vmem:[#allocation5 + $0xe98] sm:$0xf0] }
 0x358   :  { %7137 = vmatpush.bf16.msrb.mxu0 %v9501_v21  ;;  %v9645_v21 = vor.u32 %v12875_v52, %v9642_v60  ;;  %v10389_v42 = vor.u32 %v13061_v33, %v10386_v48  ;;  %v10365_v52 = vor.u32 %v13055_v50, %v10362_v17  ;;  %v6038_v60 = vadd.f32 %v14131_v27, %v6024_v10  ;;  %v13097_v22 = vld [vmem:[#allocation5 + $0x1004] sm:$0xf]  ;;  %v10722_v33 = vld [vmem:[#allocation5 + $0x1198] sm:$0xf0]  ;;  %v14373_v48 = vpop.f32.mrf.mxu0  ;;  %v10890_v10 = vld [vmem:[#allocation5 + $0x12e8] sm:$0xf0] }
 0x359   :  { %7151 = vmatpush.bf16.msrb.mxu1 %v9693_v15  ;;  %v9837_v15 = vor.u32 %v12923_v16, %v9834_v8  ;;  %v14363_v11 = vpop.f32.mrf.mxu1  ;;  %v14370_v16 = vpop.f32.mrf.mxu3  ;;  %v13049_v8 = vld [vmem:[#allocation5 + $0xe84] sm:$0xf]  ;;  %v5814_v14 = vadd.f32 %v14067_v4, %v5800_v34  ;;  %v10725_v30 = vor.u32 %v13145_v26, %v10722_v33  ;;  %v10698_v4 = vld [vmem:[#allocation5 + $0x1168] sm:$0xf0]  ;;  %v10482_v34 = vld [vmem:[#allocation5 + $0xfb8] sm:$0xf0] }
 0x35a   :  { %7165 = vmatpush.bf16.msrb.mxu2 %v9885_v19  ;;  %v13205_v19 = vld [vmem:[#allocation5 + $0x1364] sm:$0xf]  ;;  %v10485_v33 = vor.u32 %v13085_v5, %v10482_v34  ;;  %v10242_v5 = vld [vmem:[#allocation5 + $0xdd8] sm:$0xf0] }
 0x35b   :  { %7179 = vmatpush.bf16.msrb.mxu3 %v10077_v51  ;;  %v10581_v51 = vor.u32 %v13109_v25, %v10578_v28  ;;  %v10965_v0 = vor.u32 %v13205_v19, %v10962_v62  ;;  %v13193_v27 = vld [vmem:[#allocation5 + $0x1304] sm:$0xf]  ;;  %v10914_v25 = vld [vmem:[#allocation5 + $0x1318] sm:$0xf0]  ;;  %v10533_v28 = vor.u32 %v13097_v22, %v10530_v18  ;;  %v10506_v62 = vld [vmem:[#allocation5 + $0xfe8] sm:$0xf0] }
 0x35c   :  { %7138 = vmatpush.bf16.msrb.mxu0 %v9477_v12  ;;  %v13151_v12 = vld [vmem:[#allocation5 + $0x11b4] sm:$0xf]  ;;  %v13037_v39 = vld [vmem:[#allocation5 + $0xe24] sm:$0xf] }
 0x35d   :  { %7152 = vmatpush.bf16.msrb.mxu1 %v9669_v58  ;;  %v10938_v58 = vld [vmem:[#allocation5 + $0x1348] sm:$0xf0]  ;;  %v14695_v22 = vld [vmem:[#allocation23_spill] sm:$0xff] }
 0x35e   :  { %7166 = vmatpush.bf16.msrb.mxu2 %v9861_v24  ;;  %v14367_v24 = vpop.f32.mrf.mxu2  ;;  %v10941_v63 = vor.u32 %v13199_v23, %v10938_v58 }
 0x35f   :  { %7180 = vmatpush.bf16.msrb.mxu3 %v10053_v56  ;;  %v10749_v56 = vor.u32 %v13151_v12, %v10746_v61  ;;  %v14693_v12 = vld [vmem:[#allocation22_spill] sm:$0xff] }
 0x360   :  { %7139 = vmatpush.bf16.msrb.mxu0 %v9453_v20  ;;  %v10341_v20 = vor.u32 %v13049_v8, %v10338_v7  ;;  %v13181_v8 = vld [vmem:[#allocation5 + $0x12a4] sm:$0xf]  ;;  %v10866_v7 = vld [vmem:[#allocation5 + $0x12b8] sm:$0xf0]  ;;  %v14391_v26 = vpop.f32.mrf.mxu0 }
 0x361   :  { %7153 = vmatpush.bf16.msrb.mxu1 %v9645_v21  ;;  %v10314_v21 = vld [vmem:[#allocation5 + $0xe68] sm:$0xf0]  ;;  %v14384_v50 = vpop.f32.mrf.mxu3 }
 0x362   :  { %7167 = vmatpush.bf16.msrb.mxu2 %v9837_v15  ;;  %v13091_v15 = vld [vmem:[#allocation5 + $0xfd4] sm:$0xf] }
 0x363   :  { %7181 = vmatpush.bf16.msrb.mxu3 %v10029_v57  ;;  %7140 = vmatmul.bf16.vlgmr.msrb.gmra.mxu0 %v14001_v44  ;;  %v6052_v44 = vadd.f32 %v14136_v59, %v6038_v60  ;;  %v13139_v57 = vld [vmem:[#allocation5 + $0x1154] sm:$0xf]  ;;  %v10317_v59 = vor.u32 %v13043_v9, %v10314_v21  ;;  %v10509_v17 = vor.u32 %v13091_v15, %v10506_v62  ;;  %v10674_v60 = vld [vmem:[#allocation5 + $0x1138] sm:$0xf0]  ;;  %v10458_v15 = vld [vmem:[#allocation5 + $0xf88] sm:$0xf0] }
 0x364   :  { %7188 = vmatpush.bf16.msra.mxu0 %v10389_v42  ;;  %7154 = vmatmul.bf16.vlgmr.msrb.gmra.mxu1 %v13999_v43  ;;  %v10917_v43 = vor.u32 %v13193_v27, %v10914_v25  ;;  %v14381_v42 = vpop.f32.mrf.mxu1  ;;  %v10701_v1 = vor.u32 %v13139_v57, %v10698_v4  ;;  %v13031_v25 = vld [vmem:[#allocation5 + $0xdf4] sm:$0xf]  ;;  %v10869_v21 = vor.u32 %v13181_v8, %v10866_v7  ;;  %v10842_v4 = vld [vmem:[#allocation5 + $0x1288] sm:$0xf0] }
 0x365   :  { %7202 = vmatpush.bf16.msra.mxu1 %v10581_v51  ;;  %7168 = vmatmul.bf16.vlgmr.msrb.gmra.mxu2 %v14003_v47  ;;  %v14691_v47 = vld [vmem:[#allocation21_spill] sm:$0xff]  ;;  %v14692_v51 = vld [vmem:[#allocation35_spill] sm:$0xff] }
 0x366   :  { %7216 = vmatpush.bf16.msra.mxu2 %v10773_v37  ;;  %7182 = vmatmul.bf16.vlgmr.msrb.gmra.mxu3 %v14009_v31  ;;  %v5828_v19 = vadd.f32 %v14691_v47, %v5814_v14  ;;  %v13187_v31 = vld [vmem:[#allocation5 + $0x12d4] sm:$0xf]  ;;  %v6066_v37 = vadd.f32 %v14692_v51, %v6052_v44  ;;  %v14387_v23 = vpop.f32.mrf.mxu2  ;;  %v10266_v14 = vld [vmem:[#allocation5 + $0xe08] sm:$0xf0]  ;;  %v14696_v44 = vld [vmem:[#allocation49_spill] sm:$0xff] }
 0x367   :  { %7230 = vmatpush.bf16.msra.mxu3 %v10965_v0  ;;  %v10290_v0 = vld [vmem:[#allocation5 + $0xe38] sm:$0xf0]  ;;  %v10893_v58 = vor.u32 %v13187_v31, %v10890_v10  ;;  %v13127_v47 = vld [vmem:[#allocation5 + $0x10f4] sm:$0xf]  ;;  %v14701_v51 = vld [vmem:[#allocation38_spill] sm:$0xff] }
 0x368   :  { %7189 = vmatpush.bf16.msra.mxu0 %v10365_v52  ;;  %v5842_v61 = vadd.f32 %v14693_v12, %v5828_v19  ;;  %v13133_v52 = vld [vmem:[#allocation5 + $0x1124] sm:$0xf]  ;;  %v10293_v18 = vor.u32 %v13037_v39, %v10290_v0  ;;  %v10650_v19 = vld [vmem:[#allocation5 + $0x1108] sm:$0xf0]  ;;  %v13175_v57 = vld [vmem:[#allocation5 + $0x1274] sm:$0xf] }
 0x369   :  { %7203 = vmatpush.bf16.msra.mxu1 %v10557_v55  ;;  %v14694_v55 = vld [vmem:[#allocation36_spill] sm:$0xff]  ;;  %v10677_v27 = vor.u32 %v13133_v52, %v10674_v60  ;;  %v10653_v39 = vor.u32 %v13127_v47, %v10650_v19  ;;  %v13025_v0 = vld [vmem:[#allocation5 + $0xdc4] sm:$0xf]  ;;  %v10845_v34 = vor.u32 %v13175_v57, %v10842_v4  ;;  %v14403_v7 = vpop.f32.mrf.mxu3  ;;  %v13115_v47 = vld [vmem:[#allocation5 + $0x1094] sm:$0xf] }
 0x36a   :  { %7217 = vmatpush.bf16.msra.mxu2 %v10749_v56  ;;  %v6080_v56 = vadd.f32 %v14694_v55, %v6066_v37  ;;  %v14700_v31 = vld [vmem:[#allocation24_spill] sm:$0xff]  ;;  %v13073_v12 = vld [vmem:[#allocation5 + $0xf44] sm:$0xf]  ;;  %v14705_v19 = vld [vmem:[#allocation54_spill] sm:$0xff] }
 0x36b   :  { %7231 = vmatpush.bf16.msra.mxu3 %v10941_v63  ;;  %v5856_v63 = vadd.f32 %v14695_v22, %v5842_v61  ;;  %v14702_v61 = vld [vmem:[#allocation53_spill] sm:$0xff]  ;;  %v10434_v52 = vld [vmem:[#allocation5 + $0xf58] sm:$0xf0]  ;;  %v10602_v57 = vld [vmem:[#allocation5 + $0x10a8] sm:$0xf0] }
 0x36c   :  { %7190 = vmatpush.bf16.msra.mxu0 %v10341_v20  ;;  %v13079_v20 = vld [vmem:[#allocation5 + $0xf74] sm:$0xf]  ;;  %v13121_v60 = vld [vmem:[#allocation5 + $0x10c4] sm:$0xf]  ;;  %v10626_v55 = vld [vmem:[#allocation5 + $0x10d8] sm:$0xf0] }
 0x36d   :  { %7204 = vmatpush.bf16.msra.mxu1 %v10533_v28  ;;  %v14697_v28 = vperm.slane %v14696_v44, 2  ;;  %v5870_v10 = vadd.f32 %v14700_v31, %v5856_v63  ;;  %v13169_v22 = vld [vmem:[#allocation5 + $0x1244] sm:$0xf]  ;;  %v10818_v63 = vld [vmem:[#allocation5 + $0x1258] sm:$0xf0]  ;;  %v14704_v44 = vld [vmem:[#allocation39_spill] sm:$0xff] }
 0x36e   :  { %7218 = vmatpush.bf16.msra.mxu2 %v10725_v30  ;;  %v14698_v30 = vld [vmem:[#allocation52_spill] sm:$0xff]  ;;  %v13163_v4 = vld [vmem:[#allocation5 + $0x1214] sm:$0xf]  ;;  %v10794_v31 = vld [vmem:[#allocation5 + $0x1228] sm:$0xf0] }
 0x36f   :  { %7232 = vmatpush.bf16.msra.mxu3 %v10917_v43  ;;  %v6276_v9 = vadd.f32 %v14698_v30, %v14697_v28  ;;  %v14699_v43 = vld [vmem:[#allocation37_spill] sm:$0xff]  ;;  %v10437_v30 = vor.u32 %v13073_v12, %v10434_v52 }
 0x370   :  { %7191 = vmatpush.bf16.msra.mxu0 %v10317_v59  ;;  %v6094_v62 = vadd.f32 %v14699_v43, %v6080_v56  ;;  %v10269_v59 = vor.u32 %v13031_v25, %v10266_v14  ;;  %v14703_v56 = vld [vmem:[#allocation25_spill] sm:$0xff]  ;;  %v10245_v25 = vor.u32 %v13025_v0, %v10242_v5  ;;  %v13019_v14 = vld [vmem:[#allocation5 + $0xd94] sm:$0xf]  ;;  %v14414_v5 = vpop.f32.mrf.mxu0 }
 0x371   :  { %7205 = vmatpush.bf16.msra.mxu1 %v10509_v17  ;;  %v14399_v17 = vpop.f32.mrf.mxu1  ;;  %v5884_v8 = vadd.f32 %v14703_v56, %v5870_v10  ;;  %v14706_v10 = vld [vmem:[#allocation26_spill] sm:$0xff]  ;;  %v13349_v52 = vld [vmem:[#allocation5 + $0x17e4] sm:$0xf]  ;;  %v10605_v56 = vor.u32 %v13115_v47, %v10602_v57  ;;  %v13343_v47 = vld [vmem:[#allocation5 + $0x17b4] sm:$0xf] }
 0x372   :  { %7219 = vmatpush.bf16.msra.mxu2 %v10701_v1  ;;  %v6108_v37 = vadd.f32 %v14701_v51, %v6094_v62  ;;  %v10461_v1 = vor.u32 %v13079_v20, %v10458_v15  ;;  %v10218_v20 = vld [vmem:[#allocation5 + $0xda8] sm:$0xf0]  ;;  %v10821_v62 = vor.u32 %v13169_v22, %v10818_v63  ;;  %v14707_v51 = vld [vmem:[#allocation40_spill] sm:$0xff]  ;;  %v13397_v22 = vld [vmem:[#allocation5 + $0x1964] sm:$0xf] }
 0x373   :  { %7233 = vmatpush.bf16.msra.mxu3 %v10893_v58  ;;  %v6290_v58 = vadd.f32 %v14702_v61, %v6276_v9  ;;  %v10629_v9 = vor.u32 %v13121_v60, %v10626_v55  ;;  %v10410_v15 = vld [vmem:[#allocation5 + $0xf28] sm:$0xf0]  ;;  %v10221_v12 = vor.u32 %v13019_v14, %v10218_v20  ;;  %v11346_v61 = vld [vmem:[#allocation5 + $0x1678] sm:$0xf0]  ;;  %v14709_v63 = vld [vmem:[#allocation55_spill] sm:$0xff] }
 0x374   :  { %7192 = vmatpush.bf16.msra.mxu0 %v10293_v18  ;;  %v14405_v18 = vld [vmem:[#allocation7] sm:$0x3f]  ;;  %v6122_v28 = vadd.f32 %v14704_v44, %v6108_v37  ;;  %v11538_v60 = vld [vmem:[#allocation5 + $0x17f8] sm:$0xf0] }
 0x375   :  { %7206 = vmatpush.bf16.msra.mxu1 %v10485_v33  ;;  %v6304_v43 = vadd.f32 %v14705_v19, %v6290_v58  ;;  %v13253_v37 = vld [vmem:[#allocation5 + $0x14e4] sm:$0xf]  ;;  %v14708_v58 = vld [vmem:[#allocation27_spill] sm:$0xff]  ;;  %v11541_v20 = vor.u32 %v13349_v52, %v11538_v60  ;;  %v11706_v60 = vld [vmem:[#allocation5 + $0x1948] sm:$0xf0] }
 0x376   :  { %7220 = vmatpush.bf16.msra.mxu2 %v10677_v27  ;;  %v14408_v27 = vpop.f32.mrf.mxu2  ;;  %v6136_v0 = vadd.f32 %v14707_v51, %v6122_v28  ;;  %v10797_v28 = vor.u32 %v13163_v4, %v10794_v31  ;;  %v13247_v33 = vld [vmem:[#allocation5 + $0x14b4] sm:$0xf]  ;;  %v14713_v4 = vld [vmem:[#allocation42_spill] sm:$0xff] }
 0x377   :  { %7234 = vmatpush.bf16.msra.mxu3 %v10869_v21  ;;  %v13067_v21 = vld [vmem:[#allocation5 + $0xf14] sm:$0xf]  ;;  %v6318_v44 = vadd.f32 %v14709_v63, %v6304_v43  ;;  %v11514_v43 = vld [vmem:[#allocation5 + $0x17c8] sm:$0xf0]  ;;  %v14719_v63 = vld [vmem:[#allocation29_spill] sm:$0xff] }
 0x378   :  { %7193 = vmatpush.bf16.msra.mxu0 %v10269_v59  ;;  %v5898_v59 = vadd.f32 %v14706_v10, %v5884_v8  ;;  %v10413_v55 = vor.u32 %v13067_v21, %v10410_v15  ;;  %v11730_v8 = vld [vmem:[#allocation5 + $0x1978] sm:$0xf0]  ;;  %v14710_v10 = vld [vmem:[#allocation41_spill] sm:$0xff]  ;;  %v11322_v15 = vld [vmem:[#allocation5 + $0x1648] sm:$0xf0] }
 0x379   :  { %7207 = vmatpush.bf16.msra.mxu1 %v10461_v1  ;;  %v11154_v1 = vld [vmem:[#allocation5 + $0x14f8] sm:$0xf0]  ;;  %v6150_v51 = vadd.f32 %v14710_v10, %v6136_v0  ;;  %v11733_v21 = vor.u32 %v13397_v22, %v11730_v8  ;;  %v14714_v0 = vld [vmem:[#allocation69_spill] sm:$0xff]  ;;  %v13391_v52 = vld [vmem:[#allocation5 + $0x1934] sm:$0xf] }
 0x37a   :  { %7221 = vmatpush.bf16.msra.mxu2 %v10653_v39  ;;  %v13301_v39 = vld [vmem:[#allocation5 + $0x1664] sm:$0xf]  ;;  %v11157_v19 = vor.u32 %v13253_v37, %v11154_v1  ;;  %v14715_v37 = vperm.slane %v14714_v0, 3 }
 0x37b   :  { %7235 = vmatpush.bf16.msra.mxu3 %v10845_v34  ;;  %v5912_v34 = vadd.f32 %v14708_v58, %v5898_v59  ;;  %v11349_v14 = vor.u32 %v13301_v39, %v11346_v61  ;;  %v13295_v59 = vld [vmem:[#allocation5 + $0x1634] sm:$0xf]  ;;  %v6164_v31 = vadd.f32 %v14713_v4, %v6150_v51  ;;  %v14716_v1 = vld [vmem:[#allocation73_spill] sm:$0xff]  ;;  %v14429_v61 = vpop.f32.mrf.mxu3  ;;  %v14438_v51 = vpop.f32.mrf.mxu0  ;;  %v14721_v4 = vld [vmem:[#allocation74_spill] sm:$0xff] }
 0x37c   :  { %7194 = vmatpush.bf16.msra.mxu0 %v10245_v25  ;;  %v14419_v25 = vpop.f32.mrf.mxu1  ;;  %v6542_v39 = vadd.f32 %v14716_v1, %v14715_v37  ;;  %v13283_v37 = vld [vmem:[#allocation5 + $0x15d4] sm:$0xf]  ;;  %v14724_v1 = vld [vmem:[#allocation44_spill] sm:$0xff] }
 0x37d   :  { %7208 = vmatpush.bf16.msra.mxu1 %v10437_v30  ;;  %v14711_v30 = vperm.slane %v14405_v18, 4 }
 0x37e   :  { %7222 = vmatpush.bf16.msra.mxu2 %v10629_v9  ;;  %v14435_v8 = vpop.f32.mrf.mxu2  ;;  %v6556_v0 = vadd.f32 %v14721_v4, %v6542_v39  ;;  %v14729_v4 = vld [vmem:[#allocation45_spill] sm:$0xff] }
 0x37f   :  { %7236 = vmatpush.bf16.msra.mxu3 %v10821_v62  ;;  %v6806_v9 = vadd.f32 %v14359_v45, %v14711_v30  ;;  %v14712_v62 = vld [vmem:[#allocation28_spill] sm:$0xff]  ;;  %v14718_v58 = vmov %v14711_v30  ;;  %v13241_v30 = vld [vmem:[#allocation5 + $0x1484] sm:$0xf] }
 0x380   :  { %7195 = vmatpush.bf16.msra.mxu0 %v10221_v12  ;;  %v5926_v57 = vadd.f32 %v14712_v62, %v5912_v34  ;;  %v14717_v45 = vld [vmem:[#allocation56_spill] sm:$0xff]  ;;  %v6808_v22 = vadd.f32 %v14373_v48, %v14718_v58  ;;  %v11133_v34 = vor.u32 %v13247_v33, %v11130_v53  ;;  %v11709_v48 = vor.u32 %v13391_v52, %v11706_v60  ;;  %v14720_v33 = vld [vmem:[#allocation43_spill] sm:$0xff]  ;;  %v14725_v52 = vld [vmem:[#allocation58_spill] sm:$0xff] }
 0x381   :  { %7209 = vmatpush.bf16.msra.mxu1 %v10413_v55  ;;  %v6332_v12 = vadd.f32 %v14717_v45, %v6318_v44  ;;  %v11325_v55 = vor.u32 %v13295_v59, %v11322_v15  ;;  %v11106_v62 = vld [vmem:[#allocation5 + $0x1498] sm:$0xf0]  ;;  %v13289_v44 = vld [vmem:[#allocation5 + $0x1604] sm:$0xf]  ;;  %v6820_v18 = vadd.f32 %v14363_v11, %v6806_v9  ;;  %v14723_v9 = vld [vmem:[#allocation31_spill] sm:$0xff] }
 0x382   :  { %7223 = vmatpush.bf16.msra.mxu2 %v10605_v56  ;;  %v5940_v10 = vadd.f32 %v14719_v63, %v5926_v57  ;;  %v11517_v56 = vor.u32 %v13343_v47, %v11514_v43  ;;  %v11490_v53 = vld [vmem:[#allocation5 + $0x1798] sm:$0xf0]  ;;  %v6178_v57 = vadd.f32 %v14720_v33, %v6164_v31  ;;  %v14722_v59 = vld [vmem:[#allocation57_spill] sm:$0xff]  ;;  %v6822_v11 = vadd.f32 %v14381_v42, %v6808_v22  ;;  %v13235_v31 = vld [vmem:[#allocation5 + $0x1454] sm:$0xf] }
 0x383   :  { %7237 = vmatpush.bf16.msra.mxu3 %v10797_v28  ;;  %7196 = vmatmul.bf16.vlgmr.msra.gmra.mxu0 %v14013_v36  ;;  %v11298_v28 = vld [vmem:[#allocation5 + $0x1618] sm:$0xf0]  ;;  %v6346_v15 = vadd.f32 %v14722_v59, %v6332_v12  ;;  %v11109_v36 = vor.u32 %v13241_v30, %v11106_v62  ;;  %v6834_v42 = vadd.f32 %v14367_v24, %v6820_v18  ;;  %v11274_v45 = vld [vmem:[#allocation5 + $0x15e8] sm:$0xf0]  ;;  %v13331_v12 = vld [vmem:[#allocation5 + $0x1754] sm:$0xf]  ;;  %v14461_v24 = vpop.f32.mrf.mxu3 }
 0x384   :  { %7244 = vmatpush.bf16.msrb.mxu0 %v11157_v19  ;;  %v13337_v19 = vld [vmem:[#allocation5 + $0x1784] sm:$0xf]  ;;  %7210 = vmatmul.bf16.vlgmr.msra.gmra.mxu1 %v14011_v35  ;;  %v14450_v47 = vpop.f32.mrf.mxu1  ;;  %v11301_v43 = vor.u32 %v13289_v44, %v11298_v28  ;;  %v11082_v35 = vld [vmem:[#allocation5 + $0x1468] sm:$0xf0]  ;;  %v6192_v39 = vadd.f32 %v14724_v1, %v6178_v57  ;;  %v14726_v22 = vld [vmem:[#allocation75_spill] sm:$0xff]  ;;  %v6836_v30 = vadd.f32 %v14387_v23, %v6822_v11 }
 0x385   :  { %7258 = vmatpush.bf16.msrb.mxu1 %v11349_v14  ;;  %7224 = vmatmul.bf16.vlgmr.msra.gmra.mxu2 %v14015_v40  ;;  %v13385_v14 = vld [vmem:[#allocation5 + $0x1904] sm:$0xf]  ;;  %v11493_v40 = vor.u32 %v13337_v19, %v11490_v53  ;;  %v6360_v60 = vadd.f32 %v14725_v52, %v6346_v15  ;;  %v11466_v58 = vld [vmem:[#allocation5 + $0x1768] sm:$0xf0]  ;;  %v13379_v63 = vld [vmem:[#allocation5 + $0x18d4] sm:$0xf]  ;;  %v11085_v44 = vor.u32 %v13235_v31, %v11082_v35 }
 0x386   :  { %7272 = vmatpush.bf16.msrb.mxu2 %v11541_v20  ;;  %v11682_v20 = vld [vmem:[#allocation5 + $0x1918] sm:$0xf0]  ;;  %7238 = vmatmul.bf16.vlgmr.msra.gmra.mxu3 %v14021_v32  ;;  %v14458_v62 = vpop.f32.mrf.mxu2  ;;  %v11277_v18 = vor.u32 %v13283_v37, %v11274_v45  ;;  %v13229_v53 = vld [vmem:[#allocation5 + $0x1424] sm:$0xf]  ;;  %v6848_v23 = vadd.f32 %v14384_v50, %v6834_v42  ;;  %v6850_v1 = vadd.f32 %v14403_v7, %v6836_v30  ;;  %v11034_v45 = vld [vmem:[#allocation5 + $0x1408] sm:$0xf0] }
 0x387   :  { %7286 = vmatpush.bf16.msrb.mxu3 %v11733_v21  ;;  %v5954_v21 = vadd.f32 %v14723_v9, %v5940_v10  ;;  %v11685_v32 = vor.u32 %v13385_v14, %v11682_v20  ;;  %v11658_v10 = vld [vmem:[#allocation5 + $0x18e8] sm:$0xf0]  ;;  %v14728_v28 = vld [vmem:[#allocation76_spill] sm:$0xff]  ;;  %v13277_v57 = vld [vmem:[#allocation5 + $0x15a4] sm:$0xf]  ;;  %v14466_v9 = vpop.f32.mrf.mxu0 }
 0x388   :  { %7245 = vmatpush.bf16.msrb.mxu0 %v11133_v34  ;;  %v6570_v34 = vadd.f32 %v14726_v22, %v6556_v0  ;;  %v11058_v33 = vld [vmem:[#allocation5 + $0x1438] sm:$0xf0]  ;;  %v6206_v0 = vadd.f32 %v14729_v4, %v6192_v39  ;;  %v14730_v14 = vld [vmem:[#allocation59_spill] sm:$0xff]  ;;  %v11661_v59 = vor.u32 %v13379_v63, %v11658_v10  ;;  %v13325_v11 = vld [vmem:[#allocation5 + $0x1724] sm:$0xf]  ;;  %v6864_v63 = vadd.f32 %v14414_v5, %v6850_v1 }
 0x389   :  { %7259 = vmatpush.bf16.msrb.mxu1 %v11325_v55  ;;  %v14727_v55 = vld [vmem:[#allocation32_spill] sm:$0xff]  ;;  %v6374_v20 = vadd.f32 %v14730_v14, %v6360_v60  ;;  %v11061_v39 = vor.u32 %v13229_v53, %v11058_v33  ;;  %v14733_v52 = vld [vmem:[#allocation77_spill] sm:$0xff]  ;;  %v11226_v7 = vld [vmem:[#allocation5 + $0x1588] sm:$0xf0] }
 0x38a   :  { %7273 = vmatpush.bf16.msrb.mxu2 %v11517_v56  ;;  %v5968_v56 = vadd.f32 %v14727_v55, %v5954_v21  ;;  %v6584_v19 = vadd.f32 %v14728_v28, %v6570_v34  ;;  %v11250_v15 = vld [vmem:[#allocation5 + $0x15b8] sm:$0xf0]  ;;  %v13373_v21 = vld [vmem:[#allocation5 + $0x18a4] sm:$0xf]  ;;  %v6862_v34 = vadd.f32 %v14391_v26, %v6848_v23  ;;  %v13319_v55 = vld [vmem:[#allocation5 + $0x16f4] sm:$0xf] }
 0x38b   :  { %7287 = vmatpush.bf16.msrb.mxu3 %v11709_v48  ;;  %v11469_v48 = vor.u32 %v13331_v12, %v11466_v58  ;;  %v14732_v35 = vld [vmem:[#allocation60_spill] sm:$0xff]  ;;  %v11253_v50 = vor.u32 %v13277_v57, %v11250_v15  ;;  %v13271_v12 = vld [vmem:[#allocation5 + $0x1574] sm:$0xf]  ;;  %v14734_v58 = vld [vmem:[#allocation33_spill] sm:$0xff] }
 0x38c   :  { %7246 = vmatpush.bf16.msrb.mxu0 %v11109_v36  ;;  %v11442_v36 = vld [vmem:[#allocation5 + $0x1738] sm:$0xf0]  ;;  %v6388_v37 = vadd.f32 %v14732_v35, %v6374_v20  ;;  %v6598_v60 = vadd.f32 %v14733_v52, %v6584_v19  ;;  %v5982_v22 = vadd.f32 %v14734_v58, %v5968_v56  ;;  %v11418_v30 = vld [vmem:[#allocation5 + $0x1708] sm:$0xf0]  ;;  %v13367_v53 = vld [vmem:[#allocation5 + $0x1874] sm:$0xf]  ;;  %v14482_v20 = vpop.f32.mrf.mxu3  ;;  %v11229_v23 = vor.u32 %v13271_v12, %v11226_v7 }
 0x38d   :  { %7260 = vmatpush.bf16.msrb.mxu1 %v11301_v43  ;;  %v11634_v43 = vld [vmem:[#allocation5 + $0x18b8] sm:$0xf0]  ;;  %v11445_v42 = vor.u32 %v13325_v11, %v11442_v36  ;;  %v14736_v19 = vld [vmem:[#allocation78_spill] sm:$0xff]  ;;  %v14738_v56 = vld [vmem:[#allocation61_spill] sm:$0xff]  ;;  %v6878_v35 = vadd.f32 %v14419_v25, %v6864_v63 }
 0x38e   :  { %7274 = vmatpush.bf16.msrb.mxu2 %v11493_v40  ;;  %v14731_v40 = vld [vmem:[#allocation46_spill] sm:$0xff]  ;;  %v11637_v10 = vor.u32 %v13373_v21, %v11634_v43  ;;  %v14739_v5 = vld [vmem:[#allocation47_spill] sm:$0xff]  ;;  %v13217_v15 = vld [vmem:[#allocation5 + $0x13c4] sm:$0xf] }
 0x38f   :  { %7288 = vmatpush.bf16.msrb.mxu3 %v11685_v32  ;;  %v6220_v31 = vadd.f32 %v14731_v40, %v6206_v0  ;;  %v13223_v32 = vld [vmem:[#allocation5 + $0x13f4] sm:$0xf]  ;;  %v11610_v33 = vld [vmem:[#allocation5 + $0x1888] sm:$0xf0]  ;;  %v6402_v0 = vadd.f32 %v14738_v56, %v6388_v37  ;;  %v11010_v11 = vld [vmem:[#allocation5 + $0x13d8] sm:$0xf0]  ;;  %v6876_v40 = vadd.f32 %v14399_v17, %v6862_v34  ;;  %v14487_v37 = vpop.f32.mrf.mxu2  ;;  %v6892_v25 = vadd.f32 %v14435_v8, %v6878_v35 }
 0x390   :  { %7247 = vmatpush.bf16.msrb.mxu0 %v11085_v44  ;;  %v14735_v44 = vld [vmem:[#allocation30_spill] sm:$0xff]  ;;  %v11037_v26 = vor.u32 %v13223_v32, %v11034_v45  ;;  %v13265_v36 = vld [vmem:[#allocation5 + $0x1544] sm:$0xf]  ;;  %v11613_v1 = vor.u32 %v13367_v53, %v11610_v33  ;;  %v11394_v52 = vld [vmem:[#allocation5 + $0x16d8] sm:$0xf0]  ;;  %v14492_v32 = vpop.f32.mrf.mxu0  ;;  %v11013_v34 = vor.u32 %v13217_v15, %v11010_v11 }
 0x391   :  { %7261 = vmatpush.bf16.msrb.mxu1 %v11277_v18  ;;  %v7328_v28 = vsub.f32 0.0, %v14735_v44  ;;  %v6612_v18 = vadd.f32 %v14736_v19, %v6598_v60  ;;  %v14737_v57 = vld [vmem:[#allocation34_spill] sm:$0xff]  ;;  %v6234_v14 = vadd.f32 %v14739_v5, %v6220_v31  ;;  %v11202_v31 = vld [vmem:[#allocation5 + $0x1558] sm:$0xf0]  ;;  %v13361_v45 = vld [vmem:[#allocation5 + $0x1844] sm:$0xf] }
 0x392   :  { %7275 = vmatpush.bf16.msrb.mxu2 %v11469_v48  ;;  %v14477_v48 = vpop.f32.mrf.mxu1  ;;  %v5996_v4 = vadd.f32 %v14737_v57, %v5982_v22  ;;  %v14740_v21 = vld [vmem:[#allocation62_spill] sm:$0xff]  ;;  %v11586_v12 = vld [vmem:[#allocation5 + $0x1858] sm:$0xf0]  ;;  %v13211_v63 = vld [vmem:[#allocation5 + $0x1394] sm:$0xf]  ;;  %v6890_v57 = vadd.f32 %v14408_v27, %v6876_v40 }
 0x393   :  { %7289 = vmatpush.bf16.msrb.mxu3 %v11661_v59  ;;  %v11421_v59 = vor.u32 %v13319_v55, %v11418_v30  ;;  %v6416_v43 = vadd.f32 %v14740_v21, %v6402_v0  ;;  %v14489_v60 = vmul.f32 1.442695, %v7328_v28  ;;  %v14742_v22 = vld [vmem:[#allocation50_spill] sm:$0xff]  ;;  %v14743_v7 = vld [vmem:[#allocation80_spill] sm:$0xff]  ;;  %v11205_v30 = vor.u32 %v13265_v36, %v11202_v31  ;;  %v13259_v28 = vld [vmem:[#allocation5 + $0x1514] sm:$0xf] }
 0x394   :  { %7248 = vmatpush.bf16.msrb.mxu0 %v11061_v39  ;;  %v13313_v39 = vld [vmem:[#allocation5 + $0x16c4] sm:$0xf]  ;;  %v7334_v58 = vsub.f32 0.0, %v5996_v4  ;;  %v6248_v17 = vadd.f32 %v14742_v22, %v6234_v14  ;;  %v11178_v19 = vld [vmem:[#allocation5 + $0x1528] sm:$0xf0]  ;;  %v14744_v53 = vld [vmem:[#allocation63_spill] sm:$0xff]  ;;  %v11589_v4 = vor.u32 %v13361_v45, %v11586_v12  ;;  %v6906_v21 = vadd.f32 %v14461_v24, %v6892_v25 }
 0x395   :  { %7262 = vmatpush.bf16.msrb.mxu1 %v11253_v50  ;;  %v14741_v50 = vld [vmem:[#allocation79_spill] sm:$0xff]  ;;  %v11397_v44 = vor.u32 %v13313_v39, %v11394_v52  ;;  %v6430_v33 = vadd.f32 %v14744_v53, %v6416_v43  ;;  %v11370_v8 = vld [vmem:[#allocation5 + $0x16a8] sm:$0xf0]  ;;  %v13445_v5 = vld [vmem:[#allocation5 + $0x1ae4] sm:$0xf]  ;;  %v11181_v52 = vor.u32 %v13259_v28, %v11178_v19  ;;  %v6904_v12 = vadd.f32 %v14429_v61, %v6890_v57 }
 0x396   :  { %7276 = vmatpush.bf16.msrb.mxu2 %v11445_v42  ;;  %v6626_v42 = vadd.f32 %v14741_v50, %v6612_v18  ;;  %v13307_v18 = vld [vmem:[#allocation5 + $0x1694] sm:$0xf]  ;;  %v11562_v0 = vld [vmem:[#allocation5 + $0x1828] sm:$0xf0]  ;;  %v11922_v14 = vld [vmem:[#allocation5 + $0x1af8] sm:$0xf0]  ;;  %v6920_v22 = vadd.f32 %v14466_v9, %v6906_v21  ;;  %13626 = vpow2.f32 %v14489_v60 }
 0x397   :  { %7290 = vmatpush.bf16.msrb.mxu3 %v11637_v10  ;;  %v10986_v10 = vld [vmem:[#allocation5 + $0x13a8] sm:$0xf0]  ;;  %v13355_v56 = vld [vmem:[#allocation5 + $0x1814] sm:$0xf]  ;;  %v14746_v11 = vld [vmem:[#allocation64_spill] sm:$0xff]  ;;  %v11373_v50 = vor.u32 %v13307_v18, %v11370_v8  ;;  %v14511_v24 = vpop.f32.mrf.mxu2  ;;  %v11925_v25 = vor.u32 %v13445_v5, %v11922_v14  ;;  %v6918_v28 = vadd.f32 %v14438_v51, %v6904_v12 }
 0x398   :  { %7249 = vmatpush.bf16.msrb.mxu0 %v11037_v26  ;;  %v6640_v55 = vadd.f32 %v14743_v7, %v6626_v42  ;;  %v6444_v36 = vadd.f32 %v14746_v11, %v6430_v33  ;;  %v10989_v43 = vor.u32 %v13211_v63, %v10986_v10  ;;  %v12114_v27 = vld [vmem:[#allocation5 + $0x1c78] sm:$0xf0]  ;;  %v12176_v40 = vld [vmem:[#allocation8 + $0x70] sm:$0xf]  ;;  %v14747_v31 = vld [vmem:[#allocation81_spill] sm:$0xff]  ;;  %v14514_v63 = vpop.f32.mrf.mxu3  ;;  %v14518_v33 = vpop.f32.mrf.mxu0  ;;  %v6934_v14 = vadd.f32 %v14477_v48, %v6920_v22 }
 0x399   :  { %7263 = vmatpush.bf16.msrb.mxu1 %v11229_v23  ;;  %v13493_v23 = vld [vmem:[#allocation5 + $0x1c64] sm:$0xf]  ;;  %v13512_v35 = vld [vmem:[#allocation8 + $0x74] sm:$0xf0]  ;;  %v12240_v42 = vld [vmem:[#allocation8 + $0xf0] sm:$0xf] }
 0x39a   :  { %7277 = vmatpush.bf16.msrb.mxu2 %v11421_v59  ;;  %v14499_v26 = vpop.f32.mrf.mxu1  ;;  %v14745_v59 = vld [vmem:[#allocation51_spill] sm:$0xff]  ;;  %v6654_v39 = vadd.f32 %v14747_v31, %v6640_v55  ;;  %v13528_v45 = vld [vmem:[#allocation8 + $0xf4] sm:$0xf0]  ;;  %v12117_v10 = vor.u32 %v13493_v23, %v12114_v27  ;;  %v12177_v7 = vor.u32 %v13512_v35, %v12176_v40  ;;  %v12090_v19 = vld [vmem:[#allocation5 + $0x1c48] sm:$0xf0]  ;;  %v6932_v40 = vadd.f32 %v14450_v47, %v6918_v28 }
 0x39b   :  { %7291 = vmatpush.bf16.msrb.mxu3 %v11613_v1  ;;  %v14502_v15 = vadd.f32 %v14745_v59, %v6248_v17  ;;  %v14506_v1 = vmul.f32 1.442695, %v7334_v58  ;;  %v11565_v17 = vor.u32 %v13355_v56, %v11562_v0  ;;  %v13439_v55 = vld [vmem:[#allocation5 + $0x1ab4] sm:$0xf]  ;;  %v12241_v61 = vor.u32 %v13528_v45, %v12240_v42  ;;  %v12168_v9 = vld [vmem:[#allocation8 + $0x60] sm:$0xf] }
 0x39c   :  { %7250 = vmatpush.bf16.msrb.mxu0 %v11013_v34  ;;  %v14748_v34 = vld [vmem:[#allocation82_spill] sm:$0xff]  ;;  %v12232_v57 = vld [vmem:[#allocation8 + $0xe0] sm:$0xf]  ;;  %v14749_v8 = vld [vmem:[#allocation48_spill] sm:$0xff]  ;;  %v6948_v35 = vadd.f32 %v14487_v37, %v6934_v14 }
 0x39d   :  { %7264 = vmatpush.bf16.msrb.mxu1 %v11205_v30  ;;  %v6668_v58 = vadd.f32 %v14748_v34, %v6654_v39  ;;  %v11898_v30 = vld [vmem:[#allocation5 + $0x1ac8] sm:$0xf0]  ;;  %v7335_v53 = vsub.f32 0.0, %v14502_v15  ;;  %v7329_v56 = vsub.f32 0.0, %v14749_v8  ;;  %v14750_v0 = vld [vmem:[#allocation65_spill] sm:$0xff]  ;;  %v14751_v23 = vld [vmem:[#allocation83_spill] sm:$0xff]  ;;  %13628 = vpow2.f32 %v14506_v1 }
 0x39e   :  { %7278 = vmatpush.bf16.msrb.mxu2 %v11397_v44  ;;  %v13487_v44 = vld [vmem:[#allocation5 + $0x1c34] sm:$0xf]  ;;  %v13510_v18 = vld [vmem:[#allocation8 + $0x64] sm:$0xf0]  ;;  %v6458_v5 = vadd.f32 %v14750_v0, %v6444_v36  ;;  %v11901_v51 = vor.u32 %v13439_v55, %v11898_v30  ;;  %v13433_v21 = vld [vmem:[#allocation5 + $0x1a84] sm:$0xf] }
 0x39f   :  { %7292 = vmatpush.bf16.msrb.mxu3 %v11589_v4  ;;  %v13526_v4 = vld [vmem:[#allocation8 + $0xe4] sm:$0xf0]  ;;  %v6682_v59 = vadd.f32 %v14751_v23, %v6668_v58  ;;  %v12093_v15 = vor.u32 %v13487_v44, %v12090_v19  ;;  %v12169_v11 = vor.u32 %v13510_v18, %v12168_v9  ;;  %v13481_v27 = vld [vmem:[#allocation5 + $0x1c04] sm:$0xf]  ;;  %v12066_v36 = vld [vmem:[#allocation5 + $0x1c18] sm:$0xf0] }
 0x3a0   :  { %7251 = vmatpush.bf16.msrb.mxu0 %v10989_v43  ;;  %v11874_v43 = vld [vmem:[#allocation5 + $0x1a98] sm:$0xf0]  ;;  %v12233_v48 = vor.u32 %v13526_v4, %v12232_v57  ;;  %v12160_v31 = vld [vmem:[#allocation8 + $0x50] sm:$0xf]  ;;  %v7342_v47 = vmul.f32 1.442695, %v7329_v56  ;;  %v14539_v44 = vpop.f32.mrf.mxu0 }
 0x3a1   :  { %7265 = vmatpush.bf16.msrb.mxu1 %v11181_v52  ;;  %v13508_v39 = vld [vmem:[#allocation8 + $0x54] sm:$0xf0]  ;;  %v7354_v52 = vmul.f32 1.442695, %v7335_v53  ;;  %v12224_v45 = vld [vmem:[#allocation8 + $0xd0] sm:$0xf] }
 0x3a2   :  { %7279 = vmatpush.bf16.msrb.mxu2 %v11373_v50  ;;  %v6696_v50 = vadd.f32 %v14323_v6, %v6682_v59  ;;  %v6989_v42 = vpop.f32.mrf.mxu1  ;;  %v13524_v12 = vld [vmem:[#allocation8 + $0xd4] sm:$0xf0]  ;;  %v14752_v22 = vld [vmem:[#allocation66_spill] sm:$0xff]  ;;  %v12161_v6 = vor.u32 %v13508_v39, %v12160_v31  ;;  %v13475_v58 = vld [vmem:[#allocation5 + $0x1bd4] sm:$0xf] }
 0x3a3   :  { %7293 = vmatpush.bf16.msrb.mxu3 %v11565_v17  ;;  %7252 = vmatmul.bf16.vlgmr.msrb.gmra.mxu0 %v14025_v41  ;;  %v6472_v37 = vadd.f32 %v14752_v22, %v6458_v5  ;;  %v6946_v17 = vadd.f32 %v14458_v62, %v6932_v40  ;;  %v11877_v41 = vor.u32 %v13433_v21, %v11874_v43  ;;  %v11850_v34 = vld [vmem:[#allocation5 + $0x1a68] sm:$0xf0]  ;;  %v7003_v62 = vpop.f32.mrf.mxu2  ;;  %v12152_v55 = vld [vmem:[#allocation8 + $0x40] sm:$0xf]  ;;  %13630 = vpow2.f32 %v7354_v52  ;;  %v14753_v19 = vld [vmem:[#allocation67_spill] sm:$0xff] }
 0x3a4   :  { %7300 = vmatpush.bf16.msra.mxu0 %v11925_v25  ;;  %7266 = vmatmul.bf16.vlgmr.msrb.gmra.mxu1 %v14023_v38  ;;  %v14534_v25 = vpop.f32.mrf.mxu3  ;;  %v13427_v38 = vld [vmem:[#allocation5 + $0x1a54] sm:$0xf]  ;;  %v13506_v30 = vld [vmem:[#allocation8 + $0x44] sm:$0xf0]  ;;  %v6710_v60 = vadd.f32 %v14325_v3, %v6696_v50  ;;  %v12216_v28 = vld [vmem:[#allocation8 + $0xc0] sm:$0xf]  ;;  %13632 = vpow2.f32 %v7342_v47 }
 0x3a5   :  { %7314 = vmatpush.bf16.msra.mxu1 %v12117_v10  ;;  %7280 = vmatmul.bf16.vlgmr.msrb.gmra.mxu2 %v14027_v46  ;;  %v12069_v46 = vor.u32 %v13481_v27, %v12066_v36  ;;  %v6962_v10 = vadd.f32 %v14514_v63, %v6948_v35  ;;  %v6486_v9 = vadd.f32 %v14753_v19, %v6472_v37  ;;  %v14754_v53 = vld [vmem:[#allocation84_spill] sm:$0xff]  ;;  %v13421_v56 = vld [vmem:[#allocation5 + $0x1a24] sm:$0xf]  ;;  %v12208_v21 = vld [vmem:[#allocation8 + $0xb0] sm:$0xf] }
 0x3a6   :  { %7976 = vmatpush.bf16.msra.mxu2 %v12177_v7  ;;  %7294 = vmatmul.bf16.vlgmr.msrb.gmra.mxu3 %v14033_v49  ;;  %v12225_v49 = vor.u32 %v13524_v12, %v12224_v45  ;;  %v12042_v7 = vld [vmem:[#allocation5 + $0x1be8] sm:$0xf0]  ;;  %v6960_v18 = vadd.f32 %v14482_v20, %v6946_v17  ;;  %v11853_v63 = vor.u32 %v13427_v38, %v11850_v34  ;;  %v11826_v3 = vld [vmem:[#allocation5 + $0x1a38] sm:$0xf0]  ;;  %v13469_v0 = vld [vmem:[#allocation5 + $0x1ba4] sm:$0xf] }
 0x3a7   :  { %7990 = vmatpush.bf16.msra.mxu3 %v12241_v61  ;;  %v13522_v61 = vld [vmem:[#allocation8 + $0xc4] sm:$0xf0]  ;;  %v6976_v1 = vadd.f32 %v14518_v33, %v6962_v10  ;;  %v6724_v57 = vadd.f32 %v14754_v53, %v6710_v60  ;;  %v12045_v4 = vor.u32 %v13475_v58, %v12042_v7  ;;  %v12153_v8 = vor.u32 %v13506_v30, %v12152_v55  ;;  %v14755_v5 = vld [vmem:[#allocation68_spill] sm:$0xff]  ;;  %v12144_v33 = vld [vmem:[#allocation8 + $0x30] sm:$0xf] }
 0x3a8   :  { %7301 = vmatpush.bf16.msra.mxu0 %v11901_v51  ;;  %v6500_v14 = vadd.f32 %v14755_v5, %v6486_v9  ;;  %v6974_v51 = vadd.f32 %v14492_v32, %v6960_v18  ;;  %v12217_v20 = vor.u32 %v13522_v61, %v12216_v28  ;;  %v12018_v23 = vld [vmem:[#allocation5 + $0x1bb8] sm:$0xf0]  ;;  %v11829_v35 = vor.u32 %v13421_v56, %v11826_v3  ;;  %v14756_v36 = vld [vmem:[#allocation85_spill] sm:$0xff]  ;;  %v13415_v52 = vld [vmem:[#allocation5 + $0x19f4] sm:$0xf]  ;;  %v7031_v61 = vpop.f32.mrf.mxu0 }
 0x3a9   :  { %7315 = vmatpush.bf16.msra.mxu1 %v12093_v15  ;;  %v13504_v59 = vld [vmem:[#allocation8 + $0x34] sm:$0xf0]  ;;  %v13627_v15 = vpop.eup %13626  ;;  %v6990_v40 = vadd.f32 %v6989_v42, %v6976_v1  ;;  %v6738_v31 = vadd.f32 %v14756_v36, %v6724_v57  ;;  %v12021_v32 = vor.u32 %v13469_v0, %v12018_v23  ;;  %v11802_v50 = vld [vmem:[#allocation5 + $0x1a08] sm:$0xf0]  ;;  %v13463_v45 = vld [vmem:[#allocation5 + $0x1b74] sm:$0xf] }
 0x3aa   :  { %7977 = vmatpush.bf16.msra.mxu2 %v12169_v11  ;;  %v14547_v11 = vpop.f32.mrf.mxu1  ;;  %v13520_v43 = vld [vmem:[#allocation8 + $0xb4] sm:$0xf0]  ;;  %v13629_v27 = vpop.eup %13628  ;;  %v12145_v39 = vor.u32 %v13504_v59, %v12144_v33  ;;  %v14757_v12 = vld [vmem:[#allocation70_spill] sm:$0xff]  ;;  %v6988_v22 = vadd.f32 %v14499_v26, %v6974_v51  ;;  %v7364_v38 = vadd.f32 1.0, %v13627_v15  ;;  %v13409_v18 = vld [vmem:[#allocation5 + $0x19c4] sm:$0xf] }
 0x3ab   :  { %7991 = vmatpush.bf16.msra.mxu3 %v12233_v48  ;;  %v13631_v48 = vpop.eup %13630  ;;  %v6514_v47 = vadd.f32 %v14757_v12, %v6500_v14  ;;  %v7004_v37 = vadd.f32 %v7003_v62, %v6990_v40  ;;  %v12209_v17 = vor.u32 %v13520_v43, %v12208_v21  ;;  %v14552_v42 = vpop.f32.mrf.mxu2  ;;  %v7370_v34 = vadd.f32 1.0, %v13629_v27  ;;  %v13518_v7 = vld [vmem:[#allocation8 + $0xa4] sm:$0xf0]  ;;  %v14758_v60 = vld [vmem:[#allocation72_spill] sm:$0xff]  ;;  %v14759_v3 = vld [vmem:[#allocation71_spill] sm:$0xff] }
 0x3ac   :  { %7302 = vmatpush.bf16.msra.mxu0 %v11877_v41  ;;  %v11994_v41 = vld [vmem:[#allocation5 + $0x1b88] sm:$0xf0]  ;;  %v6752_v58 = vadd.f32 %v14346_v2, %v6738_v31  ;;  %v7017_v10 = vpop.f32.mrf.mxu3  ;;  %v13633_v55 = vpop.eup %13632  ;;  %v7371_v30 = vadd.f32 1.0, %v13631_v48  ;;  %v7002_v26 = vadd.f32 %v14511_v24, %v6988_v22  ;;  %v11805_v62 = vor.u32 %v13415_v52, %v11802_v50  ;;  %v11778_v1 = vld [vmem:[#allocation5 + $0x19d8] sm:$0xf0] }
 0x3ad   :  { %7316 = vmatpush.bf16.msra.mxu1 %v12069_v46  ;;  %v12136_v46 = vld [vmem:[#allocation8 + $0x20] sm:$0xf]  ;;  %v14556_v28 = vadd.f32 %v14758_v60, %v6514_v47  ;;  %v11997_v19 = vor.u32 %v13463_v45, %v11994_v41  ;;  %v11970_v57 = vld [vmem:[#allocation5 + $0x1b58] sm:$0xf0]  ;;  %v7365_v56 = vadd.f32 1.0, %v13633_v55  ;;  %v7330_v0 = vsub.f32 0.0, %v14759_v3 }
 0x3ae   :  { %7978 = vmatpush.bf16.msra.mxu2 %v12161_v6  ;;  %v13502_v6 = vld [vmem:[#allocation8 + $0x24] sm:$0xf0]  ;;  %v13457_v2 = vld [vmem:[#allocation5 + $0x1b44] sm:$0xf]  ;;  %v6766_v24 = vadd.f32 %v14351_v29, %v6752_v58  ;;  %v12192_v5 = vld [vmem:[#allocation8 + $0x90] sm:$0xf]  ;;  %v11781_v33 = vor.u32 %v13409_v18, %v11778_v1  ;;  %13634 = vrcp.f32 %v7370_v34 }
 0x3af   :  { %7992 = vmatpush.bf16.msra.mxu3 %v12225_v49  ;;  %v12200_v49 = vld [vmem:[#allocation8 + $0xa0] sm:$0xf]  ;;  %v12137_v9 = vor.u32 %v13502_v6, %v12136_v46  ;;  %v13516_v14 = vld [vmem:[#allocation8 + $0x94] sm:$0xf0]  ;;  %v7336_v51 = vsub.f32 0.0, %v14556_v28  ;;  %v11973_v27 = vor.u32 %v13457_v2, %v11970_v57  ;;  %13636 = vrcp.f32 %v7371_v30  ;;  %v14760_v41 = vld [vmem:[#allocation86_spill] sm:$0xff] }
 0x3b0   :  { %7303 = vmatpush.bf16.msra.mxu0 %v11853_v63  ;;  %v7018_v63 = vadd.f32 %v7017_v10, %v7004_v37  ;;  %v12201_v53 = vor.u32 %v13518_v7, %v12200_v49  ;;  %v13403_v59 = vld [vmem:[#allocation5 + $0x1994] sm:$0xf]  ;;  %v11754_v15 = vld [vmem:[#allocation5 + $0x19a8] sm:$0xf0]  ;;  %v6780_v21 = vadd.f32 %v14354_v13, %v6766_v24  ;;  %v12120_v48 = vld [vmem:[#allocation8] sm:$0xf]  ;;  %13638 = vrcp.f32 %v7364_v38 }
 0x3b1   :  { %7317 = vmatpush.bf16.msra.mxu1 %v12045_v4  ;;  %v12128_v4 = vld [vmem:[#allocation8 + $0x10] sm:$0xf]  ;;  %v13498_v31 = vld [vmem:[#allocation8 + $0x4] sm:$0xf0]  ;;  %v13544_v13 = vld [vmem:[#allocation8 + $0x174] sm:$0xf0]  ;;  %13640 = vrcp.f32 %v7365_v56  ;;  %v11757_v47 = vor.u32 %v13403_v59, %v11754_v15 }
 0x3b2   :  { %7979 = vmatpush.bf16.msra.mxu2 %v12153_v8  ;;  %v13500_v8 = vld [vmem:[#allocation8 + $0x14] sm:$0xf0]  ;;  %v7032_v23 = vadd.f32 %v7031_v61, %v7018_v63  ;;  %v7045_v43 = vpop.f32.mrf.mxu1  ;;  %v13451_v29 = vld [vmem:[#allocation5 + $0x1b14] sm:$0xf]  ;;  %v7331_v46 = vsub.f32 0.0, %v14760_v41  ;;  %v12121_v34 = vor.u32 %v13498_v31, %v12120_v48 }
 0x3b3   :  { %7993 = vmatpush.bf16.msra.mxu3 %v12217_v20  ;;  %v7016_v20 = vadd.f32 %v14534_v25, %v7002_v26  ;;  %v12129_v40 = vor.u32 %v13500_v8, %v12128_v4  ;;  %v12193_v25 = vor.u32 %v13516_v14, %v12192_v5  ;;  %v7059_v52 = vpop.f32.mrf.mxu2  ;;  %v12304_v50 = vld [vmem:[#allocation8 + $0x170] sm:$0xf]  ;;  %v13560_v22 = vld [vmem:[#allocation8 + $0x1f4] sm:$0xf0]  ;;  %v12296_v60 = vld [vmem:[#allocation8 + $0x160] sm:$0xf] }
 0x3b4   :  { %7304 = vmatpush.bf16.msra.mxu0 %v11829_v35  ;;  %v11946_v35 = vld [vmem:[#allocation5 + $0x1b28] sm:$0xf0]  ;;  %v12368_v45 = vld [vmem:[#allocation8 + $0x1f0] sm:$0xf]  ;;  %v7046_v12 = vadd.f32 %v7045_v43, %v7032_v23  ;;  %v12305_v49 = vor.u32 %v13544_v13, %v12304_v50  ;;  %v13635_v7 = vpop.eup %13634  ;;  %v12360_v26 = vld [vmem:[#allocation8 + $0x1e0] sm:$0xf] }
 0x3b5   :  { %7318 = vmatpush.bf16.msra.mxu1 %v12021_v32  ;;  %v7030_v36 = vadd.f32 %v14539_v44, %v7016_v20  ;;  %v12184_v32 = vld [vmem:[#allocation8 + $0x80] sm:$0xf]  ;;  %v12432_v37 = vld [vmem:[#allocation8 + $0x270] sm:$0xf]  ;;  %v6794_v44 = vadd.f32 %v14370_v16, %v6780_v21  ;;  %v11949_v6 = vor.u32 %v13451_v29, %v11946_v35  ;;  %v12369_v55 = vor.u32 %v13560_v22, %v12368_v45  ;;  %v13542_v28 = vld [vmem:[#allocation8 + $0x164] sm:$0xf0] }
 0x3b6   :  { %7980 = vmatpush.bf16.msra.mxu2 %v12145_v39  ;;  %v13514_v39 = vld [vmem:[#allocation8 + $0x84] sm:$0xf0]  ;;  %v7060_v58 = vadd.f32 %v7059_v52, %v7046_v12  ;;  %v7356_v1 = vmul.f32 1.442695, %v7336_v51  ;;  %v12288_v8 = vld [vmem:[#allocation8 + $0x150] sm:$0xf] }
 0x3b7   :  { %7994 = vmatpush.bf16.msra.mxu3 %v12209_v17  ;;  %v13576_v17 = vld [vmem:[#allocation8 + $0x274] sm:$0xf0]  ;;  %v7044_v38 = vadd.f32 %v14547_v11, %v7030_v36  ;;  %v12185_v10 = vor.u32 %v13514_v39, %v12184_v32  ;;  %v13558_v16 = vld [vmem:[#allocation8 + $0x1e4] sm:$0xf0]  ;;  %v7344_v11 = vmul.f32 1.442695, %v7330_v0 }
 0x3b8   :  { %7305 = vmatpush.bf16.msra.mxu0 %v11805_v62  ;;  %v12433_v30 = vor.u32 %v13576_v17, %v12432_v37  ;;  %v13637_v62 = vpop.eup %13636  ;;  %v7337_v2 = vsub.f32 0.0, %v6794_v44  ;;  %v7338_v57 = vsub.f32 0.0, %v7060_v58  ;;  %v12361_v24 = vor.u32 %v13558_v16, %v12360_v26  ;;  %v13540_v0 = vld [vmem:[#allocation8 + $0x154] sm:$0xf0]  ;;  %v12352_v5 = vld [vmem:[#allocation8 + $0x1d0] sm:$0xf] }
 0x3b9   :  { %7319 = vmatpush.bf16.msra.mxu1 %v11997_v19  ;;  %v7058_v61 = vadd.f32 %v14552_v42, %v7044_v38  ;;  %v12424_v19 = vld [vmem:[#allocation8 + $0x260] sm:$0xf]  ;;  %v13639_v18 = vpop.eup %13638  ;;  %v12297_v42 = vor.u32 %v13542_v28, %v12296_v60  ;;  %v13556_v14 = vld [vmem:[#allocation8 + $0x1d4] sm:$0xf0]  ;;  %v12416_v23 = vld [vmem:[#allocation8 + $0x250] sm:$0xf]  ;;  %13642 = vpow2.f32 %v7344_v11  ;;  %v12289_v21 = vor.u32 %v13540_v0, %v12288_v8 }
 0x3ba   :  { %7981 = vmatpush.bf16.msra.mxu2 %v12137_v9  ;;  %v13574_v9 = vld [vmem:[#allocation8 + $0x264] sm:$0xf0]  ;;  %v13641_v63 = vpop.eup %13640  ;;  %v14571_v4 = vpack.c.bf16 %v13635_v7, %v13639_v18  ;;  %v14761_v20 = vld [vmem:[#allocation20_spill] sm:$0xff]  ;;  %v7358_v59 = vmul.f32 1.442695, %v7337_v2  ;;  %13644 = vpow2.f32 %v7356_v1 }
 0x3bb   :  { %7995 = vmatpush.bf16.msra.mxu3 %v12201_v53  ;;  %v7346_v53 = vmul.f32 1.442695, %v7331_v46  ;;  %v14573_v56 = vpack.c.bf16 %v13637_v62, %v13641_v63  ;;  %v12425_v3 = vor.u32 %v13574_v9, %v12424_v19  ;;  %v7332_v51 = vsub.f32 0.0, %v7058_v61  ;;  %v12280_v43 = vld [vmem:[#allocation8 + $0x140] sm:$0xf] }
 0x3bc   :  { %7306 = vmatpush.bf16.msra.mxu0 %v11781_v33  ;;  %v13572_v33 = vld [vmem:[#allocation8 + $0x254] sm:$0xf0]  ;;  %v7360_v15 = vmul.f32 1.442695, %v7338_v57  ;;  %v12344_v29 = vld [vmem:[#allocation8 + $0x1c0] sm:$0xf] }
 0x3bd   :  { %7320 = vmatpush.bf16.msra.mxu1 %v11973_v27  ;;  %v12353_v27 = vor.u32 %v13556_v14, %v12352_v5  ;;  %v13554_v35 = vld [vmem:[#allocation8 + $0x1c4] sm:$0xf0]  ;;  %13646 = vpow2.f32 %v7346_v53  ;;  %v7348_v48 = vmul.f32 1.442695, %v7332_v51  ;;  %v12408_v36 = vld [vmem:[#allocation8 + $0x240] sm:$0xf] }
 0x3be   :  { %7982 = vmatpush.bf16.msra.mxu2 %v12129_v40  ;;  %v12417_v40 = vor.u32 %v13572_v33, %v12416_v23  ;;  %13648 = vpow2.f32 %v7358_v59  ;;  %v12345_v39 = vor.u32 %v13554_v35, %v12344_v29  ;;  %v12272_v50 = vld [vmem:[#allocation8 + $0x130] sm:$0xf]  ;;  %v13536_v13 = vld [vmem:[#allocation8 + $0x134] sm:$0xf0]  ;;  %v12264_v38 = vld [vmem:[#allocation8 + $0x120] sm:$0xf] }
 0x3bf   :  { %7996 = vmatpush.bf16.msra.mxu3 %v12193_v25  ;;  %v13570_v25 = vld [vmem:[#allocation8 + $0x244] sm:$0xf0]  ;;  %13650 = vpow2.f32 %v7360_v15  ;;  %v13643_v32 = vpop.eup %13642  ;;  %v12336_v45 = vld [vmem:[#allocation8 + $0x1b0] sm:$0xf]  ;;  %v13552_v12 = vld [vmem:[#allocation8 + $0x1b4] sm:$0xf0]  ;;  %v12273_v46 = vor.u32 %v13536_v13, %v12272_v50 }
 0x3c0   :  { %7307 = vmatpush.bf16.msra.mxu0 %v11757_v47  ;;  %v12409_v52 = vor.u32 %v13570_v25, %v12408_v36  ;;  %13652 = vpow2.f32 %v7348_v48  ;;  %v12400_v47 = vld [vmem:[#allocation8 + $0x230] sm:$0xf]  ;;  %v13568_v22 = vld [vmem:[#allocation8 + $0x234] sm:$0xf0]  ;;  %v13645_v37 = vpop.eup %13644  ;;  %v7366_v41 = vadd.f32 1.0, %v13643_v32 }
 0x3c1   :  { %7321 = vmatpush.bf16.msra.mxu1 %v11949_v6  ;;  %v12337_v6 = vor.u32 %v13552_v12, %v12336_v45  ;;  %v13534_v58 = vld [vmem:[#allocation8 + $0x124] sm:$0xf0]  ;;  %v7372_v60 = vadd.f32 1.0, %v13645_v37  ;;  %v12256_v61 = vld [vmem:[#allocation8 + $0x110] sm:$0xf] }
 0x3c2   :  { %7983 = vmatpush.bf16.msra.mxu2 %v12121_v34  ;;  %v12401_v34 = vor.u32 %v13568_v22, %v12400_v47  ;;  %v13550_v7 = vld [vmem:[#allocation8 + $0x1a4] sm:$0xf0]  ;;  %v12265_v62 = vor.u32 %v13534_v58, %v12264_v38  ;;  %v13532_v11 = vld [vmem:[#allocation8 + $0x114] sm:$0xf0]  ;;  %v12320_v1 = vld [vmem:[#allocation8 + $0x190] sm:$0xf]  ;;  %13654 = vrcp.f32 %v7366_v41 }
 0x3c3   :  { %7997 = vmatpush.bf16.msra.mxu3 %v12185_v10  ;;  %7308 = vmatmul.bf16.vlgmr.msra.gmra.mxu0 %v14037_v54  ;;  %v13538_v54 = vld [vmem:[#allocation8 + $0x144] sm:$0xf0]  ;;  %v13647_v17 = vpop.eup %13646  ;;  %v12328_v10 = vld [vmem:[#allocation8 + $0x1a0] sm:$0xf]  ;;  %v13548_v2 = vld [vmem:[#allocation8 + $0x194] sm:$0xf0]  ;;  %13656 = vrcp.f32 %v7372_v60 }
 0x3c4   :  { %8004 = vmatpush.bf16.msrb.mxu0 %v12305_v49  ;;  %7322 = vmatmul.bf16.vlgmr.msra.gmra.mxu1 %v14761_v20  ;;  %v12281_v31 = vor.u32 %v13538_v54, %v12280_v43  ;;  %v13649_v44 = vpop.eup %13648  ;;  %v7367_v16 = vadd.f32 1.0, %v13647_v17  ;;  %v12329_v9 = vor.u32 %v13550_v7, %v12328_v10  ;;  %v12384_v63 = vld [vmem:[#allocation8 + $0x210] sm:$0xf]  ;;  %v13564_v53 = vld [vmem:[#allocation8 + $0x214] sm:$0xf0] }
 0x3c5   :  { %8018 = vmatpush.bf16.msrb.mxu1 %v12369_v55  ;;  %7984 = vmatmul.bf16.vlgmr.msra.gmra.mxu2 %v14571_v4  ;;  %v13651_v49 = vpop.eup %13650  ;;  %v12392_v55 = vld [vmem:[#allocation8 + $0x220] sm:$0xf]  ;;  %v7373_v26 = vadd.f32 1.0, %v13649_v44  ;;  %v13530_v0 = vld [vmem:[#allocation8 + $0x104] sm:$0xf0] }
 0x3c6   :  { %8032 = vmatpush.bf16.msrb.mxu2 %v12433_v30  ;;  %7998 = vmatmul.bf16.vlgmr.msra.gmra.mxu3 %v14573_v56  ;;  %v13566_v30 = vld [vmem:[#allocation8 + $0x224] sm:$0xf0]  ;;  %v13653_v28 = vpop.eup %13652  ;;  %v7374_v19 = vadd.f32 1.0, %v13651_v49  ;;  %v12248_v8 = vld [vmem:[#allocation8 + $0x100] sm:$0xf] }
 0x3c7   :  { %v12393_v18 = vor.u32 %v13566_v30, %v12392_v55  ;;  %v7368_v57 = vadd.f32 1.0, %v13653_v28  ;;  %13658 = vrcp.f32 %v7373_v26  ;;  %v12312_v5 = vld [vmem:[#allocation8 + $0x180] sm:$0xf]  ;;  %v13546_v14 = vld [vmem:[#allocation8 + $0x184] sm:$0xf0]  ;;  %v12249_v43 = vor.u32 %v13530_v0, %v12248_v8 }
 0x3c8   :  { %8005 = vmatpush.bf16.msrb.mxu0 %v12297_v42  ;;  %v12257_v42 = vor.u32 %v13532_v11, %v12256_v61  ;;  %13660 = vrcp.f32 %v7374_v19  ;;  %v12376_v51 = vld [vmem:[#allocation8 + $0x200] sm:$0xf]  ;;  %v13562_v20 = vld [vmem:[#allocation8 + $0x204] sm:$0xf0]  ;;  %v13511_v23 = vld [vmem:[#allocation8 + $0x74] sm:$0xf]  ;;  %v12313_v29 = vor.u32 %v13546_v14, %v12312_v5 }
 0x3c9   :  { %8019 = vmatpush.bf16.msrb.mxu1 %v12361_v24  ;;  %v12321_v24 = vor.u32 %v13548_v2, %v12320_v1  ;;  %13662 = vrcp.f32 %v7367_v16  ;;  %v12178_v33 = vld [vmem:[#allocation8 + $0x78] sm:$0xf0]  ;;  %v13527_v59 = vld [vmem:[#allocation8 + $0xf4] sm:$0xf]  ;;  %v12377_v35 = vor.u32 %v13562_v20, %v12376_v51  ;;  %v13525_v50 = vld [vmem:[#allocation8 + $0xe4] sm:$0xf] }
 0x3ca   :  { %8033 = vmatpush.bf16.msrb.mxu2 %v12425_v3  ;;  %v12385_v3 = vor.u32 %v13564_v53, %v12384_v63  ;;  %13664 = vrcp.f32 %v7368_v57  ;;  %v12242_v15 = vld [vmem:[#allocation8 + $0xf8] sm:$0xf0]  ;;  %v12181_v36 = vor.u32 %v13511_v23, %v12178_v33  ;;  %v12234_v13 = vld [vmem:[#allocation8 + $0xe8] sm:$0xf0]  ;;  %v13541_v12 = vld [vmem:[#allocation8 + $0x164] sm:$0xf]  ;;  %v14588_v33 = vpop.f32.mrf.mxu3 }
 0x3cb   :  { %v12245_v25 = vor.u32 %v13527_v59, %v12242_v15  ;;  %v12298_v47 = vld [vmem:[#allocation8 + $0x168] sm:$0xf0]  ;;  %v12237_v44 = vor.u32 %v13525_v50, %v12234_v13  ;;  %v12162_v38 = vld [vmem:[#allocation8 + $0x58] sm:$0xf0]  ;;  %v13523_v58 = vld [vmem:[#allocation8 + $0xd4] sm:$0xf] }
 0x3cc   :  { %8006 = vmatpush.bf16.msrb.mxu0 %v12289_v21  ;;  %v13655_v21 = vpop.eup %13654  ;;  %v12226_v10 = vld [vmem:[#allocation8 + $0xd8] sm:$0xf0]  ;;  %v13539_v49 = vld [vmem:[#allocation8 + $0x154] sm:$0xf]  ;;  %v13505_v60 = vld [vmem:[#allocation8 + $0x44] sm:$0xf] }
 0x3cd   :  { %8020 = vmatpush.bf16.msrb.mxu1 %v12353_v27  ;;  %v13543_v27 = vld [vmem:[#allocation8 + $0x174] sm:$0xf]  ;;  %v13657_v54 = vpop.eup %13656  ;;  %v12290_v7 = vld [vmem:[#allocation8 + $0x158] sm:$0xf0]  ;;  %v12229_v30 = vor.u32 %v13523_v58, %v12226_v10  ;;  %v12154_v26 = vld [vmem:[#allocation8 + $0x48] sm:$0xf0] }
 0x3ce   :  { %8034 = vmatpush.bf16.msrb.mxu2 %v12417_v40  ;;  %v12306_v40 = vld [vmem:[#allocation8 + $0x178] sm:$0xf0]  ;;  %v13659_v48 = vpop.eup %13658  ;;  %v14579_v37 = vpack.c.bf16 %v13657_v54, %v13655_v21  ;;  %v12293_v28 = vor.u32 %v13539_v49, %v12290_v7  ;;  %v12218_v61 = vld [vmem:[#allocation8 + $0xc8] sm:$0xf0]  ;;  %v13537_v16 = vld [vmem:[#allocation8 + $0x144] sm:$0xf]  ;;  %v7113_v7 = vpop.f32.mrf.mxu2 }
 0x3cf   :  { %v13661_v32 = vpop.eup %13660  ;;  %v12282_v19 = vld [vmem:[#allocation8 + $0x148] sm:$0xf0]  ;;  %v13503_v11 = vld [vmem:[#allocation8 + $0x34] sm:$0xf]  ;;  %v12146_v2 = vld [vmem:[#allocation8 + $0x38] sm:$0xf0] }
 0x3d0   :  { %8007 = vmatpush.bf16.msrb.mxu0 %v12281_v31  ;;  %v13509_v31 = vld [vmem:[#allocation8 + $0x64] sm:$0xf]  ;;  %v13663_v45 = vpop.eup %13662  ;;  %v12285_v1 = vor.u32 %v13537_v16, %v12282_v19  ;;  %v13519_v63 = vld [vmem:[#allocation8 + $0xb4] sm:$0xf]  ;;  %v12210_v53 = vld [vmem:[#allocation8 + $0xb8] sm:$0xf0]  ;;  %v12149_v8 = vor.u32 %v13503_v11, %v12146_v2 }
 0x3d1   :  { %8021 = vmatpush.bf16.msrb.mxu1 %v12345_v39  ;;  %v12309_v39 = vor.u32 %v13543_v27, %v12306_v40  ;;  %v13665_v22 = vpop.eup %13664  ;;  %v14581_v17 = vpack.c.bf16 %v13659_v48, %v13663_v45  ;;  %v13535_v57 = vld [vmem:[#allocation8 + $0x134] sm:$0xf]  ;;  %v12138_v5 = vld [vmem:[#allocation8 + $0x28] sm:$0xf0]  ;;  %v13517_v14 = vld [vmem:[#allocation8 + $0xa4] sm:$0xf] }
 0x3d2   :  { %8035 = vmatpush.bf16.msrb.mxu2 %v12409_v52  ;;  %v12170_v52 = vld [vmem:[#allocation8 + $0x68] sm:$0xf0]  ;;  %v14583_v41 = vpack.c.bf16 %v13661_v32, %v13665_v22  ;;  %v13533_v20 = vld [vmem:[#allocation8 + $0x124] sm:$0xf]  ;;  %v13499_v21 = vld [vmem:[#allocation8 + $0x14] sm:$0xf]  ;;  %v7099_v22 = vpop.f32.mrf.mxu1 }
 0x3d3   :  { %v12202_v51 = vld [vmem:[#allocation8 + $0xa8] sm:$0xf0]  ;;  %v12130_v27 = vld [vmem:[#allocation8 + $0x18] sm:$0xf0]  ;;  %v13515_v40 = vld [vmem:[#allocation8 + $0x94] sm:$0xf] }
 0x3d4   :  { %8008 = vmatpush.bf16.msrb.mxu0 %v12273_v46  ;;  %v12173_v46 = vor.u32 %v13509_v31, %v12170_v52  ;;  %v12266_v23 = vld [vmem:[#allocation8 + $0x128] sm:$0xf0]  ;;  %v12205_v15 = vor.u32 %v13517_v14, %v12202_v51  ;;  %v12194_v54 = vld [vmem:[#allocation8 + $0x98] sm:$0xf0]  ;;  %v12133_v48 = vor.u32 %v13499_v21, %v12130_v27  ;;  %v13529_v50 = vld [vmem:[#allocation8 + $0x104] sm:$0xf] }
 0x3d5   :  { %8022 = vmatpush.bf16.msrb.mxu1 %v12337_v6  ;;  %v13507_v6 = vld [vmem:[#allocation8 + $0x54] sm:$0xf]  ;;  %v12122_v31 = vld [vmem:[#allocation8 + $0x8] sm:$0xf0]  ;;  %v13573_v58 = vld [vmem:[#allocation8 + $0x264] sm:$0xf] }
 0x3d6   :  { %8036 = vmatpush.bf16.msrb.mxu2 %v12401_v34  ;;  %v12301_v34 = vor.u32 %v13541_v12, %v12298_v47  ;;  %v12165_v55 = vor.u32 %v13507_v6, %v12162_v38  ;;  %v12186_v52 = vld [vmem:[#allocation8 + $0x88] sm:$0xf0]  ;;  %v13575_v45 = vld [vmem:[#allocation8 + $0x274] sm:$0xf]  ;;  %v12434_v12 = vld [vmem:[#allocation8 + $0x278] sm:$0xf0]  ;;  %v7085_v47 = vpop.f32.mrf.mxu0  ;;  %v7073_v6 = vpop.f32.mrf.mxu3 }
 0x3d7   :  { %v12250_v13 = vld [vmem:[#allocation8 + $0x108] sm:$0xf0]  ;;  %v12437_v38 = vor.u32 %v13575_v45, %v12434_v12  ;;  %v13702_v19 = vld [vmem:[#allocation7] sm:$0x3f]  ;;  %v13567_v11 = vld [vmem:[#allocation8 + $0x234] sm:$0xf] }
 0x3d8   :  { %8009 = vmatpush.bf16.msrb.mxu0 %v12265_v62  ;;  %v13521_v62 = vld [vmem:[#allocation8 + $0xc4] sm:$0xf]  ;;  %v12426_v10 = vld [vmem:[#allocation8 + $0x268] sm:$0xf0]  ;;  %v12496_v27 = vld [vmem:[#allocation8 + $0x2f0] sm:$0xf] }
 0x3d9   :  { %8023 = vmatpush.bf16.msrb.mxu1 %v12329_v9  ;;  %v12157_v9 = vor.u32 %v13505_v60, %v12154_v26  ;;  %v12429_v49 = vor.u32 %v13573_v58, %v12426_v10 }
 0x3da   :  { %8037 = vmatpush.bf16.msrb.mxu2 %v12393_v18  ;;  %v12221_v18 = vor.u32 %v13521_v62, %v12218_v61  ;;  %v13569_v62 = vld [vmem:[#allocation8 + $0x244] sm:$0xf]  ;;  %v12410_v61 = vld [vmem:[#allocation8 + $0x248] sm:$0xf0] }
 0x3dc   :  { %8010 = vmatpush.bf16.msrb.mxu0 %v12257_v42  ;;  %v12274_v42 = vld [vmem:[#allocation8 + $0x138] sm:$0xf0] }
 0x3dd   :  { %8024 = vmatpush.bf16.msrb.mxu1 %v12321_v24  ;;  %v12213_v24 = vor.u32 %v13519_v63, %v12210_v53  ;;  %v12277_v0 = vor.u32 %v13535_v57, %v12274_v42  ;;  %v13565_v63 = vld [vmem:[#allocation8 + $0x224] sm:$0xf] }
 0x3de   :  { %8038 = vmatpush.bf16.msrb.mxu2 %v12385_v3  ;;  %v13501_v3 = vld [vmem:[#allocation8 + $0x24] sm:$0xf]  ;;  %v7087_v60 = vpop.f32.mrf.mxu0  ;;  %v7127_v16 = vpop.f32.mrf.mxu3 }
 0x3df   :  { %v12141_v59 = vor.u32 %v13501_v3, %v12138_v5  ;;  %v13563_v3 = vld [vmem:[#allocation8 + $0x214] sm:$0xf] }
 0x3e0   :  { %8011 = vmatpush.bf16.msrb.mxu0 %v12249_v43  ;;  %v12269_v43 = vor.u32 %v13533_v20, %v12266_v23  ;;  %v13561_v20 = vld [vmem:[#allocation8 + $0x204] sm:$0xf]  ;;  %v12378_v23 = vld [vmem:[#allocation8 + $0x208] sm:$0xf0] }
 0x3e1   :  { %8025 = vmatpush.bf16.msrb.mxu1 %v12313_v29  ;;  %v13531_v29 = vld [vmem:[#allocation8 + $0x114] sm:$0xf] }
 0x3e2   :  { %8039 = vmatpush.bf16.msrb.mxu2 %v12377_v35  ;;  %v12258_v35 = vld [vmem:[#allocation8 + $0x118] sm:$0xf0] }
 0x3e3   :  { %8012 = vmatmul.bf16.vlgmr.msrb.gmra.mxu0 %v14579_v37  ;;  %v12261_v32 = vor.u32 %v13531_v29, %v12258_v35  ;;  %v13590_v35 = vld [vmem:[#allocation8 + $0x2e4] sm:$0xf0] }
 0x3e4   :  { %8060 = vmatpush.bf16.msra.mxu0 %v12181_v36  ;;  %8026 = vmatmul.bf16.vlgmr.msrb.gmra.mxu1 %v14581_v17  ;;  %v12197_v36 = vor.u32 %v13515_v40, %v12194_v54  ;;  %v13592_v40 = vld [vmem:[#allocation8 + $0x2f4] sm:$0xf0]  ;;  %v12488_v54 = vld [vmem:[#allocation8 + $0x2e0] sm:$0xf] }
 0x3e5   :  { %8074 = vmatpush.bf16.msra.mxu1 %v12245_v25  ;;  %8040 = vmatmul.bf16.vlgmr.msrb.gmra.mxu2 %v14583_v41  ;;  %v13497_v25 = vld [vmem:[#allocation8 + $0x4] sm:$0xf]  ;;  %v12497_v29 = vor.u32 %v13592_v40, %v12496_v27  ;;  %v12440_v27 = vld [vmem:[#allocation8 + $0x280] sm:$0xf]  ;;  %v13578_v40 = vld [vmem:[#allocation8 + $0x284] sm:$0xf0] }
 0x3e6   :  { %8088 = vmatpush.bf16.msra.mxu2 %v12309_v39  ;;  %v13513_v39 = vld [vmem:[#allocation8 + $0x84] sm:$0xf]  ;;  %v7141_v53 = vpop.f32.mrf.mxu0 }
 0x3e7   :  { %8046 = vmatpush.bf16.msrb.mxu3 %v12497_v29  ;;  %v12441_v29 = vor.u32 %v13578_v40, %v12440_v27 }
 0x3e8   :  { %8061 = vmatpush.bf16.msra.mxu0 %v12173_v46  ;;  %v12125_v46 = vor.u32 %v13497_v25, %v12122_v31  ;;  %v12489_v31 = vor.u32 %v13590_v35, %v12488_v54  ;;  %v13559_v35 = vld [vmem:[#allocation8 + $0x1f4] sm:$0xf] }
 0x3e9   :  { %8075 = vmatpush.bf16.msra.mxu1 %v12237_v44  ;;  %v12189_v44 = vor.u32 %v13513_v39, %v12186_v52  ;;  %v13588_v39 = vld [vmem:[#allocation8 + $0x2d4] sm:$0xf0] }
 0x3ea   :  { %8089 = vmatpush.bf16.msra.mxu2 %v12301_v34  ;;  %v12253_v34 = vor.u32 %v13529_v50, %v12250_v13 }
 0x3eb   :  { %8047 = vmatpush.bf16.msrb.mxu3 %v12489_v31  ;;  %v12466_v31 = vld [vmem:[#allocation8 + $0x2b8] sm:$0xf0] }
 0x3ec   :  { %8062 = vmatpush.bf16.msra.mxu0 %v12165_v55  ;;  %v13571_v55 = vld [vmem:[#allocation8 + $0x254] sm:$0xf] }
 0x3ed   :  { %8076 = vmatpush.bf16.msra.mxu1 %v12229_v30  ;;  %v12418_v30 = vld [vmem:[#allocation8 + $0x258] sm:$0xf0] }
 0x3ee   :  { %8090 = vmatpush.bf16.msra.mxu2 %v12293_v28  ;;  %v7101_v28 = vpop.f32.mrf.mxu1  ;;  %v12421_v26 = vor.u32 %v13571_v55, %v12418_v30  ;;  %v12498_v55 = vld [vmem:[#allocation8 + $0x2f8] sm:$0xf0] }
 0x3f0   :  { %8063 = vmatpush.bf16.msra.mxu0 %v12157_v9  ;;  %v1069_v9 = vperm.slane %v13702_v19, 5  ;;  %v13589_v19 = vld [vmem:[#allocation8 + $0x2e4] sm:$0xf] }
 0x3f1   :  { %8077 = vmatpush.bf16.msra.mxu1 %v12221_v18  ;;  %v12413_v18 = vor.u32 %v13569_v62, %v12410_v61  ;;  %v13584_v62 = vld [vmem:[#allocation8 + $0x2b4] sm:$0xf0] }
 0x3f2   :  { %8091 = vmatpush.bf16.msra.mxu2 %v12285_v1  ;;  %v12402_v1 = vld [vmem:[#allocation8 + $0x238] sm:$0xf0]  ;;  %v7072_v2 = vadd.f32 %v14588_v33, %v1069_v9  ;;  %v7074_v33 = vadd.f32 %v7073_v6, %v1069_v9  ;;  %v12472_v6 = vld [vmem:[#allocation8 + $0x2c0] sm:$0xf]  ;;  %v12490_v9 = vld [vmem:[#allocation8 + $0x2e8] sm:$0xf0] }
 0x3f4   :  { %8064 = vmatpush.bf16.msra.mxu0 %v12149_v8  ;;  %v7086_v42 = vadd.f32 %v7085_v47, %v7072_v2  ;;  %v7129_v8 = vpop.f32.mrf.mxu3 }
 0x3f5   :  { %8078 = vmatpush.bf16.msra.mxu1 %v12213_v24 }
 0x3f6   :  { %8092 = vmatpush.bf16.msra.mxu2 %v12277_v0  ;;  %v7155_v57 = vpop.f32.mrf.mxu1  ;;  %v12386_v0 = vld [vmem:[#allocation8 + $0x218] sm:$0xf0]  ;;  %v7100_v5 = vadd.f32 %v7099_v22, %v7086_v42 }
 0x3f7   :  { %v12389_v14 = vor.u32 %v13563_v3, %v12386_v0 }
 0x3f8   :  { %8065 = vmatpush.bf16.msra.mxu0 %v12141_v59  ;;  %v7114_v59 = vadd.f32 %v7113_v7, %v7100_v5  ;;  %v13591_v7 = vld [vmem:[#allocation8 + $0x2f4] sm:$0xf]  ;;  %v12448_v5 = vld [vmem:[#allocation8 + $0x290] sm:$0xf] }
 0x3f9   :  { %8079 = vmatpush.bf16.msra.mxu1 %v12205_v15  ;;  %v7143_v15 = vpop.f32.mrf.mxu0  ;;  %v12501_v30 = vor.u32 %v13591_v7, %v12498_v55  ;;  %v13555_v7 = vld [vmem:[#allocation8 + $0x1d4] sm:$0xf]  ;;  %v12354_v55 = vld [vmem:[#allocation8 + $0x1d8] sm:$0xf0] }
 0x3fa   :  { %8093 = vmatpush.bf16.msra.mxu2 %v12269_v43  ;;  %v12381_v43 = vor.u32 %v13561_v20, %v12378_v23  ;;  %v7128_v25 = vadd.f32 %v7127_v16, %v7114_v59  ;;  %v12474_v59 = vld [vmem:[#allocation8 + $0x2c8] sm:$0xf0] }
 0x3fc   :  { %8066 = vmatpush.bf16.msra.mxu0 %v12133_v48  ;;  %v7183_v48 = vpop.f32.mrf.mxu3  ;;  %v7142_v50 = vadd.f32 %v7141_v53, %v7128_v25  ;;  %v13587_v53 = vld [vmem:[#allocation8 + $0x2d4] sm:$0xf] }
 0x3fd   :  { %8080 = vmatpush.bf16.msra.mxu1 %v12197_v36  ;;  %v7088_v36 = vadd.f32 %v7087_v60, %v7074_v33  ;;  %v13585_v33 = vld [vmem:[#allocation8 + $0x2c4] sm:$0xf] }
 0x3fe   :  { %8094 = vmatpush.bf16.msra.mxu2 %v12261_v32  ;;  %v7157_v21 = vpop.f32.mrf.mxu1  ;;  %v12480_v32 = vld [vmem:[#allocation8 + $0x2d0] sm:$0xf] }
 0x3ff   :  { %v7102_v52 = vadd.f32 %v7101_v28, %v7088_v36  ;;  %v12481_v45 = vor.u32 %v13588_v39, %v12480_v32  ;;  %v13583_v36 = vld [vmem:[#allocation8 + $0x2b4] sm:$0xf] }
 0x400   :  { %8067 = vmatpush.bf16.msra.mxu0 %v12125_v46  ;;  %v7156_v46 = vadd.f32 %v7155_v57, %v7142_v50  ;;  %v12482_v57 = vld [vmem:[#allocation8 + $0x2d8] sm:$0xf0]  ;;  %v12469_v50 = vor.u32 %v13583_v36, %v12466_v31 }
 0x401   :  { %8081 = vmatpush.bf16.msra.mxu1 %v12189_v44  ;;  %v7197_v12 = vpop.f32.mrf.mxu0  ;;  %8048 = vmatpush.bf16.msrb.mxu3 %v12481_v45  ;;  %v12485_v42 = vor.u32 %v13587_v53, %v12482_v57  ;;  %v13557_v45 = vld [vmem:[#allocation8 + $0x1e4] sm:$0xf]  ;;  %v13551_v57 = vld [vmem:[#allocation8 + $0x1b4] sm:$0xf] }
 0x402   :  { %8095 = vmatpush.bf16.msra.mxu2 %v12253_v34  ;;  %v13586_v34 = vld [vmem:[#allocation8 + $0x2c4] sm:$0xf0] }
 0x403   :  { %8068 = vmatmul.bf16.vlgmr.msra.gmra.mxu0 %v14571_v4  ;;  %v7115_v4 = vpop.f32.mrf.mxu2 }
 0x404   :  { %8116 = vmatpush.bf16.msrb.mxu0 %v12437_v38  ;;  %8082 = vmatmul.bf16.vlgmr.msra.gmra.mxu1 %v14573_v56  ;;  %v12405_v56 = vor.u32 %v13567_v11, %v12402_v1  ;;  %v7116_v22 = vadd.f32 %v7115_v4, %v7102_v52  ;;  %v7185_v44 = vpop.f32.mrf.mxu3  ;;  %v12493_v11 = vor.u32 %v13589_v19, %v12490_v9  ;;  %v12456_v4 = vld [vmem:[#allocation8 + $0x2a0] sm:$0xf]  ;;  %v12346_v19 = vld [vmem:[#allocation8 + $0x1c8] sm:$0xf0]  ;;  %v13577_v9 = vld [vmem:[#allocation8 + $0x284] sm:$0xf] }
 0x405   :  { %8096 = vmatmul.bf16.vlgmr.msra.gmra.mxu2 %v14579_v37  ;;  %v12394_v37 = vld [vmem:[#allocation8 + $0x228] sm:$0xf0]  ;;  %8130 = vmatpush.bf16.msrb.mxu1 %v12501_v30  ;;  %v13579_v30 = vld [vmem:[#allocation8 + $0x294] sm:$0xf] }
 0x406   :  { %v12397_v24 = vor.u32 %v13565_v63, %v12394_v37  ;;  %v7211_v47 = vpop.f32.mrf.mxu1  ;;  %v7130_v38 = vadd.f32 %v7129_v8, %v7116_v22 }
 0x408   :  { %8117 = vmatpush.bf16.msrb.mxu0 %v12429_v49  ;;  %v12473_v49 = vor.u32 %v13586_v34, %v12472_v6  ;;  %v7144_v60 = vadd.f32 %v7143_v15, %v7130_v38  ;;  %v12477_v15 = vor.u32 %v13585_v33, %v12474_v59  ;;  %v12458_v6 = vld [vmem:[#allocation8 + $0x2a8] sm:$0xf0] }
 0x409   :  { %8131 = vmatpush.bf16.msrb.mxu1 %v12493_v11 }
 0x40a   :  { %8049 = vmatpush.bf16.msrb.mxu3 %v12473_v49  ;;  %v7158_v1 = vadd.f32 %v7157_v21, %v7144_v60  ;;  %v12357_v60 = vor.u32 %v13555_v7, %v12354_v55  ;;  %v13595_v7 = vld [vmem:[#allocation11 + $0x10] sm:$0xff]  ;;  %v13608_v55 = vld [vmem:[#allocation11 + $0x78] sm:$0xff] }
 0x40b   :  { %v7169_v51 = vpop.f32.mrf.mxu2 }
 0x40c   :  { %8118 = vmatpush.bf16.msrb.mxu0 %v12421_v26  ;;  %v7170_v58 = vadd.f32 %v7169_v51, %v7156_v46  ;;  %v12464_v26 = vld [vmem:[#allocation8 + $0x2b0] sm:$0xf] }
 0x40d   :  { %v12465_v16 = vor.u32 %v13584_v62, %v12464_v26  ;;  %8132 = vmatpush.bf16.msrb.mxu1 %v12485_v42  ;;  %v12338_v42 = vld [vmem:[#allocation8 + $0x1b8] sm:$0xf0] }
 0x40e   :  { %v7213_v28 = vpop.f32.mrf.mxu1  ;;  %v7184_v61 = vadd.f32 %v7183_v48, %v7170_v58  ;;  %v12370_v48 = vld [vmem:[#allocation8 + $0x1f8] sm:$0xf0] }
 0x40f   :  { %8050 = vmatpush.bf16.msrb.mxu3 %v12465_v16  ;;  %v12373_v25 = vor.u32 %v13559_v35, %v12370_v48  ;;  %v13553_v16 = vld [vmem:[#allocation8 + $0x1c4] sm:$0xf] }
 0x410   :  { %8119 = vmatpush.bf16.msrb.mxu0 %v12413_v18  ;;  %v7239_v18 = vpop.f32.mrf.mxu3  ;;  %v7198_v2 = vadd.f32 %v7197_v12, %v7184_v61  ;;  %v12362_v12 = vld [vmem:[#allocation8 + $0x1e8] sm:$0xf0] }
 0x411   :  { %8133 = vmatpush.bf16.msrb.mxu1 %v12477_v15 }
 0x412   :  { %v7212_v8 = vadd.f32 %v7211_v47, %v7198_v2  ;;  %v13581_v47 = vld [vmem:[#allocation8 + $0x2a4] sm:$0xf]  ;;  %v12442_v2 = vld [vmem:[#allocation8 + $0x288] sm:$0xf0] }
 0x413   :  { %v7171_v13 = vpop.f32.mrf.mxu2  ;;  %v12461_v38 = vor.u32 %v13581_v47, %v12458_v6  ;;  %v13598_v47 = vld [vmem:[#allocation11 + $0x28] sm:$0xff] }
 0x414   :  { %8120 = vmatpush.bf16.msrb.mxu0 %v12405_v56  ;;  %v13582_v56 = vld [vmem:[#allocation8 + $0x2a4] sm:$0xf0]  ;;  %v7172_v63 = vadd.f32 %v7171_v13, %v7158_v1  ;;  %v12349_v1 = vor.u32 %v13553_v16, %v12346_v19 }
 0x415   :  { %v12457_v37 = vor.u32 %v13582_v56, %v12456_v4  ;;  %8134 = vmatpush.bf16.msrb.mxu1 %v12469_v50 }
 0x416   :  { %v7186_v51 = vadd.f32 %v7185_v44, %v7172_v63  ;;  %v12365_v44 = vor.u32 %v13557_v45, %v12362_v12  ;;  %v12445_v63 = vor.u32 %v13577_v9, %v12442_v2  ;;  %v13599_v12 = vld [vmem:[#allocation11 + $0x30] sm:$0xff] }
 0x417   :  { %8051 = vmatpush.bf16.msrb.mxu3 %v12457_v37 }
 0x418   :  { %8121 = vmatpush.bf16.msrb.mxu0 %v12397_v24 }
 0x419   :  { %8135 = vmatpush.bf16.msrb.mxu1 %v12461_v38 }
 0x41b   :  { %v7225_v10 = vpop.f32.mrf.mxu2 }
 0x41c   :  { %8122 = vmatpush.bf16.msrb.mxu0 %v12389_v14  ;;  %v13580_v14 = vld [vmem:[#allocation8 + $0x294] sm:$0xf0]  ;;  %v7226_v20 = vadd.f32 %v7225_v10, %v7212_v8 }
 0x41d   :  { %v12449_v23 = vor.u32 %v13580_v14, %v12448_v5  ;;  %v13549_v5 = vld [vmem:[#allocation8 + $0x1a4] sm:$0xf]  ;;  %v12330_v14 = vld [vmem:[#allocation8 + $0x1a8] sm:$0xf0] }
 0x41e   :  { %v7240_v54 = vadd.f32 %v7239_v18, %v7226_v20 }
 0x41f   :  { %8052 = vmatpush.bf16.msrb.mxu3 %v12449_v23  ;;  %v12333_v23 = vor.u32 %v13549_v5, %v12330_v14 }
 0x420   :  { %8123 = vmatpush.bf16.msrb.mxu0 %v12381_v43  ;;  %v7241_v43 = vpop.f32.mrf.mxu3 }
 0x421   :  { %v7267_v0 = vpop.f32.mrf.mxu1 }
 0x423   :  { %8124 = vmatmul.bf16.vlgmr.msrb.gmra.mxu0 %v14583_v41  ;;  %v7199_v41 = vpop.f32.mrf.mxu0  ;;  %v7227_v24 = vpop.f32.mrf.mxu2  ;;  %8053 = vmatpush.bf16.msrb.mxu3 %v12441_v29  ;;  %v12314_v29 = vld [vmem:[#allocation8 + $0x188] sm:$0xf0] }
 0x424   :  { %v7200_v21 = vadd.f32 %v7199_v41, %v7186_v51  ;;  %v12450_v41 = vld [vmem:[#allocation8 + $0x298] sm:$0xf0] }
 0x425   :  { %v12453_v26 = vor.u32 %v13579_v30, %v12450_v41 }
 0x426   :  { %v7214_v32 = vadd.f32 %v7213_v28, %v7200_v21  ;;  %v13547_v21 = vld [vmem:[#allocation8 + $0x194] sm:$0xf] }
 0x427   :  { %8102 = vmatpush.bf16.msra.mxu3 %v12373_v25  ;;  %8136 = vmatpush.bf16.msrb.mxu1 %v12453_v26 }
 0x428   :  { %v7228_v13 = vadd.f32 %v7227_v24, %v7214_v32  ;;  %v12341_v24 = vor.u32 %v13551_v57, %v12338_v42  ;;  %v13605_v57 = vld [vmem:[#allocation11 + $0x60] sm:$0xff] }
 0x429   :  { %v7269_v46 = vpop.f32.mrf.mxu1  ;;  %v7295_v58 = vpop.f32.mrf.mxu3 }
 0x42a   :  { %v7242_v10 = vadd.f32 %v7241_v43, %v7228_v13  ;;  %v12322_v43 = vld [vmem:[#allocation8 + $0x198] sm:$0xf0] }
 0x42b   :  { %v7253_v3 = vpop.f32.mrf.mxu0  ;;  %v7281_v52 = vpop.f32.mrf.mxu2  ;;  %8103 = vmatpush.bf16.msra.mxu3 %v12365_v44  ;;  %8137 = vmatpush.bf16.msrb.mxu1 %v12445_v63  ;;  %v12325_v27 = vor.u32 %v13547_v21, %v12322_v43  ;;  %v13600_v13 = vld [vmem:[#allocation11 + $0x38] sm:$0xff]  ;;  %v13602_v43 = vld [vmem:[#allocation11 + $0x48] sm:$0xff] }
 0x42c   :  { %v7254_v39 = vadd.f32 %v7253_v3, %v7240_v54  ;;  %v13545_v54 = vld [vmem:[#allocation8 + $0x184] sm:$0xf]  ;;  %8298 = vmatpush.bf16.msrb.mxu2 %v13600_v13 }
 0x42d   :  { %v12317_v35 = vor.u32 %v13545_v54, %v12314_v29 }
 0x42e   :  { %v7268_v34 = vadd.f32 %v7267_v0, %v7254_v39 }
 0x42f   :  { %8104 = vmatpush.bf16.msra.mxu3 %v12357_v60 }
 0x430   :  { %v7282_v49 = vadd.f32 %v7281_v52, %v7268_v34  ;;  %8299 = vmatpush.bf16.msrb.mxu2 %v13599_v12  ;;  %v13597_v34 = vld [vmem:[#allocation11 + $0x20] sm:$0xff] }
 0x431   :  { %v7297_v8 = vpop.f32.mrf.mxu3 }
 0x432   :  { %v7296_v62 = vadd.f32 %v7295_v58, %v7282_v49 }
 0x433   :  { %v7255_v22 = vpop.f32.mrf.mxu0  ;;  %v7283_v61 = vpop.f32.mrf.mxu2  ;;  %8105 = vmatpush.bf16.msra.mxu3 %v12349_v1 }
 0x434   :  { %v7256_v28 = vadd.f32 %v7255_v22, %v7242_v10  ;;  %v14596_v22 = vld [vmem:[#allocation10] sm:$0x3]  ;;  %8300 = vmatpush.bf16.msrb.mxu2 %v13598_v47 }
 0x435   :  { %v7492_v38 = vperm.slane %v14596_v22, 0  ;;  %v13596_v10 = vld [vmem:[#allocation11 + $0x18] sm:$0xff] }
 0x436   :  { %v7270_v4 = vadd.f32 %v7269_v46, %v7256_v28 }
 0x437   :  { %8106 = vmatpush.bf16.msra.mxu3 %v12341_v24  ;;  %v7493_v24 = vperm.slane %v14596_v22, 1 }
 0x438   :  { %v7284_v37 = vadd.f32 %v7283_v61, %v7270_v4  ;;  %8301 = vmatpush.bf16.msrb.mxu2 %v13597_v34  ;;  %v13607_v61 = vld [vmem:[#allocation11 + $0x70] sm:$0xff] }
 0x43a   :  { %v7298_v0 = vadd.f32 %v7297_v8, %v7284_v37 }
 0x43b   :  { %8107 = vmatpush.bf16.msra.mxu3 %v12333_v23 }
 0x43c   :  { %8302 = vmatpush.bf16.msrb.mxu2 %v13596_v10 }
 0x43f   :  { %8108 = vmatpush.bf16.msra.mxu3 %v12325_v27 }
 0x440   :  { %v7309_v18 = vpop.f32.mrf.mxu0  ;;  %8303 = vmatpush.bf16.msrb.mxu2 %v13595_v7 }
 0x441   :  { %v7323_v11 = vpop.f32.mrf.mxu1  ;;  %v7310_v56 = vadd.f32 %v7309_v18, %v7296_v62  ;;  %v13594_v62 = vld [vmem:[#allocation11 + $0x8] sm:$0xff]  ;;  %v13593_v18 = vld [vmem:[#allocation11] sm:$0xff] }
 0x443   :  { %v7324_v53 = vadd.f32 %v7323_v11, %v7310_v56  ;;  %8109 = vmatpush.bf16.msra.mxu3 %v12317_v35  ;;  %v13606_v11 = vld [vmem:[#allocation11 + $0x68] sm:$0xff] }
 0x444   :  { %8304 = vmatpush.bf16.msrb.mxu2 %v13594_v62 }
 0x445   :  { %v7333_v3 = vsub.f32 0.0, %v7324_v53 }
 0x447   :  { %v7350_v51 = vmul.f32 1.442695, %v7333_v3 }
 0x448   :  { %v7311_v20 = vpop.f32.mrf.mxu0  ;;  %v7985_v45 = vpop.f32.mrf.mxu2  ;;  %8305 = vmatpush.bf16.msrb.mxu2 %v13593_v18  ;;  %v13625_v18 = vld [vmem:[#allocation13] ss:$0 sm:$0xff] }
 0x449   :  { %v7312_v33 = vadd.f32 %v7311_v20, %v7298_v0  ;;  %v7325_v59 = vpop.f32.mrf.mxu1  ;;  %13666 = vpow2.f32 %v7350_v51  ;;  %v7999_v44 = vpop.f32.mrf.mxu3  ;;  %v7986_v49 = vadd.f32 %v7985_v45, %v7492_v38  ;;  %v13604_v0 = vld [vmem:[#allocation11 + $0x58] sm:$0xff] }
 0x44b   :  { %v7326_v15 = vadd.f32 %v7325_v59, %v7312_v33  ;;  %v8000_v30 = vadd.f32 %v7999_v44, %v7986_v49 }
 0x44d   :  { %v7339_v40 = vsub.f32 0.0, %v7326_v15  ;;  %v13603_v15 = vld [vmem:[#allocation11 + $0x50] sm:$0xff] }
 0x44f   :  { %v7362_v48 = vmul.f32 1.442695, %v7339_v40  ;;  %v13667_v36 = vpop.eup %13666 }
 0x450   :  { %v7369_v25 = vadd.f32 1.0, %v13667_v36  ;;  %v7987_v58 = vpop.f32.mrf.mxu2  ;;  %v13601_v36 = vld [vmem:[#allocation11 + $0x40] sm:$0xff] }
 0x451   :  { %13668 = vpow2.f32 %v7362_v48  ;;  %v8001_v60 = vpop.f32.mrf.mxu3  ;;  %v7988_v16 = vadd.f32 %v7987_v58, %v7492_v38 }
 0x452   :  { %13670 = vrcp.f32 %v7369_v25 }
 0x453   :  { %v8002_v1 = vadd.f32 %v8001_v60, %v7988_v16 }
 0x457   :  { %v13669_v31 = vpop.eup %13668 }
 0x458   :  { %v7375_v32 = vadd.f32 1.0, %v13669_v31  ;;  %v13671_v39 = vpop.eup %13670 }
 0x45a   :  { %13672 = vrcp.f32 %v7375_v32 }
 0x460   :  { %v13673_v52 = vpop.eup %13672  ;;  %v8013_v46 = vpop.f32.mrf.mxu0 }
 0x461   :  { %v7393_v50 = vpack.c.bf16 %v13673_v52, %v13671_v39  ;;  %v8027_v6 = vpop.f32.mrf.mxu1  ;;  %v8014_v26 = vadd.f32 %v8013_v46, %v8000_v30 }
 0x463   :  { %8054 = vmatmul.bf16.vlgmr.msrb.gmra.mxu3 %v7393_v50  ;;  %8138 = vmatmul.bf16.vlgmr.msrb.gmra.mxu1 %v7393_v50  ;;  %v8028_v19 = vadd.f32 %v8027_v6, %v8014_v26 }
 0x464   :  { %8312 = vmatpush.bf16.msrb.mxu3 %v13608_v55 }
 0x468   :  { %v8041_v41 = vpop.f32.mrf.mxu2  ;;  %8313 = vmatpush.bf16.msrb.mxu3 %v13607_v61 }
 0x469   :  { %v8029_v28 = vpop.f32.mrf.mxu1  ;;  %v8042_v2 = vadd.f32 %v8041_v41, %v8028_v19 }
 0x46c   :  { %8314 = vmatpush.bf16.msrb.mxu3 %v13606_v11 }
 0x470   :  { %v8043_v53 = vpop.f32.mrf.mxu2  ;;  %8315 = vmatpush.bf16.msrb.mxu3 %v13605_v57 }
 0x473   :  { %8110 = vmatmul.bf16.vlgmr.msra.gmra.mxu3 %v14581_v17  ;;  %v8015_v17 = vpop.f32.mrf.mxu0 }
 0x474   :  { %v8016_v63 = vadd.f32 %v8015_v17, %v8002_v1  ;;  %8316 = vmatpush.bf16.msrb.mxu3 %v13604_v0 }
 0x476   :  { %v8030_v8 = vadd.f32 %v8029_v28, %v8016_v63 }
 0x478   :  { %v8044_v5 = vadd.f32 %v8043_v53, %v8030_v8  ;;  %8317 = vmatpush.bf16.msrb.mxu3 %v13603_v15 }
 0x47c   :  { %8318 = vmatpush.bf16.msrb.mxu3 %v13602_v43 }
 0x480   :  { %v8069_v9 = vpop.f32.mrf.mxu0  ;;  %8319 = vmatpush.bf16.msrb.mxu3 %v13601_v36 }
 0x481   :  { %v8083_v4 = vpop.f32.mrf.mxu1  ;;  %v8070_v20 = vadd.f32 %v8069_v9, %v7493_v24 }
 0x483   :  { %v8084_v27 = vadd.f32 %v8083_v4, %v8070_v20 }
 0x488   :  { %v8071_v14 = vpop.f32.mrf.mxu0  ;;  %v8097_v33 = vpop.f32.mrf.mxu2 }
 0x489   :  { %v8085_v59 = vpop.f32.mrf.mxu1  ;;  %v8098_v54 = vadd.f32 %v8097_v33, %v8084_v27  ;;  %v8072_v25 = vadd.f32 %v8071_v14, %v7493_v24 }
 0x48b   :  { %v8086_v45 = vadd.f32 %v8085_v59, %v8072_v25 }
 0x490   :  { %v8099_v50 = vpop.f32.mrf.mxu2 }
 0x491   :  { %v8100_v22 = vadd.f32 %v8099_v50, %v8086_v45 }
 0x4a0   :  { %v8125_v35 = vpop.f32.mrf.mxu0 }
 0x4a8   :  { %v8127_v34 = vpop.f32.mrf.mxu0 }
 0x4e0   :  { %v8139_v32 = vpop.f32.mrf.mxu1 }
 0x4e6   :  { %v8055_v56 = vpop.f32.mrf.mxu3 }
 0x4e7   :  { %v8056_v37 = vadd.f32 %v8055_v56, %v8042_v2 }
 0x4e8   :  { %v8141_v10 = vpop.f32.mrf.mxu1 }
 0x4e9   :  { %v8144_v42 = vsub.f32 0.0, %v8056_v37 }
 0x4eb   :  { %v8148_v3 = vmul.f32 1.442695, %v8144_v42 }
 0x4ed   :  { %13674 = vpow2.f32 %v8148_v3 }
 0x4ee   :  { %v8057_v51 = vpop.f32.mrf.mxu3 }
 0x4ef   :  { %v8058_v23 = vadd.f32 %v8057_v51, %v8044_v5 }
 0x4f1   :  { %v8146_v21 = vsub.f32 0.0, %v8058_v23 }
 0x4f3   :  { %v8152_v40 = vmul.f32 1.442695, %v8146_v21  ;;  %v13675_v29 = vpop.eup %13674 }
 0x4f4   :  { %v8156_v39 = vadd.f32 1.0, %v13675_v29 }
 0x4f5   :  { %13676 = vpow2.f32 %v8152_v40 }
 0x4f6   :  { %v8111_v48 = vpop.f32.mrf.mxu3  ;;  %13678 = vrcp.f32 %v8156_v39 }
 0x4f7   :  { %v8112_v31 = vadd.f32 %v8111_v48, %v8098_v54 }
 0x4f9   :  { %v8126_v52 = vadd.f32 %v8125_v35, %v8112_v31 }
 0x4fb   :  { %v13677_v13 = vpop.eup %13676  ;;  %v8140_v12 = vadd.f32 %v8139_v32, %v8126_v52 }
 0x4fc   :  { %v8158_v47 = vadd.f32 1.0, %v13677_v13  ;;  %v13679_v49 = vpop.eup %13678 }
 0x4fd   :  { %v8145_v46 = vsub.f32 0.0, %v8140_v12 }
 0x4fe   :  { %13680 = vrcp.f32 %v8158_v47  ;;  %v8113_v44 = vpop.f32.mrf.mxu3 }
 0x4ff   :  { %v8114_v6 = vadd.f32 %v8113_v44, %v8100_v22  ;;  %v8150_v38 = vmul.f32 1.442695, %v8145_v46 }
 0x501   :  { %v8128_v58 = vadd.f32 %v8127_v34, %v8114_v6  ;;  %13682 = vpow2.f32 %v8150_v38 }
 0x503   :  { %v8142_v17 = vadd.f32 %v8141_v10, %v8128_v58 }
 0x504   :  { %v13681_v7 = vpop.eup %13680 }
 0x505   :  { %v8164_v55 = vpack.c.bf16 %v13681_v7, %v13679_v49  ;;  %v8147_v30 = vsub.f32 0.0, %v8142_v17 }
 0x507   :  { %v8154_v60 = vmul.f32 1.442695, %v8147_v30  ;;  %8306 = vmatmul.bf16.vlgmr.msrb.gmra.mxu2 %v8164_v55  ;;  %v13683_v41 = vpop.eup %13682 }
 0x508   :  { %v8157_v28 = vadd.f32 1.0, %v13683_v41 }
 0x509   :  { %13684 = vpow2.f32 %v8154_v60 }
 0x50a   :  { %13686 = vrcp.f32 %v8157_v28 }
 0x50f   :  { %v13685_v26 = vpop.eup %13684 }
 0x510   :  { %v8159_v62 = vadd.f32 1.0, %v13685_v26  ;;  %v13687_v61 = vpop.eup %13686 }
 0x512   :  { %13688 = vrcp.f32 %v8159_v62 }
 0x518   :  { %v13689_v16 = vpop.eup %13688 }
 0x519   :  { %v8165_v19 = vpack.c.bf16 %v13689_v16, %v13687_v61 }
 0x51b   :  { %8320 = vmatmul.bf16.vlgmr.msrb.gmra.mxu3 %v8165_v19 }
 0x58a   :  { %v8307_v9 = vpop.f32.mrf.mxu2 }
 0x58b   :  { %v8308_v11 = vadd.f32 %v13625_v18, %v8307_v9 }
 0x592   :  { %v8309_v4 = vpop.f32.mrf.mxu2 }
 0x593   :  { %v8310_v56 = vadd.f32 %v13625_v18, %v8309_v4 }
 0x59e   :  { %v8321_v1 = vpop.f32.mrf.mxu3 }
 0x59f   :  { %v8322_v2 = vadd.f32 %v8321_v1, %v8308_v11 }
 0x5a1   :  { %8326 = vmax.xlane.f32.xlu0 %v8322_v2 }
 0x5a6   :  { %v8323_v63 = vpop.f32.mrf.mxu3 }
 0x5a7   :  { %v8324_v37 = vadd.f32 %v8323_v63, %v8310_v56 }
 0x5a9   :  { %8328 = vmax.xlane.f32.xlu0 %v8324_v37 }
 0x614   :  { %v8327_v53 = vpop.xlane.xlu0 %8326 }
 0x615   :  { %v8330_v57 = vsub.f32 %v8322_v2, %v8327_v53 }
 0x617   :  { %v8332_v42 = vmul.f32 1.442695, %v8330_v57 }
 0x619   :  { %13690 = vpow2.f32 %v8332_v42 }
 0x61c   :  { %v8329_v8 = vpop.xlane.xlu0 %8328 }
 0x61d   :  { %v8331_v24 = vsub.f32 %v8324_v37, %v8329_v8 }
 0x61f   :  { %v13691_v3 = vpop.eup %13690  ;;  %v8334_v0 = vmul.f32 1.442695, %v8331_v24 }
 0x620   :  { %8336 = vadd.xlane.f32.xlu1 %v13691_v3 }
 0x621   :  { %13692 = vpow2.f32 %v8334_v0 }
 0x627   :  { %v13693_v5 = vpop.eup %13692 }
 0x628   :  { %8338 = vadd.xlane.f32.xlu1 %v13693_v5 }
 0x693   :  { %v8337_v14 = vpop.xlane.xlu1 %8336 }
 0x694   :  { %13694 = vrcp.f32 %v8337_v14  ;;  %v8351_v59 = vand.u32 2147483648, %v8337_v14  ;;  %v8349_v21 = vand.u32 2147483647, %v8337_v14  ;;  %vm8345_vm1 = vweird.f32 %v8337_v14 }
 0x696   :  { %v8352_v40 = vor.u32 1.1754944e-38, %v8351_v59  ;;  %vm8350_vm3 = vcmp.eq.f32.partialorder %v8349_v21, 8.507059e+37 }
 0x69a   :  { %v13695_v51 = vpop.eup %13694 }
 0x69b   :  { %v8341_v20 = vmul.f32 %v13695_v51, %v8337_v14  ;;  %v8339_v23 = vpop.xlane.xlu1 %8338  ;;  %vm8346_vm0 = vweird.f32 %v13695_v51 }
 0x69c   :  { %13696 = vrcp.f32 %v8339_v23  ;;  %vm8347_vm2 = vmor %vm8345_vm1, %vm8346_vm0  ;;  %v8366_v25 = vand.u32 2147483648, %v8339_v23  ;;  %v8364_v32 = vand.u32 2147483647, %v8339_v23  ;;  %vm8360_vm5 = vweird.f32 %v8339_v23 }
 0x69d   :  { %v8342_v33 = vsub.f32 1.0, %v8341_v20 }
 0x69e   :  { %v8367_v52 = vor.u32 1.1754944e-38, %v8366_v25  ;;  %vm8365_vm7 = vcmp.eq.f32.partialorder %v8364_v32, 8.507059e+37 }
 0x69f   :  { %v8343_v15 = vmul.f32 %v13695_v51, %v8342_v33 }
 0x6a1   :  { %v8344_v43 = vadd.f32 %v13695_v51, %v8343_v15 }
 0x6a2   :  { %v13697_v27 = vpop.eup %13696 }
 0x6a3   :  { %v8356_v54 = vmul.f32 %v13697_v27, %v8339_v23  ;;  %v8348_v29 = vsel %vm8347_vm2, %v13695_v51, %v8344_v43  ;;  %vm8361_vm4 = vweird.f32 %v13697_v27 }
 0x6a4   :  { %v8353_v35 = vsel %vm8350_vm3, %v8352_v40, %v8348_v29  ;;  %vm8362_vm6 = vmor %vm8360_vm5, %vm8361_vm4 }
 0x6a5   :  { %v8357_v48 = vsub.f32 1.0, %v8356_v54  ;;  %v8354_v36 = vmul.f32 %v13691_v3, %v8353_v35 }
 0x6a7   :  { %v8358_v31 = vmul.f32 %v13697_v27, %v8357_v48  ;;  %8370 = vst [vmem:[#allocation14] sm:$0xff] %v8354_v36 }
 0x6a9   :  { %v8359_v39 = vadd.f32 %v13697_v27, %v8358_v31 }
 0x6ab   :  { %v8363_v50 = vsel %vm8362_vm6, %v13697_v27, %v8359_v39 }
 0x6ac   :  { %v8368_v13 = vsel %vm8365_vm7, %v8367_v52, %v8363_v50 }
 0x6ad   :  { %v8369_v45 = vmul.f32 %v13693_v5, %v8368_v13 }
 0x6af   :  { %8371 = vst [vmem:[#allocation14 + $0x8] sm:$0xff] %v8369_v45 }
 0x6b0   :  { %8384 = dma.vmem_to_hbm [thread:$0]  %s8377_s6, 256, %s8379_s18, [#allocation4], %s13909_s13, %s13909_s13, %s13910_s14  }
 0x6b1   :  { %13903 = dma.done.wait [#allocation4], 256  }
 0x6b2   :  { %13904 = vsyncadd [#allocation4], 4294967040 }
 0x6b3   :  { %8389 = vsyncpa [#allocation3], 1 }
 0x6b4   :  { %8390 = vsyncpa [#allocation6], 1 }
 0x6b5   :  { %8391 = vsyncpa [#allocation9], 1 }
 0x6b6   :  { %8392 = vsyncpa [#allocation12], 1 }
 0x6b7   :  { %8393 = vsyncpa [#allocation4], 1 }

</bundles_post_ra>
